<compile_context>
chip_gen: v7x
topology: tpu7x:2x2x1
jax: 0.10.0
libtpu: 0.0.40
codegen_flags: <defaults>
</compile_context>

<pallas_src>
import functools

import jax
import jax.numpy as jnp
from jax import lax
from jax.experimental import pallas as pl
from jax.experimental.pallas import tpu as pltpu

EPS = 1e-5
LANES = 128


# ---------------------------------------------------------------------------
# in-kernel helpers (operate on VMEM values)
# ---------------------------------------------------------------------------
def _bn_train_affine(h, gamma, beta, inv_n):
    """Training-mode BatchNorm folded into one per-channel affine.

    h: (rows, Cp) f32.  One-pass sum / sum-of-squares statistics (one
    full-tensor multiply + two cross-sublane reductions), then a single fused
    `h * scale + shift` apply.  Zero-padded channels stay exactly zero.
    """
    s = jnp.sum(h, axis=0, keepdims=True)
    ss = jnp.sum(h * h, axis=0, keepdims=True)
    mean = s * inv_n
    var = jnp.maximum(ss * inv_n - mean * mean, 0.0)   # guard tiny cancellation
    scale = gamma * lax.rsqrt(var + EPS)
    shift = beta - mean * scale
    return h * scale + shift


# ---------------------------------------------------------------------------
# fused residual-block kernel
# ---------------------------------------------------------------------------
def resblock_kernel(x_ref, w1_ref, g1_ref, be1_ref, w2_ref, g2_ref, be2_ref,
                    out_ref, xpad_ref, col_ref, *, ksize, pad):
    KH, KW = ksize
    P = pad
    N, H, W, C = x_ref.shape
    _, Hp, Wp, Cp = xpad_ref.shape
    NHW = N * H * W
    inv_n = 1.0 / float(NHW)

    # ---- zero ONLY the halo ring of the shared padded scratch; the interior
    # is fully overwritten below, and the scratch is reused for both convs. ----
    if P > 0:
        zrow = jnp.zeros((N, P, Wp, Cp), jnp.float32)
        xpad_ref[:, 0:P, :, :] = zrow
        xpad_ref[:, P + H:Hp, :, :] = zrow
        zcol = jnp.zeros((N, H, P, Cp), jnp.float32)
        xpad_ref[:, P:P + H, 0:P, :] = zcol
        xpad_ref[:, P:P + H, P + W:Wp, :] = zcol

    # ---- load x once; channel-pad to the lane-dense Cp layout.  This single
    # value serves both as conv1's input (scratch interior) and as the
    # residual for the final add — no pre-padded HBM tensor, no duplicate DMA.
    x2d = x_ref[...].astype(jnp.float32).reshape(NHW, C)
    if Cp == C:
        res = x2d
    else:
        res = jnp.concatenate(
            [x2d, jnp.zeros((NHW, Cp - C), jnp.float32)], axis=-1)
    xpad_ref[:, P:P + H, P:P + W, :] = res.reshape(N, H, W, Cp)

    def conv(w_ref):
        # im2col into `col_ref` (lane-offset stores at multiples of 128), then
        # ONE MXU matmul with contraction depth KH*KW*Cp instead of KH*KW
        # small matmuls + VPU accumulator adds.
        xp = xpad_ref[...]
        for kh in range(KH):
            for kw in range(KW):
                t = kh * KW + kw
                col_ref[:, t * Cp:(t + 1) * Cp] = (
                    xp[:, kh:kh + H, kw:kw + W, :]
                    .reshape(NHW, Cp).astype(col_ref.dtype))
        return jnp.dot(col_ref[...], w_ref[...],
                       preferred_element_type=jnp.float32)

    # conv1 -> bn1 -> relu  (conv bias dropped: cancelled by train-mode BN)
    h1 = conv(w1_ref)
    h1 = jnp.maximum(
        _bn_train_affine(h1, g1_ref[...], be1_ref[...], inv_n), 0.0)

    # reuse the SAME padded scratch as conv2's input (halo is still zero).
    xpad_ref[:, P:P + H, P:P + W, :] = h1.reshape(N, H, W, Cp)

    # conv2 -> bn2 -> +residual -> relu, stored as a lane-dense (NHW, Cp) slab.
    h2 = conv(w2_ref)
    h2 = _bn_train_affine(h2, g2_ref[...], be2_ref[...], inv_n)
    out_ref[...] = jnp.maximum(h2 + res, 0.0).astype(out_ref.dtype)


# ---------------------------------------------------------------------------
# wrapper (NCHW in / NCHW out, like the PyTorch module)
# ---------------------------------------------------------------------------
def residual_block(x_nchw, params, *, padding=1, stride=1,
                   mxu_dtype=jnp.float32):
    """mxu_dtype=jnp.bfloat16 feeds the MXU in bf16 (f32 accumulation) for ~2x
    matmul throughput and half the im2col/weight VMEM; BN statistics and the
    residual path always stay in f32."""
    # TODO(synk): stride != 1 is not modeled — the PyTorch forward itself would
    # fail on the residual add (shape mismatch).
    assert stride == 1
    w1, b1, g1, be1, w2, b2, g2, be2 = params
    del b1, b2   # conv bias is a mathematical no-op in front of train-mode BN

    x = jnp.transpose(x_nchw, (0, 2, 3, 1))                  # NCHW -> NHWC
    N, H, W, C = x.shape
    KH, KW = int(w1.shape[0]), int(w1.shape[1])
    P = padding
    Hp, Wp = H + 2 * P, W + 2 * P
    Cp = max(LANES, ((C + LANES - 1) // LANES) * LANES)      # lane-dense channels
    NHW = N * H * W

    def pack_w(w):   # (KH,KW,Cin,Cout) -> zero-padded (KH*KW*Cp, Cp)
        wp = jnp.zeros((KH, KW, Cp, Cp), jnp.float32).at[:, :, :C, :C].set(w)
        return wp.reshape(KH * KW * Cp, Cp).astype(mxu_dtype)

    def pack_c(v):   # per-channel vector -> zero-padded (1, Cp)
        return jnp.zeros((1, Cp), jnp.float32).at[0, :C].set(
            v.astype(jnp.float32))

    kernel = functools.partial(resblock_kernel, ksize=(KH, KW), pad=P)
    vmem = pl.BlockSpec(memory_space=pltpu.MemorySpace.VMEM)

    out2d = pl.pallas_call(
        kernel,
        out_shape=jax.ShapeDtypeStruct((NHW, Cp), x.dtype),   # lane-dense slab
        in_specs=[vmem] * 7,
        out_specs=vmem,
        scratch_shapes=[
            pltpu.VMEM((N, Hp, Wp, Cp), jnp.float32),         # shared padded act
            pltpu.VMEM((NHW, KH * KW * Cp), mxu_dtype),       # shared im2col
        ],
        compiler_params=pltpu.CompilerParams(
            vmem_limit_bytes=32 * 1024 * 1024),
    )(x, pack_w(w1), pack_c(g1), pack_c(be1),
      pack_w(w2), pack_c(g2), pack_c(be2))

    out = out2d[:, :C].reshape(N, H, W, C)
    return jnp.transpose(out, (0, 3, 1, 2))                   # NHWC -> NCHW


# ---------------------------------------------------------------------------
# pure-JAX reference (for verification; keeps the conv biases to also verify
# that dropping them inside the kernel is exact up to float rounding)
# ---------------------------------------------------------------------------
def _conv_ref(x_nhwc, w_hwio, b, p):
    y = lax.conv_general_dilated(x_nhwc, w_hwio, (1, 1), ((p, p), (p, p)),
                                 dimension_numbers=('NHWC', 'HWIO', 'NHWC'))
    return y + b.reshape(1, 1, 1, -1)


def _bn_ref(x_nhwc, g, be):
    mean = jnp.mean(x_nhwc, axis=(0, 1, 2), keepdims=True)
    var = jnp.mean((x_nhwc - mean) ** 2, axis=(0, 1, 2), keepdims=True)
    return (x_nhwc - mean) * lax.rsqrt(var + EPS) * g.reshape(1, 1, 1, -1) \
        + be.reshape(1, 1, 1, -1)


def residual_block_ref(x_nchw, params, *, padding=1):
    w1, b1, g1, be1, w2, b2, g2, be2 = params
    x = jnp.transpose(x_nchw, (0, 2, 3, 1))
    h = jnp.maximum(_bn_ref(_conv_ref(x, w1, b1, padding), g1, be1), 0.0)
    h = _bn_ref(_conv_ref(h, w2, b2, padding), g2, be2)
    out = jnp.maximum(h + x, 0.0)
    return jnp.transpose(out, (0, 3, 1, 2))


# ---------------------------------------------------------------------------
def make_params(key, channels, k):
    ks = jax.random.split(key, 8)
    # PyTorch conv weight (Cout, Cin, KH, KW) -> (KH, KW, Cin, Cout)
    w1 = 0.1 * jax.random.normal(ks[0], (channels, channels, k, k), jnp.float32)
    w2 = 0.1 * jax.random.normal(ks[1], (channels, channels, k, k), jnp.float32)
    w1 = jnp.transpose(w1, (2, 3, 1, 0))
    w2 = jnp.transpose(w2, (2, 3, 1, 0))
    b1 = 0.1 * jax.random.normal(ks[2], (channels,), jnp.float32)
    b2 = 0.1 * jax.random.normal(ks[3], (channels,), jnp.float32)
    g1 = 1.0 + 0.1 * jax.random.normal(ks[4], (channels,), jnp.float32)
    g2 = 1.0 + 0.1 * jax.random.normal(ks[5], (channels,), jnp.float32)
    be1 = 0.1 * jax.random.normal(ks[6], (channels,), jnp.float32)
    be2 = 0.1 * jax.random.normal(ks[7], (channels,), jnp.float32)
    return (w1, b1, g1, be1, w2, b2, g2, be2)


if __name__ == "__main__":
    key = jax.random.PRNGKey(0)
    kx, kp = jax.random.split(key)

    N, C, H, W = 2, 4, 16, 16          # in_channels == out_channels (residual)
    KSIZE, STRIDE, PAD = 3, 1, 1

    x = jax.random.normal(kx, (N, C, H, W), jnp.float32)   # NCHW like PyTorch
    params = make_params(kp, C, KSIZE)

    ref = residual_block_ref(x, params, padding=PAD)

    # f32 MXU path: must match the PyTorch-equivalent reference tightly.
    out = jax.block_until_ready(
        residual_block(x, params, padding=PAD, stride=STRIDE))
    assert out.shape == (N, C, H, W)
    err = float(jnp.max(jnp.abs(out - ref)))
    assert err < 2e-4, f"f32 path max abs err {err}"

    # bf16 MXU feeding (f32 accumulation / BN) — ~2x MXU throughput.
    out_bf16 = jax.block_until_ready(
        residual_block(x, params, padding=PAD, stride=STRIDE,
                       mxu_dtype=jnp.bfloat16))
    err_bf16 = float(jnp.max(jnp.abs(out_bf16 - ref)))
    assert err_bf16 < 7e-2, f"bf16 path max abs err {err_bf16}"

    print("KERNEL_OK")
</pallas_src>

<mosaic_0001>
module attributes {stable_mosaic.version = 11 : i64} {
  func.func @resblock_kernel(%arg0: memref<2x16x16x4xf32, #tpu.memory_space<vmem>>, %arg1: memref<1152x128xf32, #tpu.memory_space<vmem>>, %arg2: memref<1x128xf32, #tpu.memory_space<vmem>>, %arg3: memref<1x128xf32, #tpu.memory_space<vmem>>, %arg4: memref<1152x128xf32, #tpu.memory_space<vmem>>, %arg5: memref<1x128xf32, #tpu.memory_space<vmem>>, %arg6: memref<1x128xf32, #tpu.memory_space<vmem>>, %arg7: memref<512x128xf32, #tpu.memory_space<vmem>>, %arg8: memref<2x18x18x128xf32, #tpu.memory_space<vmem>>, %arg9: memref<512x1152xf32, #tpu.memory_space<vmem>>) attributes {dimension_semantics = [], scalar_prefetch = 0 : i64, scratch_operands = 2 : i64, tpu.core_type = #tpu.core_type<tc>} {
    %cst = arith.constant 0.000000e+00 : f32
    %0 = vector.broadcast %cst : f32 to vector<2x1x18x128xf32>
    %c0 = arith.constant 0 : index
    %c0_0 = arith.constant 0 : index
    %c0_1 = arith.constant 0 : index
    %c0_2 = arith.constant 0 : index
    %1 = vector.load %arg8[%c0, %c0_0, %c0_1, %c0_2] : memref<2x18x18x128xf32, #tpu.memory_space<vmem>>, vector<2x1x18x128xf32>
    tpu.vector_store %arg8[%c0, %c0_0, %c0_1, %c0_2], %0 {strides = array<i32>} : memref<2x18x18x128xf32, #tpu.memory_space<vmem>>, vector<2x1x18x128xf32>,
    %c0_3 = arith.constant 0 : index
    %c17 = arith.constant 17 : index
    %c0_4 = arith.constant 0 : index
    %c0_5 = arith.constant 0 : index
    %2 = vector.load %arg8[%c0_3, %c17, %c0_4, %c0_5] : memref<2x18x18x128xf32, #tpu.memory_space<vmem>>, vector<2x1x18x128xf32>
    tpu.vector_store %arg8[%c0_3, %c17, %c0_4, %c0_5], %0 {strides = array<i32>} : memref<2x18x18x128xf32, #tpu.memory_space<vmem>>, vector<2x1x18x128xf32>,
    %cst_6 = arith.constant 0.000000e+00 : f32
    %3 = vector.broadcast %cst_6 : f32 to vector<2x16x1x128xf32>
    %c0_7 = arith.constant 0 : index
    %c1 = arith.constant 1 : index
    %c0_8 = arith.constant 0 : index
    %c0_9 = arith.constant 0 : index
    %4 = vector.load %arg8[%c0_7, %c1, %c0_8, %c0_9] : memref<2x18x18x128xf32, #tpu.memory_space<vmem>>, vector<2x16x1x128xf32>
    tpu.vector_store %arg8[%c0_7, %c1, %c0_8, %c0_9], %3 {strides = array<i32>} : memref<2x18x18x128xf32, #tpu.memory_space<vmem>>, vector<2x16x1x128xf32>,
    %c0_10 = arith.constant 0 : index
    %c1_11 = arith.constant 1 : index
    %c17_12 = arith.constant 17 : index
    %c0_13 = arith.constant 0 : index
    %5 = vector.load %arg8[%c0_10, %c1_11, %c17_12, %c0_13] : memref<2x18x18x128xf32, #tpu.memory_space<vmem>>, vector<2x16x1x128xf32>
    tpu.vector_store %arg8[%c0_10, %c1_11, %c17_12, %c0_13], %3 {strides = array<i32>} : memref<2x18x18x128xf32, #tpu.memory_space<vmem>>, vector<2x16x1x128xf32>,
    %c0_14 = arith.constant 0 : index
    %c0_15 = arith.constant 0 : index
    %c0_16 = arith.constant 0 : index
    %c0_17 = arith.constant 0 : index
    %6 = vector.load %arg0[%c0_14, %c0_15, %c0_16, %c0_17] : memref<2x16x16x4xf32, #tpu.memory_space<vmem>>, vector<2x16x16x4xf32>
    %7 = vector.shape_cast %6 : vector<2x16x16x4xf32> to vector<512x4xf32>
    %cst_18 = arith.constant 0.000000e+00 : f32
    %8 = vector.broadcast %cst_18 : f32 to vector<512x124xf32>
    %9 = tpu.concatenate %7, %8 in 1 : vector<512x4xf32>, vector<512x124xf32> -> vector<512x128xf32>
    %10 = vector.shape_cast %9 : vector<512x128xf32> to vector<2x16x16x128xf32>
    %c0_19 = arith.constant 0 : index
    %c1_20 = arith.constant 1 : index
    %c1_21 = arith.constant 1 : index
    %c0_22 = arith.constant 0 : index
    %11 = vector.load %arg8[%c0_19, %c1_20, %c1_21, %c0_22] : memref<2x18x18x128xf32, #tpu.memory_space<vmem>>, vector<2x16x16x128xf32>
    tpu.vector_store %arg8[%c0_19, %c1_20, %c1_21, %c0_22], %10 {strides = array<i32>} : memref<2x18x18x128xf32, #tpu.memory_space<vmem>>, vector<2x16x16x128xf32>,
    %c0_23 = arith.constant 0 : index
    %c0_24 = arith.constant 0 : index
    %c0_25 = arith.constant 0 : index
    %c0_26 = arith.constant 0 : index
    %12 = vector.load %arg8[%c0_23, %c0_24, %c0_25, %c0_26] : memref<2x18x18x128xf32, #tpu.memory_space<vmem>>, vector<2x18x18x128xf32>
    %13 = vector.extract_strided_slice %12 {offsets = [0, 0, 0, 0], sizes = [2, 16, 16, 128], strides = [1, 1, 1, 1]} : vector<2x18x18x128xf32> to vector<2x16x16x128xf32>
    %14 = vector.shape_cast %13 : vector<2x16x16x128xf32> to vector<512x128xf32>
    %c0_27 = arith.constant 0 : index
    %c0_28 = arith.constant 0 : index
    %15 = vector.load %arg9[%c0_27, %c0_28] : memref<512x1152xf32, #tpu.memory_space<vmem>>, vector<512x128xf32>
    tpu.vector_store %arg9[%c0_27, %c0_28], %14 {strides = array<i32>} : memref<512x1152xf32, #tpu.memory_space<vmem>>, vector<512x128xf32>,
    %16 = vector.extract_strided_slice %12 {offsets = [0, 0, 1, 0], sizes = [2, 16, 16, 128], strides = [1, 1, 1, 1]} : vector<2x18x18x128xf32> to vector<2x16x16x128xf32>
    %17 = vector.shape_cast %16 : vector<2x16x16x128xf32> to vector<512x128xf32>
    %c0_29 = arith.constant 0 : index
    %c128 = arith.constant 128 : index
    %18 = vector.load %arg9[%c0_29, %c128] : memref<512x1152xf32, #tpu.memory_space<vmem>>, vector<512x128xf32>
    tpu.vector_store %arg9[%c0_29, %c128], %17 {strides = array<i32>} : memref<512x1152xf32, #tpu.memory_space<vmem>>, vector<512x128xf32>,
    %19 = vector.extract_strided_slice %12 {offsets = [0, 0, 2, 0], sizes = [2, 16, 16, 128], strides = [1, 1, 1, 1]} : vector<2x18x18x128xf32> to vector<2x16x16x128xf32>
    %20 = vector.shape_cast %19 : vector<2x16x16x128xf32> to vector<512x128xf32>
    %c0_30 = arith.constant 0 : index
    %c256 = arith.constant 256 : index
    %21 = vector.load %arg9[%c0_30, %c256] : memref<512x1152xf32, #tpu.memory_space<vmem>>, vector<512x128xf32>
    tpu.vector_store %arg9[%c0_30, %c256], %20 {strides = array<i32>} : memref<512x1152xf32, #tpu.memory_space<vmem>>, vector<512x128xf32>,
    %22 = vector.extract_strided_slice %12 {offsets = [0, 1, 0, 0], sizes = [2, 16, 16, 128], strides = [1, 1, 1, 1]} : vector<2x18x18x128xf32> to vector<2x16x16x128xf32>
    %23 = vector.shape_cast %22 : vector<2x16x16x128xf32> to vector<512x128xf32>
    %c0_31 = arith.constant 0 : index
    %c384 = arith.constant 384 : index
    %24 = vector.load %arg9[%c0_31, %c384] : memref<512x1152xf32, #tpu.memory_space<vmem>>, vector<512x128xf32>
    tpu.vector_store %arg9[%c0_31, %c384], %23 {strides = array<i32>} : memref<512x1152xf32, #tpu.memory_space<vmem>>, vector<512x128xf32>,
    %25 = vector.extract_strided_slice %12 {offsets = [0, 1, 1, 0], sizes = [2, 16, 16, 128], strides = [1, 1, 1, 1]} : vector<2x18x18x128xf32> to vector<2x16x16x128xf32>
    %26 = vector.shape_cast %25 : vector<2x16x16x128xf32> to vector<512x128xf32>
    %c0_32 = arith.constant 0 : index
    %c512 = arith.constant 512 : index
    %27 = vector.load %arg9[%c0_32, %c512] : memref<512x1152xf32, #tpu.memory_space<vmem>>, vector<512x128xf32>
    tpu.vector_store %arg9[%c0_32, %c512], %26 {strides = array<i32>} : memref<512x1152xf32, #tpu.memory_space<vmem>>, vector<512x128xf32>,
    %28 = vector.extract_strided_slice %12 {offsets = [0, 1, 2, 0], sizes = [2, 16, 16, 128], strides = [1, 1, 1, 1]} : vector<2x18x18x128xf32> to vector<2x16x16x128xf32>
    %29 = vector.shape_cast %28 : vector<2x16x16x128xf32> to vector<512x128xf32>
    %c0_33 = arith.constant 0 : index
    %c640 = arith.constant 640 : index
    %30 = vector.load %arg9[%c0_33, %c640] : memref<512x1152xf32, #tpu.memory_space<vmem>>, vector<512x128xf32>
    tpu.vector_store %arg9[%c0_33, %c640], %29 {strides = array<i32>} : memref<512x1152xf32, #tpu.memory_space<vmem>>, vector<512x128xf32>,
    %31 = vector.extract_strided_slice %12 {offsets = [0, 2, 0, 0], sizes = [2, 16, 16, 128], strides = [1, 1, 1, 1]} : vector<2x18x18x128xf32> to vector<2x16x16x128xf32>
    %32 = vector.shape_cast %31 : vector<2x16x16x128xf32> to vector<512x128xf32>
    %c0_34 = arith.constant 0 : index
    %c768 = arith.constant 768 : index
    %33 = vector.load %arg9[%c0_34, %c768] : memref<512x1152xf32, #tpu.memory_space<vmem>>, vector<512x128xf32>
    tpu.vector_store %arg9[%c0_34, %c768], %32 {strides = array<i32>} : memref<512x1152xf32, #tpu.memory_space<vmem>>, vector<512x128xf32>,
    %34 = vector.extract_strided_slice %12 {offsets = [0, 2, 1, 0], sizes = [2, 16, 16, 128], strides = [1, 1, 1, 1]} : vector<2x18x18x128xf32> to vector<2x16x16x128xf32>
    %35 = vector.shape_cast %34 : vector<2x16x16x128xf32> to vector<512x128xf32>
    %c0_35 = arith.constant 0 : index
    %c896 = arith.constant 896 : index
    %36 = vector.load %arg9[%c0_35, %c896] : memref<512x1152xf32, #tpu.memory_space<vmem>>, vector<512x128xf32>
    tpu.vector_store %arg9[%c0_35, %c896], %35 {strides = array<i32>} : memref<512x1152xf32, #tpu.memory_space<vmem>>, vector<512x128xf32>,
    %37 = vector.extract_strided_slice %12 {offsets = [0, 2, 2, 0], sizes = [2, 16, 16, 128], strides = [1, 1, 1, 1]} : vector<2x18x18x128xf32> to vector<2x16x16x128xf32>
    %38 = vector.shape_cast %37 : vector<2x16x16x128xf32> to vector<512x128xf32>
    %c0_36 = arith.constant 0 : index
    %c1024 = arith.constant 1024 : index
    %39 = vector.load %arg9[%c0_36, %c1024] : memref<512x1152xf32, #tpu.memory_space<vmem>>, vector<512x128xf32>
    tpu.vector_store %arg9[%c0_36, %c1024], %38 {strides = array<i32>} : memref<512x1152xf32, #tpu.memory_space<vmem>>, vector<512x128xf32>,
    %c0_37 = arith.constant 0 : index
    %c0_38 = arith.constant 0 : index
    %40 = vector.load %arg9[%c0_37, %c0_38] : memref<512x1152xf32, #tpu.memory_space<vmem>>, vector<512x1152xf32>
    %c0_39 = arith.constant 0 : index
    %c0_40 = arith.constant 0 : index
    %41 = vector.load %arg1[%c0_39, %c0_40] : memref<1152x128xf32, #tpu.memory_space<vmem>>, vector<1152x128xf32>
    %cst_41 = arith.constant dense<0.000000e+00> : vector<512x128xf32>
    %42 = tpu.matmul %40, %41, %cst_41 {dimension_numbers = #tpu.dot_dimension_numbers<[1], [0], [0], [1], [0, 0, 1, 1], [], []>} : vector<512x1152xf32>, vector<1152x128xf32>, vector<512x128xf32> -> vector<512x128xf32>
    %c0_42 = arith.constant 0 : index
    %c0_43 = arith.constant 0 : index
    %43 = vector.load %arg2[%c0_42, %c0_43] : memref<1x128xf32, #tpu.memory_space<vmem>>, vector<1x128xf32>
    %c0_44 = arith.constant 0 : index
    %c0_45 = arith.constant 0 : index
    %44 = vector.load %arg3[%c0_44, %c0_45] : memref<1x128xf32, #tpu.memory_space<vmem>>, vector<1x128xf32>
    %cst_46 = arith.constant dense<0.000000e+00> : vector<128xf32>
    %45 = vector.multi_reduction <add>, %42, %cst_46 [0] : vector<512x128xf32> to vector<128xf32>
    %46 = vector.shape_cast %45 : vector<128xf32> to vector<1x128xf32>
    %47 = arith.mulf %42, %42 : vector<512x128xf32>
    %cst_47 = arith.constant dense<0.000000e+00> : vector<128xf32>
    %48 = vector.multi_reduction <add>, %47, %cst_47 [0] : vector<512x128xf32> to vector<128xf32>
    %49 = vector.shape_cast %48 : vector<128xf32> to vector<1x128xf32>
    %cst_48 = arith.constant 0.001953125 : f32
    %50 = vector.broadcast %cst_48 : f32 to vector<1x128xf32>
    %51 = arith.mulf %46, %50 : vector<1x128xf32>
    %cst_49 = arith.constant 0.001953125 : f32
    %52 = vector.broadcast %cst_49 : f32 to vector<1x128xf32>
    %53 = arith.mulf %49, %52 : vector<1x128xf32>
    %54 = arith.mulf %51, %51 : vector<1x128xf32>
    %55 = arith.subf %53, %54 : vector<1x128xf32>
    %cst_50 = arith.constant 0.000000e+00 : f32
    %56 = vector.broadcast %cst_50 : f32 to vector<1x128xf32>
    %57 = arith.maximumf %55, %56 : vector<1x128xf32>
    %cst_51 = arith.constant 9.99999974E-6 : f32
    %58 = vector.broadcast %cst_51 : f32 to vector<1x128xf32>
    %59 = arith.addf %57, %58 : vector<1x128xf32>
    %60 = math.rsqrt %59 : vector<1x128xf32>
    %61 = arith.mulf %43, %60 : vector<1x128xf32>
    %62 = arith.mulf %51, %61 : vector<1x128xf32>
    %63 = arith.subf %44, %62 : vector<1x128xf32>
    %64 = vector.broadcast %61 : vector<1x128xf32> to vector<512x128xf32>
    %65 = arith.mulf %42, %64 : vector<512x128xf32>
    %66 = vector.broadcast %63 : vector<1x128xf32> to vector<512x128xf32>
    %67 = arith.addf %65, %66 : vector<512x128xf32>
    %cst_52 = arith.constant 0.000000e+00 : f32
    %68 = vector.broadcast %cst_52 : f32 to vector<512x128xf32>
    %69 = arith.maximumf %67, %68 : vector<512x128xf32>
    %70 = vector.shape_cast %69 : vector<512x128xf32> to vector<2x16x16x128xf32>
    %c0_53 = arith.constant 0 : index
    %c1_54 = arith.constant 1 : index
    %c1_55 = arith.constant 1 : index
    %c0_56 = arith.constant 0 : index
    %71 = vector.load %arg8[%c0_53, %c1_54, %c1_55, %c0_56] : memref<2x18x18x128xf32, #tpu.memory_space<vmem>>, vector<2x16x16x128xf32>
    tpu.vector_store %arg8[%c0_53, %c1_54, %c1_55, %c0_56], %70 {strides = array<i32>} : memref<2x18x18x128xf32, #tpu.memory_space<vmem>>, vector<2x16x16x128xf32>,
    %c0_57 = arith.constant 0 : index
    %c0_58 = arith.constant 0 : index
    %c0_59 = arith.constant 0 : index
    %c0_60 = arith.constant 0 : index
    %72 = vector.load %arg8[%c0_57, %c0_58, %c0_59, %c0_60] : memref<2x18x18x128xf32, #tpu.memory_space<vmem>>, vector<2x18x18x128xf32>
    %73 = vector.extract_strided_slice %72 {offsets = [0, 0, 0, 0], sizes = [2, 16, 16, 128], strides = [1, 1, 1, 1]} : vector<2x18x18x128xf32> to vector<2x16x16x128xf32>
    %74 = vector.shape_cast %73 : vector<2x16x16x128xf32> to vector<512x128xf32>
    %c0_61 = arith.constant 0 : index
    %c0_62 = arith.constant 0 : index
    %75 = vector.load %arg9[%c0_61, %c0_62] : memref<512x1152xf32, #tpu.memory_space<vmem>>, vector<512x128xf32>
    tpu.vector_store %arg9[%c0_61, %c0_62], %74 {strides = array<i32>} : memref<512x1152xf32, #tpu.memory_space<vmem>>, vector<512x128xf32>,
    %76 = vector.extract_strided_slice %72 {offsets = [0, 0, 1, 0], sizes = [2, 16, 16, 128], strides = [1, 1, 1, 1]} : vector<2x18x18x128xf32> to vector<2x16x16x128xf32>
    %77 = vector.shape_cast %76 : vector<2x16x16x128xf32> to vector<512x128xf32>
    %c0_63 = arith.constant 0 : index
    %c128_64 = arith.constant 128 : index
    %78 = vector.load %arg9[%c0_63, %c128_64] : memref<512x1152xf32, #tpu.memory_space<vmem>>, vector<512x128xf32>
    tpu.vector_store %arg9[%c0_63, %c128_64], %77 {strides = array<i32>} : memref<512x1152xf32, #tpu.memory_space<vmem>>, vector<512x128xf32>,
    %79 = vector.extract_strided_slice %72 {offsets = [0, 0, 2, 0], sizes = [2, 16, 16, 128], strides = [1, 1, 1, 1]} : vector<2x18x18x128xf32> to vector<2x16x16x128xf32>
    %80 = vector.shape_cast %79 : vector<2x16x16x128xf32> to vector<512x128xf32>
    %c0_65 = arith.constant 0 : index
    %c256_66 = arith.constant 256 : index
    %81 = vector.load %arg9[%c0_65, %c256_66] : memref<512x1152xf32, #tpu.memory_space<vmem>>, vector<512x128xf32>
    tpu.vector_store %arg9[%c0_65, %c256_66], %80 {strides = array<i32>} : memref<512x1152xf32, #tpu.memory_space<vmem>>, vector<512x128xf32>,
    %82 = vector.extract_strided_slice %72 {offsets = [0, 1, 0, 0], sizes = [2, 16, 16, 128], strides = [1, 1, 1, 1]} : vector<2x18x18x128xf32> to vector<2x16x16x128xf32>
    %83 = vector.shape_cast %82 : vector<2x16x16x128xf32> to vector<512x128xf32>
    %c0_67 = arith.constant 0 : index
    %c384_68 = arith.constant 384 : index
    %84 = vector.load %arg9[%c0_67, %c384_68] : memref<512x1152xf32, #tpu.memory_space<vmem>>, vector<512x128xf32>
    tpu.vector_store %arg9[%c0_67, %c384_68], %83 {strides = array<i32>} : memref<512x1152xf32, #tpu.memory_space<vmem>>, vector<512x128xf32>,
    %85 = vector.extract_strided_slice %72 {offsets = [0, 1, 1, 0], sizes = [2, 16, 16, 128], strides = [1, 1, 1, 1]} : vector<2x18x18x128xf32> to vector<2x16x16x128xf32>
    %86 = vector.shape_cast %85 : vector<2x16x16x128xf32> to vector<512x128xf32>
    %c0_69 = arith.constant 0 : index
    %c512_70 = arith.constant 512 : index
    %87 = vector.load %arg9[%c0_69, %c512_70] : memref<512x1152xf32, #tpu.memory_space<vmem>>, vector<512x128xf32>
    tpu.vector_store %arg9[%c0_69, %c512_70], %86 {strides = array<i32>} : memref<512x1152xf32, #tpu.memory_space<vmem>>, vector<512x128xf32>,
    %88 = vector.extract_strided_slice %72 {offsets = [0, 1, 2, 0], sizes = [2, 16, 16, 128], strides = [1, 1, 1, 1]} : vector<2x18x18x128xf32> to vector<2x16x16x128xf32>
    %89 = vector.shape_cast %88 : vector<2x16x16x128xf32> to vector<512x128xf32>
    %c0_71 = arith.constant 0 : index
    %c640_72 = arith.constant 640 : index
    %90 = vector.load %arg9[%c0_71, %c640_72] : memref<512x1152xf32, #tpu.memory_space<vmem>>, vector<512x128xf32>
    tpu.vector_store %arg9[%c0_71, %c640_72], %89 {strides = array<i32>} : memref<512x1152xf32, #tpu.memory_space<vmem>>, vector<512x128xf32>,
    %91 = vector.extract_strided_slice %72 {offsets = [0, 2, 0, 0], sizes = [2, 16, 16, 128], strides = [1, 1, 1, 1]} : vector<2x18x18x128xf32> to vector<2x16x16x128xf32>
    %92 = vector.shape_cast %91 : vector<2x16x16x128xf32> to vector<512x128xf32>
    %c0_73 = arith.constant 0 : index
    %c768_74 = arith.constant 768 : index
    %93 = vector.load %arg9[%c0_73, %c768_74] : memref<512x1152xf32, #tpu.memory_space<vmem>>, vector<512x128xf32>
    tpu.vector_store %arg9[%c0_73, %c768_74], %92 {strides = array<i32>} : memref<512x1152xf32, #tpu.memory_space<vmem>>, vector<512x128xf32>,
    %94 = vector.extract_strided_slice %72 {offsets = [0, 2, 1, 0], sizes = [2, 16, 16, 128], strides = [1, 1, 1, 1]} : vector<2x18x18x128xf32> to vector<2x16x16x128xf32>
    %95 = vector.shape_cast %94 : vector<2x16x16x128xf32> to vector<512x128xf32>
    %c0_75 = arith.constant 0 : index
    %c896_76 = arith.constant 896 : index
    %96 = vector.load %arg9[%c0_75, %c896_76] : memref<512x1152xf32, #tpu.memory_space<vmem>>, vector<512x128xf32>
    tpu.vector_store %arg9[%c0_75, %c896_76], %95 {strides = array<i32>} : memref<512x1152xf32, #tpu.memory_space<vmem>>, vector<512x128xf32>,
    %97 = vector.extract_strided_slice %72 {offsets = [0, 2, 2, 0], sizes = [2, 16, 16, 128], strides = [1, 1, 1, 1]} : vector<2x18x18x128xf32> to vector<2x16x16x128xf32>
    %98 = vector.shape_cast %97 : vector<2x16x16x128xf32> to vector<512x128xf32>
    %c0_77 = arith.constant 0 : index
    %c1024_78 = arith.constant 1024 : index
    %99 = vector.load %arg9[%c0_77, %c1024_78] : memref<512x1152xf32, #tpu.memory_space<vmem>>, vector<512x128xf32>
    tpu.vector_store %arg9[%c0_77, %c1024_78], %98 {strides = array<i32>} : memref<512x1152xf32, #tpu.memory_space<vmem>>, vector<512x128xf32>,
    %c0_79 = arith.constant 0 : index
    %c0_80 = arith.constant 0 : index
    %100 = vector.load %arg9[%c0_79, %c0_80] : memref<512x1152xf32, #tpu.memory_space<vmem>>, vector<512x1152xf32>
    %c0_81 = arith.constant 0 : index
    %c0_82 = arith.constant 0 : index
    %101 = vector.load %arg4[%c0_81, %c0_82] : memref<1152x128xf32, #tpu.memory_space<vmem>>, vector<1152x128xf32>
    %cst_83 = arith.constant dense<0.000000e+00> : vector<512x128xf32>
    %102 = tpu.matmul %100, %101, %cst_83 {dimension_numbers = #tpu.dot_dimension_numbers<[1], [0], [0], [1], [0, 0, 1, 1], [], []>} : vector<512x1152xf32>, vector<1152x128xf32>, vector<512x128xf32> -> vector<512x128xf32>
    %c0_84 = arith.constant 0 : index
    %c0_85 = arith.constant 0 : index
    %103 = vector.load %arg5[%c0_84, %c0_85] : memref<1x128xf32, #tpu.memory_space<vmem>>, vector<1x128xf32>
    %c0_86 = arith.constant 0 : index
    %c0_87 = arith.constant 0 : index
    %104 = vector.load %arg6[%c0_86, %c0_87] : memref<1x128xf32, #tpu.memory_space<vmem>>, vector<1x128xf32>
    %cst_88 = arith.constant dense<0.000000e+00> : vector<128xf32>
    %105 = vector.multi_reduction <add>, %102, %cst_88 [0] : vector<512x128xf32> to vector<128xf32>
    %106 = vector.shape_cast %105 : vector<128xf32> to vector<1x128xf32>
    %107 = arith.mulf %102, %102 : vector<512x128xf32>
    %cst_89 = arith.constant dense<0.000000e+00> : vector<128xf32>
    %108 = vector.multi_reduction <add>, %107, %cst_89 [0] : vector<512x128xf32> to vector<128xf32>
    %109 = vector.shape_cast %108 : vector<128xf32> to vector<1x128xf32>
    %cst_90 = arith.constant 0.001953125 : f32
    %110 = vector.broadcast %cst_90 : f32 to vector<1x128xf32>
    %111 = arith.mulf %106, %110 : vector<1x128xf32>
    %cst_91 = arith.constant 0.001953125 : f32
    %112 = vector.broadcast %cst_91 : f32 to vector<1x128xf32>
    %113 = arith.mulf %109, %112 : vector<1x128xf32>
    %114 = arith.mulf %111, %111 : vector<1x128xf32>
    %115 = arith.subf %113, %114 : vector<1x128xf32>
    %cst_92 = arith.constant 0.000000e+00 : f32
    %116 = vector.broadcast %cst_92 : f32 to vector<1x128xf32>
    %117 = arith.maximumf %115, %116 : vector<1x128xf32>
    %cst_93 = arith.constant 9.99999974E-6 : f32
    %118 = vector.broadcast %cst_93 : f32 to vector<1x128xf32>
    %119 = arith.addf %117, %118 : vector<1x128xf32>
    %120 = math.rsqrt %119 : vector<1x128xf32>
    %121 = arith.mulf %103, %120 : vector<1x128xf32>
    %122 = arith.mulf %111, %121 : vector<1x128xf32>
    %123 = arith.subf %104, %122 : vector<1x128xf32>
    %124 = vector.broadcast %121 : vector<1x128xf32> to vector<512x128xf32>
    %125 = arith.mulf %102, %124 : vector<512x128xf32>
    %126 = vector.broadcast %123 : vector<1x128xf32> to vector<512x128xf32>
    %127 = arith.addf %125, %126 : vector<512x128xf32>
    %128 = arith.addf %127, %9 : vector<512x128xf32>
    %cst_94 = arith.constant 0.000000e+00 : f32
    %129 = vector.broadcast %cst_94 : f32 to vector<512x128xf32>
    %130 = arith.maximumf %128, %129 : vector<512x128xf32>
    %c0_95 = arith.constant 0 : index
    %c0_96 = arith.constant 0 : index
    %131 = vector.load %arg7[%c0_95, %c0_96] : memref<512x128xf32, #tpu.memory_space<vmem>>, vector<512x128xf32>
    tpu.vector_store %arg7[%c0_95, %c0_96], %130 {strides = array<i32>} : memref<512x128xf32, #tpu.memory_space<vmem>>, vector<512x128xf32>,
    return
  }
}

</mosaic_0001>

<bundles_post_ra>
// kernel: tpu_custom_call.1
= control target key start
LH: loop header
LB: loop body
LE: loop exit
PB: predicated region body
PF: predicated region fallthrough
CT: control target
= control target key end

     0   :  { %12 = vsyncpa [#allocation5], 0  ;;  %s16994_s0 = inlined_call_operand.vmem [shape: f32[2,16,16,4], index: 0, kind: input, shape index: {}]   ;;  %s16995_s1 = inlined_call_operand.hbm [shape: f32[1152,128], index: 1, kind: input, shape index: {}]   ;;  %s16996_s2 = inlined_call_operand.vmem [shape: f32[1,128], index: 2, kind: input, shape index: {}]   ;;  %s16997_s3 = inlined_call_operand.vmem [shape: f32[1,128], index: 3, kind: input, shape index: {}]   ;;  %s16998_s4 = inlined_call_operand.hbm [shape: f32[1152,128], index: 4, kind: input, shape index: {}]   ;;  %s16999_s5 = inlined_call_operand.vmem [shape: f32[1,128], index: 5, kind: input, shape index: {}]   ;;  %s17000_s6 = inlined_call_operand.vmem [shape: f32[1,128], index: 6, kind: input, shape index: {}]   ;;  %s17001_s7 = inlined_call_operand.hbm [shape: f32[512,128], index: 7, kind: output, shape index: {}]  }
   0x1   :  { %13 = vsyncpa [#allocation8], 0 }
   0x2   :  { %14 = vsyncpa [#allocation6], 0  ;;  %s11134_s24 = smov [#allocation4]   ;;  %s11062_s28 = scalar_lea.hbm %s16995_s1, 18432 }
   0x3   :  { %s22_s25 = sshll.u32 %s11134_s24, 4  ;;  %p11063_p0 = scmp.ne.s32.totalorder %s16995_s1, %s11062_s28  ;;  %s23_s25 = int_to_ptr.vmem [resolvable:$true] %s22_s25 }
   0x4   :  { %p11066_p1 = scmp.lt.u32.totalorder %s11062_s28, %s16995_s1 }
   0x6   :  { %p11068_p2 = pnand %p11066_p1, %p11063_p0 }
   0x8   :  { %11071 = shalt.err (!%p11068_p2)
}
   0x9   :  { %s11072_s10 = scalar_lea.vmem %s23_s25, 18432  ;;  %p11077_p4 = scmp.lt.s32.totalorder %s23_s25, %s23_s25 }
   0xa   :  { %p11073_p3 = scmp.ne.s32.totalorder %s23_s25, %s11072_s10  ;;  %p11078_p5 = scmp.lt.s32.totalorder %s11072_s10, %s11072_s10 }
   0xc   :  { %p11079_p6 = por %p11078_p5, %p11077_p4 }
   0xe   :  { %p11080_p7 = pnand %p11079_p6, %p11073_p3 }
  0x10   :  { %11083 = shalt.err (!%p11080_p7)
}
  0x11   :  { %s11135_s11 = smov 128   ;;  %s11136_s12 = smov 8  }
  0x12   :  { %28 = dma.hbm_to_vmem [thread:$0]  %s16995_s1, 18432, %s23_s25, [#allocation5], %s11135_s11, %s11135_s11, %s11136_s12  }
  0x13   :  { %s11137_s15 = smov [#allocation7]   ;;  %s11084_s19 = scalar_lea.hbm %s16998_s4, 18432 }
  0x14   :  { %s38_s16 = sshll.u32 %s11137_s15, 4  ;;  %p11085_p8 = scmp.ne.s32.totalorder %s16998_s4, %s11084_s19  ;;  %s39_s16 = int_to_ptr.vmem [resolvable:$true] %s38_s16 }
  0x15   :  { %p11088_p9 = scmp.lt.u32.totalorder %s11084_s19, %s16998_s4 }
  0x17   :  { %p11090_p10 = pnand %p11088_p9, %p11085_p8 }
  0x19   :  { %11093 = shalt.err (!%p11090_p10)
}
  0x1a   :  { %s11094_s24 = scalar_lea.vmem %s39_s16, 18432  ;;  %p11099_p12 = scmp.lt.s32.totalorder %s39_s16, %s39_s16 }
  0x1b   :  { %p11095_p11 = scmp.ne.s32.totalorder %s39_s16, %s11094_s24  ;;  %p11100_p13 = scmp.lt.s32.totalorder %s11094_s24, %s11094_s24 }
  0x1d   :  { %p11101_p0 = por %p11100_p13, %p11099_p12 }
  0x1f   :  { %p11102_p1 = pnand %p11101_p0, %p11095_p11 }
  0x21   :  { %11105 = shalt.err (!%p11102_p1)
}
  0x22   :  { %44 = dma.hbm_to_vmem [thread:$0]  %s16998_s4, 18432, %s39_s16, [#allocation8], %s11135_s11, %s11135_s11, %s11136_s12  }
  0x23   :  { %11128 = dma.done.wait [#allocation5], 18432  }
  0x24   :  { %11129 = vsyncadd [#allocation5], 4294948864 }
  0x25   :  { %11130 = dma.done.wait [#allocation8], 18432  }
  0x26   :  { %11131 = vsyncadd [#allocation8], 4294948864  ;;  %vm594_vm0 = vcmask 1046528   ;;  %v17004_v0 = vmov 0.0|0.0   ;;  %v11139_v1 = vmov 0.0   ;;  %v2200_v3 = vld [vmem:[#allocation4] sm:$0xff] }
  0x27   :  { %9672 = vmatprep.subr.bf16.mxu0 %v17004_v0  ;;  %55 = vst [vmem:[#allocation2] sm:$0xff] %v11139_v1  ;;  %v11214_v2 = vrot.slane %v11139_v1, 1  ;;  %57 = vst [vmem:[#allocation2 + $0x10] sm:$0x3] %v11139_v1  ;;  %v2201_v4 = vld [vmem:[#allocation4 + $0x8] sm:$0xff]  ;;  %v2202_v5 = vld [vmem:[#allocation4 + $0x10] sm:$0xff] }
  0x28   :  { %60 = vst [vmem:[#allocation2 + $0x1c0] sm:$0x3] %v11139_v1  ;;  %64 = vst [vmem:[#allocation2 + $0x1a8] sm:$0x3] %v11139_v1  ;;  %v9673_v6 = vpack.c.bf16 %v2201_v4, %v2200_v3  ;;  %v2203_v7 = vld [vmem:[#allocation4 + $0x18] sm:$0xff]  ;;  %v2204_v9 = vld [vmem:[#allocation4 + $0x20] sm:$0xff] }
  0x29   :  { %67 = vst [vmem:[#allocation2 + $0x358] sm:$0x3] %v11139_v1  ;;  %69 = vst [vmem:[#allocation2 + $0x18] sm:$0x1] %v11139_v1  ;;  %2408 = vmatprep.mubr.f32.mxu0 %v11214_v2  ;;  %v9676_v8 = vpack.c.bf16 %v2203_v7, %v2202_v5  ;;  %v2205_v10 = vld [vmem:[#allocation4 + $0x28] sm:$0xff]  ;;  %v2206_v12 = vld [vmem:[#allocation4 + $0x30] sm:$0xff] }
  0x2a   :  { %70 = vst [vmem:[#allocation2 + $0x30] sm:$0x1] %v11139_v1  ;;  %71 = vst [vmem:[#allocation2 + $0x48] sm:$0x1] %v11139_v1  ;;  %9674 = vmatpush1.bf16.msra.mxu0 %v9673_v6  ;;  %v9679_v11 = vpack.c.bf16 %v2205_v10, %v2204_v9  ;;  %v2207_v13 = vld [vmem:[#allocation4 + $0x38] sm:$0xff]  ;;  %vm197_vm1 = vcmask 31744  }
  0x2b   :  { %72 = vst [vmem:[#allocation2 + $0x60] sm:$0x1] %v11139_v1  ;;  %73 = vst [vmem:[#allocation2 + $0x78] sm:$0x1] %v11139_v1  ;;  %9675 = vmatprep.subr.bf16.mxu0 %v17004_v0  ;;  %v9682_v14 = vpack.c.bf16 %v2207_v13, %v2206_v12  ;;  %v2208_v15 = vld [vmem:[#allocation4 + $0x40] sm:$0xff]  ;;  %v2209_v16 = vld [vmem:[#allocation4 + $0x48] sm:$0xff] }
  0x2c   :  { %74 = vst [vmem:[#allocation2 + $0x90] sm:$0x1] %v11139_v1  ;;  %75 = vst [vmem:[#allocation2 + $0xa8] sm:$0x1] %v11139_v1  ;;  %v133_v17 = vld [vmem:[%s16994_s0] sm:$0xff]  ;;  %v134_v18 = vld [vmem:[%s16994_s0 + $0x8] sm:$0xff]  ;;  %v9685_v30 = vpack.c.bf16 %v2209_v16, %v2208_v15 }
  0x2d   :  { %76 = vst [vmem:[#allocation2 + $0xc0] sm:$0x1] %v11139_v1  ;;  %77 = vst [vmem:[#allocation2 + $0xd8] sm:$0x1] %v11139_v1  ;;  %v11295_v19 = vsel %vm197_vm1, %v133_v17, 0.0  ;;  %v135_v20 = vld [vmem:[%s16994_s0 + $0x10] sm:$0xff] }
  0x2e   :  { %78 = vst [vmem:[#allocation2 + $0xf0] sm:$0x1] %v11139_v1  ;;  %79 = vst [vmem:[#allocation2 + $0x108] sm:$0x1] %v11139_v1  ;;  %9677 = vmatpush1.bf16.msra.mxu0 %v9676_v8  ;;  %v136_v21 = vld [vmem:[%s16994_s0 + $0x18] sm:$0xff]  ;;  %v11304_v22 = vsel %vm197_vm1, %v134_v18, 0.0 }
  0x2f   :  { %80 = vst [vmem:[#allocation2 + $0x120] sm:$0x1] %v11139_v1  ;;  %81 = vst [vmem:[#allocation2 + $0x138] sm:$0x1] %v11139_v1  ;;  %9678 = vmatprep.subr.bf16.mxu0 %v17004_v0  ;;  %v11308_v23 = vsel %vm197_vm1, %v135_v20, 0.0  ;;  %v11311_v24 = vsel %vm197_vm1, %v136_v21, 0.0 }
  0x30   :  { %82 = vst [vmem:[#allocation2 + $0x150] sm:$0x1] %v11139_v1  ;;  %83 = vst [vmem:[#allocation2 + $0x168] sm:$0x1] %v11139_v1  ;;  %v137_v25 = vld [vmem:[%s16994_s0 + $0x20] sm:$0xff]  ;;  %v138_v26 = vld [vmem:[%s16994_s0 + $0x28] sm:$0xff] }
  0x31   :  { %84 = vst [vmem:[#allocation2 + $0x180] sm:$0x1] %v11139_v1  ;;  %85 = vst [vmem:[#allocation2 + $0x1c8] sm:$0x1] %v11139_v1  ;;  %v11323_v27 = vsel %vm197_vm1, %v137_v25, 0.0  ;;  %v139_v28 = vld [vmem:[%s16994_s0 + $0x30] sm:$0xff] }
  0x32   :  { %86 = vst [vmem:[#allocation2 + $0x1e0] sm:$0x1] %v11139_v1  ;;  %87 = vst [vmem:[#allocation2 + $0x1f8] sm:$0x1] %v11139_v1  ;;  %9680 = vmatpush1.bf16.msra.mxu0 %v9679_v11  ;;  %v140_v29 = vld [vmem:[%s16994_s0 + $0x38] sm:$0xff]  ;;  %v2210_v31 = vld [vmem:[#allocation4 + $0x50] sm:$0xff] }
  0x33   :  { %88 = vst [vmem:[#allocation2 + $0x210] sm:$0x1] %v11139_v1  ;;  %89 = vst [vmem:[#allocation2 + $0x228] sm:$0x1] %v11139_v1  ;;  %9681 = vmatprep.subr.bf16.mxu0 %v17004_v0  ;;  %v2211_v32 = vld [vmem:[#allocation4 + $0x58] sm:$0xff]  ;;  %v11332_v33 = vsel %vm197_vm1, %v138_v26, 0.0 }
  0x34   :  { %90 = vst [vmem:[#allocation2 + $0x240] sm:$0x1] %v11139_v1  ;;  %91 = vst [vmem:[#allocation2 + $0x258] sm:$0x1] %v11139_v1  ;;  %v11336_v34 = vsel %vm197_vm1, %v139_v28, 0.0  ;;  %v11339_v35 = vsel %vm197_vm1, %v140_v29, 0.0  ;;  %v9688_v49 = vpack.c.bf16 %v2211_v32, %v2210_v31 }
  0x35   :  { %92 = vst [vmem:[#allocation2 + $0x270] sm:$0x1] %v11139_v1  ;;  %93 = vst [vmem:[#allocation2 + $0x288] sm:$0x1] %v11139_v1  ;;  %v141_v36 = vld [vmem:[%s16994_s0 + $0x40] sm:$0xff]  ;;  %v142_v37 = vld [vmem:[%s16994_s0 + $0x48] sm:$0xff] }
  0x36   :  { %94 = vst [vmem:[#allocation2 + $0x2a0] sm:$0x1] %v11139_v1  ;;  %95 = vst [vmem:[#allocation2 + $0x2b8] sm:$0x1] %v11139_v1  ;;  %9683 = vmatpush1.bf16.msra.mxu0 %v9682_v14  ;;  %v11352_v38 = vsel %vm197_vm1, %v141_v36, 0.0  ;;  %v143_v39 = vld [vmem:[%s16994_s0 + $0x50] sm:$0xff] }
  0x37   :  { %96 = vst [vmem:[#allocation2 + $0x2d0] sm:$0x1] %v11139_v1  ;;  %97 = vst [vmem:[#allocation2 + $0x2e8] sm:$0x1] %v11139_v1  ;;  %9684 = vmatprep.subr.bf16.mxu0 %v17004_v0  ;;  %v144_v40 = vld [vmem:[%s16994_s0 + $0x58] sm:$0xff]  ;;  %v11361_v41 = vsel %vm197_vm1, %v142_v37, 0.0 }
  0x38   :  { %98 = vst [vmem:[#allocation2 + $0x300] sm:$0x1] %v11139_v1  ;;  %99 = vst [vmem:[#allocation2 + $0x318] sm:$0x1] %v11139_v1  ;;  %v11365_v42 = vsel %vm197_vm1, %v143_v39, 0.0  ;;  %v11368_v43 = vsel %vm197_vm1, %v144_v40, 0.0 }
  0x39   :  { %100 = vst [vmem:[#allocation2 + $0x330] sm:$0x1] %v11139_v1  ;;  %101 = vst [vmem:[#allocation2 + $0x29] sm:$0x1] %v11139_v1  ;;  %v145_v44 = vld [vmem:[%s16994_s0 + $0x60] sm:$0xff]  ;;  %v146_v45 = vld [vmem:[%s16994_s0 + $0x68] sm:$0xff] }
  0x3a   :  { %102 = vst [vmem:[#allocation2 + $0x41] sm:$0x1] %v11139_v1  ;;  %103 = vst [vmem:[#allocation2 + $0x59] sm:$0x1] %v11139_v1  ;;  %v11380_v46 = vsel %vm197_vm1, %v145_v44, 0.0  ;;  %v147_v47 = vld [vmem:[%s16994_s0 + $0x70] sm:$0xff]  ;;  %9686 = vmatpush1.bf16.msra.mxu0 %v9685_v30 }
  0x3b   :  { %104 = vst [vmem:[#allocation2 + $0x71] sm:$0x1] %v11139_v1  ;;  %105 = vst [vmem:[#allocation2 + $0x89] sm:$0x1] %v11139_v1  ;;  %v148_v48 = vld [vmem:[%s16994_s0 + $0x78] sm:$0xff]  ;;  %v11389_v50 = vsel %vm197_vm1, %v146_v45, 0.0  ;;  %9687 = vmatprep.subr.bf16.mxu0 %v17004_v0 }
  0x3c   :  { %106 = vst [vmem:[#allocation2 + $0xa1] sm:$0x1] %v11139_v1  ;;  %107 = vst [vmem:[#allocation2 + $0xb9] sm:$0x1] %v11139_v1  ;;  %v11393_v51 = vsel %vm197_vm1, %v147_v47, 0.0  ;;  %v11396_v52 = vsel %vm197_vm1, %v148_v48, 0.0 }
  0x3d   :  { %108 = vst [vmem:[#allocation2 + $0xd1] sm:$0x1] %v11139_v1  ;;  %109 = vst [vmem:[#allocation2 + $0xe9] sm:$0x1] %v11139_v1  ;;  %v149_v53 = vld [vmem:[%s16994_s0 + $0x80] sm:$0xff]  ;;  %v2213_v55 = vld [vmem:[#allocation4 + $0x68] sm:$0xff] }
  0x3e   :  { %110 = vst [vmem:[#allocation2 + $0x101] sm:$0x1] %v11139_v1  ;;  %111 = vst [vmem:[#allocation2 + $0x119] sm:$0x1] %v11139_v1  ;;  %v2212_v54 = vld [vmem:[#allocation4 + $0x60] sm:$0xff]  ;;  %v150_v56 = vld [vmem:[%s16994_s0 + $0x88] sm:$0xff]  ;;  %9689 = vmatpush1.bf16.msra.mxu0 %v9688_v49 }
  0x3f   :  { %112 = vst [vmem:[#allocation2 + $0x131] sm:$0x1] %v11139_v1  ;;  %113 = vst [vmem:[#allocation2 + $0x149] sm:$0x1] %v11139_v1  ;;  %v11409_v57 = vsel %vm197_vm1, %v149_v53, 0.0  ;;  %v11412_v58 = vsel %vm197_vm1, %v150_v56, 0.0  ;;  %v9691_v59 = vpack.c.bf16 %v2213_v55, %v2212_v54  ;;  %9690 = vmatprep.subr.bf16.mxu0 %v17004_v0 }
  0x40   :  { %114 = vst [vmem:[#allocation2 + $0x161] sm:$0x1] %v11139_v1  ;;  %115 = vst [vmem:[#allocation2 + $0x179] sm:$0x1] %v11139_v1  ;;  %v2214_v60 = vld [vmem:[#allocation4 + $0x70] sm:$0xff]  ;;  %v2215_v61 = vld [vmem:[#allocation4 + $0x78] sm:$0xff] }
  0x41   :  { %116 = vst [vmem:[#allocation2 + $0x191] sm:$0x1] %v11139_v1  ;;  %117 = vst [vmem:[#allocation2 + $0x1d9] sm:$0x1] %v11139_v1  ;;  %v9694_v62 = vpack.c.bf16 %v2215_v61, %v2214_v60  ;;  %v2216_v63 = vld [vmem:[#allocation4 + $0x80] sm:$0xff]  ;;  %v2217_v3 = vld [vmem:[#allocation4 + $0x88] sm:$0xff] }
  0x42   :  { %118 = vst [vmem:[#allocation2 + $0x1f1] sm:$0x1] %v11139_v1  ;;  %119 = vst [vmem:[#allocation2 + $0x209] sm:$0x1] %v11139_v1  ;;  %9692 = vmatpush1.bf16.msra.mxu0 %v9691_v59  ;;  %v151_v4 = vld [vmem:[%s16994_s0 + $0x90] sm:$0xff]  ;;  %v152_v6 = vld [vmem:[%s16994_s0 + $0x98] sm:$0xff]  ;;  %v9697_v7 = vpack.c.bf16 %v2217_v3, %v2216_v63 }
  0x43   :  { %120 = vst [vmem:[#allocation2 + $0x221] sm:$0x1] %v11139_v1  ;;  %121 = vst [vmem:[#allocation2 + $0x239] sm:$0x1] %v11139_v1  ;;  %9693 = vmatprep.subr.bf16.mxu0 %v17004_v0  ;;  %v2218_v5 = vld [vmem:[#allocation4 + $0x90] sm:$0xff]  ;;  %v2219_v8 = vld [vmem:[#allocation4 + $0x98] sm:$0xff] }
  0x44   :  { %122 = vst [vmem:[#allocation2 + $0x251] sm:$0x1] %v11139_v1  ;;  %123 = vst [vmem:[#allocation2 + $0x269] sm:$0x1] %v11139_v1  ;;  %v153_v9 = vld [vmem:[%s16994_s0 + $0xa0] sm:$0xff]  ;;  %v154_v10 = vld [vmem:[%s16994_s0 + $0xa8] sm:$0xff]  ;;  %v9700_v20 = vpack.c.bf16 %v2219_v8, %v2218_v5 }
  0x45   :  { %124 = vst [vmem:[#allocation2 + $0x281] sm:$0x1] %v11139_v1  ;;  %125 = vst [vmem:[#allocation2 + $0x299] sm:$0x1] %v11139_v1  ;;  %v11432_v11 = vsel %vm197_vm1, %v151_v4, 0.0  ;;  %v155_v12 = vld [vmem:[%s16994_s0 + $0xb0] sm:$0xff] }
  0x46   :  { %126 = vst [vmem:[#allocation2 + $0x2b1] sm:$0x1] %v11139_v1  ;;  %127 = vst [vmem:[#allocation2 + $0x2c9] sm:$0x1] %v11139_v1  ;;  %9695 = vmatpush1.bf16.msra.mxu0 %v9694_v62  ;;  %v156_v13 = vld [vmem:[%s16994_s0 + $0xb8] sm:$0xff]  ;;  %v157_v14 = vld [vmem:[%s16994_s0 + $0xc0] sm:$0xff] }
  0x47   :  { %128 = vst [vmem:[#allocation2 + $0x2e1] sm:$0x1] %v11139_v1  ;;  %129 = vst [vmem:[#allocation2 + $0x2f9] sm:$0x1] %v11139_v1  ;;  %9696 = vmatprep.subr.bf16.mxu0 %v17004_v0  ;;  %v11444_v15 = vsel %vm197_vm1, %v152_v6, 0.0  ;;  %v158_v16 = vld [vmem:[%s16994_s0 + $0xc8] sm:$0xff] }
  0x48   :  { %130 = vst [vmem:[#allocation2 + $0x311] sm:$0x1] %v11139_v1  ;;  %131 = vst [vmem:[#allocation2 + $0x329] sm:$0x1] %v11139_v1  ;;  %v11452_v17 = vsel %vm197_vm1, %v153_v9, 0.0  ;;  %v11455_v18 = vsel %vm197_vm1, %v154_v10, 0.0 }
  0x49   :  { %132 = vst [vmem:[#allocation2 + $0x341] sm:$0x1] %v11139_v1  ;;  %17608 = vst [vmem:[#allocation13_spill] sm:$0xff] %v11295_v19  ;;  %v2220_v21 = vld [vmem:[#allocation4 + $0xa0] sm:$0xff]  ;;  %v11460_v25 = vsel %vm197_vm1, %v155_v12, 0.0  ;;  %v11463_v26 = vsel %vm197_vm1, %v156_v13, 0.0 }
  0x4a   :  { %17609 = vst [vmem:[#allocation14_spill] sm:$0xff] %v11304_v22  ;;  %262 = vst [vmem:[#allocation2 + $0x19] sm:$0xff] %v11295_v19  ;;  %9698 = vmatpush1.bf16.msra.mxu0 %v9697_v7  ;;  %v11466_v28 = vsel %vm197_vm1, %v157_v14, 0.0  ;;  %v2221_v29 = vld [vmem:[#allocation4 + $0xa8] sm:$0xff]  ;;  %v11472_v30 = vsel %vm197_vm1, %v158_v16, 0.0  ;;  %v159_v31 = vld [vmem:[%s16994_s0 + $0xd0] sm:$0xff] }
  0x4b   :  { %17610 = vst [vmem:[#allocation15_spill] sm:$0xff] %v11308_v23  ;;  %17611 = vst [vmem:[#allocation16_spill] sm:$0xff] %v11311_v24  ;;  %9699 = vmatprep.subr.bf16.mxu0 %v17004_v0  ;;  %v160_v32 = vld [vmem:[%s16994_s0 + $0xd8] sm:$0xff]  ;;  %v11483_v36 = vsel %vm197_vm1, %v159_v31, 0.0  ;;  %v9703_v39 = vpack.c.bf16 %v2221_v29, %v2220_v21  ;;  %v2222_v40 = vld [vmem:[#allocation4 + $0xb0] sm:$0xff]  ;;  %vm883_vm2 = vcmask 1045504  }
  0x4c   :  { %263 = vst [vmem:[#allocation2 + $0x21] sm:$0xff] %v11304_v22  ;;  %264 = vst [vmem:[#allocation2 + $0x31] sm:$0xff] %v11308_v23  ;;  %v11486_v37 = vsel %vm197_vm1, %v160_v32, 0.0  ;;  %v2223_v44 = vld [vmem:[#allocation4 + $0xb8] sm:$0xff]  ;;  %v2224_v47 = vld [vmem:[#allocation4 + $0xc0] sm:$0xff] }
  0x4d   :  { %265 = vst [vmem:[#allocation2 + $0x39] sm:$0xff] %v11311_v24  ;;  %17612 = vst [vmem:[#allocation17_spill] sm:$0xff] %v11323_v27  ;;  %v9706_v45 = vpack.c.bf16 %v2223_v44, %v2222_v40  ;;  %v2225_v48 = vld [vmem:[#allocation4 + $0xc8] sm:$0xff]  ;;  %v161_v49 = vld [vmem:[%s16994_s0 + $0xe0] sm:$0xff] }
  0x4e   :  { %17613 = vst [vmem:[#allocation18_spill] sm:$0xff] %v11332_v33  ;;  %266 = vst [vmem:[#allocation2 + $0x49] sm:$0xff] %v11323_v27  ;;  %9701 = vmatpush1.bf16.msra.mxu0 %v9700_v20  ;;  %v162_v53 = vld [vmem:[%s16994_s0 + $0xe8] sm:$0xff]  ;;  %v9709_v54 = vpack.c.bf16 %v2225_v48, %v2224_v47  ;;  %v11499_v55 = vsel %vm197_vm1, %v161_v49, 0.0  ;;  %v2226_v59 = vld [vmem:[#allocation4 + $0xd0] sm:$0xff] }
  0x4f   :  { %17614 = vst [vmem:[#allocation19_spill] sm:$0xff] %v11336_v34  ;;  %17615 = vst [vmem:[#allocation20_spill] sm:$0xff] %v11339_v35  ;;  %9702 = vmatprep.subr.bf16.mxu0 %v17004_v0  ;;  %v11502_v56 = vsel %vm197_vm1, %v162_v53, 0.0  ;;  %v2227_v60 = vld [vmem:[#allocation4 + $0xd8] sm:$0xff]  ;;  %v2228_v62 = vld [vmem:[#allocation4 + $0xe0] sm:$0xff] }
  0x50   :  { %267 = vst [vmem:[#allocation2 + $0x51] sm:$0xff] %v11332_v33  ;;  %268 = vst [vmem:[#allocation2 + $0x61] sm:$0xff] %v11336_v34  ;;  %v9712_v61 = vpack.c.bf16 %v2227_v60, %v2226_v59  ;;  %v2229_v63 = vld [vmem:[#allocation4 + $0xe8] sm:$0xff]  ;;  %v2230_v4 = vld [vmem:[#allocation4 + $0xf0] sm:$0xff] }
  0x51   :  { %269 = vst [vmem:[#allocation2 + $0x69] sm:$0xff] %v11339_v35  ;;  %17616 = vst [vmem:[#allocation21_spill] sm:$0xff] %v11352_v38  ;;  %v9715_v3 = vpack.c.bf16 %v2229_v63, %v2228_v62  ;;  %v2231_v5 = vld [vmem:[#allocation4 + $0xf8] sm:$0xff]  ;;  %v328_v6 = vld [vmem:[#allocation2 + $0x10] sm:$0x3] }
  0x52   :  { %17617 = vst [vmem:[#allocation22_spill] sm:$0xff] %v11361_v41  ;;  %270 = vst [vmem:[#allocation2 + $0x79] sm:$0xff] %v11352_v38  ;;  %9704 = vmatpush1.bf16.msra.mxu0 %v9703_v39  ;;  %v9718_v7 = vpack.c.bf16 %v2231_v5, %v2230_v4  ;;  %v2232_v8 = vld [vmem:[#allocation4 + $0x100] sm:$0xff]  ;;  %v2233_v9 = vld [vmem:[#allocation4 + $0x108] sm:$0xff]  ;;  %v598_v10 = vrot.slane %v328_v6, 1 }
  0x53   :  { %17618 = vst [vmem:[#allocation23_spill] sm:$0xff] %v11365_v42  ;;  %17619 = vst [vmem:[#allocation24_spill] sm:$0xff] %v11368_v43  ;;  %9705 = vmatprep.subr.bf16.mxu0 %v17004_v0  ;;  %v165_v12 = vld [vmem:[%s16994_s0 + $0x100] sm:$0xff]  ;;  %v166_v13 = vld [vmem:[%s16994_s0 + $0x108] sm:$0xff]  ;;  %v9721_v29 = vpack.c.bf16 %v2233_v9, %v2232_v8 }
  0x54   :  { %271 = vst [vmem:[#allocation2 + $0x81] sm:$0xff] %v11361_v41  ;;  %272 = vst [vmem:[#allocation2 + $0x91] sm:$0xff] %v11365_v42  ;;  %v329_v14 = vld [vmem:[#allocation2 + $0x18] sm:$0xff]  ;;  %v330_v16 = vld [vmem:[#allocation2 + $0x20] sm:$0xff]  ;;  %v11517_v20 = vsel %vm197_vm1, %v165_v12, 0.0  ;;  %v11520_v21 = vsel %vm197_vm1, %v166_v13, 0.0  ;;  %v599_v31 = vsel %vm594_vm0, %v11214_v2, %v598_v10 }
  0x55   :  { %273 = vst [vmem:[#allocation2 + $0x99] sm:$0xff] %v11368_v43  ;;  %17620 = vst [vmem:[#allocation25_spill] sm:$0xff] %v11380_v46  ;;  %v600_v32 = vrot.slane %v329_v14, 1  ;;  %v601_v39 = vrot.slane %v330_v16, 1  ;;  %v2234_v40 = vld [vmem:[#allocation4 + $0x110] sm:$0xff]  ;;  %v2235_v44 = vld [vmem:[#allocation4 + $0x118] sm:$0xff] }
  0x56   :  { %17621 = vst [vmem:[#allocation26_spill] sm:$0xff] %v11389_v50  ;;  %274 = vst [vmem:[#allocation2 + $0xa9] sm:$0xff] %v11380_v46  ;;  %9707 = vmatpush1.bf16.msra.mxu0 %v9706_v45  ;;  %v331_v45 = vld [vmem:[#allocation2 + $0x28] sm:$0x3]  ;;  %v9724_v47 = vpack.c.bf16 %v2235_v44, %v2234_v40  ;;  %v2236_v48 = vld [vmem:[#allocation4 + $0x120] sm:$0xff] }
  0x57   :  { %17622 = vst [vmem:[#allocation27_spill] sm:$0xff] %v11393_v51  ;;  %17623 = vst [vmem:[#allocation28_spill] sm:$0xff] %v11396_v52  ;;  %9708 = vmatprep.subr.bf16.mxu0 %v17004_v0  ;;  %v11529_v49 = vsel %vm594_vm0, %v600_v32, %v601_v39  ;;  %v603_v53 = vrot.slane %v331_v45, 1  ;;  %v167_v59 = vld [vmem:[%s16994_s0 + $0x110] sm:$0xff]  ;;  %v168_v60 = vld [vmem:[%s16994_s0 + $0x118] sm:$0xff] }
  0x58   :  { %275 = vst [vmem:[#allocation2 + $0xb1] sm:$0xff] %v11389_v50  ;;  %276 = vst [vmem:[#allocation2 + $0xc1] sm:$0xff] %v11393_v51  ;;  %v11540_v62 = vld [vmem:[#allocation2 + $0x38] sm:$0xff]  ;;  %v11543_v63 = vsel %vm197_vm1, %v167_v59, 0.0  ;;  %v2238_v8 = vld [vmem:[#allocation4 + $0x130] sm:$0xff] }
  0x59   :  { %277 = vst [vmem:[#allocation2 + $0xc9] sm:$0xff] %v11396_v52  ;;  %17624 = vst [vmem:[#allocation29_spill] sm:$0xff] %v11409_v57  ;;  %v11553_v5 = vsel %vm594_vm0, %v601_v39, %v603_v53  ;;  %v2239_v9 = vld [vmem:[#allocation4 + $0x138] sm:$0xff]  ;;  %v2240_v12 = vld [vmem:[#allocation4 + $0x140] sm:$0xff] }
  0x5a   :  { %17625 = vst [vmem:[#allocation30_spill] sm:$0xff] %v11412_v58  ;;  %278 = vst [vmem:[#allocation2 + $0xd9] sm:$0xff] %v11409_v57  ;;  %9710 = vmatpush1.bf16.msra.mxu0 %v9709_v54  ;;  %v2237_v54 = vld [vmem:[#allocation4 + $0x128] sm:$0xff]  ;;  %v9730_v10 = vpack.c.bf16 %v2239_v9, %v2238_v8  ;;  %v169_v32 = vld [vmem:[%s16994_s0 + $0x120] sm:$0xff] }
  0x5b   :  { %279 = vst [vmem:[#allocation2 + $0xe1] sm:$0xff] %v11412_v58  ;;  %17626 = vst [vmem:[#allocation31_spill] sm:$0xff] %v11432_v11  ;;  %9711 = vmatprep.subr.bf16.mxu0 %v17004_v0  ;;  %v9727_v4 = vpack.c.bf16 %v2237_v54, %v2236_v48  ;;  %v335_v39 = vld [vmem:[#allocation2 + $0x48] sm:$0xff]  ;;  %v336_v40 = vld [vmem:[#allocation2 + $0x50] sm:$0xff]  ;;  %v11570_v44 = vsel %vm197_vm1, %v169_v32, 0.0 }
  0x5c   :  { %17627 = vst [vmem:[#allocation32_spill] sm:$0xff] %v11444_v15  ;;  %280 = vst [vmem:[#allocation2 + $0xf1] sm:$0xff] %v11432_v11  ;;  %v610_v53 = vrot.slane %v335_v39, 1  ;;  %v611_v54 = vrot.slane %v336_v40, 1  ;;  %v2242_v59 = vld [vmem:[#allocation4 + $0x150] sm:$0xff]  ;;  %v2259_v51 = vld [vmem:[#allocation4 + $0x1d8] sm:$0xff] }
  0x5d   :  { %281 = vst [vmem:[#allocation2 + $0xf9] sm:$0xff] %v11444_v15  ;;  %17628 = vst [vmem:[#allocation33_spill] sm:$0xff] %v11452_v17  ;;  %v2261_v27 = vld [vmem:[#allocation4 + $0x1e8] sm:$0xff] }
  0x5e   :  { %17629 = vst [vmem:[#allocation34_spill] sm:$0xff] %v11455_v18  ;;  %282 = vst [vmem:[#allocation2 + $0x109] sm:$0xff] %v11452_v17  ;;  %9713 = vmatpush1.bf16.msra.mxu0 %v9712_v61  ;;  %v11538_v61 = vld [vmem:[#allocation2 + $0x30] sm:$0xff]  ;;  %v11585_v8 = vsel %vm594_vm0, %v610_v53, %v611_v54 }
  0x5f   :  { %283 = vst [vmem:[#allocation2 + $0x111] sm:$0xff] %v11455_v18  ;;  %17630 = vst [vmem:[#allocation35_spill] sm:$0xff] %v11460_v25  ;;  %9714 = vmatprep.subr.bf16.mxu0 %v17004_v0  ;;  %v605_v6 = vrot.slane %v11538_v61, 1 }
  0x60   :  { %17631 = vst [vmem:[#allocation36_spill] sm:$0xff] %v11463_v26  ;;  %17632 = vst [vmem:[#allocation37_spill] sm:$0xff] %v11466_v28 }
  0x61   :  { %284 = vst [vmem:[#allocation2 + $0x121] sm:$0xff] %v11460_v25  ;;  %285 = vst [vmem:[#allocation2 + $0x129] sm:$0xff] %v11463_v26 }
  0x62   :  { %17633 = vst [vmem:[#allocation38_spill] sm:$0xff] %v11472_v30  ;;  %286 = vst [vmem:[#allocation2 + $0x139] sm:$0xff] %v11466_v28  ;;  %9716 = vmatpush1.bf16.msra.mxu0 %v9715_v3  ;;  %v11546_v3 = vsel %vm197_vm1, %v168_v60, 0.0  ;;  %v2243_v60 = vld [vmem:[#allocation4 + $0x158] sm:$0xff]  ;;  %v2257_v28 = vld [vmem:[#allocation4 + $0x1c8] sm:$0xff] }
  0x63   :  { %287 = vst [vmem:[#allocation2 + $0x141] sm:$0xff] %v11472_v30  ;;  %17634 = vst [vmem:[#allocation39_spill] sm:$0xff] %v11483_v36  ;;  %9717 = vmatprep.subr.bf16.mxu0 %v17004_v0  ;;  %v11775_v25 = vld [vmem:[#allocation2 + $0xf0] sm:$0xff] }
  0x64   :  { %17635 = vst [vmem:[#allocation40_spill] sm:$0xff] %v11486_v37  ;;  %288 = vst [vmem:[#allocation2 + $0x151] sm:$0xff] %v11483_v36  ;;  %v11777_v18 = vld [vmem:[#allocation2 + $0xf8] sm:$0xff]  ;;  %v11795_v17 = vld [vmem:[#allocation2 + $0x100] sm:$0x3] }
  0x65   :  { %289 = vst [vmem:[#allocation2 + $0x159] sm:$0xff] %v11486_v37  ;;  %17636 = vst [vmem:[#allocation41_spill] sm:$0xff] %v11499_v55 }
  0x66   :  { %17637 = vst [vmem:[#allocation42_spill] sm:$0xff] %v11502_v56  ;;  %290 = vst [vmem:[#allocation2 + $0x169] sm:$0xff] %v11499_v55  ;;  %9719 = vmatpush1.bf16.msra.mxu0 %v9718_v7  ;;  %v606_v7 = vrot.slane %v11540_v62, 1  ;;  %v11811_v15 = vld [vmem:[#allocation2 + $0x110] sm:$0xff] }
  0x67   :  { %291 = vst [vmem:[#allocation2 + $0x171] sm:$0xff] %v11502_v56  ;;  %17638 = vst [vmem:[#allocation43_spill] sm:$0xff] %v11517_v20  ;;  %9720 = vmatprep.subr.bf16.mxu0 %v17004_v0  ;;  %v11744_v56 = vld [vmem:[#allocation2 + $0xe0] sm:$0xff]  ;;  %v651_v52 = vrot.slane %v11811_v15, 1 }
  0x68   :  { %17639 = vst [vmem:[#allocation44_spill] sm:$0xff] %v11520_v21  ;;  %294 = vst [vmem:[#allocation2 + $0x1c9] sm:$0xff] %v11517_v20  ;;  %v11560_v13 = vsel %vm594_vm0, %v605_v6, %v606_v7  ;;  %v2244_v6 = vld [vmem:[#allocation4 + $0x160] sm:$0xff]  ;;  %v11728_v20 = vld [vmem:[#allocation2 + $0xd0] sm:$0x3]  ;;  %v641_v30 = vrot.slane %v11744_v56, 1 }
  0x69   :  { %295 = vst [vmem:[#allocation2 + $0x1d1] sm:$0xff] %v11520_v21  ;;  %2409 = vmatmul.mubr.f32.vlgmr.msra.gmra.mrb[0].mxu0 %v11139_v1  ;;  %17640 = vst [vmem:[#allocation45_spill] sm:$0xff] %v11529_v49  ;;  %v11710_v21 = vld [vmem:[#allocation2 + $0xc8] sm:$0xff]  ;;  %v11842_v46 = vld [vmem:[#allocation2 + $0x120] sm:$0xff] }
  0x6a   :  { %9722 = vmatpush1.bf16.msra.mxu0 %v9721_v29  ;;  %2413 = vmatprep.mubr.f32.mxu0 %v599_v31  ;;  %17641 = vst [vmem:[#allocation46_spill] sm:$0xff] %v11543_v63  ;;  %17642 = vst [vmem:[#allocation47_spill] sm:$0xff] %v11546_v3  ;;  %v2241_v31 = vld [vmem:[#allocation4 + $0x148] sm:$0xff]  ;;  %v11862_v42 = vld [vmem:[#allocation2 + $0x130] sm:$0x3] }
  0x6b   :  { %9723 = vmatprep.subr.bf16.mxu0 %v17004_v0  ;;  %296 = vst [vmem:[#allocation2 + $0x1e1] sm:$0xff] %v11543_v63  ;;  %297 = vst [vmem:[#allocation2 + $0x1e9] sm:$0xff] %v11546_v3  ;;  %v11694_v3 = vld [vmem:[#allocation2 + $0xb8] sm:$0x3]  ;;  %v11708_v63 = vld [vmem:[#allocation2 + $0xc0] sm:$0xff] }
  0x6c   :  { %17643 = vst [vmem:[#allocation48_spill] sm:$0xff] %v11553_v5  ;;  %17644 = vst [vmem:[#allocation49_spill] sm:$0xff] %v11560_v13  ;;  %v11844_v43 = vld [vmem:[#allocation2 + $0x128] sm:$0xff]  ;;  %v11878_v41 = vld [vmem:[#allocation2 + $0x140] sm:$0xff] }
  0x6d   :  { %2414 = vmatmul.mubr.f32.gmra.mrb[2].mxu0 %v11139_v1  ;;  %v334_v1 = vld [vmem:[#allocation2 + $0x40] sm:$0x3]  ;;  %17645 = vst [vmem:[#allocation50_spill] sm:$0xff] %v11570_v44  ;;  %298 = vst [vmem:[#allocation2 + $0x1f9] sm:$0xff] %v11570_v44  ;;  %v2251_v44 = vld [vmem:[#allocation4 + $0x198] sm:$0xff]  ;;  %v661_v33 = vrot.slane %v11878_v41, 1 }
  0x6e   :  { %2418 = vmatprep.mubr.f32.mxu0 %v11529_v49  ;;  %9725 = vmatpush1.bf16.msra.mxu0 %v9724_v47  ;;  %v608_v29 = vrot.slane %v334_v1, 1  ;;  %v9733_v47 = vpack.c.bf16 %v2241_v31, %v2240_v12  ;;  %17648 = vst [vmem:[#allocation53_spill] sm:$0xff] %v11585_v8  ;;  %v171_v1 = vld [vmem:[%s16994_s0 + $0x130] sm:$0xff]  ;;  %v338_v12 = vld [vmem:[#allocation2 + $0x60] sm:$0xff]  ;;  %v11911_v22 = vld [vmem:[#allocation2 + $0x158] sm:$0xff] }
  0x6f   :  { %9726 = vmatprep.subr.bf16.mxu0 %v17004_v0  ;;  %v11595_v31 = vsel %vm197_vm1, %v171_v1, 0.0  ;;  %v615_v53 = vrot.slane %v338_v12, 1  ;;  %v340_v1 = vld [vmem:[#allocation2 + $0x70] sm:$0x3]  ;;  %v11929_v19 = vld [vmem:[#allocation2 + $0x160] sm:$0x3] }
  0x70   :  { %v11579_v48 = vsel %vm594_vm0, %v606_v7, %v608_v29  ;;  %v2245_v7 = vld [vmem:[#allocation4 + $0x168] sm:$0xff]  ;;  %17649 = vst [vmem:[#allocation54_spill] sm:$0xff] %v11595_v31  ;;  %300 = vst [vmem:[#allocation2 + $0x211] sm:$0xff] %v11595_v31  ;;  %v11909_v23 = vld [vmem:[#allocation2 + $0x150] sm:$0xff] }
  0x71   :  { %2419 = vmatmul.mubr.f32.gmra.mrb[4].mxu0 %v329_v14  ;;  %v170_v14 = vld [vmem:[%s16994_s0 + $0x128] sm:$0xff]  ;;  %17647 = vst [vmem:[#allocation52_spill] sm:$0xff] %v11579_v48 }
  0x72   :  { %2423 = vmatprep.mubr.f32.mxu0 %v11553_v5  ;;  %9728 = vmatpush1.bf16.msra.mxu0 %v9727_v4  ;;  %v11573_v45 = vsel %vm197_vm1, %v170_v14, 0.0  ;;  %v337_v4 = vld [vmem:[#allocation2 + $0x58] sm:$0x3]  ;;  %v339_v29 = vld [vmem:[#allocation2 + $0x68] sm:$0xff]  ;;  %v9739_v14 = vpack.c.bf16 %v2245_v7, %v2244_v6  ;;  %v173_v6 = vld [vmem:[%s16994_s0 + $0x140] sm:$0xff] }
  0x73   :  { %9729 = vmatprep.subr.bf16.mxu0 %v17004_v0  ;;  %17646 = vst [vmem:[#allocation51_spill] sm:$0xff] %v11573_v45  ;;  %299 = vst [vmem:[#allocation2 + $0x201] sm:$0xff] %v11573_v45  ;;  %v613_v9 = vrot.slane %v337_v4, 1  ;;  %v2247_v4 = vld [vmem:[#allocation4 + $0x178] sm:$0xff]  ;;  %v342_v7 = vld [vmem:[#allocation2 + $0x80] sm:$0xff]  ;;  %v17656_v45 = vmov 0.0|0.0  }
  0x75   :  { %2424 = vmatmul.mubr.f32.gmra.mrb[6].mxu0 %v330_v16  ;;  %v9736_v16 = vpack.c.bf16 %v2243_v60, %v2242_v59  ;;  %v616_v59 = vrot.slane %v339_v29, 1  ;;  %v2246_v60 = vld [vmem:[#allocation4 + $0x170] sm:$0xff] }
  0x76   :  { %2428 = vmatprep.mubr.f32.mxu0 %v11560_v13  ;;  %9731 = vmatpush1.bf16.msra.mxu0 %v9730_v10  ;;  %v172_v10 = vld [vmem:[%s16994_s0 + $0x138] sm:$0xff] }
  0x77   :  { %9732 = vmatprep.subr.bf16.mxu0 %v17004_v0  ;;  %v11598_v32 = vsel %vm197_vm1, %v172_v10, 0.0  ;;  %v9742_v10 = vpack.c.bf16 %v2247_v4, %v2246_v60  ;;  %v11610_v31 = vsel %vm594_vm0, %v615_v53, %v616_v59 }
  0x78   :  { %17650 = vst [vmem:[#allocation55_spill] sm:$0xff] %v11598_v32  ;;  %301 = vst [vmem:[#allocation2 + $0x219] sm:$0xff] %v11598_v32  ;;  %v2248_v32 = vld [vmem:[#allocation4 + $0x180] sm:$0xff] }
  0x79   :  { %2429 = vmatmul.mubr.f32.gmra.mrb[8].mxu0 %v11538_v61  ;;  %17652 = vst [vmem:[#allocation57_spill] sm:$0xff] %v11610_v31 }
  0x7a   :  { %2433 = vmatprep.mubr.f32.mxu0 %v11579_v48  ;;  %9734 = vmatpush1.bf16.msra.mxu0 %v9733_v47  ;;  %v11605_v47 = vsel %vm594_vm0, %v611_v54, %v613_v9  ;;  %v2249_v54 = vld [vmem:[#allocation4 + $0x188] sm:$0xff]  ;;  %v341_v9 = vld [vmem:[#allocation2 + $0x78] sm:$0xff] }
  0x7b   :  { %9735 = vmatprep.subr.bf16.mxu0 %v17004_v0  ;;  %17651 = vst [vmem:[#allocation56_spill] sm:$0xff] %v11605_v47  ;;  %v9745_v60 = vpack.c.bf16 %v2249_v54, %v2248_v32  ;;  %v11645_v54 = vld [vmem:[#allocation2 + $0x98] sm:$0xff] }
  0x7d   :  { %2434 = vmatmul.mubr.f32.gmra.mrb[10].mxu0 %v11540_v62 }
  0x7e   :  { %2438 = vmatprep.mubr.f32.mxu0 %v11585_v8  ;;  %9737 = vmatpush1.bf16.msra.mxu0 %v9736_v16  ;;  %v618_v16 = vrot.slane %v340_v1, 1  ;;  %v620_v1 = vrot.slane %v341_v9, 1 }
  0x7f   :  { %9738 = vmatprep.subr.bf16.mxu0 %v17004_v0 }
  0x80   :  { %v11629_v4 = vsel %vm594_vm0, %v616_v59, %v618_v16  ;;  %v2253_v59 = vld [vmem:[#allocation4 + $0x1a8] sm:$0xff]  ;;  %v11643_v16 = vld [vmem:[#allocation2 + $0x90] sm:$0xff] }
  0x81   :  { %2439 = vmatmul.mubr.f32.gmra.mrb[12].mxu0 %v335_v39  ;;  %v174_v39 = vld [vmem:[%s16994_s0 + $0x148] sm:$0xff]  ;;  %17655 = vst [vmem:[#allocation60_spill] sm:$0xff] %v11629_v4 }
  0x82   :  { %2443 = vmatprep.mubr.f32.mxu0 %v11605_v47  ;;  %9740 = vmatpush1.bf16.msra.mxu0 %v9739_v14  ;;  %v11620_v14 = vsel %vm197_vm1, %v173_v6, 0.0  ;;  %v11623_v53 = vsel %vm197_vm1, %v174_v39, 0.0  ;;  %v2250_v6 = vld [vmem:[#allocation4 + $0x190] sm:$0xff]  ;;  %v343_v39 = vld [vmem:[#allocation2 + $0x88] sm:$0x3] }
  0x83   :  { %9741 = vmatprep.subr.bf16.mxu0 %v17004_v0  ;;  %17653 = vst [vmem:[#allocation58_spill] sm:$0xff] %v11620_v14  ;;  %17654 = vst [vmem:[#allocation59_spill] sm:$0xff] %v11623_v53  ;;  %v621_v0 = vrot.slane %v342_v7, 1  ;;  %v623_v32 = vrot.slane %v343_v39, 1  ;;  %v625_v39 = vrot.slane %v11643_v16, 1 }
  0x84   :  { %302 = vst [vmem:[#allocation2 + $0x229] sm:$0xff] %v11620_v14  ;;  %303 = vst [vmem:[#allocation2 + $0x231] sm:$0xff] %v11623_v53  ;;  %v2252_v53 = vld [vmem:[#allocation4 + $0x1a0] sm:$0xff] }
  0x85   :  { %2444 = vmatmul.mubr.f32.gmra.mrb[14].mxu0 %v336_v40  ;;  %v9748_v40 = vpack.c.bf16 %v2251_v44, %v2250_v6  ;;  %v11634_v14 = vsel %vm594_vm0, %v620_v1, %v621_v0  ;;  %v9751_v1 = vpack.c.bf16 %v2253_v59, %v2252_v53  ;;  %v11657_v6 = vsel %vm594_vm0, %v621_v0, %v623_v32  ;;  %v177_v0 = vld [vmem:[%s16994_s0 + $0x160] sm:$0xff]  ;;  %v11676_v32 = vld [vmem:[#allocation2 + $0xa8] sm:$0xff] }
  0x86   :  { %2448 = vmatprep.mubr.f32.mxu0 %v11610_v31  ;;  %9743 = vmatpush1.bf16.msra.mxu0 %v9742_v10  ;;  %17657 = vst [vmem:[#allocation61_spill] sm:$0xff] %v11634_v14  ;;  %v175_v10 = vld [vmem:[%s16994_s0 + $0x150] sm:$0xff]  ;;  %17660 = vst [vmem:[#allocation64_spill] sm:$0xff] %v11657_v6  ;;  %v11681_v59 = vsel %vm197_vm1, %v177_v0, 0.0 }
  0x87   :  { %9744 = vmatprep.subr.bf16.mxu0 %v17656_v45  ;;  %v11648_v44 = vsel %vm197_vm1, %v175_v10, 0.0  ;;  %v626_v10 = vrot.slane %v11645_v54, 1  ;;  %17662 = vst [vmem:[#allocation66_spill] sm:$0xff] %v11681_v59  ;;  %306 = vst [vmem:[#allocation2 + $0x259] sm:$0xff] %v11681_v59  ;;  %v2254_v0 = vld [vmem:[#allocation4 + $0x1b0] sm:$0xff]  ;;  %v633_v59 = vrot.slane %v11694_v3, 1 }
  0x88   :  { %17658 = vst [vmem:[#allocation62_spill] sm:$0xff] %v11648_v44  ;;  %304 = vst [vmem:[#allocation2 + $0x241] sm:$0xff] %v11648_v44 }
  0x89   :  { %2449 = vmatmul.mubr.f32.gmra.mrb[16].mxu0 %v338_v12  ;;  %v176_v12 = vld [vmem:[%s16994_s0 + $0x158] sm:$0xff] }
  0x8a   :  { %2453 = vmatprep.mubr.f32.mxu0 %v11629_v4  ;;  %9746 = vmatpush1.bf16.msra.mxu0 %v9745_v60  ;;  %v11651_v60 = vsel %vm197_vm1, %v176_v12, 0.0  ;;  %v11662_v12 = vld [vmem:[#allocation2 + $0xa0] sm:$0x3] }
  0x8b   :  { %9747 = vmatprep.subr.bf16.mxu0 %v17656_v45  ;;  %17659 = vst [vmem:[#allocation63_spill] sm:$0xff] %v11651_v60  ;;  %305 = vst [vmem:[#allocation2 + $0x249] sm:$0xff] %v11651_v60  ;;  %v628_v53 = vrot.slane %v11662_v12, 1  ;;  %v630_v60 = vrot.slane %v11676_v32, 1  ;;  %v12076_v4 = vld [vmem:[#allocation2 + $0x238] sm:$0x3] }
  0x8c   :  { %17709 = vst [vmem:[#allocation113_spill] sm:$0xff] %v12076_v4  ;;  %v703_v31 = vrot.slane %v12076_v4, 1 }
  0x8d   :  { %2454 = vmatmul.mubr.f32.gmra.mrb[18].mxu0 %v339_v29  ;;  %v11666_v29 = vsel %vm594_vm0, %v625_v39, %v626_v10  ;;  %v11690_v39 = vsel %vm594_vm0, %v626_v10, %v628_v53  ;;  %v179_v10 = vld [vmem:[%s16994_s0 + $0x170] sm:$0xff]  ;;  %v180_v53 = vld [vmem:[%s16994_s0 + $0x178] sm:$0xff] }
  0x8e   :  { %2458 = vmatprep.mubr.f32.mxu0 %v11634_v14  ;;  %9749 = vmatpush1.bf16.msra.mxu0 %v9748_v40  ;;  %17661 = vst [vmem:[#allocation65_spill] sm:$0xff] %v11666_v29  ;;  %v178_v40 = vld [vmem:[%s16994_s0 + $0x168] sm:$0xff]  ;;  %17664 = vst [vmem:[#allocation68_spill] sm:$0xff] %v11690_v39  ;;  %v12103_v13 = vld [vmem:[#allocation2 + $0x258] sm:$0xff] }
  0x8f   :  { %9750 = vmatprep.subr.bf16.mxu0 %v17656_v45  ;;  %v12065_v14 = vld [vmem:[#allocation2 + $0x228] sm:$0xff]  ;;  %v12084_v47 = vld [vmem:[#allocation2 + $0x240] sm:$0xff]  ;;  %17716 = vst [vmem:[#allocation120_spill] sm:$0xff] %v12103_v13 }
  0x90   :  { %17711 = vst [vmem:[#allocation115_spill] sm:$0xff] %v12084_v47 }
  0x91   :  { %2459 = vmatmul.mubr.f32.gmra.mrb[20].mxu0 %v341_v9  ;;  %v11678_v9 = vld [vmem:[#allocation2 + $0xb0] sm:$0xff] }
  0x92   :  { %2463 = vmatprep.mubr.f32.mxu0 %v11657_v6  ;;  %9752 = vmatpush1.bf16.msra.mxu0 %v9751_v1  ;;  %v11684_v1 = vsel %vm197_vm1, %v178_v40, 0.0  ;;  %v631_v44 = vrot.slane %v11678_v9, 1  ;;  %v2255_v40 = vld [vmem:[#allocation4 + $0x1b8] sm:$0xff]  ;;  %v12095_v8 = vld [vmem:[#allocation2 + $0x250] sm:$0x3] }
  0x93   :  { %9753 = vmatprep.subr.bf16.mxu0 %v17656_v45  ;;  %17663 = vst [vmem:[#allocation67_spill] sm:$0xff] %v11684_v1  ;;  %307 = vst [vmem:[#allocation2 + $0x261] sm:$0xff] %v11684_v1  ;;  %v708_v48 = vrot.slane %v12095_v8, 1 }
  0x94   :  { %v11699_v1 = vsel %vm594_vm0, %v630_v60, %v631_v44  ;;  %v11716_v60 = vsel %vm197_vm1, %v180_v53, 0.0  ;;  %17714 = vst [vmem:[#allocation118_spill] sm:$0xff] %v12095_v8 }
  0x95   :  { %2464 = vmatmul.mubr.f32.gmra.mrb[22].mxu0 %v342_v7  ;;  %v9754_v7 = vpack.c.bf16 %v2255_v40, %v2254_v0  ;;  %17665 = vst [vmem:[#allocation69_spill] sm:$0xff] %v11699_v1  ;;  %v11713_v0 = vsel %vm197_vm1, %v179_v10, 0.0  ;;  %17667 = vst [vmem:[#allocation71_spill] sm:$0xff] %v11716_v60  ;;  %v11724_v40 = vsel %vm594_vm0, %v631_v44, %v633_v59  ;;  %v636_v10 = vrot.slane %v11710_v21, 1  ;;  %v181_v44 = vld [vmem:[%s16994_s0 + $0x180] sm:$0xff]  ;;  %v182_v59 = vld [vmem:[%s16994_s0 + $0x188] sm:$0xff] }
  0x96   :  { %2468 = vmatprep.mubr.f32.mxu0 %v11666_v29  ;;  %17666 = vst [vmem:[#allocation70_spill] sm:$0xff] %v11713_v0  ;;  %308 = vst [vmem:[#allocation2 + $0x271] sm:$0xff] %v11713_v0  ;;  %v11742_v0 = vld [vmem:[#allocation2 + $0xd8] sm:$0xff]  ;;  %v11747_v55 = vsel %vm197_vm1, %v181_v44, 0.0  ;;  %v11761_v44 = vld [vmem:[#allocation2 + $0xe8] sm:$0x3] }
  0x97   :  { %9755 = vmatpush1.bf16.msra.mxu0 %v9754_v7  ;;  %309 = vst [vmem:[#allocation2 + $0x279] sm:$0xff] %v11716_v60  ;;  %17668 = vst [vmem:[#allocation72_spill] sm:$0xff] %v11724_v40  ;;  %v635_v7 = vrot.slane %v11708_v63, 1  ;;  %v638_v60 = vrot.slane %v11728_v20, 1  ;;  %v640_v36 = vrot.slane %v11742_v0, 1  ;;  %v643_v26 = vrot.slane %v11761_v44, 1 }
  0x98   :  { %9756 = vmatprep.subr.bf16.mxu0 %v17656_v45  ;;  %17670 = vst [vmem:[#allocation74_spill] sm:$0xff] %v11747_v55  ;;  %310 = vst [vmem:[#allocation2 + $0x289] sm:$0xff] %v11747_v55  ;;  %v12057_v29 = vld [vmem:[#allocation2 + $0x220] sm:$0x3] }
  0x99   :  { %2469 = vmatmul.mubr.f32.gmra.mrb[24].mxu0 %v11643_v16  ;;  %v11733_v53 = vsel %vm594_vm0, %v635_v7, %v636_v10  ;;  %v11750_v7 = vsel %vm197_vm1, %v182_v59, 0.0  ;;  %v11757_v37 = vsel %vm594_vm0, %v636_v10, %v638_v60  ;;  %v2256_v59 = vld [vmem:[#allocation4 + $0x1c0] sm:$0xff]  ;;  %v183_v60 = vld [vmem:[%s16994_s0 + $0x190] sm:$0xff]  ;;  %v184_v10 = vld [vmem:[%s16994_s0 + $0x198] sm:$0xff]  ;;  %v698_v6 = vrot.slane %v12057_v29, 1 }
  0x9a   :  { %2473 = vmatprep.mubr.f32.mxu0 %v11690_v39  ;;  %17669 = vst [vmem:[#allocation73_spill] sm:$0xff] %v11733_v53  ;;  %17671 = vst [vmem:[#allocation75_spill] sm:$0xff] %v11750_v7  ;;  %v9757_v55 = vpack.c.bf16 %v2257_v28, %v2256_v59  ;;  %v11780_v28 = vsel %vm197_vm1, %v183_v60, 0.0  ;;  %v11791_v59 = vsel %vm594_vm0, %v641_v30, %v643_v26  ;;  %v646_v60 = vrot.slane %v11777_v18, 1  ;;  %v185_v26 = vld [vmem:[%s16994_s0 + $0x1a0] sm:$0xff] }
  0x9b   :  { %311 = vst [vmem:[#allocation2 + $0x291] sm:$0xff] %v11750_v7  ;;  %17672 = vst [vmem:[#allocation76_spill] sm:$0xff] %v11757_v37  ;;  %v11766_v7 = vsel %vm594_vm0, %v640_v36, %v641_v30  ;;  %v11783_v36 = vsel %vm197_vm1, %v184_v10, 0.0  ;;  %v186_v30 = vld [vmem:[%s16994_s0 + $0x1a8] sm:$0xff]  ;;  %v11814_v11 = vsel %vm197_vm1, %v185_v26, 0.0 }
  0x9c   :  { %17673 = vst [vmem:[#allocation77_spill] sm:$0xff] %v11766_v7  ;;  %9758 = vmatpush1.bf16.msra.mxu0 %v9757_v55  ;;  %17674 = vst [vmem:[#allocation78_spill] sm:$0xff] %v11780_v28  ;;  %v645_v55 = vrot.slane %v11775_v25, 1  ;;  %v11828_v26 = vld [vmem:[#allocation2 + $0x118] sm:$0x3] }
  0x9d   :  { %2474 = vmatmul.mubr.f32.gmra.mrb[26].mxu0 %v11645_v54  ;;  %17675 = vst [vmem:[#allocation79_spill] sm:$0xff] %v11783_v36  ;;  %312 = vst [vmem:[#allocation2 + $0x2a1] sm:$0xff] %v11780_v28  ;;  %9759 = vmatprep.subr.bf16.mxu0 %v17656_v45  ;;  %v11809_v28 = vld [vmem:[#allocation2 + $0x108] sm:$0xff]  ;;  %v653_v50 = vrot.slane %v11828_v26, 1  ;;  %v12122_v8 = vld [vmem:[#allocation2 + $0x270] sm:$0xff] }
  0x9e   :  { %2478 = vmatprep.mubr.f32.mxu0 %v11699_v1  ;;  %313 = vst [vmem:[#allocation2 + $0x2a9] sm:$0xff] %v11783_v36  ;;  %17676 = vst [vmem:[#allocation80_spill] sm:$0xff] %v11791_v59  ;;  %v11800_v10 = vsel %vm594_vm0, %v645_v55, %v646_v60  ;;  %v648_v36 = vrot.slane %v11795_v17, 1  ;;  %v11817_v55 = vsel %vm197_vm1, %v186_v30, 0.0  ;;  %v650_v57 = vrot.slane %v11809_v28, 1  ;;  %v2258_v30 = vld [vmem:[#allocation4 + $0x1d0] sm:$0xff] }
  0x9f   :  { %17677 = vst [vmem:[#allocation81_spill] sm:$0xff] %v11800_v10  ;;  %17678 = vst [vmem:[#allocation82_spill] sm:$0xff] %v11814_v11  ;;  %v12032_v1 = vld [vmem:[#allocation2 + $0x208] sm:$0x3]  ;;  %v12133_v4 = vld [vmem:[#allocation2 + $0x280] sm:$0x3] }
  0xa0   :  { %17679 = vst [vmem:[#allocation83_spill] sm:$0xff] %v11817_v55  ;;  %314 = vst [vmem:[#allocation2 + $0x2b9] sm:$0xff] %v11814_v11  ;;  %v11824_v58 = vsel %vm594_vm0, %v646_v60, %v648_v36  ;;  %v9760_v11 = vpack.c.bf16 %v2259_v51, %v2258_v30  ;;  %v187_v36 = vld [vmem:[%s16994_s0 + $0x1b0] sm:$0xff]  ;;  %v188_v60 = vld [vmem:[%s16994_s0 + $0x1b8] sm:$0xff]  ;;  %v11858_v30 = vsel %vm594_vm0, %v651_v52, %v653_v50 }
  0xa1   :  { %2479 = vmatmul.mubr.f32.gmra.mrb[28].mxu0 %v11676_v32  ;;  %315 = vst [vmem:[#allocation2 + $0x2c1] sm:$0xff] %v11817_v55  ;;  %17680 = vst [vmem:[#allocation84_spill] sm:$0xff] %v11824_v58  ;;  %v11833_v55 = vsel %vm594_vm0, %v650_v57, %v651_v52  ;;  %v11847_v51 = vsel %vm197_vm1, %v187_v36, 0.0  ;;  %v11850_v57 = vsel %vm197_vm1, %v188_v60, 0.0  ;;  %v656_v36 = vrot.slane %v11844_v43, 1  ;;  %v189_v50 = vld [vmem:[%s16994_s0 + $0x1c0] sm:$0xff] }
  0xa2   :  { %2483 = vmatprep.mubr.f32.mxu0 %v11724_v40  ;;  %17681 = vst [vmem:[#allocation85_spill] sm:$0xff] %v11833_v55  ;;  %9761 = vmatpush1.bf16.msra.mxu0 %v9760_v11  ;;  %17682 = vst [vmem:[#allocation86_spill] sm:$0xff] %v11847_v51  ;;  %v655_v11 = vrot.slane %v11842_v46, 1  ;;  %v190_v52 = vld [vmem:[%s16994_s0 + $0x1c8] sm:$0xff]  ;;  %v11881_v38 = vsel %vm197_vm1, %v189_v50, 0.0 }
  0xa3   :  { %17683 = vst [vmem:[#allocation87_spill] sm:$0xff] %v11850_v57  ;;  %316 = vst [vmem:[#allocation2 + $0x2d1] sm:$0xff] %v11847_v51  ;;  %9762 = vmatprep.subr.bf16.mxu0 %v17656_v45  ;;  %v11876_v51 = vld [vmem:[#allocation2 + $0x138] sm:$0xff]  ;;  %v11895_v50 = vld [vmem:[#allocation2 + $0x148] sm:$0x3] }
  0xa4   :  { %317 = vst [vmem:[#allocation2 + $0x2d9] sm:$0xff] %v11850_v57  ;;  %17684 = vst [vmem:[#allocation88_spill] sm:$0xff] %v11858_v30  ;;  %v11867_v60 = vsel %vm594_vm0, %v655_v11, %v656_v36  ;;  %v658_v57 = vrot.slane %v11862_v42, 1  ;;  %v11884_v11 = vsel %vm197_vm1, %v190_v52, 0.0  ;;  %v660_v34 = vrot.slane %v11876_v51, 1  ;;  %v2260_v52 = vld [vmem:[#allocation4 + $0x1e0] sm:$0xff] }
  0xa5   :  { %2484 = vmatmul.mubr.f32.gmra.mrb[30].mxu0 %v11678_v9  ;;  %17685 = vst [vmem:[#allocation89_spill] sm:$0xff] %v11867_v60  ;;  %17686 = vst [vmem:[#allocation90_spill] sm:$0xff] %v11881_v38  ;;  %v663_v24 = vrot.slane %v11895_v50, 1  ;;  %v12114_v5 = vld [vmem:[#allocation2 + $0x268] sm:$0x3] }
  0xa6   :  { %2488 = vmatprep.mubr.f32.mxu0 %v11733_v53  ;;  %17687 = vst [vmem:[#allocation91_spill] sm:$0xff] %v11884_v11  ;;  %318 = vst [vmem:[#allocation2 + $0x2e9] sm:$0xff] %v11881_v38  ;;  %v11891_v35 = vsel %vm594_vm0, %v656_v36, %v658_v57  ;;  %v9763_v38 = vpack.c.bf16 %v2261_v27, %v2260_v52  ;;  %v191_v57 = vld [vmem:[%s16994_s0 + $0x1d0] sm:$0xff]  ;;  %v192_v36 = vld [vmem:[%s16994_s0 + $0x1d8] sm:$0xff]  ;;  %v713_v49 = vrot.slane %v12114_v5, 1 }
  0xa7   :  { %319 = vst [vmem:[#allocation2 + $0x2f1] sm:$0xff] %v11884_v11  ;;  %17688 = vst [vmem:[#allocation92_spill] sm:$0xff] %v11891_v35  ;;  %v11900_v11 = vsel %vm594_vm0, %v660_v34, %v661_v33  ;;  %v11914_v27 = vsel %vm197_vm1, %v191_v57, 0.0  ;;  %v11917_v34 = vsel %vm197_vm1, %v192_v36, 0.0  ;;  %v11925_v52 = vsel %vm594_vm0, %v661_v33, %v663_v24  ;;  %v193_v24 = vld [vmem:[%s16994_s0 + $0x1e0] sm:$0xff]  ;;  %v194_v33 = vld [vmem:[%s16994_s0 + $0x1e8] sm:$0xff] }
  0xa8   :  { %17689 = vst [vmem:[#allocation93_spill] sm:$0xff] %v11900_v11  ;;  %9764 = vmatpush1.bf16.msra.mxu0 %v9763_v38  ;;  %17690 = vst [vmem:[#allocation94_spill] sm:$0xff] %v11914_v27  ;;  %v665_v38 = vrot.slane %v11909_v23, 1  ;;  %v666_v57 = vrot.slane %v11911_v22, 1  ;;  %v12019_v53 = vld [vmem:[#allocation2 + $0x1f8] sm:$0xff] }
  0xa9   :  { %2489 = vmatmul.mubr.f32.gmra.mrb[32].mxu0 %v11708_v63  ;;  %17691 = vst [vmem:[#allocation95_spill] sm:$0xff] %v11917_v34  ;;  %320 = vst [vmem:[#allocation2 + $0x301] sm:$0xff] %v11914_v27  ;;  %9765 = vmatprep.subr.bf16.mxu0 %v17656_v45  ;;  %v11943_v27 = vld [vmem:[#allocation2 + $0x168] sm:$0xff] }
  0xaa   :  { %2493 = vmatprep.mubr.f32.mxu0 %v11757_v37  ;;  %321 = vst [vmem:[#allocation2 + $0x309] sm:$0xff] %v11917_v34  ;;  %17692 = vst [vmem:[#allocation96_spill] sm:$0xff] %v11925_v52  ;;  %v11934_v36 = vsel %vm594_vm0, %v665_v38, %v666_v57  ;;  %v668_v34 = vrot.slane %v11929_v19, 1  ;;  %v11951_v38 = vsel %vm197_vm1, %v194_v33, 0.0  ;;  %v2262_v33 = vld [vmem:[#allocation4 + $0x1f0] sm:$0xff] }
  0xab   :  { %17693 = vst [vmem:[#allocation97_spill] sm:$0xff] %v11934_v36  ;;  %17695 = vst [vmem:[#allocation99_spill] sm:$0xff] %v11951_v38 }
  0xac   :  { %323 = vst [vmem:[#allocation2 + $0x321] sm:$0xff] %v11951_v38  ;;  %17719 = vst [vmem:[#allocation123_spill] sm:$0xff] %v12114_v5  ;;  %v718_v5 = vrot.slane %v12133_v4, 1 }
  0xad   :  { %2494 = vmatmul.mubr.f32.gmra.mrb[34].mxu0 %v11710_v21  ;;  %17721 = vst [vmem:[#allocation125_spill] sm:$0xff] %v12122_v8  ;;  %17724 = vst [vmem:[#allocation128_spill] sm:$0xff] %v12133_v4 }
  0xae   :  { %2498 = vmatprep.mubr.f32.mxu0 %v11766_v7  ;;  %v12011_v7 = vld [vmem:[#allocation2 + $0x1f0] sm:$0x3] }
  0xaf   :  { %v688_v37 = vrot.slane %v12011_v7, 1 }
  0xb1   :  { %2499 = vmatmul.mubr.f32.gmra.mrb[36].mxu0 %v11742_v0 }
  0xb2   :  { %2503 = vmatprep.mubr.f32.mxu0 %v11791_v59  ;;  %v12002_v59 = vld [vmem:[#allocation2 + $0x1e8] sm:$0xff] }
  0xb5   :  { %2504 = vmatmul.mubr.f32.gmra.mrb[38].mxu0 %v11744_v56 }
  0xb6   :  { %2508 = vmatprep.mubr.f32.mxu0 %v11800_v10  ;;  %v12000_v10 = vld [vmem:[#allocation2 + $0x1e0] sm:$0xff] }
  0xb9   :  { %2509 = vmatmul.mubr.f32.gmra.mrb[40].mxu0 %v11775_v25 }
  0xba   :  { %2513 = vmatprep.mubr.f32.mxu0 %v11824_v58 }
  0xbd   :  { %2514 = vmatmul.mubr.f32.gmra.mrb[42].mxu0 %v11777_v18 }
  0xbe   :  { %2518 = vmatprep.mubr.f32.mxu0 %v11833_v55  ;;  %v2263_v55 = vld [vmem:[#allocation4 + $0x1f8] sm:$0xff] }
  0xc1   :  { %2519 = vmatmul.mubr.f32.gmra.mrb[44].mxu0 %v11809_v28 }
  0xc2   :  { %2523 = vmatprep.mubr.f32.mxu0 %v11858_v30 }
  0xc5   :  { %2524 = vmatmul.mubr.f32.gmra.mrb[46].mxu0 %v11811_v15 }
  0xc6   :  { %2528 = vmatprep.mubr.f32.mxu0 %v11867_v60  ;;  %v670_v60 = vrot.slane %v11943_v27, 1 }
  0xc9   :  { %2529 = vmatmul.mubr.f32.gmra.mrb[48].mxu0 %v11842_v46 }
  0xca   :  { %2533 = vmatprep.mubr.f32.mxu0 %v11891_v35  ;;  %v11948_v35 = vsel %vm197_vm1, %v193_v24, 0.0  ;;  %v11962_v24 = vld [vmem:[#allocation2 + $0x178] sm:$0x3] }
  0xcb   :  { %17694 = vst [vmem:[#allocation98_spill] sm:$0xff] %v11948_v35  ;;  %322 = vst [vmem:[#allocation2 + $0x319] sm:$0xff] %v11948_v35  ;;  %v9766_v35 = vpack.c.bf16 %v2263_v55, %v2262_v33 }
  0xcd   :  { %2534 = vmatmul.mubr.f32.gmra.mrb[50].mxu0 %v11844_v43 }
  0xce   :  { %2538 = vmatprep.mubr.f32.mxu0 %v11900_v11  ;;  %v11945_v11 = vld [vmem:[#allocation2 + $0x170] sm:$0xff]  ;;  %9767 = vmatpush1.bf16.msra.mxu0 %v9766_v35 }
  0xcf   :  { %v671_v30 = vrot.slane %v11945_v11, 1  ;;  %9768 = vmatprep.subr.bf16.mxu0 %v17656_v45  ;;  %v11983_v35 = vld [vmem:[#allocation2 + $0x1d0] sm:$0xff] }
  0xd0   :  { %v681_v33 = vrot.slane %v11983_v35, 1 }
  0xd1   :  { %2539 = vmatmul.mubr.f32.gmra.mrb[52].mxu0 %v11876_v51  ;;  %v11967_v38 = vsel %vm594_vm0, %v670_v60, %v671_v30  ;;  %v11981_v60 = vld [vmem:[#allocation2 + $0x1c8] sm:$0xff] }
  0xd2   :  { %2543 = vmatprep.mubr.f32.mxu0 %v11925_v52  ;;  %v11958_v52 = vsel %vm594_vm0, %v666_v57, %v668_v34  ;;  %17697 = vst [vmem:[#allocation101_spill] sm:$0xff] %v11967_v38  ;;  %v11976_v57 = vld [vmem:[#allocation2 + $0x1c0] sm:$0x3] }
  0xd3   :  { %17696 = vst [vmem:[#allocation100_spill] sm:$0xff] %v11958_v52  ;;  %v678_v55 = vrot.slane %v11976_v57, 1 }
  0xd5   :  { %2544 = vmatmul.mubr.f32.gmra.mrb[54].mxu0 %v11878_v41 }
  0xd6   :  { %2548 = vmatprep.mubr.f32.mxu0 %v11934_v36  ;;  %v673_v36 = vrot.slane %v11962_v24, 1 }
  0xd8   :  { %v11974_v34 = vsel %vm594_vm0, %v671_v30, %v673_v36  ;;  %v679_v30 = vsel %vm594_vm0, %v11214_v2, %v678_v55  ;;  %v680_v36 = vrot.slane %v11981_v60, 1  ;;  %v685_v55 = vrot.slane %v12000_v10, 1 }
  0xd9   :  { %2549 = vmatmul.mubr.f32.gmra.mrb[56].mxu0 %v11909_v23  ;;  %17698 = vst [vmem:[#allocation102_spill] sm:$0xff] %v11974_v34 }
  0xda   :  { %2553 = vmatprep.mubr.f32.mxu0 %v11958_v52  ;;  %v11997_v52 = vsel %vm594_vm0, %v680_v36, %v681_v33 }
  0xdb   :  { %17699 = vst [vmem:[#allocation103_spill] sm:$0xff] %v11997_v52 }
  0xdd   :  { %2554 = vmatmul.mubr.f32.gmra.mrb[58].mxu0 %v11911_v22 }
  0xde   :  { %2558 = vmatprep.mubr.f32.mxu0 %v11967_v38  ;;  %v11991_v38 = vld [vmem:[#allocation2 + $0x1d8] sm:$0x3] }
  0xdf   :  { %v683_v58 = vrot.slane %v11991_v38, 1 }
  0xe1   :  { %2559 = vmatmul.mubr.f32.gmra.mrb[60].mxu0 %v11943_v27 }
  0xe2   :  { %2563 = vmatprep.mubr.f32.mxu0 %v11974_v34  ;;  %v11993_v34 = vld [vmem:[#allocation2] sm:$0xff] }
  0xe5   :  { %2564 = vmatmul.mubr.f32.gmra.mrb[62].mxu0 %v11945_v11 }
  0xe6   :  { %2568 = vmatprep.mubr.f32.mxu0 %v11214_v2  ;;  %v12007_v2 = vsel %vm594_vm0, %v681_v33, %v683_v58  ;;  %v894_v58 = vrot.slane %v11538_v61, 2  ;;  %v17106_v33 = vrot.slane %v11540_v62, 2  ;;  %v693_v61 = vrot.slane %v12032_v1, 1 }
  0xe7   :  { %17700 = vst [vmem:[#allocation104_spill] sm:$0xff] %v12007_v2 }
  0xe8   :  { %v12037_v39 = vsel %vm883_vm2, %v894_v58, %v17106_v33 }
  0xe9   :  { %2569 = vmatmul.mubr.f32.gmra.mrb[64].mxu0 %v11993_v34  ;;  %17703 = vst [vmem:[#allocation107_spill] sm:$0xff] %v12037_v39  ;;  %9448 = vmatprep.mubr.f32.mxu1 %v12037_v39 }
  0xea   :  { %2573 = vmatprep.mubr.f32.mxu0 %v679_v30  ;;  %v686_v30 = vrot.slane %v12002_v59, 1 }
  0xec   :  { %v12016_v36 = vsel %vm594_vm0, %v685_v55, %v686_v30  ;;  %v12028_v40 = vsel %vm594_vm0, %v686_v30, %v688_v37  ;;  %v690_v55 = vrot.slane %v12019_v53, 1  ;;  %v12046_v30 = vld [vmem:[#allocation2 + $0x210] sm:$0xff] }
  0xed   :  { %2574 = vmatmul.mubr.f32.gmra.mrb[66].mxu0 %v11993_v34  ;;  %17701 = vst [vmem:[#allocation105_spill] sm:$0xff] %v12016_v36  ;;  %17702 = vst [vmem:[#allocation106_spill] sm:$0xff] %v12028_v40  ;;  %v695_v33 = vrot.slane %v12046_v30, 1 }
  0xee   :  { %2578 = vmatprep.mubr.f32.mxu0 %v11997_v52  ;;  %v12021_v52 = vld [vmem:[#allocation2 + $0x200] sm:$0xff] }
  0xf1   :  { %2579 = vmatmul.mubr.f32.gmra.mrb[68].mxu0 %v11981_v60 }
  0xf2   :  { %2583 = vmatprep.mubr.f32.mxu0 %v12007_v2  ;;  %v691_v2 = vrot.slane %v12021_v52, 1 }
  0xf4   :  { %v12043_v37 = vsel %vm594_vm0, %v690_v55, %v691_v2  ;;  %v12053_v58 = vsel %vm594_vm0, %v691_v2, %v693_v61  ;;  %v700_v61 = vrot.slane %v12065_v14, 1 }
  0xf5   :  { %2584 = vmatmul.mubr.f32.gmra.mrb[70].mxu0 %v11983_v35  ;;  %17704 = vst [vmem:[#allocation108_spill] sm:$0xff] %v12043_v37  ;;  %17705 = vst [vmem:[#allocation109_spill] sm:$0xff] %v12053_v58 }
  0xf6   :  { %2588 = vmatprep.mubr.f32.mxu0 %v12016_v36  ;;  %v12048_v36 = vld [vmem:[#allocation2 + $0x218] sm:$0xff] }
  0xf9   :  { %2589 = vmatmul.mubr.f32.gmra.mrb[72].mxu0 %v12000_v10 }
  0xfa   :  { %2593 = vmatprep.mubr.f32.mxu0 %v12028_v40  ;;  %v696_v40 = vrot.slane %v12048_v36, 1 }
  0xfc   :  { %v12062_v55 = vsel %vm594_vm0, %v695_v33, %v696_v40  ;;  %v12072_v2 = vsel %vm594_vm0, %v696_v40, %v698_v6  ;;  %v705_v40 = vrot.slane %v12084_v47, 1 }
  0xfd   :  { %2594 = vmatmul.mubr.f32.gmra.mrb[74].mxu0 %v12002_v59  ;;  %17706 = vst [vmem:[#allocation110_spill] sm:$0xff] %v12062_v55  ;;  %17708 = vst [vmem:[#allocation112_spill] sm:$0xff] %v12072_v2 }
  0xfe   :  { %2598 = vmatprep.mubr.f32.mxu0 %v12043_v37  ;;  %v12067_v37 = vld [vmem:[#allocation2 + $0x230] sm:$0xff] }
  0xff   :  { %17707 = vst [vmem:[#allocation111_spill] sm:$0xff] %v12067_v37 }
 0x101   :  { %2599 = vmatmul.mubr.f32.gmra.mrb[76].mxu0 %v12019_v53 }
 0x102   :  { %2603 = vmatprep.mubr.f32.mxu0 %v12053_v58  ;;  %v701_v58 = vrot.slane %v12067_v37, 1 }
 0x104   :  { %v12081_v33 = vsel %vm594_vm0, %v700_v61, %v701_v58  ;;  %v12091_v6 = vsel %vm594_vm0, %v701_v58, %v703_v31  ;;  %v710_v58 = vrot.slane %v12103_v13, 1 }
 0x105   :  { %2604 = vmatmul.mubr.f32.gmra.mrb[78].mxu0 %v12021_v52  ;;  %17710 = vst [vmem:[#allocation114_spill] sm:$0xff] %v12081_v33  ;;  %17713 = vst [vmem:[#allocation117_spill] sm:$0xff] %v12091_v6 }
 0x106   :  { %2608 = vmatprep.mubr.f32.mxu0 %v12062_v55  ;;  %v12086_v55 = vld [vmem:[#allocation2 + $0x248] sm:$0xff] }
 0x107   :  { %17712 = vst [vmem:[#allocation116_spill] sm:$0xff] %v12086_v55 }
 0x109   :  { %2609 = vmatmul.mubr.f32.gmra.mrb[80].mxu0 %v12046_v30 }
 0x10a   :  { %2613 = vmatprep.mubr.f32.mxu0 %v12072_v2  ;;  %v706_v2 = vrot.slane %v12086_v55, 1 }
 0x10c   :  { %v12100_v61 = vsel %vm594_vm0, %v705_v40, %v706_v2  ;;  %v12110_v31 = vsel %vm594_vm0, %v706_v2, %v708_v48  ;;  %v715_v2 = vrot.slane %v12122_v8, 1 }
 0x10d   :  { %2614 = vmatmul.mubr.f32.gmra.mrb[82].mxu0 %v12048_v36  ;;  %17715 = vst [vmem:[#allocation119_spill] sm:$0xff] %v12100_v61  ;;  %17718 = vst [vmem:[#allocation122_spill] sm:$0xff] %v12110_v31 }
 0x10e   :  { %2618 = vmatprep.mubr.f32.mxu0 %v12081_v33  ;;  %v12105_v33 = vld [vmem:[#allocation2 + $0x260] sm:$0xff] }
 0x10f   :  { %17717 = vst [vmem:[#allocation121_spill] sm:$0xff] %v12105_v33 }
 0x111   :  { %2619 = vmatmul.mubr.f32.gmra.mrb[84].mxu0 %v12065_v14 }
 0x112   :  { %2623 = vmatprep.mubr.f32.mxu0 %v12091_v6  ;;  %v711_v6 = vrot.slane %v12105_v33, 1 }
 0x114   :  { %v12119_v40 = vsel %vm594_vm0, %v710_v58, %v711_v6  ;;  %v12129_v48 = vsel %vm594_vm0, %v711_v6, %v713_v49 }
 0x115   :  { %2624 = vmatmul.mubr.f32.gmra.mrb[86].mxu0 %v12067_v37  ;;  %17720 = vst [vmem:[#allocation124_spill] sm:$0xff] %v12119_v40  ;;  %17723 = vst [vmem:[#allocation127_spill] sm:$0xff] %v12129_v48 }
 0x116   :  { %2628 = vmatprep.mubr.f32.mxu0 %v12100_v61  ;;  %v12124_v61 = vld [vmem:[#allocation2 + $0x278] sm:$0xff] }
 0x117   :  { %17722 = vst [vmem:[#allocation126_spill] sm:$0xff] %v12124_v61 }
 0x119   :  { %2629 = vmatmul.mubr.f32.gmra.mrb[88].mxu0 %v12084_v47  ;;  %v2269_v47 = vld [vmem:[#allocation4 + $0x228] sm:$0xff] }
 0x11a   :  { %2633 = vmatprep.mubr.f32.mxu0 %v12110_v31  ;;  %v716_v31 = vrot.slane %v12124_v61, 1 }
 0x11c   :  { %v12138_v58 = vsel %vm594_vm0, %v715_v2, %v716_v31  ;;  %v12148_v49 = vsel %vm594_vm0, %v716_v31, %v718_v5 }
 0x11d   :  { %2634 = vmatmul.mubr.f32.gmra.mrb[90].mxu0 %v12086_v55  ;;  %17725 = vst [vmem:[#allocation129_spill] sm:$0xff] %v12138_v58  ;;  %v12141_v55 = vld [vmem:[#allocation2 + $0x288] sm:$0xff]  ;;  %17728 = vst [vmem:[#allocation132_spill] sm:$0xff] %v12148_v49 }
 0x11e   :  { %2638 = vmatprep.mubr.f32.mxu0 %v12119_v40  ;;  %17726 = vst [vmem:[#allocation130_spill] sm:$0xff] %v12141_v55  ;;  %v12143_v40 = vld [vmem:[#allocation2 + $0x290] sm:$0xff]  ;;  %v720_v6 = vrot.slane %v12141_v55, 1 }
 0x11f   :  { %17727 = vst [vmem:[#allocation131_spill] sm:$0xff] %v12143_v40 }
 0x121   :  { %2639 = vmatmul.mubr.f32.gmra.mrb[92].mxu0 %v12103_v13  ;;  %v12152_v13 = vld [vmem:[#allocation2 + $0x298] sm:$0x3] }
 0x122   :  { %2643 = vmatprep.mubr.f32.mxu0 %v12129_v48  ;;  %v721_v48 = vrot.slane %v12143_v40, 1  ;;  %17729 = vst [vmem:[#allocation133_spill] sm:$0xff] %v12152_v13  ;;  %v723_v4 = vrot.slane %v12152_v13, 1 }
 0x124   :  { %v12157_v2 = vsel %vm594_vm0, %v720_v6, %v721_v48  ;;  %v12167_v5 = vsel %vm594_vm0, %v721_v48, %v723_v4 }
 0x125   :  { %2644 = vmatmul.mubr.f32.gmra.mrb[94].mxu0 %v12105_v33  ;;  %17730 = vst [vmem:[#allocation134_spill] sm:$0xff] %v12157_v2  ;;  %v12160_v33 = vld [vmem:[#allocation2 + $0x2a0] sm:$0xff]  ;;  %17733 = vst [vmem:[#allocation137_spill] sm:$0xff] %v12167_v5 }
 0x126   :  { %2648 = vmatprep.mubr.f32.mxu0 %v12138_v58  ;;  %17731 = vst [vmem:[#allocation135_spill] sm:$0xff] %v12160_v33  ;;  %v12162_v58 = vld [vmem:[#allocation2 + $0x2a8] sm:$0xff]  ;;  %v725_v31 = vrot.slane %v12160_v33, 1 }
 0x127   :  { %17732 = vst [vmem:[#allocation136_spill] sm:$0xff] %v12162_v58 }
 0x129   :  { %2649 = vmatmul.mubr.f32.gmra.mrb[96].mxu0 %v12122_v8  ;;  %v12171_v8 = vld [vmem:[#allocation2 + $0x2b0] sm:$0x3] }
 0x12a   :  { %2653 = vmatprep.mubr.f32.mxu0 %v12148_v49  ;;  %v726_v49 = vrot.slane %v12162_v58, 1  ;;  %17734 = vst [vmem:[#allocation138_spill] sm:$0xff] %v12171_v8  ;;  %v728_v13 = vrot.slane %v12171_v8, 1 }
 0x12c   :  { %v12176_v6 = vsel %vm594_vm0, %v725_v31, %v726_v49  ;;  %v12186_v4 = vsel %vm594_vm0, %v726_v49, %v728_v13 }
 0x12d   :  { %2654 = vmatmul.mubr.f32.gmra.mrb[98].mxu0 %v12124_v61  ;;  %17735 = vst [vmem:[#allocation139_spill] sm:$0xff] %v12176_v6  ;;  %v12179_v61 = vld [vmem:[#allocation2 + $0x2b8] sm:$0xff]  ;;  %17738 = vst [vmem:[#allocation142_spill] sm:$0xff] %v12186_v4 }
 0x12e   :  { %2658 = vmatprep.mubr.f32.mxu0 %v12157_v2  ;;  %17736 = vst [vmem:[#allocation140_spill] sm:$0xff] %v12179_v61  ;;  %v12181_v2 = vld [vmem:[#allocation2 + $0x2c0] sm:$0xff]  ;;  %v730_v48 = vrot.slane %v12179_v61, 1 }
 0x12f   :  { %17737 = vst [vmem:[#allocation141_spill] sm:$0xff] %v12181_v2 }
 0x131   :  { %2659 = vmatmul.mubr.f32.gmra.mrb[100].mxu0 %v12141_v55  ;;  %v12190_v55 = vld [vmem:[#allocation2 + $0x2c8] sm:$0x3] }
 0x132   :  { %2663 = vmatprep.mubr.f32.mxu0 %v12167_v5  ;;  %v731_v5 = vrot.slane %v12181_v2, 1  ;;  %17739 = vst [vmem:[#allocation143_spill] sm:$0xff] %v12190_v55  ;;  %v733_v8 = vrot.slane %v12190_v55, 1 }
 0x134   :  { %v12195_v31 = vsel %vm594_vm0, %v730_v48, %v731_v5  ;;  %v12205_v13 = vsel %vm594_vm0, %v731_v5, %v733_v8 }
 0x135   :  { %2664 = vmatmul.mubr.f32.gmra.mrb[102].mxu0 %v12143_v40  ;;  %17740 = vst [vmem:[#allocation144_spill] sm:$0xff] %v12195_v31  ;;  %v12198_v40 = vld [vmem:[#allocation2 + $0x2d0] sm:$0xff]  ;;  %17743 = vst [vmem:[#allocation147_spill] sm:$0xff] %v12205_v13 }
 0x136   :  { %2668 = vmatprep.mubr.f32.mxu0 %v12176_v6  ;;  %17741 = vst [vmem:[#allocation145_spill] sm:$0xff] %v12198_v40  ;;  %v12200_v6 = vld [vmem:[#allocation2 + $0x2d8] sm:$0xff]  ;;  %v735_v49 = vrot.slane %v12198_v40, 1 }
 0x137   :  { %17742 = vst [vmem:[#allocation146_spill] sm:$0xff] %v12200_v6 }
 0x139   :  { %2669 = vmatmul.mubr.f32.gmra.mrb[104].mxu0 %v12160_v33  ;;  %v12209_v33 = vld [vmem:[#allocation2 + $0x2e0] sm:$0x3] }
 0x13a   :  { %2673 = vmatprep.mubr.f32.mxu0 %v12186_v4  ;;  %v736_v4 = vrot.slane %v12200_v6, 1  ;;  %17744 = vst [vmem:[#allocation148_spill] sm:$0xff] %v12209_v33  ;;  %v738_v55 = vrot.slane %v12209_v33, 1 }
 0x13c   :  { %v12214_v48 = vsel %vm594_vm0, %v735_v49, %v736_v4  ;;  %v12224_v8 = vsel %vm594_vm0, %v736_v4, %v738_v55 }
 0x13d   :  { %2674 = vmatmul.mubr.f32.gmra.mrb[106].mxu0 %v12162_v58  ;;  %17745 = vst [vmem:[#allocation149_spill] sm:$0xff] %v12214_v48  ;;  %v12217_v58 = vld [vmem:[#allocation2 + $0x2e8] sm:$0xff]  ;;  %17748 = vst [vmem:[#allocation152_spill] sm:$0xff] %v12224_v8 }
 0x13e   :  { %2678 = vmatprep.mubr.f32.mxu0 %v12195_v31  ;;  %17746 = vst [vmem:[#allocation150_spill] sm:$0xff] %v12217_v58  ;;  %v12219_v31 = vld [vmem:[#allocation2 + $0x2f0] sm:$0xff]  ;;  %v740_v5 = vrot.slane %v12217_v58, 1 }
 0x13f   :  { %17747 = vst [vmem:[#allocation151_spill] sm:$0xff] %v12219_v31 }
 0x141   :  { %2679 = vmatmul.mubr.f32.gmra.mrb[108].mxu0 %v12179_v61  ;;  %v12228_v61 = vld [vmem:[#allocation2 + $0x2f8] sm:$0x3] }
 0x142   :  { %2683 = vmatprep.mubr.f32.mxu0 %v12205_v13  ;;  %v741_v13 = vrot.slane %v12219_v31, 1  ;;  %17749 = vst [vmem:[#allocation153_spill] sm:$0xff] %v12228_v61  ;;  %v743_v33 = vrot.slane %v12228_v61, 1 }
 0x144   :  { %v12233_v49 = vsel %vm594_vm0, %v740_v5, %v741_v13  ;;  %v12243_v55 = vsel %vm594_vm0, %v741_v13, %v743_v33  ;;  %v163_v33 = vld [vmem:[%s16994_s0 + $0xf0] sm:$0xff] }
 0x145   :  { %2684 = vmatmul.mubr.f32.gmra.mrb[110].mxu0 %v12181_v2  ;;  %17750 = vst [vmem:[#allocation154_spill] sm:$0xff] %v12233_v49  ;;  %v12236_v2 = vld [vmem:[#allocation2 + $0x300] sm:$0xff]  ;;  %17753 = vst [vmem:[#allocation157_spill] sm:$0xff] %v12243_v55 }
 0x146   :  { %2688 = vmatprep.mubr.f32.mxu0 %v12214_v48  ;;  %17751 = vst [vmem:[#allocation155_spill] sm:$0xff] %v12236_v2  ;;  %v12238_v48 = vld [vmem:[#allocation2 + $0x308] sm:$0xff]  ;;  %v745_v4 = vrot.slane %v12236_v2, 1 }
 0x147   :  { %17752 = vst [vmem:[#allocation156_spill] sm:$0xff] %v12238_v48 }
 0x149   :  { %2689 = vmatmul.mubr.f32.gmra.mrb[112].mxu0 %v12198_v40  ;;  %v12247_v40 = vld [vmem:[#allocation2 + $0x310] sm:$0x3] }
 0x14a   :  { %2693 = vmatprep.mubr.f32.mxu0 %v12224_v8  ;;  %v746_v8 = vrot.slane %v12238_v48, 1  ;;  %17754 = vst [vmem:[#allocation158_spill] sm:$0xff] %v12247_v40  ;;  %v748_v61 = vrot.slane %v12247_v40, 1  ;;  %v12270_v40 = vsel %vm197_vm1, %v163_v33, 0.0 }
 0x14b   :  { %17759 = vst [vmem:[#allocation163_spill] sm:$0xff] %v12270_v40  ;;  %292 = vst [vmem:[#allocation2 + $0x181] sm:$0xff] %v12270_v40 }
 0x14c   :  { %v12252_v5 = vsel %vm594_vm0, %v745_v4, %v746_v8  ;;  %v12265_v13 = vsel %vm594_vm0, %v746_v8, %v748_v61  ;;  %v164_v61 = vld [vmem:[%s16994_s0 + $0xf8] sm:$0xff] }
 0x14d   :  { %2694 = vmatmul.mubr.f32.gmra.mrb[114].mxu0 %v12200_v6  ;;  %17755 = vst [vmem:[#allocation159_spill] sm:$0xff] %v12252_v5  ;;  %v12255_v6 = vld [vmem:[#allocation2 + $0x318] sm:$0xff]  ;;  %17758 = vst [vmem:[#allocation162_spill] sm:$0xff] %v12265_v13  ;;  %v12285_v33 = vsel %vm197_vm1, %v164_v61, 0.0 }
 0x14e   :  { %2698 = vmatprep.mubr.f32.mxu0 %v12233_v49  ;;  %17756 = vst [vmem:[#allocation160_spill] sm:$0xff] %v12255_v6  ;;  %v12257_v49 = vld [vmem:[#allocation2 + $0x320] sm:$0xff]  ;;  %v750_v4 = vrot.slane %v12255_v6, 1  ;;  %17762 = vst [vmem:[#allocation166_spill] sm:$0xff] %v12285_v33  ;;  %v10916_v61 = vld [vmem:[#allocation2 + $0x18] sm:$0xff] }
 0x14f   :  { %17757 = vst [vmem:[#allocation161_spill] sm:$0xff] %v12257_v49  ;;  %293 = vst [vmem:[#allocation2 + $0x189] sm:$0xff] %v12285_v33 }
 0x151   :  { %2699 = vmatmul.mubr.f32.gmra.mrb[116].mxu0 %v12217_v58  ;;  %v12272_v58 = vld [vmem:[#allocation2 + $0x328] sm:$0x3] }
 0x152   :  { %2703 = vmatprep.mubr.f32.mxu0 %v12243_v55  ;;  %v751_v55 = vrot.slane %v12257_v49, 1  ;;  %17760 = vst [vmem:[#allocation164_spill] sm:$0xff] %v12272_v58 }
 0x154   :  { %v12281_v8 = vsel %vm594_vm0, %v750_v4, %v751_v55  ;;  %v2264_v4 = vld [vmem:[#allocation4 + $0x200] sm:$0xff] }
 0x155   :  { %2704 = vmatmul.mubr.f32.gmra.mrb[118].mxu0 %v12219_v31  ;;  %17761 = vst [vmem:[#allocation165_spill] sm:$0xff] %v12281_v8  ;;  %v2267_v31 = vld [vmem:[#allocation4 + $0x218] sm:$0xff] }
 0x156   :  { %2708 = vmatprep.mubr.f32.mxu0 %v12252_v5  ;;  %v753_v5 = vrot.slane %v12272_v58, 1  ;;  %v2265_v58 = vld [vmem:[#allocation4 + $0x208] sm:$0xff] }
 0x157   :  { %v9769_v33 = vpack.c.bf16 %v2265_v58, %v2264_v4  ;;  %v10919_v58 = vld [vmem:[#allocation2 + $0x30] sm:$0xff]  ;;  %v10920_v4 = vld [vmem:[#allocation2 + $0x28] sm:$0x3] }
 0x158   :  { %v12291_v40 = vsel %vm594_vm0, %v751_v55, %v753_v5  ;;  %v10918_v55 = vld [vmem:[#allocation2 + $0x20] sm:$0xff]  ;;  %v889_v5 = vrot.slane %v10916_v61, 2 }
 0x159   :  { %2709 = vmatmul.mubr.f32.gmra.mrb[120].mxu0 %v12236_v2  ;;  %17763 = vst [vmem:[#allocation167_spill] sm:$0xff] %v12291_v40 }
 0x15a   :  { %2713 = vmatprep.mubr.f32.mxu0 %v12265_v13  ;;  %v12295_v13 = vrot.slane %v11993_v34, 2 }
 0x15d   :  { %2714 = vmatmul.mubr.f32.gmra.mrb[122].mxu0 %v12238_v48  ;;  %v10917_v48 = vld [vmem:[#allocation2 + $0x10] sm:$0x3] }
 0x15e   :  { %2718 = vmatprep.mubr.f32.mxu0 %v12281_v8  ;;  %v887_v2 = vrot.slane %v10917_v48, 2  ;;  %v2266_v8 = vld [vmem:[#allocation4 + $0x210] sm:$0xff] }
 0x160   :  { %v888_v34 = vsel %vm883_vm2, %v12295_v13, %v887_v2  ;;  %v2270_v2 = vld [vmem:[#allocation4 + $0x230] sm:$0xff] }
 0x161   :  { %2719 = vmatmul.mubr.f32.gmra.mrb[124].mxu0 %v12255_v6  ;;  %v9772_v6 = vpack.c.bf16 %v2267_v31, %v2266_v8  ;;  %v10921_v31 = vld [vmem:[#allocation2 + $0x38] sm:$0xff] }
 0x162   :  { %2723 = vmatprep.mubr.f32.mxu0 %v12291_v40  ;;  %v890_v40 = vrot.slane %v10918_v55, 2 }
 0x164   :  { %v12304_v48 = vsel %vm883_vm2, %v889_v5, %v890_v40  ;;  %v2273_v5 = vld [vmem:[#allocation4 + $0x248] sm:$0xff] }
 0x165   :  { %2724 = vmatmul.mubr.f32.gmra.mrb[126].mxu0 %v12257_v49  ;;  %v2268_v49 = vld [vmem:[#allocation4 + $0x220] sm:$0xff] }
 0x166   :  { %2793 = vmatprep.mubr.f32.mxu0 %v10916_v61  ;;  %v9775_v37 = vpack.c.bf16 %v2269_v47, %v2268_v49  ;;  %v2271_v61 = vld [vmem:[#allocation4 + $0x238] sm:$0xff]  ;;  %v10922_v47 = vld [vmem:[#allocation2 + $0x48] sm:$0xff] }
 0x169   :  { %2794 = vmatmul.mubr.f32.vlgmr.msra.gmra.mrb[0].mxu0 %v12295_v13 }
 0x16a   :  { %9770 = vmatpush1.bf16.msra.mxu0 %v9769_v33  ;;  %2798 = vmatprep.mubr.f32.mxu0 %v10918_v55  ;;  %v892_v33 = vrot.slane %v10920_v4, 2  ;;  %v9778_v55 = vpack.c.bf16 %v2271_v61, %v2270_v2  ;;  %v2274_v4 = vld [vmem:[#allocation4 + $0x250] sm:$0xff]  ;;  %v899_v2 = vrot.slane %v10922_v47, 2 }
 0x16b   :  { %9771 = vmatprep.subr.bf16.mxu0 %v17656_v45 }
 0x16c   :  { %v12309_v8 = vsel %vm883_vm2, %v890_v40, %v892_v33  ;;  %v17765_v40 = vrot.slane %v11540_v62, 2 }
 0x16d   :  { %2799 = vmatmul.mubr.f32.gmra.mrb[2].mxu0 %v888_v34  ;;  %17764 = vst [vmem:[#allocation168_spill] sm:$0xff] %v12309_v8  ;;  %v2272_v34 = vld [vmem:[#allocation4 + $0x240] sm:$0xff] }
 0x16e   :  { %2803 = vmatprep.mubr.f32.mxu0 %v10919_v58  ;;  %9773 = vmatpush1.bf16.msra.mxu0 %v9772_v6  ;;  %v10923_v6 = vld [vmem:[#allocation2 + $0x40] sm:$0x3]  ;;  %v9781_v58 = vpack.c.bf16 %v2273_v5, %v2272_v34  ;;  %v2277_v34 = vld [vmem:[#allocation4 + $0x268] sm:$0xff] }
 0x16f   :  { %9774 = vmatprep.subr.bf16.mxu0 %v17656_v45  ;;  %v897_v49 = vrot.slane %v10923_v6, 2  ;;  %v10925_v5 = vld [vmem:[#allocation2 + $0x60] sm:$0xff] }
 0x171   :  { %2804 = vmatmul.mubr.f32.gmra.mrb[4].mxu0 %v12304_v48  ;;  %v12318_v33 = vsel %vm883_vm2, %v17765_v40, %v897_v49 }
 0x172   :  { %2808 = vmatprep.mubr.f32.mxu0 %v10921_v31  ;;  %9776 = vmatpush1.bf16.msra.mxu0 %v9775_v37  ;;  %v2275_v31 = vld [vmem:[#allocation4 + $0x258] sm:$0xff]  ;;  %v10924_v37 = vld [vmem:[#allocation2 + $0x50] sm:$0xff]  ;;  %17766 = vst [vmem:[#allocation169_spill] sm:$0xff] %v12318_v33 }
 0x173   :  { %9777 = vmatprep.subr.bf16.mxu0 %v17656_v45  ;;  %v900_v61 = vrot.slane %v10924_v37, 2 }
 0x175   :  { %2809 = vmatmul.mubr.f32.gmra.mrb[6].mxu0 %v12309_v8  ;;  %v9784_v8 = vpack.c.bf16 %v2275_v31, %v2274_v4  ;;  %v12323_v6 = vsel %vm883_vm2, %v899_v2, %v900_v61  ;;  %v10927_v4 = vld [vmem:[#allocation2 + $0x68] sm:$0xff] }
 0x176   :  { %2813 = vmatprep.mubr.f32.mxu0 %v10922_v47  ;;  %9779 = vmatpush1.bf16.msra.mxu0 %v9778_v55  ;;  %v2276_v55 = vld [vmem:[#allocation4 + $0x260] sm:$0xff]  ;;  %17767 = vst [vmem:[#allocation170_spill] sm:$0xff] %v12323_v6  ;;  %v2278_v47 = vld [vmem:[#allocation4 + $0x270] sm:$0xff]  ;;  %v905_v40 = vrot.slane %v10927_v4, 2 }
 0x177   :  { %9780 = vmatprep.subr.bf16.mxu0 %v17656_v45  ;;  %v9787_v49 = vpack.c.bf16 %v2277_v34, %v2276_v55  ;;  %v10928_v55 = vld [vmem:[#allocation2 + $0x78] sm:$0xff] }
 0x179   :  { %2814 = vmatmul.mubr.f32.gmra.mrb[8].mxu0 %v12037_v39  ;;  %v10926_v39 = vld [vmem:[#allocation2 + $0x58] sm:$0x3] }
 0x17a   :  { %2818 = vmatprep.mubr.f32.mxu0 %v10924_v37  ;;  %9782 = vmatpush1.bf16.msra.mxu0 %v9781_v58  ;;  %v902_v62 = vrot.slane %v10926_v39, 2  ;;  %v2279_v58 = vld [vmem:[#allocation4 + $0x278] sm:$0xff]  ;;  %v904_v37 = vrot.slane %v10925_v5, 2  ;;  %v2280_v39 = vld [vmem:[#allocation4 + $0x280] sm:$0xff] }
 0x17b   :  { %9783 = vmatprep.subr.bf16.mxu0 %v17656_v45  ;;  %v9790_v2 = vpack.c.bf16 %v2279_v58, %v2278_v47  ;;  %v909_v58 = vrot.slane %v10928_v55, 2 }
 0x17c   :  { %v12328_v31 = vsel %vm883_vm2, %v900_v61, %v902_v62  ;;  %v12333_v34 = vsel %vm883_vm2, %v904_v37, %v905_v40  ;;  %v2283_v62 = vld [vmem:[#allocation4 + $0x298] sm:$0xff] }
 0x17d   :  { %2819 = vmatmul.mubr.f32.gmra.mrb[10].mxu0 %v12318_v33  ;;  %17768 = vst [vmem:[#allocation171_spill] sm:$0xff] %v12333_v34 }
 0x17e   :  { %2823 = vmatprep.mubr.f32.mxu0 %v10925_v5  ;;  %9785 = vmatpush1.bf16.msra.mxu0 %v9784_v8  ;;  %v2281_v8 = vld [vmem:[#allocation4 + $0x288] sm:$0xff]  ;;  %v2282_v5 = vld [vmem:[#allocation4 + $0x290] sm:$0xff] }
 0x17f   :  { %9786 = vmatprep.subr.bf16.mxu0 %v17656_v45  ;;  %v9793_v61 = vpack.c.bf16 %v2281_v8, %v2280_v39  ;;  %v9796_v37 = vpack.c.bf16 %v2283_v62, %v2282_v5  ;;  %v10931_v8 = vld [vmem:[#allocation2 + $0x88] sm:$0x3]  ;;  %v10933_v5 = vld [vmem:[#allocation2 + $0x98] sm:$0xff] }
 0x181   :  { %2824 = vmatmul.mubr.f32.gmra.mrb[12].mxu0 %v12323_v6  ;;  %v10929_v6 = vld [vmem:[#allocation2 + $0x70] sm:$0x3] }
 0x182   :  { %2828 = vmatprep.mubr.f32.mxu0 %v10927_v4  ;;  %9788 = vmatpush1.bf16.msra.mxu0 %v9787_v49  ;;  %v907_v33 = vrot.slane %v10929_v6, 2  ;;  %v10930_v49 = vld [vmem:[#allocation2 + $0x80] sm:$0xff] }
 0x183   :  { %9789 = vmatprep.subr.bf16.mxu0 %v17656_v45  ;;  %v910_v4 = vrot.slane %v10930_v49, 2  ;;  %v2284_v6 = vld [vmem:[#allocation4 + $0x2a0] sm:$0xff] }
 0x184   :  { %v12338_v47 = vsel %vm883_vm2, %v905_v40, %v907_v33 }
 0x185   :  { %2829 = vmatmul.mubr.f32.gmra.mrb[14].mxu0 %v12328_v31  ;;  %v12344_v39 = vsel %vm883_vm2, %v909_v58, %v910_v4 }
 0x186   :  { %2833 = vmatprep.mubr.f32.mxu0 %v10928_v55  ;;  %9791 = vmatpush1.bf16.msra.mxu0 %v9790_v2  ;;  %v2285_v2 = vld [vmem:[#allocation4 + $0x2a8] sm:$0xff]  ;;  %v10932_v55 = vld [vmem:[#allocation2 + $0x90] sm:$0xff] }
 0x187   :  { %9792 = vmatprep.subr.bf16.mxu0 %v17656_v45  ;;  %v9799_v33 = vpack.c.bf16 %v2285_v2, %v2284_v6  ;;  %v922_v2 = vrot.slane %v11694_v3, 2  ;;  %v927_v3 = vrot.slane %v11728_v20, 2 }
 0x189   :  { %2834 = vmatmul.mubr.f32.gmra.mrb[16].mxu0 %v12333_v34  ;;  %v912_v34 = vrot.slane %v10931_v8, 2  ;;  %v925_v8 = vrot.slane %v11710_v21, 2 }
 0x18a   :  { %2838 = vmatprep.mubr.f32.mxu0 %v10930_v49  ;;  %9794 = vmatpush1.bf16.msra.mxu0 %v9793_v61  ;;  %v914_v61 = vrot.slane %v10932_v55, 2  ;;  %v917_v49 = vrot.slane %v11662_v12, 2  ;;  %v2288_v55 = vld [vmem:[#allocation4 + $0x2c0] sm:$0xff] }
 0x18b   :  { %9795 = vmatprep.subr.bf16.mxu0 %v17656_v45  ;;  %v12350_v40 = vsel %vm883_vm2, %v910_v4, %v912_v34  ;;  %v2287_v34 = vld [vmem:[#allocation4 + $0x2b8] sm:$0xff]  ;;  %v919_v4 = vrot.slane %v11676_v32, 2 }
 0x18d   :  { %2839 = vmatmul.mubr.f32.gmra.mrb[18].mxu0 %v12338_v47 }
 0x18e   :  { %2843 = vmatprep.mubr.f32.mxu0 %v11643_v16  ;;  %9797 = vmatpush1.bf16.msra.mxu0 %v9796_v37  ;;  %v915_v16 = vrot.slane %v10933_v5, 2  ;;  %v920_v37 = vrot.slane %v11678_v9, 2  ;;  %v12389_v5 = vsel %vm883_vm2, %v925_v8, %v927_v3 }
 0x18f   :  { %9798 = vmatprep.subr.bf16.mxu0 %v17656_v45 }
 0x190   :  { %v12356_v62 = vsel %vm883_vm2, %v914_v61, %v915_v16  ;;  %v12362_v58 = vsel %vm883_vm2, %v915_v16, %v917_v49  ;;  %v12370_v12 = vsel %vm883_vm2, %v919_v4, %v920_v37  ;;  %v2289_v61 = vld [vmem:[#allocation4 + $0x2c8] sm:$0xff]  ;;  %v932_v49 = vrot.slane %v11761_v44, 2  ;;  %v2290_v4 = vld [vmem:[#allocation4 + $0x2d0] sm:$0xff] }
 0x191   :  { %2844 = vmatmul.mubr.f32.gmra.mrb[20].mxu0 %v12344_v39  ;;  %v9805_v16 = vpack.c.bf16 %v2289_v61, %v2288_v55  ;;  %v937_v44 = vrot.slane %v11795_v17, 2  ;;  %v2292_v55 = vld [vmem:[#allocation4 + $0x2e0] sm:$0xff]  ;;  %v2293_v61 = vld [vmem:[#allocation4 + $0x2e8] sm:$0xff] }
 0x192   :  { %2848 = vmatprep.mubr.f32.mxu0 %v11645_v54  ;;  %9800 = vmatpush1.bf16.msra.mxu0 %v9799_v33  ;;  %v2286_v54 = vld [vmem:[#allocation4 + $0x2b0] sm:$0xff] }
 0x193   :  { %9801 = vmatprep.subr.bf16.mxu0 %v17656_v45  ;;  %v9802_v6 = vpack.c.bf16 %v2287_v34, %v2286_v54  ;;  %v935_v54 = vrot.slane %v11777_v18, 2 }
 0x195   :  { %2849 = vmatmul.mubr.f32.gmra.mrb[22].mxu0 %v12350_v40 }
 0x196   :  { %2853 = vmatprep.mubr.f32.mxu0 %v11676_v32  ;;  %9803 = vmatpush1.bf16.msra.mxu0 %v9802_v6  ;;  %v12376_v32 = vsel %vm883_vm2, %v920_v37, %v922_v2  ;;  %v2291_v37 = vld [vmem:[#allocation4 + $0x2d8] sm:$0xff]  ;;  %v12416_v6 = vsel %vm883_vm2, %v935_v54, %v937_v44 }
 0x197   :  { %9804 = vmatprep.subr.bf16.mxu0 %v17656_v45  ;;  %v9808_v2 = vpack.c.bf16 %v2291_v37, %v2290_v4  ;;  %v960_v37 = vrot.slane %v11945_v11, 2 }
 0x199   :  { %2854 = vmatmul.mubr.f32.gmra.mrb[24].mxu0 %v12356_v62 }
 0x19a   :  { %2858 = vmatprep.mubr.f32.mxu0 %v11678_v9  ;;  %v924_v9 = vrot.slane %v11708_v63, 2  ;;  %9806 = vmatpush1.bf16.msra.mxu0 %v9805_v16  ;;  %v952_v16 = vrot.slane %v11895_v50, 2  ;;  %v957_v50 = vrot.slane %v11929_v19, 2  ;;  %v959_v19 = vrot.slane %v11943_v27, 2 }
 0x19b   :  { %9807 = vmatprep.subr.bf16.mxu0 %v17656_v45 }
 0x19c   :  { %v12383_v33 = vsel %vm883_vm2, %v924_v9, %v925_v8  ;;  %v942_v9 = vrot.slane %v11828_v26, 2  ;;  %v945_v8 = vrot.slane %v11844_v43, 2  ;;  %v947_v26 = vrot.slane %v11862_v42, 2 }
 0x19d   :  { %2859 = vmatmul.mubr.f32.gmra.mrb[26].mxu0 %v12362_v58 }
 0x19e   :  { %2863 = vmatprep.mubr.f32.mxu0 %v11708_v63  ;;  %v930_v63 = vrot.slane %v11744_v56, 2  ;;  %9809 = vmatpush1.bf16.msra.mxu0 %v9808_v2  ;;  %v12484_v2 = vld [vmem:[#allocation2 + $0x180] sm:$0xff] }
 0x19f   :  { %9810 = vmatprep.subr.bf16.mxu0 %v17656_v45 }
 0x1a1   :  { %2864 = vmatmul.mubr.f32.gmra.mrb[28].mxu0 %v12370_v12 }
 0x1a2   :  { %2868 = vmatprep.mubr.f32.mxu0 %v11710_v21  ;;  %v929_v21 = vrot.slane %v11742_v0, 2 }
 0x1a4   :  { %v12397_v20 = vsel %vm883_vm2, %v929_v21, %v930_v63  ;;  %v12443_v21 = vsel %vm883_vm2, %v945_v8, %v947_v26  ;;  %v967_v26 = vrot.slane %v11976_v57, 2 }
 0x1a5   :  { %2869 = vmatmul.mubr.f32.gmra.mrb[30].mxu0 %v12376_v32 }
 0x1a6   :  { %2873 = vmatprep.mubr.f32.mxu0 %v11742_v0  ;;  %v12403_v0 = vsel %vm883_vm2, %v930_v63, %v932_v49  ;;  %v9811_v63 = vpack.c.bf16 %v2293_v61, %v2292_v55  ;;  %v955_v49 = vrot.slane %v11911_v22, 2  ;;  %v969_v55 = vrot.slane %v11981_v60, 2 }
 0x1a7   :  { %v970_v61 = vrot.slane %v11983_v35, 2 }
 0x1a8   :  { %9812 = vmatpush1.bf16.msra.mxu0 %v9811_v63  ;;  %v12477_v4 = vsel %vm883_vm2, %v955_v49, %v957_v50  ;;  %v17771_v50 = vld [vmem:[#allocation111_spill] sm:$0xff] }
 0x1a9   :  { %2874 = vmatmul.mubr.f32.gmra.mrb[32].mxu0 %v12383_v33  ;;  %9813 = vmatprep.subr.bf16.mxu0 %v17656_v45 }
 0x1aa   :  { %2878 = vmatprep.mubr.f32.mxu0 %v11744_v56  ;;  %v934_v56 = vrot.slane %v11775_v25, 2 }
 0x1ac   :  { %v12410_v34 = vsel %vm883_vm2, %v934_v56, %v935_v54  ;;  %v195_v54 = vld [vmem:[%s16994_s0 + $0x1f0] sm:$0xff] }
 0x1ad   :  { %2879 = vmatmul.mubr.f32.gmra.mrb[34].mxu0 %v12389_v5  ;;  %v12471_v44 = vsel %vm197_vm1, %v195_v54, 0.0 }
 0x1ae   :  { %2883 = vmatprep.mubr.f32.mxu0 %v11775_v25  ;;  %v940_v25 = vrot.slane %v11811_v15, 2  ;;  %17769 = vst [vmem:[#allocation172_spill] sm:$0xff] %v12471_v44  ;;  %324 = vst [vmem:[#allocation2 + $0x331] sm:$0xff] %v12471_v44  ;;  %v17810_v44 = vld [vmem:[#allocation158_spill] sm:$0xff] }
 0x1b1   :  { %2884 = vmatmul.mubr.f32.gmra.mrb[36].mxu0 %v12397_v20 }
 0x1b2   :  { %2888 = vmatprep.mubr.f32.mxu0 %v11777_v18  ;;  %v939_v18 = vrot.slane %v11809_v28, 2 }
 0x1b4   :  { %v12424_v17 = vsel %vm883_vm2, %v939_v18, %v940_v25 }
 0x1b5   :  { %2889 = vmatmul.mubr.f32.gmra.mrb[38].mxu0 %v12403_v0 }
 0x1b6   :  { %2893 = vmatprep.mubr.f32.mxu0 %v11809_v28  ;;  %v12430_v28 = vsel %vm883_vm2, %v940_v25, %v942_v9  ;;  %v196_v25 = vld [vmem:[%s16994_s0 + $0x1f8] sm:$0xff] }
 0x1b7   :  { %v12487_v9 = vsel %vm197_vm1, %v196_v25, 0.0 }
 0x1b8   :  { %17770 = vst [vmem:[#allocation173_spill] sm:$0xff] %v12487_v9  ;;  %325 = vst [vmem:[#allocation2 + $0x339] sm:$0xff] %v12487_v9  ;;  %v17806_v9 = vld [vmem:[#allocation156_spill] sm:$0xff] }
 0x1b9   :  { %2894 = vmatmul.mubr.f32.gmra.mrb[40].mxu0 %v12410_v34 }
 0x1ba   :  { %2898 = vmatprep.mubr.f32.mxu0 %v11811_v15  ;;  %v944_v15 = vrot.slane %v11842_v46, 2 }
 0x1bc   :  { %v12437_v3 = vsel %vm883_vm2, %v944_v15, %v945_v8  ;;  %v12497_v15 = vld [vmem:[#allocation2 + $0x188] sm:$0xff] }
 0x1bd   :  { %2899 = vmatmul.mubr.f32.gmra.mrb[42].mxu0 %v12416_v6 }
 0x1be   :  { %2903 = vmatprep.mubr.f32.mxu0 %v11842_v46  ;;  %v950_v46 = vrot.slane %v11878_v41, 2 }
 0x1c1   :  { %2904 = vmatmul.mubr.f32.gmra.mrb[44].mxu0 %v12424_v17 }
 0x1c2   :  { %2908 = vmatprep.mubr.f32.mxu0 %v11844_v43  ;;  %v949_v43 = vrot.slane %v11876_v51, 2 }
 0x1c4   :  { %v12451_v42 = vsel %vm883_vm2, %v949_v43, %v950_v46  ;;  %v12515_v43 = vsel %vm883_vm2, %v969_v55, %v970_v61 }
 0x1c5   :  { %2909 = vmatmul.mubr.f32.gmra.mrb[46].mxu0 %v12430_v28 }
 0x1c6   :  { %2913 = vmatprep.mubr.f32.mxu0 %v11876_v51  ;;  %v12457_v51 = vsel %vm883_vm2, %v950_v46, %v952_v16  ;;  %v972_v46 = vrot.slane %v11991_v38, 2  ;;  %v977_v38 = vrot.slane %v12011_v7, 2  ;;  %v982_v7 = vrot.slane %v12032_v1, 2 }
 0x1c7   :  { %v987_v1 = vrot.slane %v12057_v29, 2 }
 0x1c8   :  { %v12521_v57 = vsel %vm883_vm2, %v970_v61, %v972_v46  ;;  %v17777_v61 = vld [vmem:[#allocation121_spill] sm:$0xff] }
 0x1c9   :  { %2914 = vmatmul.mubr.f32.gmra.mrb[48].mxu0 %v12437_v3 }
 0x1ca   :  { %2918 = vmatprep.mubr.f32.mxu0 %v11878_v41  ;;  %v954_v41 = vrot.slane %v11909_v23, 2 }
 0x1cc   :  { %v12464_v56 = vsel %vm883_vm2, %v954_v41, %v955_v49 }
 0x1cd   :  { %2919 = vmatmul.mubr.f32.gmra.mrb[50].mxu0 %v12443_v21 }
 0x1ce   :  { %2923 = vmatprep.mubr.f32.mxu0 %v11909_v23  ;;  %v2295_v23 = vld [vmem:[#allocation4 + $0x2f8] sm:$0xff] }
 0x1d1   :  { %2924 = vmatmul.mubr.f32.gmra.mrb[52].mxu0 %v12451_v42 }
 0x1d2   :  { %2928 = vmatprep.mubr.f32.mxu0 %v11911_v22  ;;  %v2294_v22 = vld [vmem:[#allocation4 + $0x2f0] sm:$0xff] }
 0x1d3   :  { %v9814_v18 = vpack.c.bf16 %v2295_v23, %v2294_v22  ;;  %v17772_v22 = vld [vmem:[#allocation115_spill] sm:$0xff] }
 0x1d5   :  { %2929 = vmatmul.mubr.f32.gmra.mrb[54].mxu0 %v12457_v51 }
 0x1d6   :  { %2933 = vmatprep.mubr.f32.mxu0 %v11943_v27  ;;  %9815 = vmatpush1.bf16.msra.mxu0 %v9814_v18  ;;  %v962_v27 = vrot.slane %v11962_v24, 2  ;;  %v968_v24 = vsel %vm883_vm2, %v12295_v13, %v967_v26 }
 0x1d7   :  { %9816 = vmatprep.subr.bf16.mxu0 %v17656_v45 }
 0x1d8   :  { %v12502_v8 = vsel %vm883_vm2, %v960_v37, %v962_v27  ;;  %v17775_v27 = vld [vmem:[#allocation120_spill] sm:$0xff] }
 0x1d9   :  { %2934 = vmatmul.mubr.f32.gmra.mrb[56].mxu0 %v12464_v56 }
 0x1da   :  { %2938 = vmatprep.mubr.f32.mxu0 %v11945_v11  ;;  %v12494_v11 = vsel %vm883_vm2, %v959_v19, %v960_v37  ;;  %v17773_v19 = vld [vmem:[#allocation113_spill] sm:$0xff]  ;;  %v17774_v37 = vld [vmem:[#allocation116_spill] sm:$0xff] }
 0x1db   :  { %v992_v29 = vrot.slane %v17773_v19, 2  ;;  %v995_v25 = vrot.slane %v17774_v37, 2 }
 0x1dd   :  { %2939 = vmatmul.mubr.f32.gmra.mrb[58].mxu0 %v12477_v4 }
 0x1de   :  { %2943 = vmatprep.mubr.f32.mxu0 %v12484_v2 }
 0x1e1   :  { %2944 = vmatmul.mubr.f32.gmra.mrb[60].mxu0 %v12494_v11 }
 0x1e2   :  { %2948 = vmatprep.mubr.f32.mxu0 %v12497_v15 }
 0x1e5   :  { %2949 = vmatmul.mubr.f32.gmra.mrb[62].mxu0 %v12502_v8 }
 0x1e6   :  { %2953 = vmatprep.mubr.f32.mxu0 %v11981_v60  ;;  %v975_v60 = vrot.slane %v12002_v59, 2 }
 0x1e8   :  { %v12534_v63 = vsel %vm883_vm2, %v975_v60, %v977_v38  ;;  %v17778_v38 = vld [vmem:[#allocation125_spill] sm:$0xff] }
 0x1e9   :  { %2954 = vmatmul.mubr.f32.gmra.mrb[64].mxu0 %v12295_v13  ;;  %v974_v13 = vrot.slane %v12000_v10, 2 }
 0x1ea   :  { %2958 = vmatprep.mubr.f32.mxu0 %v11983_v35 }
 0x1eb   :  { %v12528_v35 = vsel %vm883_vm2, %v974_v13, %v975_v60  ;;  %v999_v13 = vrot.slane %v17775_v27, 2  ;;  %v1000_v60 = vrot.slane %v17777_v61, 2 }
 0x1ed   :  { %2959 = vmatmul.mubr.f32.gmra.mrb[66].mxu0 %v968_v24  ;;  %v17776_v24 = vld [vmem:[#allocation118_spill] sm:$0xff] }
 0x1ee   :  { %2963 = vmatprep.mubr.f32.mxu0 %v12000_v10  ;;  %v979_v10 = vrot.slane %v12019_v53, 2  ;;  %v997_v55 = vrot.slane %v17776_v24, 2 }
 0x1f0   :  { %v12586_v46 = vsel %vm883_vm2, %v995_v25, %v997_v55  ;;  %v17785_v55 = vld [vmem:[#allocation133_spill] sm:$0xff] }
 0x1f1   :  { %2964 = vmatmul.mubr.f32.gmra.mrb[68].mxu0 %v12515_v43 }
 0x1f2   :  { %2968 = vmatprep.mubr.f32.mxu0 %v12002_v59  ;;  %v980_v59 = vrot.slane %v12021_v52, 2 }
 0x1f4   :  { %v12541_v16 = vsel %vm883_vm2, %v979_v10, %v980_v59  ;;  %v12547_v41 = vsel %vm883_vm2, %v980_v59, %v982_v7  ;;  %v12593_v10 = vsel %vm883_vm2, %v999_v13, %v1000_v60  ;;  %v17779_v59 = vld [vmem:[#allocation123_spill] sm:$0xff]  ;;  %v17786_v13 = vld [vmem:[#allocation136_spill] sm:$0xff] }
 0x1f5   :  { %2969 = vmatmul.mubr.f32.gmra.mrb[70].mxu0 %v12521_v57  ;;  %v1002_v7 = vrot.slane %v17779_v59, 2  ;;  %v1015_v59 = vrot.slane %v17786_v13, 2 }
 0x1f6   :  { %2973 = vmatprep.mubr.f32.mxu0 %v12019_v53  ;;  %v984_v53 = vrot.slane %v12046_v30, 2 }
 0x1f9   :  { %2974 = vmatmul.mubr.f32.gmra.mrb[72].mxu0 %v12528_v35 }
 0x1fa   :  { %2978 = vmatprep.mubr.f32.mxu0 %v12021_v52  ;;  %v985_v52 = vrot.slane %v12048_v36, 2 }
 0x1fc   :  { %v12554_v49 = vsel %vm883_vm2, %v984_v53, %v985_v52  ;;  %v12560_v54 = vsel %vm883_vm2, %v985_v52, %v987_v1  ;;  %v17780_v53 = vld [vmem:[#allocation126_spill] sm:$0xff]  ;;  %v12599_v52 = vsel %vm883_vm2, %v1000_v60, %v1002_v7  ;;  %v1004_v1 = vrot.slane %v17778_v38, 2  ;;  %v17788_v7 = vld [vmem:[#allocation140_spill] sm:$0xff] }
 0x1fd   :  { %2979 = vmatmul.mubr.f32.gmra.mrb[74].mxu0 %v12534_v63 }
 0x1fe   :  { %2983 = vmatprep.mubr.f32.mxu0 %v12046_v30  ;;  %v989_v30 = vrot.slane %v12065_v14, 2 }
 0x201   :  { %2984 = vmatmul.mubr.f32.gmra.mrb[76].mxu0 %v12541_v16 }
 0x202   :  { %2988 = vmatprep.mubr.f32.mxu0 %v12048_v36  ;;  %v990_v36 = vrot.slane %v17771_v50, 2 }
 0x204   :  { %v12567_v23 = vsel %vm883_vm2, %v989_v30, %v990_v36  ;;  %v12573_v18 = vsel %vm883_vm2, %v990_v36, %v992_v29  ;;  %v17781_v30 = vld [vmem:[#allocation130_spill] sm:$0xff]  ;;  %v17783_v29 = vld [vmem:[#allocation131_spill] sm:$0xff] }
 0x205   :  { %2989 = vmatmul.mubr.f32.gmra.mrb[78].mxu0 %v12547_v41 }
 0x206   :  { %2993 = vmatprep.mubr.f32.mxu0 %v12065_v14  ;;  %v994_v14 = vrot.slane %v17772_v22, 2 }
 0x208   :  { %v12580_v26 = vsel %vm883_vm2, %v994_v14, %v995_v25  ;;  %v1009_v14 = vrot.slane %v17781_v30, 2  ;;  %v1010_v25 = vrot.slane %v17783_v29, 2 }
 0x209   :  { %2994 = vmatmul.mubr.f32.gmra.mrb[80].mxu0 %v12554_v49 }
 0x20a   :  { %2998 = vmatprep.mubr.f32.mxu0 %v17771_v50  ;;  %v1005_v50 = vrot.slane %v17780_v53, 2  ;;  %v12619_v24 = vsel %vm883_vm2, %v1009_v14, %v1010_v25  ;;  %v17793_v14 = vld [vmem:[#allocation145_spill] sm:$0xff] }
 0x20c   :  { %v12606_v36 = vsel %vm883_vm2, %v1004_v1, %v1005_v50  ;;  %v17790_v1 = vld [vmem:[#allocation138_spill] sm:$0xff] }
 0x20d   :  { %2999 = vmatmul.mubr.f32.gmra.mrb[82].mxu0 %v12560_v54 }
 0x20e   :  { %3003 = vmatprep.mubr.f32.mxu0 %v17772_v22  ;;  %v17782_v22 = vld [vmem:[#allocation128_spill] sm:$0xff] }
 0x20f   :  { %v1007_v19 = vrot.slane %v17782_v22, 2 }
 0x211   :  { %3004 = vmatmul.mubr.f32.gmra.mrb[84].mxu0 %v12567_v23 }
 0x212   :  { %3008 = vmatprep.mubr.f32.mxu0 %v17774_v37  ;;  %v12612_v37 = vsel %vm883_vm2, %v1005_v50, %v1007_v19  ;;  %v1017_v50 = vrot.slane %v17790_v1, 2  ;;  %v1019_v19 = vrot.slane %v17788_v7, 2 }
 0x214   :  { %v12638_v22 = vsel %vm883_vm2, %v1015_v59, %v1017_v50  ;;  %v17800_v50 = vld [vmem:[#allocation148_spill] sm:$0xff] }
 0x215   :  { %3009 = vmatmul.mubr.f32.gmra.mrb[86].mxu0 %v12573_v18  ;;  %17792 = vst [vmem:[#allocation113_spill] sm:$0xff] %v12638_v22 }
 0x216   :  { %3013 = vmatprep.mubr.f32.mxu0 %v17775_v27  ;;  %v17784_v27 = vld [vmem:[#allocation135_spill] sm:$0xff] }
 0x219   :  { %3014 = vmatmul.mubr.f32.gmra.mrb[88].mxu0 %v12580_v26 }
 0x21a   :  { %3018 = vmatprep.mubr.f32.mxu0 %v17777_v61  ;;  %v1012_v61 = vrot.slane %v17785_v55, 2 }
 0x21c   :  { %v12625_v60 = vsel %vm883_vm2, %v1010_v25, %v1012_v61  ;;  %v17796_v61 = vld [vmem:[#allocation146_spill] sm:$0xff] }
 0x21d   :  { %3019 = vmatmul.mubr.f32.gmra.mrb[90].mxu0 %v12586_v46  ;;  %17787 = vst [vmem:[#allocation111_spill] sm:$0xff] %v12625_v60 }
 0x21e   :  { %3023 = vmatprep.mubr.f32.mxu0 %v17778_v38  ;;  %v1014_v38 = vrot.slane %v17784_v27, 2 }
 0x221   :  { %3024 = vmatmul.mubr.f32.gmra.mrb[92].mxu0 %v12593_v10 }
 0x222   :  { %3028 = vmatprep.mubr.f32.mxu0 %v17780_v53  ;;  %v12632_v53 = vsel %vm883_vm2, %v1014_v38, %v1015_v59  ;;  %v1024_v38 = vrot.slane %v17793_v14, 2  ;;  %v1025_v59 = vrot.slane %v17796_v61, 2 }
 0x223   :  { %17789 = vst [vmem:[#allocation115_spill] sm:$0xff] %v12632_v53 }
 0x224   :  { %v12658_v1 = vsel %vm883_vm2, %v1024_v38, %v1025_v59  ;;  %v17805_v38 = vld [vmem:[#allocation153_spill] sm:$0xff] }
 0x225   :  { %3029 = vmatmul.mubr.f32.gmra.mrb[94].mxu0 %v12599_v52  ;;  %17799 = vst [vmem:[#allocation118_spill] sm:$0xff] %v12658_v1 }
 0x226   :  { %3033 = vmatprep.mubr.f32.mxu0 %v17781_v30  ;;  %v17791_v30 = vld [vmem:[#allocation141_spill] sm:$0xff] }
 0x229   :  { %3034 = vmatmul.mubr.f32.gmra.mrb[96].mxu0 %v12606_v36 }
 0x22a   :  { %3038 = vmatprep.mubr.f32.mxu0 %v17783_v29  ;;  %v1020_v29 = vrot.slane %v17791_v30, 2 }
 0x22c   :  { %v12645_v25 = vsel %vm883_vm2, %v1019_v19, %v1020_v29  ;;  %v17801_v19 = vld [vmem:[#allocation151_spill] sm:$0xff] }
 0x22d   :  { %3039 = vmatmul.mubr.f32.gmra.mrb[98].mxu0 %v12612_v37  ;;  %17794 = vst [vmem:[#allocation116_spill] sm:$0xff] %v12645_v25 }
 0x22e   :  { %3043 = vmatprep.mubr.f32.mxu0 %v17784_v27  ;;  %v17795_v27 = vld [vmem:[#allocation143_spill] sm:$0xff] }
 0x22f   :  { %v1022_v55 = vrot.slane %v17795_v27, 2  ;;  %v1030_v27 = vrot.slane %v17801_v19, 2 }
 0x231   :  { %3044 = vmatmul.mubr.f32.gmra.mrb[100].mxu0 %v12619_v24 }
 0x232   :  { %3048 = vmatprep.mubr.f32.mxu0 %v17786_v13  ;;  %v12651_v13 = vsel %vm883_vm2, %v1020_v29, %v1022_v55  ;;  %v17803_v55 = vld [vmem:[#allocation155_spill] sm:$0xff] }
 0x233   :  { %17797 = vst [vmem:[#allocation120_spill] sm:$0xff] %v12651_v13 }
 0x235   :  { %3049 = vmatmul.mubr.f32.gmra.mrb[102].mxu0 %v12625_v60  ;;  %v2341_v60 = vld [vmem:[#allocation4 + $0x468] sm:$0xff] }
 0x236   :  { %3053 = vmatprep.mubr.f32.mxu0 %v17788_v7  ;;  %v17798_v7 = vld [vmem:[#allocation150_spill] sm:$0xff] }
 0x239   :  { %3054 = vmatmul.mubr.f32.gmra.mrb[104].mxu0 %v12632_v53  ;;  %v17852_v53 = vld [vmem:[#allocation102_spill] sm:$0xff] }
 0x23a   :  { %3058 = vmatprep.mubr.f32.mxu0 %v17791_v30  ;;  %v1027_v30 = vrot.slane %v17800_v50, 2  ;;  %v1032_v50 = vrot.slane %v17805_v38, 2  ;;  %v1037_v38 = vrot.slane %v17810_v44, 2  ;;  %v17815_v44 = vld [vmem:[#allocation164_spill] sm:$0xff] }
 0x23c   :  { %v12664_v29 = vsel %vm883_vm2, %v1025_v59, %v1027_v30  ;;  %v12677_v59 = vsel %vm883_vm2, %v1030_v27, %v1032_v50  ;;  %v1035_v30 = vrot.slane %v17806_v9, 2  ;;  %v12694_v50 = vld [vmem:[#allocation2 + $0x330] sm:$0xff] }
 0x23d   :  { %3059 = vmatmul.mubr.f32.gmra.mrb[106].mxu0 %v12638_v22  ;;  %17802 = vst [vmem:[#allocation121_spill] sm:$0xff] %v12664_v29  ;;  %17807 = vst [vmem:[#allocation123_spill] sm:$0xff] %v12677_v59 }
 0x23e   :  { %3063 = vmatprep.mubr.f32.mxu0 %v17793_v14  ;;  %v1029_v14 = vrot.slane %v17798_v7, 2  ;;  %17813 = vst [vmem:[#allocation128_spill] sm:$0xff] %v12694_v50 }
 0x241   :  { %3064 = vmatmul.mubr.f32.gmra.mrb[108].mxu0 %v12645_v25 }
 0x242   :  { %3068 = vmatprep.mubr.f32.mxu0 %v17796_v61  ;;  %v12671_v61 = vsel %vm883_vm2, %v1029_v14, %v1030_v27  ;;  %v12690_v27 = vsel %vm883_vm2, %v1035_v30, %v1037_v38 }
 0x243   :  { %17804 = vst [vmem:[#allocation125_spill] sm:$0xff] %v12671_v61  ;;  %17812 = vst [vmem:[#allocation130_spill] sm:$0xff] %v12690_v27 }
 0x245   :  { %3069 = vmatmul.mubr.f32.gmra.mrb[110].mxu0 %v12651_v13  ;;  %v2333_v13 = vld [vmem:[#allocation4 + $0x428] sm:$0xff] }
 0x246   :  { %3073 = vmatprep.mubr.f32.mxu0 %v17798_v7  ;;  %v1034_v7 = vrot.slane %v17803_v55, 2 }
 0x248   :  { %v12684_v14 = vsel %vm883_vm2, %v1034_v7, %v1035_v30 }
 0x249   :  { %3074 = vmatmul.mubr.f32.gmra.mrb[112].mxu0 %v12658_v1  ;;  %17809 = vst [vmem:[#allocation126_spill] sm:$0xff] %v12684_v14  ;;  %v17829_v1 = vld [vmem:[#allocation57_spill] sm:$0xff] }
 0x24a   :  { %3078 = vmatprep.mubr.f32.mxu0 %v17801_v19  ;;  %v17808_v19 = vld [vmem:[#allocation160_spill] sm:$0xff] }
 0x24d   :  { %3079 = vmatmul.mubr.f32.gmra.mrb[114].mxu0 %v12664_v29  ;;  %v17821_v29 = vld [vmem:[#allocation107_spill] sm:$0xff] }
 0x24e   :  { %3083 = vmatprep.mubr.f32.mxu0 %v17803_v55  ;;  %v1039_v55 = vrot.slane %v17808_v19, 2 }
 0x251   :  { %3084 = vmatmul.mubr.f32.gmra.mrb[116].mxu0 %v12671_v61  ;;  %v17811_v61 = vld [vmem:[#allocation161_spill] sm:$0xff] }
 0x252   :  { %3088 = vmatprep.mubr.f32.mxu0 %v17806_v9  ;;  %v1040_v9 = vrot.slane %v17811_v61, 2 }
 0x254   :  { %v12699_v7 = vsel %vm883_vm2, %v1039_v55, %v1040_v9  ;;  %v2298_v55 = vld [vmem:[#allocation4 + $0x310] sm:$0xff] }
 0x255   :  { %3089 = vmatmul.mubr.f32.gmra.mrb[118].mxu0 %v12677_v59  ;;  %17814 = vst [vmem:[#allocation131_spill] sm:$0xff] %v12699_v7  ;;  %v12702_v59 = vld [vmem:[#allocation2 + $0x338] sm:$0xff] }
 0x256   :  { %3093 = vmatprep.mubr.f32.mxu0 %v17808_v19  ;;  %17816 = vst [vmem:[#allocation135_spill] sm:$0xff] %v12702_v59  ;;  %v2297_v19 = vld [vmem:[#allocation4 + $0x308] sm:$0xff] }
 0x259   :  { %3094 = vmatmul.mubr.f32.gmra.mrb[120].mxu0 %v12684_v14  ;;  %v1042_v14 = vrot.slane %v17815_v44, 2  ;;  %v17819_v44 = vld [vmem:[#allocation168_spill] sm:$0xff] }
 0x25a   :  { %3098 = vmatprep.mubr.f32.mxu0 %v17811_v61  ;;  %v2296_v61 = vld [vmem:[#allocation4 + $0x300] sm:$0xff] }
 0x25b   :  { %v12707_v30 = vsel %vm883_vm2, %v1040_v9, %v1042_v14  ;;  %v9817_v38 = vpack.c.bf16 %v2297_v19, %v2296_v61  ;;  %v2301_v14 = vld [vmem:[#allocation4 + $0x328] sm:$0xff]  ;;  %v17820_v9 = vld [vmem:[#allocation48_spill] sm:$0xff]  ;;  %v17822_v19 = vld [vmem:[#allocation49_spill] sm:$0xff] }
 0x25c   :  { %17817 = vst [vmem:[#allocation133_spill] sm:$0xff] %v12707_v30  ;;  %v2303_v61 = vld [vmem:[#allocation4 + $0x338] sm:$0xff] }
 0x25d   :  { %3099 = vmatmul.mubr.f32.gmra.mrb[122].mxu0 %v12690_v27  ;;  %v17818_v27 = vld [vmem:[#allocation45_spill] sm:$0xff] }
 0x25e   :  { %3103 = vmatprep.mubr.f32.mxu0 %v12694_v50  ;;  %v2299_v50 = vld [vmem:[#allocation4 + $0x318] sm:$0xff] }
 0x261   :  { %3104 = vmatmul.mubr.f32.gmra.mrb[124].mxu0 %v12699_v7  ;;  %v9820_v7 = vpack.c.bf16 %v2299_v50, %v2298_v55  ;;  %v2305_v55 = vld [vmem:[#allocation4 + $0x348] sm:$0xff] }
 0x262   :  { %3108 = vmatprep.mubr.f32.mxu0 %v12702_v59  ;;  %v2300_v59 = vld [vmem:[#allocation4 + $0x320] sm:$0xff] }
 0x265   :  { %3109 = vmatmul.mubr.f32.gmra.mrb[126].mxu0 %v12707_v30  ;;  %v9823_v30 = vpack.c.bf16 %v2301_v14, %v2300_v59  ;;  %v2306_v59 = vld [vmem:[#allocation4 + $0x350] sm:$0xff]  ;;  %v17826_v14 = vld [vmem:[#allocation53_spill] sm:$0xff] }
 0x266   :  { %3178 = vmatprep.mubr.f32.mxu0 %v12304_v48  ;;  %v2302_v48 = vld [vmem:[#allocation4 + $0x330] sm:$0xff] }
 0x267   :  { %v9826_v50 = vpack.c.bf16 %v2303_v61, %v2302_v48  ;;  %v2308_v48 = vld [vmem:[#allocation4 + $0x360] sm:$0xff]  ;;  %v2309_v61 = vld [vmem:[#allocation4 + $0x368] sm:$0xff] }
 0x269   :  { %3179 = vmatmul.mubr.f32.vlgmr.msra.gmra.mrb[0].mxu0 %v17818_v27  ;;  %v17823_v27 = vld [vmem:[#allocation169_spill] sm:$0xff] }
 0x26a   :  { %9818 = vmatpush1.bf16.msra.mxu0 %v9817_v38  ;;  %3183 = vmatprep.mubr.f32.mxu0 %v17819_v44  ;;  %v2304_v38 = vld [vmem:[#allocation4 + $0x340] sm:$0xff]  ;;  %v17824_v44 = vld [vmem:[#allocation52_spill] sm:$0xff] }
 0x26b   :  { %9819 = vmatprep.subr.bf16.mxu0 %v17656_v45 }
 0x26d   :  { %3184 = vmatmul.mubr.f32.gmra.mrb[2].mxu0 %v17820_v9  ;;  %v17825_v9 = vld [vmem:[#allocation170_spill] sm:$0xff] }
 0x26e   :  { %3188 = vmatprep.mubr.f32.mxu0 %v17821_v29  ;;  %9821 = vmatpush1.bf16.msra.mxu0 %v9820_v7  ;;  %v9829_v29 = vpack.c.bf16 %v2305_v55, %v2304_v38  ;;  %v2307_v7 = vld [vmem:[#allocation4 + $0x358] sm:$0xff]  ;;  %v2310_v38 = vld [vmem:[#allocation4 + $0x370] sm:$0xff] }
 0x26f   :  { %9822 = vmatprep.subr.bf16.mxu0 %v17656_v45  ;;  %v2311_v55 = vld [vmem:[#allocation4 + $0x378] sm:$0xff] }
 0x271   :  { %3189 = vmatmul.mubr.f32.gmra.mrb[4].mxu0 %v17822_v19  ;;  %v17827_v19 = vld [vmem:[#allocation56_spill] sm:$0xff] }
 0x272   :  { %3193 = vmatprep.mubr.f32.mxu0 %v17823_v27  ;;  %9824 = vmatpush1.bf16.msra.mxu0 %v9823_v30  ;;  %v9832_v30 = vpack.c.bf16 %v2307_v7, %v2306_v59  ;;  %v2312_v59 = vld [vmem:[#allocation4 + $0x380] sm:$0xff]  ;;  %v2313_v7 = vld [vmem:[#allocation4 + $0x388] sm:$0xff] }
 0x273   :  { %9825 = vmatprep.subr.bf16.mxu0 %v17656_v45 }
 0x275   :  { %3194 = vmatmul.mubr.f32.gmra.mrb[6].mxu0 %v17824_v44  ;;  %v17828_v44 = vld [vmem:[#allocation171_spill] sm:$0xff] }
 0x276   :  { %3198 = vmatprep.mubr.f32.mxu0 %v17825_v9  ;;  %9827 = vmatpush1.bf16.msra.mxu0 %v9826_v50  ;;  %v9835_v50 = vpack.c.bf16 %v2309_v61, %v2308_v48  ;;  %v2314_v48 = vld [vmem:[#allocation4 + $0x390] sm:$0xff]  ;;  %v2315_v61 = vld [vmem:[#allocation4 + $0x398] sm:$0xff] }
 0x277   :  { %9828 = vmatprep.subr.bf16.mxu0 %v17656_v45 }
 0x279   :  { %3199 = vmatmul.mubr.f32.gmra.mrb[8].mxu0 %v17826_v14  ;;  %v17830_v14 = vld [vmem:[#allocation60_spill] sm:$0xff] }
 0x27a   :  { %3203 = vmatprep.mubr.f32.mxu0 %v12328_v31  ;;  %9830 = vmatpush1.bf16.msra.mxu0 %v9829_v29  ;;  %v9838_v29 = vpack.c.bf16 %v2311_v55, %v2310_v38  ;;  %v2316_v38 = vld [vmem:[#allocation4 + $0x3a0] sm:$0xff]  ;;  %v2317_v55 = vld [vmem:[#allocation4 + $0x3a8] sm:$0xff] }
 0x27b   :  { %9831 = vmatprep.subr.bf16.mxu0 %v17656_v45 }
 0x27d   :  { %3204 = vmatmul.mubr.f32.gmra.mrb[10].mxu0 %v17827_v19  ;;  %v17831_v19 = vld [vmem:[#allocation61_spill] sm:$0xff] }
 0x27e   :  { %3208 = vmatprep.mubr.f32.mxu0 %v17828_v44  ;;  %9833 = vmatpush1.bf16.msra.mxu0 %v9832_v30  ;;  %v9841_v30 = vpack.c.bf16 %v2313_v7, %v2312_v59  ;;  %v17833_v59 = vld [vmem:[#allocation65_spill] sm:$0xff]  ;;  %v17834_v7 = vld [vmem:[#allocation68_spill] sm:$0xff] }
 0x27f   :  { %9834 = vmatprep.subr.bf16.mxu0 %v17656_v45 }
 0x281   :  { %3209 = vmatmul.mubr.f32.gmra.mrb[12].mxu0 %v17829_v1  ;;  %v17832_v1 = vld [vmem:[#allocation64_spill] sm:$0xff] }
 0x282   :  { %3213 = vmatprep.mubr.f32.mxu0 %v12338_v47  ;;  %9836 = vmatpush1.bf16.msra.mxu0 %v9835_v50  ;;  %v9844_v50 = vpack.c.bf16 %v2315_v61, %v2314_v48  ;;  %v2318_v48 = vld [vmem:[#allocation4 + $0x3b0] sm:$0xff]  ;;  %v2319_v61 = vld [vmem:[#allocation4 + $0x3b8] sm:$0xff] }
 0x283   :  { %9837 = vmatprep.subr.bf16.mxu0 %v17656_v45 }
 0x285   :  { %3214 = vmatmul.mubr.f32.gmra.mrb[14].mxu0 %v17830_v14  ;;  %v17848_v14 = vld [vmem:[#allocation96_spill] sm:$0xff] }
 0x286   :  { %3218 = vmatprep.mubr.f32.mxu0 %v12344_v39  ;;  %9839 = vmatpush1.bf16.msra.mxu0 %v9838_v29  ;;  %v9847_v29 = vpack.c.bf16 %v2317_v55, %v2316_v38  ;;  %v17836_v38 = vld [vmem:[#allocation72_spill] sm:$0xff]  ;;  %v17837_v55 = vld [vmem:[#allocation73_spill] sm:$0xff] }
 0x287   :  { %9840 = vmatprep.subr.bf16.mxu0 %v17656_v45 }
 0x289   :  { %3219 = vmatmul.mubr.f32.gmra.mrb[16].mxu0 %v17831_v19 }
 0x28a   :  { %3223 = vmatprep.mubr.f32.mxu0 %v12350_v40  ;;  %9842 = vmatpush1.bf16.msra.mxu0 %v9841_v30  ;;  %v17835_v30 = vld [vmem:[#allocation69_spill] sm:$0xff] }
 0x28b   :  { %9843 = vmatprep.subr.bf16.mxu0 %v17656_v45 }
 0x28d   :  { %3224 = vmatmul.mubr.f32.gmra.mrb[18].mxu0 %v17832_v1 }
 0x28e   :  { %3228 = vmatprep.mubr.f32.mxu0 %v12356_v62  ;;  %9845 = vmatpush1.bf16.msra.mxu0 %v9844_v50  ;;  %v9850_v50 = vpack.c.bf16 %v2319_v61, %v2318_v48  ;;  %v17840_v61 = vld [vmem:[#allocation80_spill] sm:$0xff] }
 0x28f   :  { %9846 = vmatprep.subr.bf16.mxu0 %v17656_v45 }
 0x291   :  { %3229 = vmatmul.mubr.f32.gmra.mrb[20].mxu0 %v17833_v59  ;;  %v2321_v59 = vld [vmem:[#allocation4 + $0x3c8] sm:$0xff] }
 0x292   :  { %3233 = vmatprep.mubr.f32.mxu0 %v12362_v58  ;;  %9848 = vmatpush1.bf16.msra.mxu0 %v9847_v29  ;;  %v17838_v29 = vld [vmem:[#allocation76_spill] sm:$0xff] }
 0x293   :  { %9849 = vmatprep.subr.bf16.mxu0 %v17656_v45 }
 0x295   :  { %3234 = vmatmul.mubr.f32.gmra.mrb[22].mxu0 %v17834_v7  ;;  %v2320_v7 = vld [vmem:[#allocation4 + $0x3c0] sm:$0xff] }
 0x296   :  { %3238 = vmatprep.mubr.f32.mxu0 %v12370_v12  ;;  %9851 = vmatpush1.bf16.msra.mxu0 %v9850_v50  ;;  %v9853_v48 = vpack.c.bf16 %v2321_v59, %v2320_v7  ;;  %v17841_v50 = vld [vmem:[#allocation81_spill] sm:$0xff]  ;;  %v17844_v7 = vld [vmem:[#allocation88_spill] sm:$0xff] }
 0x297   :  { %9852 = vmatprep.subr.bf16.mxu0 %v17656_v45 }
 0x299   :  { %3239 = vmatmul.mubr.f32.gmra.mrb[24].mxu0 %v17835_v30  ;;  %v17839_v30 = vld [vmem:[#allocation77_spill] sm:$0xff] }
 0x29a   :  { %3243 = vmatprep.mubr.f32.mxu0 %v12376_v32  ;;  %9854 = vmatpush1.bf16.msra.mxu0 %v9853_v48  ;;  %v17845_v48 = vld [vmem:[#allocation89_spill] sm:$0xff] }
 0x29b   :  { %9855 = vmatprep.subr.bf16.mxu0 %v17656_v45 }
 0x29d   :  { %3244 = vmatmul.mubr.f32.gmra.mrb[26].mxu0 %v17836_v38  ;;  %v2323_v38 = vld [vmem:[#allocation4 + $0x3d8] sm:$0xff] }
 0x29e   :  { %3248 = vmatprep.mubr.f32.mxu0 %v12383_v33 }
 0x2a1   :  { %3249 = vmatmul.mubr.f32.gmra.mrb[28].mxu0 %v17837_v55  ;;  %v2322_v55 = vld [vmem:[#allocation4 + $0x3d0] sm:$0xff] }
 0x2a2   :  { %3253 = vmatprep.mubr.f32.mxu0 %v12389_v5  ;;  %v9856_v59 = vpack.c.bf16 %v2323_v38, %v2322_v55  ;;  %v17847_v38 = vld [vmem:[#allocation93_spill] sm:$0xff] }
 0x2a3   :  { %v2324_v55 = vld [vmem:[#allocation4 + $0x3e0] sm:$0xff] }
 0x2a4   :  { %9857 = vmatpush1.bf16.msra.mxu0 %v9856_v59  ;;  %v2325_v59 = vld [vmem:[#allocation4 + $0x3e8] sm:$0xff] }
 0x2a5   :  { %3254 = vmatmul.mubr.f32.gmra.mrb[30].mxu0 %v17838_v29  ;;  %v17842_v29 = vld [vmem:[#allocation84_spill] sm:$0xff]  ;;  %9858 = vmatprep.subr.bf16.mxu0 %v17656_v45  ;;  %v9859_v1 = vpack.c.bf16 %v2325_v59, %v2324_v55  ;;  %v2337_v55 = vld [vmem:[#allocation4 + $0x448] sm:$0xff]  ;;  %v376_v59 = vld [vmem:[#allocation2 + $0x190] sm:$0x3] }
 0x2a6   :  { %3258 = vmatprep.mubr.f32.mxu0 %v12397_v20  ;;  %v1323_v25 = vrot.slane %v376_v59, 2 }
 0x2a8   :  { %9860 = vmatpush1.bf16.msra.mxu0 %v9859_v1 }
 0x2a9   :  { %3259 = vmatmul.mubr.f32.gmra.mrb[32].mxu0 %v17839_v30  ;;  %v17843_v30 = vld [vmem:[#allocation85_spill] sm:$0xff]  ;;  %9861 = vmatprep.subr.bf16.mxu0 %v17656_v45 }
 0x2aa   :  { %3263 = vmatprep.mubr.f32.mxu0 %v12403_v0 }
 0x2ad   :  { %3264 = vmatmul.mubr.f32.gmra.mrb[34].mxu0 %v17840_v61 }
 0x2ae   :  { %3268 = vmatprep.mubr.f32.mxu0 %v12410_v34 }
 0x2b1   :  { %3269 = vmatmul.mubr.f32.gmra.mrb[36].mxu0 %v17841_v50  ;;  %v2328_v50 = vld [vmem:[#allocation4 + $0x400] sm:$0xff] }
 0x2b2   :  { %3273 = vmatprep.mubr.f32.mxu0 %v12416_v6 }
 0x2b5   :  { %3274 = vmatmul.mubr.f32.gmra.mrb[38].mxu0 %v17842_v29  ;;  %v17846_v29 = vld [vmem:[#allocation92_spill] sm:$0xff] }
 0x2b6   :  { %3278 = vmatprep.mubr.f32.mxu0 %v12424_v17 }
 0x2b9   :  { %3279 = vmatmul.mubr.f32.gmra.mrb[40].mxu0 %v17843_v30  ;;  %v2329_v30 = vld [vmem:[#allocation4 + $0x408] sm:$0xff] }
 0x2ba   :  { %3283 = vmatprep.mubr.f32.mxu0 %v12430_v28  ;;  %v9864_v61 = vpack.c.bf16 %v2329_v30, %v2328_v50  ;;  %v2334_v50 = vld [vmem:[#allocation4 + $0x430] sm:$0xff] }
 0x2bc   :  { %9865 = vmatprep.subr.bf16.mxu1 %v9864_v61 }
 0x2bd   :  { %3284 = vmatmul.mubr.f32.gmra.mrb[42].mxu0 %v17844_v7  ;;  %9867 = vmatpush3.bf16.msra.mxu1 %v9864_v61  ;;  %v2330_v7 = vld [vmem:[#allocation4 + $0x410] sm:$0xff]  ;;  %v17849_v61 = vld [vmem:[#allocation97_spill] sm:$0xff] }
 0x2be   :  { %3288 = vmatprep.mubr.f32.mxu0 %v12437_v3 }
 0x2c1   :  { %3289 = vmatmul.mubr.f32.gmra.mrb[44].mxu0 %v17845_v48  ;;  %v2331_v48 = vld [vmem:[#allocation4 + $0x418] sm:$0xff] }
 0x2c2   :  { %3293 = vmatprep.mubr.f32.mxu0 %v12443_v21  ;;  %v9868_v19 = vpack.c.bf16 %v2331_v48, %v2330_v7  ;;  %v17850_v7 = vld [vmem:[#allocation100_spill] sm:$0xff]  ;;  %v2336_v48 = vld [vmem:[#allocation4 + $0x440] sm:$0xff] }
 0x2c4   :  { %9869 = vmatprep.subr.bf16.mxu1 %v9868_v19 }
 0x2c5   :  { %3294 = vmatmul.mubr.f32.gmra.mrb[46].mxu0 %v17846_v29  ;;  %v2332_v29 = vld [vmem:[#allocation4 + $0x420] sm:$0xff]  ;;  %9871 = vmatpush3.bf16.msra.mxu1 %v9868_v19  ;;  %v1320_v19 = vrot.slane %v12484_v2, 2 }
 0x2c6   :  { %3298 = vmatprep.mubr.f32.mxu0 %v12451_v42  ;;  %v9872_v30 = vpack.c.bf16 %v2333_v13, %v2332_v29  ;;  %v9880_v13 = vpack.c.bf16 %v2337_v55, %v2336_v48  ;;  %v1321_v29 = vrot.slane %v12497_v15, 2  ;;  %v2339_v48 = vld [vmem:[#allocation4 + $0x458] sm:$0xff] }
 0x2c8   :  { %9873 = vmatprep.subr.bf16.mxu1 %v9872_v30  ;;  %v12789_v55 = vsel %vm883_vm2, %v1320_v19, %v1321_v29  ;;  %v2342_v19 = vld [vmem:[#allocation4 + $0x470] sm:$0xff] }
 0x2c9   :  { %3299 = vmatmul.mubr.f32.gmra.mrb[48].mxu0 %v17847_v38  ;;  %v2335_v38 = vld [vmem:[#allocation4 + $0x438] sm:$0xff]  ;;  %9875 = vmatpush3.bf16.msra.mxu1 %v9872_v30 }
 0x2ca   :  { %3303 = vmatprep.mubr.f32.mxu0 %v12457_v51  ;;  %v9876_v1 = vpack.c.bf16 %v2335_v38, %v2334_v50  ;;  %v2327_v30 = vld [vmem:[#allocation4 + $0x3f8] sm:$0xff]  ;;  %v2338_v38 = vld [vmem:[#allocation4 + $0x450] sm:$0xff]  ;;  %v1242_v50 = vrot.slane %v12484_v2, 1 }
 0x2cb   :  { %v9884_v22 = vpack.c.bf16 %v2339_v48, %v2338_v38  ;;  %v17890_v48 = vld [vmem:[#allocation130_spill] sm:$0xff] }
 0x2cc   :  { %9877 = vmatprep.subr.bf16.mxu1 %v9876_v1 }
 0x2cd   :  { %3304 = vmatmul.mubr.f32.gmra.mrb[50].mxu0 %v17848_v14  ;;  %9879 = vmatpush3.bf16.msra.mxu1 %v9876_v1  ;;  %v2326_v14 = vld [vmem:[#allocation4 + $0x3f0] sm:$0xff] }
 0x2ce   :  { %3308 = vmatprep.mubr.f32.mxu0 %v12464_v56  ;;  %9881 = vmatprep.subr.bf16.mxu1 %v9880_v13  ;;  %v9862_v1 = vpack.c.bf16 %v2327_v30, %v2326_v14  ;;  %v2343_v30 = vld [vmem:[#allocation4 + $0x478] sm:$0xff] }
 0x2d0   :  { %9863 = vmatpush1.bf16.msra.mxu0 %v9862_v1  ;;  %v9892_v1 = vpack.c.bf16 %v2343_v30, %v2342_v19  ;;  %v17894_v19 = vld [vmem:[#allocation135_spill] sm:$0xff] }
 0x2d1   :  { %3309 = vmatmul.mubr.f32.gmra.mrb[52].mxu0 %v17849_v61  ;;  %v17851_v61 = vld [vmem:[#allocation101_spill] sm:$0xff]  ;;  %9883 = vmatpush3.bf16.msra.mxu1 %v9880_v13  ;;  %v12797_v13 = vsel %vm883_vm2, %v1321_v29, %v1323_v25  ;;  %v17856_v25 = vld [vmem:[#allocation106_spill] sm:$0xff]  ;;  %v1326_v30 = vrot.slane %v17894_v19, 2 }
 0x2d2   :  { %3313 = vmatprep.mubr.f32.mxu0 %v12477_v4  ;;  %9885 = vmatprep.subr.bf16.mxu1 %v9884_v22  ;;  %v17887_v29 = vld [vmem:[#allocation157_spill] sm:$0xff] }
 0x2d5   :  { %3314 = vmatmul.mubr.f32.gmra.mrb[54].mxu0 %v17850_v7  ;;  %v1243_v7 = vrot.slane %v12497_v15, 1  ;;  %v1245_v15 = vrot.slane %v376_v59, 1  ;;  %9887 = vmatpush3.bf16.msra.mxu1 %v9884_v22  ;;  %v17854_v22 = vld [vmem:[#allocation104_spill] sm:$0xff]  ;;  %v17888_v59 = vld [vmem:[#allocation126_spill] sm:$0xff] }
 0x2d6   :  { %3318 = vmatprep.mubr.f32.mxu0 %v12494_v11 }
 0x2d7   :  { %v12794_v2 = vsel %vm594_vm0, %v1242_v50, %v1243_v7  ;;  %v12802_v38 = vsel %vm594_vm0, %v1243_v7, %v1245_v15  ;;  %v17886_v7 = vld [vmem:[#allocation123_spill] sm:$0xff] }
 0x2d8   :  { %v17889_v50 = vld [vmem:[#allocation159_spill] sm:$0xff] }
 0x2d9   :  { %3319 = vmatmul.mubr.f32.gmra.mrb[56].mxu0 %v17851_v61  ;;  %v2340_v61 = vld [vmem:[#allocation4 + $0x460] sm:$0xff]  ;;  %v17892_v15 = vld [vmem:[#allocation131_spill] sm:$0xff] }
 0x2da   :  { %3323 = vmatprep.mubr.f32.mxu0 %v12502_v8  ;;  %v9888_v14 = vpack.c.bf16 %v2341_v60, %v2340_v61  ;;  %v17853_v60 = vld [vmem:[#allocation103_spill] sm:$0xff]  ;;  %v17885_v61 = vld [vmem:[#allocation154_spill] sm:$0xff] }
 0x2dc   :  { %9889 = vmatprep.subr.bf16.mxu1 %v9888_v14 }
 0x2dd   :  { %3324 = vmatmul.mubr.f32.gmra.mrb[58].mxu0 %v17852_v53  ;;  %9891 = vmatpush3.bf16.msra.mxu1 %v9888_v14  ;;  %v17893_v14 = vld [vmem:[#allocation128_spill] sm:$0xff] }
 0x2de   :  { %3328 = vmatprep.mubr.f32.mxu0 %v12789_v55  ;;  %9893 = vmatprep.subr.bf16.mxu1 %v9892_v1 }
 0x2e1   :  { %3329 = vmatmul.mubr.f32.gmra.mrb[60].mxu0 %v12794_v2  ;;  %9895 = vmatpush3.bf16.msra.mxu1 %v9892_v1  ;;  %v430_v1 = vld [vmem:[#allocation2 + $0x340] sm:$0x3] }
 0x2e2   :  { %3333 = vmatprep.mubr.f32.mxu0 %v12797_v13  ;;  %9896 = vmatprep.subr.bf16.mxu1 %v17656_v45  ;;  %v1247_v45 = vrot.slane %v17893_v14, 1 }
 0x2e4   :  { %9449 = vmatmul.mubr.f32.vlgmr.msra.gmra.mrb[0].mxu1 %v17823_v27  ;;  %v17882_v27 = vld [vmem:[#allocation121_spill] sm:$0xff] }
 0x2e5   :  { %3334 = vmatmul.mubr.f32.gmra.mrb[62].mxu0 %v12802_v38  ;;  %9451 = vmatprep.mubr.f32.mxu1 %v17825_v9  ;;  %v17884_v9 = vld [vmem:[#allocation125_spill] sm:$0xff] }
 0x2e6   :  { %3338 = vmatprep.mubr.f32.mxu0 %v12515_v43  ;;  %v17855_v43 = vld [vmem:[#allocation105_spill] sm:$0xff] }
 0x2e8   :  { %9452 = vmatmul.mubr.f32.gmra.mrb[2].mxu1 %v12328_v31  ;;  %v17857_v31 = vld [vmem:[#allocation108_spill] sm:$0xff] }
 0x2e9   :  { %3339 = vmatmul.mubr.f32.gmra.mrb[64].mxu0 %v17853_v60  ;;  %9454 = vmatprep.mubr.f32.mxu1 %v17828_v44  ;;  %v17883_v44 = vld [vmem:[#allocation152_spill] sm:$0xff]  ;;  %v17895_v60 = vld [vmem:[#allocation165_spill] sm:$0xff] }
 0x2ea   :  { %3343 = vmatprep.mubr.f32.mxu0 %v12521_v57  ;;  %v17881_v57 = vld [vmem:[#allocation149_spill] sm:$0xff] }
 0x2ec   :  { %9455 = vmatmul.mubr.f32.gmra.mrb[4].mxu1 %v12338_v47  ;;  %v17858_v47 = vld [vmem:[#allocation109_spill] sm:$0xff] }
 0x2ed   :  { %3344 = vmatmul.mubr.f32.gmra.mrb[66].mxu0 %v17854_v22  ;;  %9457 = vmatprep.mubr.f32.mxu1 %v12344_v39  ;;  %v17859_v39 = vld [vmem:[#allocation110_spill] sm:$0xff]  ;;  %v17896_v22 = vld [vmem:[#allocation133_spill] sm:$0xff] }
 0x2ee   :  { %3348 = vmatprep.mubr.f32.mxu0 %v12528_v35 }
 0x2f0   :  { %9458 = vmatmul.mubr.f32.gmra.mrb[6].mxu1 %v12350_v40  ;;  %v17860_v40 = vld [vmem:[#allocation112_spill] sm:$0xff] }
 0x2f1   :  { %3349 = vmatmul.mubr.f32.gmra.mrb[68].mxu0 %v17855_v43  ;;  %9460 = vmatprep.mubr.f32.mxu1 %v12356_v62  ;;  %v17861_v62 = vld [vmem:[#allocation114_spill] sm:$0xff] }
 0x2f2   :  { %3353 = vmatprep.mubr.f32.mxu0 %v12534_v63 }
 0x2f4   :  { %9461 = vmatmul.mubr.f32.gmra.mrb[8].mxu1 %v12362_v58  ;;  %v17862_v58 = vld [vmem:[#allocation117_spill] sm:$0xff] }
 0x2f5   :  { %3354 = vmatmul.mubr.f32.gmra.mrb[70].mxu0 %v17856_v25  ;;  %9463 = vmatprep.mubr.f32.mxu1 %v12370_v12  ;;  %v17863_v12 = vld [vmem:[#allocation119_spill] sm:$0xff] }
 0x2f6   :  { %3358 = vmatprep.mubr.f32.mxu0 %v12541_v16 }
 0x2f8   :  { %9464 = vmatmul.mubr.f32.gmra.mrb[10].mxu1 %v12376_v32  ;;  %v17864_v32 = vld [vmem:[#allocation122_spill] sm:$0xff] }
 0x2f9   :  { %3359 = vmatmul.mubr.f32.gmra.mrb[72].mxu0 %v17857_v31  ;;  %9466 = vmatprep.mubr.f32.mxu1 %v12383_v33  ;;  %v17865_v33 = vld [vmem:[#allocation124_spill] sm:$0xff] }
 0x2fa   :  { %3363 = vmatprep.mubr.f32.mxu0 %v12547_v41 }
 0x2fc   :  { %9467 = vmatmul.mubr.f32.gmra.mrb[12].mxu1 %v12389_v5  ;;  %v17866_v5 = vld [vmem:[#allocation127_spill] sm:$0xff] }
 0x2fd   :  { %3364 = vmatmul.mubr.f32.gmra.mrb[74].mxu0 %v17858_v47  ;;  %9469 = vmatprep.mubr.f32.mxu1 %v12397_v20  ;;  %v17867_v20 = vld [vmem:[#allocation129_spill] sm:$0xff] }
 0x2fe   :  { %3368 = vmatprep.mubr.f32.mxu0 %v12554_v49 }
 0x300   :  { %9470 = vmatmul.mubr.f32.gmra.mrb[14].mxu1 %v12403_v0  ;;  %v17868_v0 = vld [vmem:[#allocation132_spill] sm:$0xff] }
 0x301   :  { %3369 = vmatmul.mubr.f32.gmra.mrb[76].mxu0 %v17859_v39  ;;  %9472 = vmatprep.mubr.f32.mxu1 %v12410_v34  ;;  %v17869_v34 = vld [vmem:[#allocation134_spill] sm:$0xff] }
 0x302   :  { %3373 = vmatprep.mubr.f32.mxu0 %v12560_v54 }
 0x304   :  { %9473 = vmatmul.mubr.f32.gmra.mrb[16].mxu1 %v12416_v6  ;;  %v17870_v6 = vld [vmem:[#allocation111_spill] sm:$0xff] }
 0x305   :  { %3374 = vmatmul.mubr.f32.gmra.mrb[78].mxu0 %v17860_v40  ;;  %9475 = vmatprep.mubr.f32.mxu1 %v12424_v17  ;;  %v17871_v17 = vld [vmem:[#allocation137_spill] sm:$0xff] }
 0x306   :  { %3378 = vmatprep.mubr.f32.mxu0 %v12567_v23 }
 0x308   :  { %9476 = vmatmul.mubr.f32.gmra.mrb[18].mxu1 %v12430_v28  ;;  %v17872_v28 = vld [vmem:[#allocation115_spill] sm:$0xff] }
 0x309   :  { %3379 = vmatmul.mubr.f32.gmra.mrb[80].mxu0 %v17861_v62  ;;  %9478 = vmatprep.mubr.f32.mxu1 %v12437_v3  ;;  %v17873_v3 = vld [vmem:[#allocation139_spill] sm:$0xff] }
 0x30a   :  { %3383 = vmatprep.mubr.f32.mxu0 %v12573_v18 }
 0x30c   :  { %9479 = vmatmul.mubr.f32.gmra.mrb[20].mxu1 %v12443_v21  ;;  %v17874_v21 = vld [vmem:[#allocation113_spill] sm:$0xff] }
 0x30d   :  { %3384 = vmatmul.mubr.f32.gmra.mrb[82].mxu0 %v17862_v58  ;;  %9481 = vmatprep.mubr.f32.mxu1 %v12451_v42  ;;  %v17875_v42 = vld [vmem:[#allocation142_spill] sm:$0xff] }
 0x30e   :  { %3388 = vmatprep.mubr.f32.mxu0 %v12580_v26 }
 0x310   :  { %9482 = vmatmul.mubr.f32.gmra.mrb[22].mxu1 %v12457_v51  ;;  %v17876_v51 = vld [vmem:[#allocation116_spill] sm:$0xff] }
 0x311   :  { %3389 = vmatmul.mubr.f32.gmra.mrb[84].mxu0 %v17863_v12  ;;  %9484 = vmatprep.mubr.f32.mxu1 %v12464_v56  ;;  %v17877_v56 = vld [vmem:[#allocation144_spill] sm:$0xff] }
 0x312   :  { %3393 = vmatprep.mubr.f32.mxu0 %v12586_v46 }
 0x314   :  { %9485 = vmatmul.mubr.f32.gmra.mrb[24].mxu1 %v12477_v4  ;;  %v17878_v4 = vld [vmem:[#allocation120_spill] sm:$0xff] }
 0x315   :  { %3394 = vmatmul.mubr.f32.gmra.mrb[86].mxu0 %v17864_v32  ;;  %9487 = vmatprep.mubr.f32.mxu1 %v12494_v11  ;;  %v17879_v11 = vld [vmem:[#allocation147_spill] sm:$0xff] }
 0x316   :  { %3398 = vmatprep.mubr.f32.mxu0 %v12593_v10 }
 0x318   :  { %9488 = vmatmul.mubr.f32.gmra.mrb[26].mxu1 %v12502_v8  ;;  %v17880_v8 = vld [vmem:[#allocation118_spill] sm:$0xff] }
 0x319   :  { %3399 = vmatmul.mubr.f32.gmra.mrb[88].mxu0 %v17865_v33  ;;  %9490 = vmatprep.mubr.f32.mxu1 %v12789_v55  ;;  %v17891_v55 = vld [vmem:[#allocation162_spill] sm:$0xff] }
 0x31a   :  { %3403 = vmatprep.mubr.f32.mxu0 %v12599_v52 }
 0x31c   :  { %9491 = vmatmul.mubr.f32.gmra.mrb[28].mxu1 %v12797_v13  ;;  %v1325_v13 = vrot.slane %v17893_v14, 2 }
 0x31d   :  { %3404 = vmatmul.mubr.f32.gmra.mrb[90].mxu0 %v17866_v5 }
 0x31e   :  { %3408 = vmatprep.mubr.f32.mxu0 %v12606_v36 }
 0x321   :  { %3409 = vmatmul.mubr.f32.gmra.mrb[92].mxu0 %v17867_v20 }
 0x322   :  { %3413 = vmatprep.mubr.f32.mxu0 %v12612_v37 }
 0x325   :  { %3414 = vmatmul.mubr.f32.gmra.mrb[94].mxu0 %v17868_v0 }
 0x326   :  { %3418 = vmatprep.mubr.f32.mxu0 %v12619_v24 }
 0x329   :  { %3419 = vmatmul.mubr.f32.gmra.mrb[96].mxu0 %v17869_v34 }
 0x32a   :  { %3423 = vmatprep.mubr.f32.mxu0 %v17870_v6 }
 0x32d   :  { %3424 = vmatmul.mubr.f32.gmra.mrb[98].mxu0 %v17871_v17 }
 0x32e   :  { %3428 = vmatprep.mubr.f32.mxu0 %v17872_v28 }
 0x331   :  { %3429 = vmatmul.mubr.f32.gmra.mrb[100].mxu0 %v17873_v3 }
 0x332   :  { %3433 = vmatprep.mubr.f32.mxu0 %v17874_v21 }
 0x335   :  { %3434 = vmatmul.mubr.f32.gmra.mrb[102].mxu0 %v17875_v42 }
 0x336   :  { %3438 = vmatprep.mubr.f32.mxu0 %v17876_v51 }
 0x339   :  { %3439 = vmatmul.mubr.f32.gmra.mrb[104].mxu0 %v17877_v56 }
 0x33a   :  { %3443 = vmatprep.mubr.f32.mxu0 %v17878_v4 }
 0x33d   :  { %3444 = vmatmul.mubr.f32.gmra.mrb[106].mxu0 %v17879_v11  ;;  %v17897_v11 = vld [vmem:[#allocation167_spill] sm:$0xff] }
 0x33e   :  { %3448 = vmatprep.mubr.f32.mxu0 %v17880_v8 }
 0x341   :  { %3449 = vmatmul.mubr.f32.gmra.mrb[108].mxu0 %v17881_v57  ;;  %v12906_v57 = vld [vmem:[#allocation2 + $0x1a8] sm:$0x3] }
 0x342   :  { %3453 = vmatprep.mubr.f32.mxu0 %v17882_v27 }
 0x345   :  { %3454 = vmatmul.mubr.f32.gmra.mrb[110].mxu0 %v17883_v44 }
 0x346   :  { %3458 = vmatprep.mubr.f32.mxu0 %v17884_v9 }
 0x349   :  { %3459 = vmatmul.mubr.f32.gmra.mrb[112].mxu0 %v17885_v61  ;;  %v1328_v61 = vrot.slane %v430_v1, 2 }
 0x34a   :  { %3463 = vmatprep.mubr.f32.mxu0 %v17886_v7 }
 0x34d   :  { %3464 = vmatmul.mubr.f32.gmra.mrb[114].mxu0 %v17887_v29  ;;  %v1248_v29 = vrot.slane %v17894_v19, 1  ;;  %v1250_v19 = vrot.slane %v430_v1, 1  ;;  %v17914_v1 = vld [vmem:[#allocation81_spill] sm:$0xff] }
 0x34e   :  { %3468 = vmatprep.mubr.f32.mxu0 %v17888_v59 }
 0x34f   :  { %v12912_v14 = vsel %vm594_vm0, %v1247_v45, %v1248_v29  ;;  %v17898_v45 = vld [vmem:[#allocation49_spill] sm:$0xff] }
 0x351   :  { %3469 = vmatmul.mubr.f32.gmra.mrb[116].mxu0 %v17889_v50  ;;  %v12899_v50 = vsel %vm883_vm2, %v1325_v13, %v1326_v30  ;;  %v12915_v13 = vsel %vm883_vm2, %v1326_v30, %v1328_v61  ;;  %v10936_v61 = vld [vmem:[#allocation2 + $0x38] sm:$0xff]  ;;  %v10950_v30 = vld [vmem:[#allocation2 + $0xe0] sm:$0xff] }
 0x352   :  { %3473 = vmatprep.mubr.f32.mxu0 %v17890_v48 }
 0x355   :  { %3474 = vmatmul.mubr.f32.gmra.mrb[118].mxu0 %v17891_v55  ;;  %v12901_v55 = vld [vmem:[#allocation2] sm:$0xff] }
 0x356   :  { %3478 = vmatprep.mubr.f32.mxu0 %v17892_v15  ;;  %v12904_v44 = vrot.slane %v12901_v55, 2 }
 0x358   :  { %9493 = vmatprep.mubr.f32.mxu1 %v12904_v44 }
 0x359   :  { %3479 = vmatmul.mubr.f32.gmra.mrb[120].mxu0 %v17895_v60  ;;  %v1549_v60 = vrot.slane %v12906_v57, 2 }
 0x35a   :  { %3483 = vmatprep.mubr.f32.mxu0 %v17896_v22 }
 0x35b   :  { %v1550_v56 = vsel %vm883_vm2, %v12904_v44, %v1549_v60  ;;  %v10951_v60 = vld [vmem:[#allocation2 + $0xf0] sm:$0xff] }
 0x35c   :  { %9494 = vmatmul.mubr.f32.gmra.mrb[30].mxu1 %v1550_v56  ;;  %v10935_v56 = vld [vmem:[#allocation2 + $0x30] sm:$0xff] }
 0x35d   :  { %3484 = vmatmul.mubr.f32.gmra.mrb[122].mxu0 %v17897_v11  ;;  %9496 = vmatprep.mubr.f32.mxu1 %v12528_v35  ;;  %v12924_v11 = vsel %vm594_vm0, %v1248_v29, %v1250_v19  ;;  %v17899_v35 = vld [vmem:[#allocation52_spill] sm:$0xff]  ;;  %v10948_v29 = vld [vmem:[#allocation2 + $0xc8] sm:$0xff]  ;;  %v17916_v19 = vld [vmem:[#allocation85_spill] sm:$0xff] }
 0x35e   :  { %3488 = vmatprep.mubr.f32.mxu0 %v12899_v50 }
 0x360   :  { %9497 = vmatmul.mubr.f32.gmra.mrb[32].mxu1 %v12534_v63  ;;  %v17900_v63 = vld [vmem:[#allocation53_spill] sm:$0xff] }
 0x361   :  { %3489 = vmatmul.mubr.f32.gmra.mrb[124].mxu0 %v12912_v14  ;;  %9499 = vmatprep.mubr.f32.mxu1 %v12541_v16  ;;  %v10937_v16 = vld [vmem:[#allocation2 + $0x48] sm:$0xff] }
 0x362   :  { %3493 = vmatprep.mubr.f32.mxu0 %v12915_v13 }
 0x364   :  { %9500 = vmatmul.mubr.f32.gmra.mrb[34].mxu1 %v12547_v41  ;;  %v17901_v41 = vld [vmem:[#allocation56_spill] sm:$0xff] }
 0x365   :  { %3494 = vmatmul.mubr.f32.gmra.mrb[126].mxu0 %v12924_v11  ;;  %9502 = vmatprep.mubr.f32.mxu1 %v12554_v49  ;;  %v10938_v49 = vld [vmem:[#allocation2 + $0x50] sm:$0xff] }
 0x366   :  { %3563 = vmatprep.mubr.f32.mxu0 %v17898_v45  ;;  %v17917_v45 = vld [vmem:[#allocation88_spill] sm:$0xff] }
 0x368   :  { %9503 = vmatmul.mubr.f32.gmra.mrb[36].mxu1 %v12560_v54  ;;  %v17902_v54 = vld [vmem:[#allocation57_spill] sm:$0xff] }
 0x369   :  { %3564 = vmatmul.mubr.f32.vlgmr.msra.gmra.mrb[0].mxu0 %v10935_v56  ;;  %9505 = vmatprep.mubr.f32.mxu1 %v12567_v23  ;;  %v10939_v23 = vld [vmem:[#allocation2 + $0x60] sm:$0xff]  ;;  %v10954_v56 = vld [vmem:[#allocation2 + $0x110] sm:$0xff] }
 0x36a   :  { %3568 = vmatprep.mubr.f32.mxu0 %v17899_v35  ;;  %v17918_v35 = vld [vmem:[#allocation89_spill] sm:$0xff] }
 0x36c   :  { %9506 = vmatmul.mubr.f32.gmra.mrb[38].mxu1 %v12573_v18  ;;  %v17903_v18 = vld [vmem:[#allocation60_spill] sm:$0xff] }
 0x36d   :  { %3569 = vmatmul.mubr.f32.gmra.mrb[2].mxu0 %v10936_v61  ;;  %9508 = vmatprep.mubr.f32.mxu1 %v12580_v26  ;;  %v10940_v26 = vld [vmem:[#allocation2 + $0x68] sm:$0xff]  ;;  %v10955_v61 = vld [vmem:[#allocation2 + $0x120] sm:$0xff] }
 0x36e   :  { %3573 = vmatprep.mubr.f32.mxu0 %v17900_v63  ;;  %v17919_v63 = vld [vmem:[#allocation92_spill] sm:$0xff] }
 0x370   :  { %9509 = vmatmul.mubr.f32.gmra.mrb[40].mxu1 %v12586_v46  ;;  %v17904_v46 = vld [vmem:[#allocation61_spill] sm:$0xff] }
 0x371   :  { %3574 = vmatmul.mubr.f32.gmra.mrb[4].mxu0 %v10937_v16  ;;  %9511 = vmatprep.mubr.f32.mxu1 %v12593_v10  ;;  %v10941_v10 = vld [vmem:[#allocation2 + $0x78] sm:$0xff] }
 0x372   :  { %3578 = vmatprep.mubr.f32.mxu0 %v17901_v41  ;;  %v10956_v41 = vld [vmem:[#allocation2 + $0x128] sm:$0xff] }
 0x374   :  { %9512 = vmatmul.mubr.f32.gmra.mrb[42].mxu1 %v12599_v52  ;;  %v17905_v52 = vld [vmem:[#allocation64_spill] sm:$0xff] }
 0x375   :  { %3579 = vmatmul.mubr.f32.gmra.mrb[6].mxu0 %v10938_v49  ;;  %9514 = vmatprep.mubr.f32.mxu1 %v12606_v36  ;;  %v10942_v36 = vld [vmem:[#allocation2 + $0x80] sm:$0xff] }
 0x376   :  { %3583 = vmatprep.mubr.f32.mxu0 %v17902_v54  ;;  %v17920_v54 = vld [vmem:[#allocation93_spill] sm:$0xff] }
 0x378   :  { %9515 = vmatmul.mubr.f32.gmra.mrb[44].mxu1 %v12612_v37  ;;  %v17906_v37 = vld [vmem:[#allocation65_spill] sm:$0xff] }
 0x379   :  { %3584 = vmatmul.mubr.f32.gmra.mrb[8].mxu0 %v10939_v23  ;;  %9517 = vmatprep.mubr.f32.mxu1 %v12619_v24  ;;  %v10943_v24 = vld [vmem:[#allocation2 + $0x90] sm:$0xff]  ;;  %v10957_v23 = vld [vmem:[#allocation2 + $0x138] sm:$0xff] }
 0x37a   :  { %3588 = vmatprep.mubr.f32.mxu0 %v17903_v18  ;;  %v17921_v18 = vld [vmem:[#allocation96_spill] sm:$0xff] }
 0x37c   :  { %9518 = vmatmul.mubr.f32.gmra.mrb[46].mxu1 %v17870_v6  ;;  %v17907_v6 = vld [vmem:[#allocation68_spill] sm:$0xff] }
 0x37d   :  { %3589 = vmatmul.mubr.f32.gmra.mrb[10].mxu0 %v10940_v26  ;;  %9520 = vmatprep.mubr.f32.mxu1 %v17872_v28  ;;  %v10944_v28 = vld [vmem:[#allocation2 + $0x98] sm:$0xff] }
 0x37e   :  { %3593 = vmatprep.mubr.f32.mxu0 %v17904_v46 }
 0x380   :  { %9521 = vmatmul.mubr.f32.gmra.mrb[48].mxu1 %v17874_v21  ;;  %v17908_v21 = vld [vmem:[#allocation69_spill] sm:$0xff] }
 0x381   :  { %3594 = vmatmul.mubr.f32.gmra.mrb[12].mxu0 %v10941_v10  ;;  %9523 = vmatprep.mubr.f32.mxu1 %v17876_v51  ;;  %v10945_v51 = vld [vmem:[#allocation2 + $0xa8] sm:$0xff]  ;;  %v10958_v10 = vld [vmem:[#allocation2 + $0x140] sm:$0xff] }
 0x382   :  { %3598 = vmatprep.mubr.f32.mxu0 %v17905_v52  ;;  %v17922_v52 = vld [vmem:[#allocation97_spill] sm:$0xff] }
 0x384   :  { %9524 = vmatmul.mubr.f32.gmra.mrb[50].mxu1 %v17878_v4  ;;  %v17909_v4 = vld [vmem:[#allocation72_spill] sm:$0xff] }
 0x385   :  { %3599 = vmatmul.mubr.f32.gmra.mrb[14].mxu0 %v10942_v36  ;;  %9526 = vmatprep.mubr.f32.mxu1 %v17880_v8  ;;  %v10946_v8 = vld [vmem:[#allocation2 + $0xb0] sm:$0xff] }
 0x386   :  { %3603 = vmatprep.mubr.f32.mxu0 %v17906_v37  ;;  %v10959_v36 = vld [vmem:[#allocation2 + $0x150] sm:$0xff]  ;;  %v17923_v37 = vld [vmem:[#allocation100_spill] sm:$0xff] }
 0x388   :  { %9527 = vmatmul.mubr.f32.gmra.mrb[52].mxu1 %v17882_v27  ;;  %v17910_v27 = vld [vmem:[#allocation73_spill] sm:$0xff] }
 0x389   :  { %3604 = vmatmul.mubr.f32.gmra.mrb[16].mxu0 %v10943_v24  ;;  %9529 = vmatprep.mubr.f32.mxu1 %v17884_v9  ;;  %v10947_v9 = vld [vmem:[#allocation2 + $0xc0] sm:$0xff] }
 0x38a   :  { %3608 = vmatprep.mubr.f32.mxu0 %v17907_v6 }
 0x38c   :  { %9530 = vmatmul.mubr.f32.gmra.mrb[54].mxu1 %v17886_v7  ;;  %v17911_v7 = vld [vmem:[#allocation76_spill] sm:$0xff] }
 0x38d   :  { %3609 = vmatmul.mubr.f32.gmra.mrb[18].mxu0 %v10944_v28  ;;  %9532 = vmatprep.mubr.f32.mxu1 %v17888_v59  ;;  %v17912_v59 = vld [vmem:[#allocation77_spill] sm:$0xff]  ;;  %v10960_v28 = vld [vmem:[#allocation2 + $0x158] sm:$0xff] }
 0x38e   :  { %3613 = vmatprep.mubr.f32.mxu0 %v17908_v21  ;;  %v17924_v21 = vld [vmem:[#allocation101_spill] sm:$0xff] }
 0x390   :  { %9533 = vmatmul.mubr.f32.gmra.mrb[56].mxu1 %v17890_v48  ;;  %v10949_v48 = vld [vmem:[#allocation2 + $0xd8] sm:$0xff] }
 0x391   :  { %3614 = vmatmul.mubr.f32.gmra.mrb[20].mxu0 %v10945_v51  ;;  %9535 = vmatprep.mubr.f32.mxu1 %v17892_v15  ;;  %v17913_v15 = vld [vmem:[#allocation80_spill] sm:$0xff]  ;;  %v10961_v51 = vld [vmem:[#allocation2 + $0x168] sm:$0xff] }
 0x392   :  { %3618 = vmatprep.mubr.f32.mxu0 %v17909_v4 }
 0x394   :  { %9536 = vmatmul.mubr.f32.gmra.mrb[58].mxu1 %v17896_v22  ;;  %v10952_v22 = vld [vmem:[#allocation2 + $0xf8] sm:$0xff] }
 0x395   :  { %3619 = vmatmul.mubr.f32.gmra.mrb[22].mxu0 %v10946_v8  ;;  %9538 = vmatprep.mubr.f32.mxu1 %v12899_v50  ;;  %v17915_v50 = vld [vmem:[#allocation84_spill] sm:$0xff] }
 0x396   :  { %3623 = vmatprep.mubr.f32.mxu0 %v17910_v27  ;;  %v10962_v27 = vld [vmem:[#allocation2 + $0x170] sm:$0xff] }
 0x398   :  { %9539 = vmatmul.mubr.f32.gmra.mrb[60].mxu1 %v12915_v13  ;;  %v10953_v13 = vld [vmem:[#allocation2 + $0x108] sm:$0xff] }
 0x399   :  { %3624 = vmatmul.mubr.f32.gmra.mrb[24].mxu0 %v10947_v9  ;;  %9541 = vmatprep.mubr.f32.mxu1 %v12904_v44  ;;  %v13003_v9 = vrot.slane %v12901_v55, 1 }
 0x39a   :  { %3628 = vmatprep.mubr.f32.mxu0 %v17911_v7  ;;  %v10963_v7 = vld [vmem:[#allocation2 + $0x180] sm:$0xff] }
 0x39d   :  { %3629 = vmatmul.mubr.f32.gmra.mrb[26].mxu0 %v10948_v29  ;;  %v1471_v29 = vrot.slane %v12906_v57, 1 }
 0x39e   :  { %3633 = vmatprep.mubr.f32.mxu0 %v17912_v59 }
 0x3a1   :  { %3634 = vmatmul.mubr.f32.gmra.mrb[28].mxu0 %v10949_v48  ;;  %v13011_v48 = vld [vmem:[#allocation2 + $0x358] sm:$0x3] }
 0x3a2   :  { %3638 = vmatprep.mubr.f32.mxu0 %v17913_v15  ;;  %v10964_v15 = vld [vmem:[#allocation2 + $0x188] sm:$0xff] }
 0x3a5   :  { %3639 = vmatmul.mubr.f32.gmra.mrb[30].mxu0 %v10950_v30  ;;  %v1554_v30 = vrot.slane %v13011_v48, 2 }
 0x3a6   :  { %3643 = vmatprep.mubr.f32.mxu0 %v17914_v1 }
 0x3a9   :  { %3644 = vmatmul.mubr.f32.gmra.mrb[32].mxu0 %v10951_v60  ;;  %v10965_v60 = vld [vmem:[#allocation2 + $0x1e0] sm:$0xff] }
 0x3aa   :  { %3648 = vmatprep.mubr.f32.mxu0 %v17915_v50 }
 0x3ad   :  { %3649 = vmatmul.mubr.f32.gmra.mrb[34].mxu0 %v10952_v22 }
 0x3ae   :  { %3653 = vmatprep.mubr.f32.mxu0 %v17916_v19  ;;  %v10967_v19 = vld [vmem:[#allocation2 + $0x1f8] sm:$0xff] }
 0x3b1   :  { %3654 = vmatmul.mubr.f32.gmra.mrb[36].mxu0 %v10953_v13 }
 0x3b2   :  { %3658 = vmatprep.mubr.f32.mxu0 %v17917_v45 }
 0x3b5   :  { %3659 = vmatmul.mubr.f32.gmra.mrb[38].mxu0 %v10954_v56 }
 0x3b6   :  { %3663 = vmatprep.mubr.f32.mxu0 %v17918_v35 }
 0x3b7   :  { %v12979_v16 = vpop.f32.mrb[0].mxu1 }
 0x3b8   :  { %v12981_v49 = vpop.f32.mrb[1].mxu1 }
 0x3b9   :  { %3664 = vmatmul.mubr.f32.gmra.mrb[40].mxu0 %v10955_v61 }
 0x3ba   :  { %3668 = vmatprep.mubr.f32.mxu0 %v17919_v63 }
 0x3bb   :  { %v12985_v26 = vpop.f32.mrb[2].mxu1 }
 0x3bc   :  { %v12987_v46 = vpop.f32.mrb[3].mxu1 }
 0x3bd   :  { %3669 = vmatmul.mubr.f32.gmra.mrb[42].mxu0 %v10956_v41 }
 0x3be   :  { %3673 = vmatprep.mubr.f32.mxu0 %v17920_v54 }
 0x3bf   :  { %v12991_v24 = vpop.f32.mrb[4].mxu1 }
 0x3c0   :  { %v12993_v6 = vpop.f32.mrb[5].mxu1 }
 0x3c1   :  { %3674 = vmatmul.mubr.f32.gmra.mrb[44].mxu0 %v10957_v23 }
 0x3c2   :  { %3678 = vmatprep.mubr.f32.mxu0 %v17921_v18 }
 0x3c3   :  { %v12997_v4 = vpop.f32.mrb[6].mxu1 }
 0x3c4   :  { %v12999_v8 = vpop.f32.mrb[7].mxu1 }
 0x3c5   :  { %3679 = vmatmul.mubr.f32.gmra.mrb[46].mxu0 %v10958_v10 }
 0x3c6   :  { %3683 = vmatprep.mubr.f32.mxu0 %v17922_v52 }
 0x3c7   :  { %v13007_v59 = vpop.f32.mrb[8].mxu1 }
 0x3c9   :  { %3684 = vmatmul.mubr.f32.gmra.mrb[48].mxu0 %v10959_v36 }
 0x3ca   :  { %3688 = vmatprep.mubr.f32.mxu0 %v17923_v37 }
 0x3cd   :  { %3689 = vmatmul.mubr.f32.gmra.mrb[50].mxu0 %v10960_v28 }
 0x3ce   :  { %3693 = vmatprep.mubr.f32.mxu0 %v17924_v21 }
 0x3d1   :  { %3694 = vmatmul.mubr.f32.gmra.mrb[52].mxu0 %v10961_v51  ;;  %v17925_v51 = vld [vmem:[#allocation144_spill] sm:$0xff] }
 0x3d2   :  { %3698 = vmatprep.mubr.f32.mxu0 %v17852_v53  ;;  %v13009_v53 = vpop.f32.mrb[9].mxu1 }
 0x3d3   :  { %v13020_v57 = vpop.f32.mrb[10].mxu1 }
 0x3d4   :  { %v13022_v1 = vpop.f32.mrb[11].mxu1 }
 0x3d5   :  { %3699 = vmatmul.mubr.f32.gmra.mrb[54].mxu0 %v10962_v27  ;;  %v13027_v50 = vpop.f32.mrb[12].mxu1  ;;  %v17926_v27 = vld [vmem:[#allocation147_spill] sm:$0xff] }
 0x3d6   :  { %3703 = vmatprep.mubr.f32.mxu0 %v12794_v2  ;;  %v1472_v2 = vsel %vm594_vm0, %v13003_v9, %v1471_v29  ;;  %v13029_v22 = vpop.f32.mrb[13].mxu1 }
 0x3d7   :  { %v13033_v13 = vpop.f32.mrb[14].mxu1 }
 0x3d8   :  { %v13035_v45 = vpop.f32.mrb[15].mxu1 }
 0x3d9   :  { %3704 = vmatmul.mubr.f32.gmra.mrb[56].mxu0 %v10963_v7  ;;  %v13039_v56 = vpop.f32.mrb[16].mxu1 }
 0x3da   :  { %3708 = vmatprep.mubr.f32.mxu0 %v12802_v38  ;;  %v1555_v38 = vsel %vm883_vm2, %v12904_v44, %v1554_v30  ;;  %v10966_v44 = vld [vmem:[#allocation2 + $0x1e8] sm:$0xff]  ;;  %v13041_v35 = vpop.f32.mrb[17].mxu1  ;;  %v17928_v30 = vld [vmem:[#allocation152_spill] sm:$0xff] }
 0x3db   :  { %9542 = vmatmul.mubr.f32.gmra.mrb[62].mxu1 %v1555_v38  ;;  %v13045_v61 = vpop.f32.mrb[18].mxu1 }
 0x3dc   :  { %v13047_v63 = vpop.f32.mrb[19].mxu1 }
 0x3dd   :  { %3709 = vmatmul.mubr.f32.gmra.mrb[58].mxu0 %v10964_v15  ;;  %v17927_v15 = vld [vmem:[#allocation149_spill] sm:$0xff] }
 0x3de   :  { %3713 = vmatprep.mubr.f32.mxu0 %v13003_v9 }
 0x3df   :  { %v13051_v41 = vpop.f32.mrb[20].mxu1 }
 0x3e0   :  { %v13053_v54 = vpop.f32.mrb[21].mxu1 }
 0x3e1   :  { %3714 = vmatmul.mubr.f32.gmra.mrb[60].mxu0 %v12901_v55 }
 0x3e2   :  { %3718 = vmatprep.mubr.f32.mxu0 %v1472_v2 }
 0x3e3   :  { %v13057_v23 = vpop.f32.mrb[22].mxu1 }
 0x3e4   :  { %v13059_v18 = vpop.f32.mrb[23].mxu1 }
 0x3e5   :  { %3719 = vmatmul.mubr.f32.gmra.mrb[62].mxu0 %v12901_v55 }
 0x3e6   :  { %3723 = vmatprep.mubr.f32.mxu0 %v17855_v43  ;;  %v10968_v43 = vld [vmem:[#allocation2 + $0x200] sm:$0xff] }
 0x3e7   :  { %v13063_v10 = vpop.f32.mrb[24].mxu1 }
 0x3e8   :  { %v13065_v52 = vpop.f32.mrb[25].mxu1 }
 0x3e9   :  { %3724 = vmatmul.mubr.f32.gmra.mrb[64].mxu0 %v10965_v60 }
 0x3ea   :  { %3728 = vmatprep.mubr.f32.mxu0 %v17856_v25  ;;  %v10969_v25 = vld [vmem:[#allocation2 + $0x210] sm:$0xff] }
 0x3eb   :  { %v13069_v36 = vpop.f32.mrb[26].mxu1 }
 0x3ec   :  { %v13071_v37 = vpop.f32.mrb[27].mxu1 }
 0x3ed   :  { %3729 = vmatmul.mubr.f32.gmra.mrb[66].mxu0 %v10966_v44 }
 0x3ee   :  { %3733 = vmatprep.mubr.f32.mxu0 %v17857_v31  ;;  %v10970_v31 = vld [vmem:[#allocation2 + $0x218] sm:$0xff] }
 0x3ef   :  { %v13075_v28 = vpop.f32.mrb[28].mxu1 }
 0x3f0   :  { %v13077_v21 = vpop.f32.mrb[29].mxu1 }
 0x3f1   :  { %3734 = vmatmul.mubr.f32.gmra.mrb[68].mxu0 %v10967_v19 }
 0x3f2   :  { %3738 = vmatprep.mubr.f32.mxu0 %v17858_v47  ;;  %v10971_v47 = vld [vmem:[#allocation2 + $0x228] sm:$0xff] }
 0x3f5   :  { %3739 = vmatmul.mubr.f32.gmra.mrb[70].mxu0 %v10968_v43  ;;  %v10986_v43 = vld [vmem:[#allocation2 + $0x2d8] sm:$0xff] }
 0x3f6   :  { %3743 = vmatprep.mubr.f32.mxu0 %v17859_v39  ;;  %v10972_v39 = vld [vmem:[#allocation2 + $0x230] sm:$0xff] }
 0x3f9   :  { %3744 = vmatmul.mubr.f32.gmra.mrb[72].mxu0 %v10969_v25  ;;  %v17929_v25 = vld [vmem:[#allocation154_spill] sm:$0xff] }
 0x3fa   :  { %3748 = vmatprep.mubr.f32.mxu0 %v17860_v40  ;;  %v10973_v40 = vld [vmem:[#allocation2 + $0x240] sm:$0xff] }
 0x3fd   :  { %3749 = vmatmul.mubr.f32.gmra.mrb[74].mxu0 %v10970_v31 }
 0x3fe   :  { %3753 = vmatprep.mubr.f32.mxu0 %v17861_v62  ;;  %v10974_v62 = vld [vmem:[#allocation2 + $0x248] sm:$0xff] }
 0x401   :  { %3754 = vmatmul.mubr.f32.gmra.mrb[76].mxu0 %v10971_v47 }
 0x402   :  { %3758 = vmatprep.mubr.f32.mxu0 %v17862_v58  ;;  %v10975_v58 = vld [vmem:[#allocation2 + $0x258] sm:$0xff] }
 0x405   :  { %3759 = vmatmul.mubr.f32.gmra.mrb[78].mxu0 %v10972_v39 }
 0x406   :  { %3763 = vmatprep.mubr.f32.mxu0 %v17863_v12  ;;  %v10976_v12 = vld [vmem:[#allocation2 + $0x260] sm:$0xff] }
 0x409   :  { %3764 = vmatmul.mubr.f32.gmra.mrb[80].mxu0 %v10973_v40  ;;  %v10987_v40 = vld [vmem:[#allocation2 + $0x2e8] sm:$0xff] }
 0x40a   :  { %3768 = vmatprep.mubr.f32.mxu0 %v17864_v32  ;;  %v10977_v32 = vld [vmem:[#allocation2 + $0x270] sm:$0xff] }
 0x40d   :  { %3769 = vmatmul.mubr.f32.gmra.mrb[82].mxu0 %v10974_v62  ;;  %v17931_v62 = vld [vmem:[#allocation157_spill] sm:$0xff] }
 0x40e   :  { %3773 = vmatprep.mubr.f32.mxu0 %v17865_v33  ;;  %v10978_v33 = vld [vmem:[#allocation2 + $0x278] sm:$0xff] }
 0x411   :  { %3774 = vmatmul.mubr.f32.gmra.mrb[84].mxu0 %v10975_v58 }
 0x412   :  { %3778 = vmatprep.mubr.f32.mxu0 %v17866_v5  ;;  %v10979_v5 = vld [vmem:[#allocation2 + $0x288] sm:$0xff] }
 0x415   :  { %3779 = vmatmul.mubr.f32.gmra.mrb[86].mxu0 %v10976_v12 }
 0x416   :  { %3783 = vmatprep.mubr.f32.mxu0 %v17867_v20  ;;  %v10980_v20 = vld [vmem:[#allocation2 + $0x290] sm:$0xff] }
 0x419   :  { %3784 = vmatmul.mubr.f32.gmra.mrb[88].mxu0 %v10977_v32 }
 0x41a   :  { %3788 = vmatprep.mubr.f32.mxu0 %v17868_v0  ;;  %v10981_v0 = vld [vmem:[#allocation2 + $0x2a0] sm:$0xff] }
 0x41d   :  { %3789 = vmatmul.mubr.f32.gmra.mrb[90].mxu0 %v10978_v33 }
 0x41e   :  { %3793 = vmatprep.mubr.f32.mxu0 %v17869_v34  ;;  %v10982_v34 = vld [vmem:[#allocation2 + $0x2a8] sm:$0xff] }
 0x421   :  { %3794 = vmatmul.mubr.f32.gmra.mrb[92].mxu0 %v10979_v5  ;;  %v10988_v5 = vld [vmem:[#allocation2 + $0x2f0] sm:$0xff] }
 0x422   :  { %3798 = vmatprep.mubr.f32.mxu0 %v17871_v17  ;;  %v10983_v17 = vld [vmem:[#allocation2 + $0x2b8] sm:$0xff] }
 0x425   :  { %3799 = vmatmul.mubr.f32.gmra.mrb[94].mxu0 %v10980_v20  ;;  %v17933_v20 = vld [vmem:[#allocation159_spill] sm:$0xff] }
 0x426   :  { %3803 = vmatprep.mubr.f32.mxu0 %v17873_v3  ;;  %v10984_v3 = vld [vmem:[#allocation2 + $0x2c0] sm:$0xff] }
 0x429   :  { %3804 = vmatmul.mubr.f32.gmra.mrb[96].mxu0 %v10981_v0 }
 0x42a   :  { %3808 = vmatprep.mubr.f32.mxu0 %v17875_v42  ;;  %v10985_v42 = vld [vmem:[#allocation2 + $0x2d0] sm:$0xff] }
 0x42d   :  { %3809 = vmatmul.mubr.f32.gmra.mrb[98].mxu0 %v10982_v34 }
 0x42e   :  { %3813 = vmatprep.mubr.f32.mxu0 %v17925_v51  ;;  %v10989_v51 = vld [vmem:[#allocation2 + $0x300] sm:$0xff] }
 0x42f   :  { %v13081_v7 = vpop.f32.mrb[30].mxu1 }
 0x430   :  { %v13083_v29 = vpop.f32.mrb[31].mxu1 }
 0x431   :  { %3814 = vmatmul.mubr.f32.gmra.mrb[100].mxu0 %v10983_v17  ;;  %v17934_v17 = vld [vmem:[#allocation162_spill] sm:$0xff] }
 0x432   :  { %3818 = vmatprep.mubr.f32.mxu0 %v17926_v27 }
 0x433   :  { %v13087_v2 = vpop.f32.mrb[32].mxu1 }
 0x434   :  { %v13089_v60 = vpop.f32.mrb[33].mxu1 }
 0x435   :  { %3819 = vmatmul.mubr.f32.gmra.mrb[102].mxu0 %v10984_v3 }
 0x436   :  { %3823 = vmatprep.mubr.f32.mxu0 %v17927_v15 }
 0x437   :  { %v13099_v58 = vpop.f32.mrb[34].mxu1 }
 0x438   :  { %v13101_v32 = vpop.f32.mrb[35].mxu1 }
 0x439   :  { %3824 = vmatmul.mubr.f32.gmra.mrb[104].mxu0 %v10985_v42 }
 0x43a   :  { %3828 = vmatprep.mubr.f32.mxu0 %v17928_v30  ;;  %v10990_v30 = vld [vmem:[#allocation2 + $0x308] sm:$0xff] }
 0x43b   :  { %v13111_v27 = vpop.f32.mrb[36].mxu1 }
 0x43c   :  { %v3565_v38 = vpop.f32.mrb[0].mxu0  ;;  %v13113_v15 = vpop.f32.mrb[37].mxu1 }
 0x43d   :  { %v13092_v44 = vadd.f32 %v12981_v49, %v3565_v38  ;;  %v3567_v19 = vpop.f32.mrb[1].mxu0  ;;  %3829 = vmatmul.mubr.f32.gmra.mrb[106].mxu0 %v10986_v43  ;;  %v17935_v38 = vld [vmem:[#allocation165_spill] sm:$0xff] }
 0x43e   :  { %3833 = vmatprep.mubr.f32.mxu0 %v17929_v25  ;;  %v10991_v25 = vld [vmem:[#allocation2 + $0x318] sm:$0xff] }
 0x440   :  { %v3570_v31 = vpop.f32.mrb[2].mxu0 }
 0x441   :  { %v13096_v47 = vadd.f32 %v12979_v16, %v3570_v31  ;;  %v3572_v39 = vpop.f32.mrb[3].mxu0  ;;  %3834 = vmatmul.mubr.f32.gmra.mrb[108].mxu0 %v10987_v40  ;;  %v17936_v31 = vld [vmem:[#allocation167_spill] sm:$0xff] }
 0x442   :  { %3838 = vmatprep.mubr.f32.mxu0 %v17931_v62  ;;  %v13123_v39 = vpop.f32.mrb[38].mxu1 }
 0x443   :  { %17930 = vst [vmem:[#allocation136_spill] sm:$0xff] %v13096_v47  ;;  %v13125_v62 = vpop.f32.mrb[39].mxu1 }
 0x444   :  { %v3575_v12 = vpop.f32.mrb[4].mxu0 }
 0x445   :  { %v13104_v49 = vadd.f32 %v12987_v46, %v3575_v12  ;;  %v3577_v33 = vpop.f32.mrb[5].mxu0  ;;  %3839 = vmatmul.mubr.f32.gmra.mrb[110].mxu0 %v10988_v5 }
 0x446   :  { %3843 = vmatprep.mubr.f32.mxu0 %v17933_v20  ;;  %v10992_v33 = vld [vmem:[#allocation2 + $0x320] sm:$0xff] }
 0x447   :  { %17932 = vst [vmem:[#allocation140_spill] sm:$0xff] %v13104_v49 }
 0x448   :  { %v3580_v16 = vpop.f32.mrb[6].mxu0 }
 0x449   :  { %v13108_v0 = vadd.f32 %v12985_v26, %v3580_v16  ;;  %v3582_v34 = vpop.f32.mrb[7].mxu0  ;;  %3844 = vmatmul.mubr.f32.gmra.mrb[112].mxu0 %v10989_v51  ;;  %v10993_v16 = vld [vmem:[#allocation2 + $0x330] sm:$0xff]  ;;  %v13136_v51 = vpop.f32.mrb[40].mxu1 }
 0x44a   :  { %3848 = vmatprep.mubr.f32.mxu0 %v17934_v17  ;;  %v1476_v34 = vrot.slane %v13011_v48, 1  ;;  %v13138_v17 = vpop.f32.mrb[41].mxu1 }
 0x44c   :  { %v3585_v3 = vpop.f32.mrb[8].mxu0 }
 0x44d   :  { %v13116_v46 = vadd.f32 %v12993_v6, %v3585_v3  ;;  %v3587_v42 = vpop.f32.mrb[9].mxu0  ;;  %3849 = vmatmul.mubr.f32.gmra.mrb[114].mxu0 %v10990_v30 }
 0x44e   :  { %3853 = vmatprep.mubr.f32.mxu0 %v17935_v38  ;;  %v10994_v42 = vld [vmem:[#allocation2 + $0x338] sm:$0xff]  ;;  %v13150_v38 = vpop.f32.mrb[42].mxu1 }
 0x450   :  { %v3590_v26 = vpop.f32.mrb[10].mxu0 }
 0x451   :  { %v13120_v19 = vadd.f32 %v12991_v24, %v3590_v26  ;;  %v3592_v43 = vpop.f32.mrb[11].mxu0  ;;  %3854 = vmatmul.mubr.f32.gmra.mrb[116].mxu0 %v10991_v25  ;;  %v13152_v26 = vpop.f32.mrb[43].mxu1 }
 0x452   :  { %3858 = vmatprep.mubr.f32.mxu0 %v17936_v31 }
 0x454   :  { %v3595_v40 = vpop.f32.mrb[12].mxu0 }
 0x455   :  { %v13128_v6 = vadd.f32 %v12999_v8, %v3595_v40  ;;  %v3597_v12 = vpop.f32.mrb[13].mxu0  ;;  %3859 = vmatmul.mubr.f32.gmra.mrb[118].mxu0 %v10992_v33  ;;  %v13161_v40 = vpop.f32.mrb[44].mxu1 }
 0x456   :  { %3863 = vmatprep.mubr.f32.mxu0 %v12912_v14  ;;  %v13163_v33 = vpop.f32.mrb[45].mxu1 }
 0x458   :  { %v3600_v24 = vpop.f32.mrb[14].mxu0 }
 0x459   :  { %v13132_v5 = vadd.f32 %v12997_v4, %v3600_v24  ;;  %v3602_v20 = vpop.f32.mrb[15].mxu0  ;;  %3864 = vmatmul.mubr.f32.gmra.mrb[120].mxu0 %v10993_v16  ;;  %v1477_v4 = vsel %vm594_vm0, %v13003_v9, %v1476_v34 }
 0x45a   :  { %3868 = vmatprep.mubr.f32.mxu0 %v12924_v11 }
 0x45c   :  { %v3605_v8 = vpop.f32.mrb[16].mxu0 }
 0x45d   :  { %v13141_v3 = vadd.f32 %v13009_v53, %v3605_v8  ;;  %v3607_v14 = vpop.f32.mrb[17].mxu0  ;;  %3869 = vmatmul.mubr.f32.gmra.mrb[122].mxu0 %v10994_v42  ;;  %v6624_v8 = vld [vmem:[#allocation7 + $0x8] sm:$0xff] }
 0x45e   :  { %3873 = vmatprep.mubr.f32.mxu0 %v13003_v9 }
 0x460   :  { %v3610_v30 = vpop.f32.mrb[18].mxu0 }
 0x461   :  { %v13147_v11 = vadd.f32 %v13007_v59, %v3610_v30  ;;  %v3612_v48 = vpop.f32.mrb[19].mxu0  ;;  %3874 = vmatmul.mubr.f32.gmra.mrb[124].mxu0 %v12901_v55 }
 0x462   :  { %3878 = vmatprep.mubr.f32.mxu0 %v1477_v4  ;;  %v17937_v48 = vmov 0.0|0.0  }
 0x464   :  { %v3615_v53 = vpop.f32.mrb[20].mxu0 }
 0x465   :  { %v13155_v43 = vadd.f32 %v13022_v1, %v3615_v53  ;;  %v3617_v25 = vpop.f32.mrb[21].mxu0  ;;  %3879 = vmatmul.mubr.f32.gmra.mrb[126].mxu0 %v12901_v55  ;;  %v6623_v55 = vld [vmem:[#allocation7] sm:$0xff] }
 0x466   :  { %v9897_v14 = vpack.c.bf16 %v6624_v8, %v6623_v55 }
 0x468   :  { %v3620_v9 = vpop.f32.mrb[22].mxu0  ;;  %9898 = vmatpush1.bf16.msra.mxu1 %v9897_v14 }
 0x469   :  { %v13159_v31 = vadd.f32 %v13020_v57, %v3620_v9  ;;  %v3622_v59 = vpop.f32.mrb[23].mxu0  ;;  %v13171_v57 = vpop.f32.mrb[46].mxu1  ;;  %9899 = vmatprep.subr.bf16.mxu1 %v17937_v48  ;;  %v6625_v9 = vld [vmem:[#allocation7 + $0x10] sm:$0xff] }
 0x46a   :  { %v13173_v4 = vpop.f32.mrb[47].mxu1  ;;  %v6626_v59 = vld [vmem:[#allocation7 + $0x18] sm:$0xff] }
 0x46c   :  { %v3625_v12 = vpop.f32.mrb[24].mxu0 }
 0x46d   :  { %v13166_v24 = vadd.f32 %v13029_v22, %v3625_v12  ;;  %v3627_v20 = vpop.f32.mrb[25].mxu0  ;;  %v9900_v12 = vpack.c.bf16 %v6626_v59, %v6625_v9 }
 0x46e   :  { %v13182_v20 = vpop.f32.mrb[48].mxu1 }
 0x46f   :  { %17938 = vst [vmem:[#allocation138_spill] sm:$0xff] %v13182_v20  ;;  %9901 = vmatpush1.bf16.msra.mxu1 %v9900_v12 }
 0x470   :  { %v3630_v16 = vpop.f32.mrb[26].mxu0  ;;  %9902 = vmatprep.subr.bf16.mxu1 %v17937_v48 }
 0x471   :  { %v13169_v1 = vadd.f32 %v13027_v50, %v3630_v16  ;;  %v3632_v34 = vpop.f32.mrb[27].mxu0 }
 0x472   :  { %v13184_v34 = vpop.f32.mrb[49].mxu1 }
 0x474   :  { %v3635_v42 = vpop.f32.mrb[28].mxu0 }
 0x475   :  { %v13176_v30 = vadd.f32 %v13035_v45, %v3635_v42  ;;  %v3637_v22 = vpop.f32.mrb[29].mxu0  ;;  %v6627_v42 = vld [vmem:[#allocation7 + $0x20] sm:$0xff] }
 0x476   :  { %v6628_v22 = vld [vmem:[#allocation7 + $0x28] sm:$0xff] }
 0x478   :  { %v3640_v53 = vpop.f32.mrb[30].mxu0 }
 0x479   :  { %v13180_v50 = vadd.f32 %v13033_v13, %v3640_v53  ;;  %v3642_v25 = vpop.f32.mrb[31].mxu0  ;;  %v9903_v53 = vpack.c.bf16 %v6628_v22, %v6627_v42 }
 0x47a   :  { %v13193_v25 = vpop.f32.mrb[50].mxu1 }
 0x47b   :  { %17939 = vst [vmem:[#allocation141_spill] sm:$0xff] %v13193_v25  ;;  %9904 = vmatpush1.bf16.msra.mxu1 %v9903_v53  ;;  %v13195_v59 = vpop.f32.mrb[51].mxu1 }
 0x47c   :  { %v3645_v16 = vpop.f32.mrb[32].mxu0  ;;  %17940 = vst [vmem:[#allocation145_spill] sm:$0xff] %v13195_v59  ;;  %9905 = vmatprep.subr.bf16.mxu1 %v17937_v48  ;;  %v13204_v22 = vpop.f32.mrb[52].mxu1  ;;  %v6632_v59 = vld [vmem:[#allocation7 + $0x48] sm:$0xff] }
 0x47d   :  { %v13187_v45 = vadd.f32 %v13041_v35, %v3645_v16  ;;  %v3647_v55 = vpop.f32.mrb[33].mxu0  ;;  %17941 = vst [vmem:[#allocation143_spill] sm:$0xff] %v13204_v22  ;;  %v13206_v53 = vpop.f32.mrb[53].mxu1 }
 0x47e   :  { %17942 = vst [vmem:[#allocation146_spill] sm:$0xff] %v13206_v53  ;;  %v6634_v53 = vld [vmem:[#allocation7 + $0x58] sm:$0xff] }
 0x480   :  { %v3650_v8 = vpop.f32.mrb[34].mxu0 }
 0x481   :  { %v13191_v13 = vadd.f32 %v13039_v56, %v3650_v8  ;;  %v3652_v14 = vpop.f32.mrb[35].mxu0  ;;  %v6629_v8 = vld [vmem:[#allocation7 + $0x30] sm:$0xff] }
 0x482   :  { %v6630_v14 = vld [vmem:[#allocation7 + $0x38] sm:$0xff] }
 0x483   :  { %v9906_v42 = vpack.c.bf16 %v6630_v14, %v6629_v8  ;;  %v13215_v14 = vpop.f32.mrb[54].mxu1 }
 0x484   :  { %v3655_v9 = vpop.f32.mrb[36].mxu0  ;;  %17943 = vst [vmem:[#allocation150_spill] sm:$0xff] %v13215_v14 }
 0x485   :  { %v13198_v35 = vadd.f32 %v13047_v63, %v3655_v9  ;;  %v3657_v12 = vpop.f32.mrb[37].mxu0  ;;  %9907 = vmatpush1.bf16.msra.mxu1 %v9906_v42  ;;  %v13217_v42 = vpop.f32.mrb[55].mxu1 }
 0x486   :  { %9908 = vmatprep.subr.bf16.mxu1 %v17937_v48  ;;  %17944 = vst [vmem:[#allocation148_spill] sm:$0xff] %v13217_v42  ;;  %v6636_v42 = vld [vmem:[#allocation7 + $0x68] sm:$0xff] }
 0x488   :  { %v3660_v16 = vpop.f32.mrb[38].mxu0 }
 0x489   :  { %v13202_v56 = vadd.f32 %v13045_v61, %v3660_v16  ;;  %v3662_v55 = vpop.f32.mrb[39].mxu0 }
 0x48a   :  { %v6631_v55 = vld [vmem:[#allocation7 + $0x40] sm:$0xff] }
 0x48b   :  { %v9909_v8 = vpack.c.bf16 %v6632_v59, %v6631_v55  ;;  %v13226_v55 = vpop.f32.mrb[56].mxu1 }
 0x48c   :  { %v3665_v25 = vpop.f32.mrb[40].mxu0  ;;  %17945 = vst [vmem:[#allocation151_spill] sm:$0xff] %v13226_v55 }
 0x48d   :  { %v13209_v63 = vadd.f32 %v13053_v54, %v3665_v25  ;;  %v3667_v9 = vpop.f32.mrb[41].mxu0  ;;  %9910 = vmatpush1.bf16.msra.mxu1 %v9909_v8  ;;  %v13228_v8 = vpop.f32.mrb[57].mxu1 }
 0x48e   :  { %9911 = vmatprep.subr.bf16.mxu1 %v17937_v48  ;;  %17946 = vst [vmem:[#allocation155_spill] sm:$0xff] %v13228_v8  ;;  %v6638_v8 = vld [vmem:[#allocation7 + $0x78] sm:$0xff] }
 0x490   :  { %v3670_v12 = vpop.f32.mrb[42].mxu0 }
 0x491   :  { %v13213_v61 = vadd.f32 %v13051_v41, %v3670_v12  ;;  %v3672_v16 = vpop.f32.mrb[43].mxu0 }
 0x492   :  { %v6633_v16 = vld [vmem:[#allocation7 + $0x50] sm:$0xff] }
 0x493   :  { %v9912_v59 = vpack.c.bf16 %v6634_v53, %v6633_v16  ;;  %v13237_v16 = vpop.f32.mrb[58].mxu1 }
 0x494   :  { %v3675_v22 = vpop.f32.mrb[44].mxu0  ;;  %17947 = vst [vmem:[#allocation153_spill] sm:$0xff] %v13237_v16 }
 0x495   :  { %v13220_v54 = vadd.f32 %v13059_v18, %v3675_v22  ;;  %v3677_v25 = vpop.f32.mrb[45].mxu0  ;;  %9913 = vmatpush1.bf16.msra.mxu1 %v9912_v59  ;;  %v13239_v59 = vpop.f32.mrb[59].mxu1 }
 0x496   :  { %9914 = vmatprep.subr.bf16.mxu1 %v17937_v48  ;;  %17948 = vst [vmem:[#allocation156_spill] sm:$0xff] %v13239_v59  ;;  %v6640_v59 = vld [vmem:[#allocation7 + $0x88] sm:$0xff] }
 0x498   :  { %v3680_v9 = vpop.f32.mrb[46].mxu0 }
 0x499   :  { %v13224_v41 = vadd.f32 %v13057_v23, %v3680_v9  ;;  %v3682_v12 = vpop.f32.mrb[47].mxu0 }
 0x49a   :  { %v6635_v12 = vld [vmem:[#allocation7 + $0x60] sm:$0xff] }
 0x49b   :  { %v9915_v53 = vpack.c.bf16 %v6636_v42, %v6635_v12  ;;  %v13248_v12 = vpop.f32.mrb[60].mxu1 }
 0x49c   :  { %v3685_v14 = vpop.f32.mrb[48].mxu0  ;;  %17949 = vst [vmem:[#allocation160_spill] sm:$0xff] %v13248_v12 }
 0x49d   :  { %v13231_v18 = vadd.f32 %v13065_v52, %v3685_v14  ;;  %v3687_v22 = vpop.f32.mrb[49].mxu0  ;;  %9916 = vmatpush1.bf16.msra.mxu1 %v9915_v53  ;;  %v13250_v53 = vpop.f32.mrb[61].mxu1 }
 0x49e   :  { %9917 = vmatprep.subr.bf16.mxu1 %v17937_v48  ;;  %17950 = vst [vmem:[#allocation158_spill] sm:$0xff] %v13250_v53  ;;  %v6642_v53 = vld [vmem:[#allocation7 + $0x98] sm:$0xff] }
 0x4a0   :  { %v3690_v25 = vpop.f32.mrb[50].mxu0 }
 0x4a1   :  { %v13235_v23 = vadd.f32 %v13063_v10, %v3690_v25  ;;  %v3692_v9 = vpop.f32.mrb[51].mxu0 }
 0x4a2   :  { %v6637_v9 = vld [vmem:[#allocation7 + $0x70] sm:$0xff] }
 0x4a3   :  { %v9918_v42 = vpack.c.bf16 %v6638_v8, %v6637_v9 }
 0x4a4   :  { %v3695_v55 = vpop.f32.mrb[52].mxu0 }
 0x4a5   :  { %v13242_v52 = vadd.f32 %v13071_v37, %v3695_v55  ;;  %v3697_v14 = vpop.f32.mrb[53].mxu0  ;;  %9919 = vmatpush1.bf16.msra.mxu1 %v9918_v42 }
 0x4a6   :  { %9920 = vmatprep.subr.bf16.mxu1 %v17937_v48 }
 0x4a8   :  { %v3700_v22 = vpop.f32.mrb[54].mxu0 }
 0x4a9   :  { %v13246_v10 = vadd.f32 %v13069_v36, %v3700_v22  ;;  %v3702_v25 = vpop.f32.mrb[55].mxu0 }
 0x4aa   :  { %v6639_v25 = vld [vmem:[#allocation7 + $0x80] sm:$0xff] }
 0x4ab   :  { %v9921_v8 = vpack.c.bf16 %v6640_v59, %v6639_v25  ;;  %v4341_v59 = vmul.f32 %v13096_v47, %v13096_v47 }
 0x4ac   :  { %v3705_v16 = vpop.f32.mrb[56].mxu0 }
 0x4ad   :  { %v13253_v37 = vadd.f32 %v13077_v21, %v3705_v16  ;;  %v3707_v55 = vpop.f32.mrb[57].mxu0  ;;  %9922 = vmatpush1.bf16.msra.mxu1 %v9921_v8  ;;  %v4340_v8 = vmul.f32 %v13092_v44, %v13092_v44 }
 0x4ae   :  { %v13259_v9 = vpop.f32.mrb[62].mxu1  ;;  %9923 = vmatprep.subr.bf16.mxu1 %v17937_v48 }
 0x4af   :  { %17951 = vst [vmem:[#allocation161_spill] sm:$0xff] %v13259_v9  ;;  %v13261_v42 = vpop.f32.mrb[63].mxu1 }
 0x4b0   :  { %v3710_v14 = vpop.f32.mrb[58].mxu0  ;;  %17952 = vst [vmem:[#allocation164_spill] sm:$0xff] %v13261_v42  ;;  %v4344_v42 = vmul.f32 %v13116_v46, %v13116_v46 }
 0x4b1   :  { %v13257_v36 = vadd.f32 %v13075_v28, %v3710_v14  ;;  %v3712_v22 = vpop.f32.mrb[59].mxu0 }
 0x4b2   :  { %v6641_v22 = vld [vmem:[#allocation7 + $0x90] sm:$0xff] }
 0x4b3   :  { %v9924_v25 = vpack.c.bf16 %v6642_v53, %v6641_v22  ;;  %v4343_v53 = vmul.f32 %v13108_v0, %v13108_v0 }
 0x4b4   :  { %v3715_v12 = vpop.f32.mrb[60].mxu0 }
 0x4b5   :  { %v13264_v21 = vadd.f32 %v13083_v29, %v3715_v12  ;;  %v3717_v16 = vpop.f32.mrb[61].mxu0  ;;  %v4342_v29 = vmul.f32 %v13104_v49, %v13104_v49  ;;  %9925 = vmatpush1.bf16.msra.mxu1 %v9924_v25 }
 0x4b6   :  { %v4271_v16 = vadd.f32 %v13096_v47, %v13092_v44  ;;  %9926 = vmatprep.subr.bf16.mxu1 %v17937_v48 }
 0x4b8   :  { %v3720_v55 = vpop.f32.mrb[62].mxu0  ;;  %v4272_v22 = vadd.f32 %v4271_v16, %v13104_v49 }
 0x4b9   :  { %v13268_v28 = vadd.f32 %v13081_v7, %v3720_v55  ;;  %v3722_v14 = vpop.f32.mrb[63].mxu0 }
 0x4ba   :  { %v4404_v14 = vadd.f32 %v4341_v59, %v4340_v8  ;;  %v4273_v20 = vadd.f32 %v4272_v22, %v13108_v0  ;;  %v4345_v59 = vmul.f32 %v13120_v19, %v13120_v19 }
 0x4bb   :  { %17953 = vst [vmem:[#allocation45_spill] sm:$0xff] %v13268_v28 }
 0x4bc   :  { %v3725_v12 = vpop.f32.mrb[64].mxu0  ;;  %v4405_v9 = vadd.f32 %v4404_v14, %v4342_v29  ;;  %v4274_v8 = vadd.f32 %v4273_v20, %v13116_v46  ;;  %v4346_v29 = vmul.f32 %v13128_v6, %v13128_v6  ;;  %v4348_v20 = vmul.f32 %v13141_v3, %v13141_v3 }
 0x4bd   :  { %v13279_v7 = vadd.f32 %v13089_v60, %v3725_v12  ;;  %v3727_v55 = vpop.f32.mrb[65].mxu0 }
 0x4be   :  { %v4406_v12 = vadd.f32 %v4405_v9, %v4343_v53  ;;  %v4275_v14 = vadd.f32 %v4274_v8, %v13120_v19  ;;  %v4347_v9 = vmul.f32 %v13132_v5, %v13132_v5 }
 0x4bf   :  { %17954 = vst [vmem:[#allocation168_spill] sm:$0xff] %v13279_v7 }
 0x4c0   :  { %v3730_v25 = vpop.f32.mrb[66].mxu0  ;;  %v4407_v55 = vadd.f32 %v4406_v12, %v4344_v42  ;;  %v4276_v53 = vadd.f32 %v4275_v14, %v13128_v6 }
 0x4c1   :  { %v13289_v47 = vadd.f32 %v13087_v2, %v3730_v25  ;;  %v3732_v60 = vpop.f32.mrb[67].mxu0 }
 0x4c2   :  { %v4408_v2 = vadd.f32 %v4407_v55, %v4345_v59  ;;  %v4277_v60 = vadd.f32 %v4276_v53, %v13132_v5  ;;  %v4349_v59 = vmul.f32 %v13147_v11, %v13147_v11 }
 0x4c4   :  { %v3735_v16 = vpop.f32.mrb[68].mxu0  ;;  %v4409_v25 = vadd.f32 %v4408_v2, %v4346_v29  ;;  %v4278_v55 = vadd.f32 %v4277_v60, %v13141_v3  ;;  %v4350_v29 = vmul.f32 %v13155_v43, %v13155_v43 }
 0x4c5   :  { %v13298_v49 = vadd.f32 %v13101_v32, %v3735_v16  ;;  %v3737_v22 = vpop.f32.mrb[69].mxu0 }
 0x4c6   :  { %v4410_v32 = vadd.f32 %v4409_v25, %v4347_v9  ;;  %v4279_v22 = vadd.f32 %v4278_v55, %v13147_v11  ;;  %v4351_v9 = vmul.f32 %v13159_v31, %v13159_v31 }
 0x4c7   :  { %17955 = vst [vmem:[#allocation48_spill] sm:$0xff] %v13298_v49 }
 0x4c8   :  { %v3740_v42 = vpop.f32.mrb[70].mxu0  ;;  %v4411_v16 = vadd.f32 %v4410_v32, %v4348_v20  ;;  %v4280_v25 = vadd.f32 %v4279_v22, %v13155_v43  ;;  %v4352_v20 = vmul.f32 %v13166_v24, %v13166_v24 }
 0x4c9   :  { %v13307_v12 = vadd.f32 %v13099_v58, %v3740_v42  ;;  %v3742_v8 = vpop.f32.mrb[71].mxu0 }
 0x4ca   :  { %v4412_v58 = vadd.f32 %v4411_v16, %v4349_v59  ;;  %v4281_v8 = vadd.f32 %v4280_v25, %v13159_v31  ;;  %v4353_v59 = vmul.f32 %v13169_v1, %v13169_v1 }
 0x4cb   :  { %17956 = vst [vmem:[#allocation107_spill] sm:$0xff] %v13307_v12 }
 0x4cc   :  { %v3745_v14 = vpop.f32.mrb[72].mxu0  ;;  %v4413_v42 = vadd.f32 %v4412_v58, %v4350_v29  ;;  %v4282_v16 = vadd.f32 %v4281_v8, %v13166_v24  ;;  %v4354_v29 = vmul.f32 %v13176_v30, %v13176_v30 }
 0x4cd   :  { %v13316_v2 = vadd.f32 %v13113_v15, %v3745_v14  ;;  %v3747_v53 = vpop.f32.mrb[73].mxu0 }
 0x4ce   :  { %v4414_v15 = vadd.f32 %v4413_v42, %v4351_v9  ;;  %v4283_v53 = vadd.f32 %v4282_v16, %v13169_v1  ;;  %v4355_v9 = vmul.f32 %v13180_v50, %v13180_v50 }
 0x4cf   :  { %17957 = vst [vmem:[#allocation169_spill] sm:$0xff] %v13316_v2 }
 0x4d0   :  { %v3750_v60 = vpop.f32.mrb[74].mxu0  ;;  %v4415_v14 = vadd.f32 %v4414_v15, %v4352_v20  ;;  %v4284_v42 = vadd.f32 %v4283_v53, %v13176_v30  ;;  %v4356_v20 = vmul.f32 %v13187_v45, %v13187_v45 }
 0x4d1   :  { %v13325_v32 = vadd.f32 %v13111_v27, %v3750_v60  ;;  %v3752_v55 = vpop.f32.mrb[75].mxu0 }
 0x4d2   :  { %v4416_v27 = vadd.f32 %v4415_v14, %v4353_v59  ;;  %v4285_v55 = vadd.f32 %v4284_v42, %v13180_v50  ;;  %v4357_v59 = vmul.f32 %v13191_v13, %v13191_v13 }
 0x4d3   :  { %17958 = vst [vmem:[#allocation170_spill] sm:$0xff] %v13325_v32 }
 0x4d4   :  { %v3755_v22 = vpop.f32.mrb[76].mxu0  ;;  %v4417_v60 = vadd.f32 %v4416_v27, %v4354_v29  ;;  %v4286_v14 = vadd.f32 %v4285_v55, %v13187_v45  ;;  %v4358_v29 = vmul.f32 %v13198_v35, %v13198_v35 }
 0x4d5   :  { %v13334_v58 = vadd.f32 %v13125_v62, %v3755_v22  ;;  %v3757_v25 = vpop.f32.mrb[77].mxu0 }
 0x4d6   :  { %v4418_v62 = vadd.f32 %v4417_v60, %v4355_v9  ;;  %v4287_v25 = vadd.f32 %v4286_v14, %v13191_v13  ;;  %v4359_v9 = vmul.f32 %v13202_v56, %v13202_v56 }
 0x4d7   :  { %17959 = vst [vmem:[#allocation171_spill] sm:$0xff] %v13334_v58 }
 0x4d8   :  { %v3760_v8 = vpop.f32.mrb[78].mxu0  ;;  %v4419_v22 = vadd.f32 %v4418_v62, %v4356_v20  ;;  %v4288_v60 = vadd.f32 %v4287_v25, %v13198_v35  ;;  %v4360_v20 = vmul.f32 %v13209_v63, %v13209_v63 }
 0x4d9   :  { %v13343_v15 = vadd.f32 %v13123_v39, %v3760_v8  ;;  %v3762_v16 = vpop.f32.mrb[79].mxu0 }
 0x4da   :  { %v4420_v39 = vadd.f32 %v4419_v22, %v4357_v59  ;;  %v4289_v16 = vadd.f32 %v4288_v60, %v13202_v56  ;;  %v4361_v59 = vmul.f32 %v13213_v61, %v13213_v61 }
 0x4db   :  { %17960 = vst [vmem:[#allocation102_spill] sm:$0xff] %v13343_v15 }
 0x4dc   :  { %v3765_v53 = vpop.f32.mrb[80].mxu0  ;;  %v4421_v8 = vadd.f32 %v4420_v39, %v4358_v29  ;;  %v4290_v22 = vadd.f32 %v4289_v16, %v13209_v63  ;;  %v4362_v29 = vmul.f32 %v13220_v54, %v13220_v54 }
 0x4dd   :  { %v13352_v27 = vadd.f32 %v13138_v17, %v3765_v53  ;;  %v3767_v42 = vpop.f32.mrb[81].mxu0 }
 0x4de   :  { %v4422_v17 = vadd.f32 %v4421_v8, %v4359_v9  ;;  %v4291_v42 = vadd.f32 %v4290_v22, %v13213_v61  ;;  %v4363_v9 = vmul.f32 %v13224_v41, %v13224_v41 }
 0x4df   :  { %17961 = vst [vmem:[#allocation103_spill] sm:$0xff] %v13352_v27 }
 0x4e0   :  { %v3770_v55 = vpop.f32.mrb[82].mxu0  ;;  %v4423_v53 = vadd.f32 %v4422_v17, %v4360_v20  ;;  %v4292_v8 = vadd.f32 %v4291_v42, %v13220_v54  ;;  %v4364_v20 = vmul.f32 %v13231_v18, %v13231_v18 }
 0x4e1   :  { %v13361_v62 = vadd.f32 %v13136_v51, %v3770_v55  ;;  %v3772_v14 = vpop.f32.mrb[83].mxu0 }
 0x4e2   :  { %v4424_v51 = vadd.f32 %v4423_v53, %v4361_v59  ;;  %v4293_v14 = vadd.f32 %v4292_v8, %v13224_v41  ;;  %v4365_v59 = vmul.f32 %v13235_v23, %v13235_v23 }
 0x4e3   :  { %17962 = vst [vmem:[#allocation104_spill] sm:$0xff] %v13361_v62 }
 0x4e4   :  { %v3775_v25 = vpop.f32.mrb[84].mxu0  ;;  %v4425_v55 = vadd.f32 %v4424_v51, %v4362_v29  ;;  %v4294_v53 = vadd.f32 %v4293_v14, %v13231_v18  ;;  %v4366_v29 = vmul.f32 %v13242_v52, %v13242_v52 }
 0x4e5   :  { %v13370_v39 = vadd.f32 %v13152_v26, %v3775_v25  ;;  %v3777_v60 = vpop.f32.mrb[85].mxu0 }
 0x4e6   :  { %v4426_v26 = vadd.f32 %v4425_v55, %v4363_v9  ;;  %v4295_v60 = vadd.f32 %v4294_v53, %v13235_v23  ;;  %v4367_v9 = vmul.f32 %v13246_v10, %v13246_v10 }
 0x4e7   :  { %17963 = vst [vmem:[#allocation105_spill] sm:$0xff] %v13370_v39 }
 0x4e8   :  { %v3780_v16 = vpop.f32.mrb[86].mxu0  ;;  %v4427_v25 = vadd.f32 %v4426_v26, %v4364_v20  ;;  %v4296_v55 = vadd.f32 %v4295_v60, %v13242_v52  ;;  %v4368_v20 = vmul.f32 %v13253_v37, %v13253_v37 }
 0x4e9   :  { %v13379_v17 = vadd.f32 %v13150_v38, %v3780_v16  ;;  %v3782_v22 = vpop.f32.mrb[87].mxu0 }
 0x4ea   :  { %v4428_v38 = vadd.f32 %v4427_v25, %v4365_v59  ;;  %v4297_v22 = vadd.f32 %v4296_v55, %v13246_v10  ;;  %v4369_v59 = vmul.f32 %v13257_v36, %v13257_v36 }
 0x4eb   :  { %17964 = vst [vmem:[#allocation106_spill] sm:$0xff] %v13379_v17 }
 0x4ec   :  { %v3785_v42 = vpop.f32.mrb[88].mxu0  ;;  %v4429_v16 = vadd.f32 %v4428_v38, %v4366_v29  ;;  %v4298_v25 = vadd.f32 %v4297_v22, %v13253_v37  ;;  %v4370_v29 = vmul.f32 %v13264_v21, %v13264_v21 }
 0x4ed   :  { %v13388_v51 = vadd.f32 %v13163_v33, %v3785_v42  ;;  %v3787_v8 = vpop.f32.mrb[89].mxu0 }
 0x4ee   :  { %v4430_v33 = vadd.f32 %v4429_v16, %v4367_v9  ;;  %v4299_v8 = vadd.f32 %v4298_v25, %v13257_v36  ;;  %v4371_v9 = vmul.f32 %v13268_v28, %v13268_v28 }
 0x4ef   :  { %17965 = vst [vmem:[#allocation108_spill] sm:$0xff] %v13388_v51 }
 0x4f0   :  { %v3790_v14 = vpop.f32.mrb[90].mxu0  ;;  %v4431_v42 = vadd.f32 %v4430_v33, %v4368_v20  ;;  %v4300_v16 = vadd.f32 %v4299_v8, %v13264_v21  ;;  %v4372_v20 = vmul.f32 %v13279_v7, %v13279_v7 }
 0x4f1   :  { %v13397_v26 = vadd.f32 %v13161_v40, %v3790_v14  ;;  %v3792_v53 = vpop.f32.mrb[91].mxu0 }
 0x4f2   :  { %v4432_v40 = vadd.f32 %v4431_v42, %v4369_v59  ;;  %v4301_v53 = vadd.f32 %v4300_v16, %v13268_v28  ;;  %v4373_v59 = vmul.f32 %v13289_v47, %v13289_v47  ;;  %v6644_v28 = vld [vmem:[#allocation7 + $0xa8] sm:$0xff] }
 0x4f4   :  { %v3795_v60 = vpop.f32.mrb[92].mxu0  ;;  %v4433_v14 = vadd.f32 %v4432_v40, %v4370_v29  ;;  %v4302_v42 = vadd.f32 %v4301_v53, %v13279_v7  ;;  %v4374_v29 = vmul.f32 %v13298_v49, %v13298_v49 }
 0x4f5   :  { %v13406_v38 = vadd.f32 %v13173_v4, %v3795_v60  ;;  %v3797_v55 = vpop.f32.mrb[93].mxu0 }
 0x4f6   :  { %v4434_v4 = vadd.f32 %v4433_v14, %v4371_v9  ;;  %v4303_v55 = vadd.f32 %v4302_v42, %v13289_v47  ;;  %v4375_v9 = vmul.f32 %v13307_v12, %v13307_v12  ;;  %v6643_v14 = vld [vmem:[#allocation7 + $0xa0] sm:$0xff]  ;;  %v4376_v42 = vmul.f32 %v13316_v2, %v13316_v2 }
 0x4f8   :  { %v3800_v22 = vpop.f32.mrb[94].mxu0  ;;  %v4435_v60 = vadd.f32 %v4434_v4, %v4372_v20  ;;  %v4304_v20 = vadd.f32 %v4303_v55, %v13298_v49  ;;  %v9927_v4 = vpack.c.bf16 %v6644_v28, %v6643_v14  ;;  %v4377_v28 = vmul.f32 %v13325_v32, %v13325_v32  ;;  %v6766_v49 = vld [vmem:[#allocation7 + $0x478] sm:$0xff] }
 0x4f9   :  { %v13415_v33 = vadd.f32 %v13171_v57, %v3800_v22  ;;  %v3802_v25 = vpop.f32.mrb[95].mxu0  ;;  %v6751_v57 = vld [vmem:[#allocation7 + $0x400] sm:$0xff]  ;;  %v6752_v22 = vld [vmem:[#allocation7 + $0x408] sm:$0xff] }
 0x4fa   :  { %v4436_v25 = vadd.f32 %v4435_v60, %v4373_v59  ;;  %v13428_v53 = vpack.c.bf16 %v6752_v22, %v6751_v57  ;;  %v17967_v59 = vld [vmem:[#allocation138_spill] sm:$0xff]  ;;  %9928 = vmatpush1.bf16.msra.mxu1 %v9927_v4  ;;  %v6753_v57 = vld [vmem:[#allocation7 + $0x410] sm:$0xff]  ;;  %v6754_v22 = vld [vmem:[#allocation7 + $0x418] sm:$0xff]  ;;  %v4378_v4 = vmul.f32 %v13334_v58, %v13334_v58 }
 0x4fb   :  { %9929 = vmatprep.subr.bf16.mxu1 %v17937_v48  ;;  %v13442_v14 = vpack.c.bf16 %v6754_v22, %v6753_v57  ;;  %v6755_v57 = vld [vmem:[#allocation7 + $0x420] sm:$0xff]  ;;  %v6756_v22 = vld [vmem:[#allocation7 + $0x428] sm:$0xff] }
 0x4fc   :  { %v3805_v8 = vpop.f32.mrb[96].mxu0  ;;  %17966 = vst [vmem:[#allocation109_spill] sm:$0xff] %v13428_v53  ;;  %v4437_v7 = vadd.f32 %v4436_v25, %v4374_v29  ;;  %10089 = vmatprep.subr.bf16.mxu0 %v13428_v53  ;;  %v6645_v29 = vld [vmem:[#allocation7 + $0xb0] sm:$0xff]  ;;  %v6646_v25 = vld [vmem:[#allocation7 + $0xb8] sm:$0xff] }
 0x4fd   :  { %v13424_v40 = vadd.f32 %v13184_v34, %v3805_v8  ;;  %v3807_v16 = vpop.f32.mrb[97].mxu0  ;;  %v4305_v8 = vadd.f32 %v4304_v20, %v13307_v12  ;;  %10091 = vmatpush3.bf16.msra.mxu0 %v13428_v53  ;;  %17968 = vst [vmem:[#allocation110_spill] sm:$0xff] %v13442_v14 }
 0x4fe   :  { %v4438_v55 = vadd.f32 %v4437_v7, %v4375_v9  ;;  %10093 = vmatprep.subr.bf16.mxu0 %v13442_v14  ;;  %v17969_v9 = vld [vmem:[#allocation145_spill] sm:$0xff] }
 0x4ff   :  { %v4306_v20 = vadd.f32 %v4305_v8, %v13316_v2 }
 0x500   :  { %v3810_v34 = vpop.f32.mrb[98].mxu0 }
 0x501   :  { %v13436_v60 = vadd.f32 %v17967_v59, %v3810_v34  ;;  %v3812_v16 = vpop.f32.mrb[99].mxu0  ;;  %v9930_v34 = vpack.c.bf16 %v6646_v25, %v6645_v29  ;;  %v4439_v59 = vadd.f32 %v4438_v55, %v4376_v42  ;;  %v4307_v7 = vadd.f32 %v4306_v20, %v13325_v32  ;;  %10095 = vmatpush3.bf16.msra.mxu0 %v13442_v14  ;;  %v6647_v55 = vld [vmem:[#allocation7 + $0xc0] sm:$0xff]  ;;  %v6648_v29 = vld [vmem:[#allocation7 + $0xc8] sm:$0xff] }
 0x502   :  { %v4379_v42 = vmul.f32 %v13343_v15, %v13343_v15  ;;  %v13456_v25 = vpack.c.bf16 %v6756_v22, %v6755_v57  ;;  %v6757_v57 = vld [vmem:[#allocation7 + $0x430] sm:$0xff]  ;;  %v6758_v22 = vld [vmem:[#allocation7 + $0x438] sm:$0xff] }
 0x503   :  { %9931 = vmatpush1.bf16.msra.mxu1 %v9930_v34  ;;  %v4440_v8 = vadd.f32 %v4439_v59, %v4377_v28  ;;  %v4308_v20 = vadd.f32 %v4307_v7, %v13334_v58  ;;  %v17971_v59 = vld [vmem:[#allocation141_spill] sm:$0xff] }
 0x504   :  { %v3815_v16 = vpop.f32.mrb[100].mxu0  ;;  %9932 = vmatprep.subr.bf16.mxu1 %v17937_v48  ;;  %17970 = vst [vmem:[#allocation112_spill] sm:$0xff] %v13456_v25  ;;  %10097 = vmatprep.subr.bf16.mxu0 %v13456_v25 }
 0x505   :  { %v13450_v53 = vadd.f32 %v17969_v9, %v3815_v16  ;;  %v3817_v12 = vpop.f32.mrb[101].mxu0  ;;  %v9933_v16 = vpack.c.bf16 %v6648_v29, %v6647_v55  ;;  %v4441_v9 = vadd.f32 %v4440_v8, %v4378_v4  ;;  %v4309_v28 = vadd.f32 %v4308_v20, %v13343_v15  ;;  %10099 = vmatpush3.bf16.msra.mxu0 %v13456_v25  ;;  %v6649_v8 = vld [vmem:[#allocation7 + $0xd0] sm:$0xff]  ;;  %v6650_v55 = vld [vmem:[#allocation7 + $0xd8] sm:$0xff] }
 0x506   :  { %v4380_v12 = vmul.f32 %v13352_v27, %v13352_v27  ;;  %v4381_v4 = vmul.f32 %v13361_v62, %v13361_v62  ;;  %v13470_v29 = vpack.c.bf16 %v6758_v22, %v6757_v57  ;;  %v6759_v57 = vld [vmem:[#allocation7 + $0x440] sm:$0xff]  ;;  %v6760_v22 = vld [vmem:[#allocation7 + $0x448] sm:$0xff] }
 0x507   :  { %9934 = vmatpush1.bf16.msra.mxu1 %v9933_v16  ;;  %v4442_v7 = vadd.f32 %v4441_v9, %v4379_v42  ;;  %v4310_v20 = vadd.f32 %v4309_v28, %v13352_v27  ;;  %v17973_v9 = vld [vmem:[#allocation146_spill] sm:$0xff] }
 0x508   :  { %v3820_v34 = vpop.f32.mrb[102].mxu0  ;;  %9935 = vmatprep.subr.bf16.mxu1 %v17937_v48  ;;  %17972 = vst [vmem:[#allocation114_spill] sm:$0xff] %v13470_v29  ;;  %10101 = vmatprep.subr.bf16.mxu0 %v13470_v29 }
 0x509   :  { %v13464_v14 = vadd.f32 %v17971_v59, %v3820_v34  ;;  %v3822_v32 = vpop.f32.mrb[103].mxu0  ;;  %v9936_v34 = vpack.c.bf16 %v6650_v55, %v6649_v8  ;;  %v4443_v59 = vadd.f32 %v4442_v7, %v4380_v12  ;;  %v4311_v42 = vadd.f32 %v4310_v20, %v13361_v62  ;;  %10103 = vmatpush3.bf16.msra.mxu0 %v13470_v29  ;;  %v6651_v7 = vld [vmem:[#allocation7 + $0xe0] sm:$0xff]  ;;  %v6652_v8 = vld [vmem:[#allocation7 + $0xe8] sm:$0xff] }
 0x50a   :  { %v4382_v32 = vmul.f32 %v13370_v39, %v13370_v39  ;;  %v4383_v12 = vmul.f32 %v13379_v17, %v13379_v17  ;;  %v13484_v55 = vpack.c.bf16 %v6760_v22, %v6759_v57  ;;  %v6761_v57 = vld [vmem:[#allocation7 + $0x450] sm:$0xff]  ;;  %v6762_v22 = vld [vmem:[#allocation7 + $0x458] sm:$0xff] }
 0x50b   :  { %9937 = vmatpush1.bf16.msra.mxu1 %v9936_v34  ;;  %v4444_v28 = vadd.f32 %v4443_v59, %v4381_v4  ;;  %v4312_v20 = vadd.f32 %v4311_v42, %v13370_v39  ;;  %v17975_v59 = vld [vmem:[#allocation143_spill] sm:$0xff]  ;;  %v6655_v39 = vld [vmem:[#allocation7 + $0x100] sm:$0xff] }
 0x50c   :  { %v3825_v16 = vpop.f32.mrb[104].mxu0  ;;  %9938 = vmatprep.subr.bf16.mxu1 %v17937_v48  ;;  %17974 = vst [vmem:[#allocation117_spill] sm:$0xff] %v13484_v55  ;;  %10105 = vmatprep.subr.bf16.mxu0 %v13484_v55 }
 0x50d   :  { %v13478_v25 = vadd.f32 %v17973_v9, %v3825_v16  ;;  %v3827_v15 = vpop.f32.mrb[105].mxu0  ;;  %v9939_v16 = vpack.c.bf16 %v6652_v8, %v6651_v7  ;;  %v4445_v9 = vadd.f32 %v4444_v28, %v4382_v32  ;;  %v4313_v4 = vadd.f32 %v4312_v20, %v13379_v17  ;;  %10107 = vmatpush3.bf16.msra.mxu0 %v13484_v55  ;;  %v6653_v28 = vld [vmem:[#allocation7 + $0xf0] sm:$0xff]  ;;  %v6654_v7 = vld [vmem:[#allocation7 + $0xf8] sm:$0xff]  ;;  %v6763_v55 = vld [vmem:[#allocation7 + $0x460] sm:$0xff] }
 0x50e   :  { %v4384_v15 = vmul.f32 %v13388_v51, %v13388_v51  ;;  %v4385_v32 = vmul.f32 %v13397_v26, %v13397_v26  ;;  %v13498_v8 = vpack.c.bf16 %v6762_v22, %v6761_v57  ;;  %v6764_v17 = vld [vmem:[#allocation7 + $0x468] sm:$0xff]  ;;  %v17978_v57 = vld [vmem:[#allocation148_spill] sm:$0xff] }
 0x50f   :  { %9940 = vmatpush1.bf16.msra.mxu1 %v9939_v16  ;;  %v4446_v42 = vadd.f32 %v4445_v9, %v4383_v12  ;;  %v4314_v20 = vadd.f32 %v4313_v4, %v13388_v51  ;;  %v10995_v12 = vld [vmem:[#allocation2] sm:$0xff] }
 0x510   :  { %v3830_v34 = vpop.f32.mrb[106].mxu0  ;;  %9941 = vmatprep.subr.bf16.mxu1 %v17937_v48  ;;  %17976 = vst [vmem:[#allocation119_spill] sm:$0xff] %v13498_v8  ;;  %10109 = vmatprep.subr.bf16.mxu0 %v13498_v8  ;;  %v13504_v9 = vrot.slane %v10995_v12, 1 }
 0x511   :  { %v13492_v29 = vadd.f32 %v17975_v59, %v3830_v34  ;;  %v3832_v62 = vpop.f32.mrb[107].mxu0  ;;  %v9942_v34 = vpack.c.bf16 %v6654_v7, %v6653_v28  ;;  %v4447_v59 = vadd.f32 %v4446_v42, %v4384_v15  ;;  %v4315_v27 = vadd.f32 %v4314_v20, %v13397_v26  ;;  %10111 = vmatpush3.bf16.msra.mxu0 %v13498_v8  ;;  %v6656_v42 = vld [vmem:[#allocation7 + $0x108] sm:$0xff]  ;;  %v4753_v28 = vld [vmem:[#allocation2 + $0x10] sm:$0x3] }
 0x512   :  { %v4386_v62 = vmul.f32 %v13406_v38, %v13406_v38  ;;  %17977 = vst [vmem:[#allocation122_spill] sm:$0xff] %v13504_v9  ;;  %v13511_v15 = vpack.c.bf16 %v6764_v17, %v6763_v55  ;;  %v6765_v7 = vld [vmem:[#allocation7 + $0x470] sm:$0xff]  ;;  %v9945_v58 = vpack.c.bf16 %v6656_v42, %v6655_v39  ;;  %v5022_v2 = vrot.slane %v4753_v28, 1  ;;  %6831 = vmatprep.mubr.f32.mxu1 %v13504_v9 }
 0x513   :  { %9943 = vmatpush1.bf16.msra.mxu1 %v9942_v34  ;;  %v4448_v51 = vadd.f32 %v4447_v59, %v4385_v32  ;;  %v4316_v20 = vadd.f32 %v4315_v27, %v13406_v38  ;;  %v13519_v17 = vpack.c.bf16 %v6766_v49, %v6765_v7  ;;  %v4388_v27 = vmul.f32 %v13424_v40, %v13424_v40  ;;  %v17981_v59 = vld [vmem:[#allocation150_spill] sm:$0xff]  ;;  %v17983_v7 = vld [vmem:[#allocation155_spill] sm:$0xff] }
 0x514   :  { %v3835_v16 = vpop.f32.mrb[108].mxu0  ;;  %17979 = vst [vmem:[#allocation124_spill] sm:$0xff] %v13511_v15  ;;  %9944 = vmatprep.subr.bf16.mxu1 %v17937_v48  ;;  %10113 = vmatprep.subr.bf16.mxu0 %v13511_v15  ;;  %v5023_v32 = vsel %vm594_vm0, %v13504_v9, %v5022_v2  ;;  %v4389_v2 = vmul.f32 %v13436_v60, %v13436_v60 }
 0x515   :  { %v13508_v22 = vadd.f32 %v17978_v57, %v3835_v16  ;;  %v3837_v4 = vpop.f32.mrb[109].mxu0  ;;  %v4387_v16 = vmul.f32 %v13415_v33, %v13415_v33  ;;  %17980 = vst [vmem:[#allocation127_spill] sm:$0xff] %v13519_v17  ;;  %v4449_v55 = vadd.f32 %v4448_v51, %v4386_v62  ;;  %v4317_v39 = vadd.f32 %v4316_v20, %v13415_v33 }
 0x516   :  { %6832 = vmatmul.mubr.f32.vlgmr.msra.gmra.mrb[64].mxu1 %v10995_v12  ;;  %10115 = vmatpush3.bf16.msra.mxu0 %v13511_v15 }
 0x517   :  { %9946 = vmatpush1.bf16.msra.mxu1 %v9945_v58  ;;  %6836 = vmatprep.mubr.f32.mxu1 %v5023_v32  ;;  %v4450_v49 = vadd.f32 %v4449_v55, %v4387_v16  ;;  %v4318_v51 = vadd.f32 %v4317_v39, %v13424_v40  ;;  %v4390_v58 = vmul.f32 %v13450_v53, %v13450_v53  ;;  %v6657_v39 = vld [vmem:[#allocation7 + $0x110] sm:$0xff] }
 0x518   :  { %v3840_v34 = vpop.f32.mrb[110].mxu0  ;;  %10117 = vmatprep.subr.bf16.mxu0 %v13519_v17  ;;  %9947 = vmatprep.subr.bf16.mxu1 %v17937_v48  ;;  %v4391_v32 = vmul.f32 %v13464_v14, %v13464_v14 }
 0x519   :  { %v13527_v57 = vadd.f32 %v17981_v59, %v3840_v34  ;;  %v3842_v4 = vpop.f32.mrb[111].mxu0  ;;  %v4451_v42 = vadd.f32 %v4450_v49, %v4388_v27  ;;  %v4319_v28 = vadd.f32 %v4318_v51, %v13436_v60  ;;  %v4392_v51 = vmul.f32 %v13478_v25, %v13478_v25 }
 0x51a   :  { %6837 = vmatmul.mubr.f32.gmra.mrb[66].mxu1 %v10995_v12  ;;  %10119 = vmatpush3.bf16.msra.mxu0 %v13519_v17  ;;  %v6658_v12 = vld [vmem:[#allocation7 + $0x118] sm:$0xff] }
 0x51b   :  { %17982 = vst [vmem:[#allocation129_spill] sm:$0xff] %v13527_v57  ;;  %v4452_v16 = vadd.f32 %v4451_v42, %v4389_v2  ;;  %v4320_v55 = vadd.f32 %v4319_v28, %v13450_v53  ;;  %v9948_v59 = vpack.c.bf16 %v6658_v12, %v6657_v39  ;;  %v4393_v28 = vmul.f32 %v13492_v29, %v13492_v29  ;;  %v17987_v12 = vld [vmem:[#allocation156_spill] sm:$0xff] }
 0x51c   :  { %v3845_v62 = vpop.f32.mrb[112].mxu0 }
 0x51d   :  { %v13539_v20 = vadd.f32 %v17983_v7, %v3845_v62  ;;  %v3847_v34 = vpop.f32.mrb[113].mxu0  ;;  %v4453_v4 = vadd.f32 %v4452_v16, %v4390_v58  ;;  %v4321_v49 = vadd.f32 %v4320_v55, %v13464_v14  ;;  %v17985_v62 = vld [vmem:[#allocation151_spill] sm:$0xff]  ;;  %9949 = vmatpush1.bf16.msra.mxu1 %v9948_v59  ;;  %v4394_v55 = vmul.f32 %v13508_v22, %v13508_v22 }
 0x51e   :  { %9950 = vmatprep.subr.bf16.mxu1 %v17937_v48 }
 0x51f   :  { %17984 = vst [vmem:[#allocation132_spill] sm:$0xff] %v13539_v20  ;;  %v4454_v2 = vadd.f32 %v4453_v4, %v4391_v32  ;;  %v4322_v42 = vadd.f32 %v4321_v49, %v13478_v25  ;;  %v4395_v4 = vmul.f32 %v13527_v57, %v13527_v57 }
 0x520   :  { %v3850_v27 = vpop.f32.mrb[114].mxu0 }
 0x521   :  { %v13549_v7 = vadd.f32 %v17985_v62, %v3850_v27  ;;  %v3852_v34 = vpop.f32.mrb[115].mxu0  ;;  %v4455_v58 = vadd.f32 %v4454_v2, %v4392_v51  ;;  %v4323_v16 = vadd.f32 %v4322_v42, %v13492_v29  ;;  %v4396_v51 = vmul.f32 %v13539_v20, %v13539_v20  ;;  %v17989_v2 = vld [vmem:[#allocation153_spill] sm:$0xff] }
 0x523   :  { %17986 = vst [vmem:[#allocation134_spill] sm:$0xff] %v13549_v7  ;;  %v4456_v59 = vadd.f32 %v4455_v58, %v4393_v28  ;;  %v4324_v32 = vadd.f32 %v4323_v16, %v13508_v22  ;;  %v4397_v28 = vmul.f32 %v13549_v7, %v13549_v7 }
 0x524   :  { %v3855_v39 = vpop.f32.mrb[116].mxu0 }
 0x525   :  { %v13559_v27 = vadd.f32 %v17987_v12, %v3855_v39  ;;  %v3857_v62 = vpop.f32.mrb[117].mxu0  ;;  %v4457_v34 = vadd.f32 %v4456_v59, %v4394_v55  ;;  %v4325_v17 = vadd.f32 %v4324_v32, %v13527_v57  ;;  %v17991_v59 = vld [vmem:[#allocation158_spill] sm:$0xff] }
 0x526   :  { %v6664_v57 = vld [vmem:[#allocation7 + $0x148] sm:$0xff] }
 0x527   :  { %17988 = vst [vmem:[#allocation111_spill] sm:$0xff] %v13559_v27  ;;  %v4458_v39 = vadd.f32 %v4457_v34, %v4395_v4  ;;  %v4326_v12 = vadd.f32 %v4325_v17, %v13539_v20  ;;  %v4398_v55 = vmul.f32 %v13559_v27, %v13559_v27  ;;  %v6659_v4 = vld [vmem:[#allocation7 + $0x120] sm:$0xff]  ;;  %v6660_v34 = vld [vmem:[#allocation7 + $0x128] sm:$0xff] }
 0x528   :  { %v3860_v49 = vpop.f32.mrb[118].mxu0  ;;  %v9951_v9 = vpack.c.bf16 %v6660_v34, %v6659_v4 }
 0x529   :  { %v13568_v42 = vadd.f32 %v17989_v2, %v3860_v49  ;;  %v3862_v15 = vpop.f32.mrb[119].mxu0  ;;  %v4459_v16 = vadd.f32 %v4458_v39, %v4396_v51  ;;  %v4327_v62 = vadd.f32 %v4326_v12, %v13549_v7  ;;  %v17993_v7 = vld [vmem:[#allocation160_spill] sm:$0xff] }
 0x52a   :  { %9952 = vmatpush1.bf16.msra.mxu1 %v9951_v9 }
 0x52b   :  { %17990 = vst [vmem:[#allocation137_spill] sm:$0xff] %v13568_v42  ;;  %v4460_v49 = vadd.f32 %v4459_v16, %v4397_v28  ;;  %v4328_v15 = vadd.f32 %v4327_v62, %v13559_v27  ;;  %v4399_v17 = vmul.f32 %v13568_v42, %v13568_v42  ;;  %9953 = vmatprep.subr.bf16.mxu1 %v17937_v48 }
 0x52c   :  { %v3865_v58 = vpop.f32.mrb[120].mxu0 }
 0x52d   :  { %v13577_v32 = vadd.f32 %v17991_v59, %v3865_v58  ;;  %v3867_v8 = vpop.f32.mrb[121].mxu0  ;;  %v4461_v51 = vadd.f32 %v4460_v49, %v4398_v55  ;;  %v4329_v39 = vadd.f32 %v4328_v15, %v13568_v42  ;;  %v17995_v15 = vld [vmem:[#allocation164_spill] sm:$0xff] }
 0x52f   :  { %17992 = vst [vmem:[#allocation115_spill] sm:$0xff] %v13577_v32  ;;  %v4400_v12 = vmul.f32 %v13577_v32, %v13577_v32  ;;  %v4462_v28 = vadd.f32 %v4461_v51, %v4399_v17  ;;  %v4330_v16 = vadd.f32 %v4329_v39, %v13577_v32  ;;  %v17997_v39 = vld [vmem:[#allocation161_spill] sm:$0xff] }
 0x530   :  { %v3870_v2 = vpop.f32.mrb[122].mxu0 }
 0x531   :  { %v13586_v58 = vadd.f32 %v17993_v7, %v3870_v2  ;;  %v3872_v8 = vpop.f32.mrb[123].mxu0  ;;  %v4463_v55 = vadd.f32 %v4462_v28, %v4400_v12 }
 0x533   :  { %17994 = vst [vmem:[#allocation139_spill] sm:$0xff] %v13586_v58  ;;  %v4401_v62 = vmul.f32 %v13586_v58, %v13586_v58  ;;  %v4331_v49 = vadd.f32 %v4330_v16, %v13586_v58 }
 0x534   :  { %v3875_v59 = vpop.f32.mrb[124].mxu0 }
 0x535   :  { %v13594_v4 = vadd.f32 %v17995_v15, %v3875_v59  ;;  %v3877_v34 = vpop.f32.mrb[125].mxu0  ;;  %v4464_v7 = vadd.f32 %v4463_v55, %v4401_v62  ;;  %v6661_v59 = vld [vmem:[#allocation7 + $0x130] sm:$0xff]  ;;  %v6662_v15 = vld [vmem:[#allocation7 + $0x138] sm:$0xff] }
 0x536   :  { %v9954_v34 = vpack.c.bf16 %v6662_v15, %v6661_v59 }
 0x537   :  { %17996 = vst [vmem:[#allocation113_spill] sm:$0xff] %v13594_v4  ;;  %v4332_v2 = vadd.f32 %v4331_v49, %v13594_v4  ;;  %v4402_v9 = vmul.f32 %v13594_v4, %v13594_v4 }
 0x538   :  { %v3880_v17 = vpop.f32.mrb[126].mxu0  ;;  %9955 = vmatpush1.bf16.msra.mxu1 %v9954_v34 }
 0x539   :  { %v4465_v51 = vadd.f32 %v4464_v7, %v4402_v9  ;;  %v4266_v8 = vadd.f32 %v17997_v39, %v3880_v17  ;;  %v3882_v32 = vpop.f32.mrb[127].mxu0  ;;  %9956 = vmatprep.subr.bf16.mxu1 %v17937_v48 }
 0x53b   :  { %v4333_v42 = vadd.f32 %v4332_v2, %v4266_v8  ;;  %v4403_v27 = vmul.f32 %v4266_v8, %v4266_v8 }
 0x53d   :  { %v4334_v12 = vrot.slane %v4333_v42, 4  ;;  %v4466_v28 = vadd.f32 %v4465_v51, %v4403_v27 }
 0x53f   :  { %v4335_v16 = vadd.f32 %v4334_v12, %v4333_v42  ;;  %v4467_v58 = vrot.slane %v4466_v28, 4  ;;  %v6663_v12 = vld [vmem:[#allocation7 + $0x140] sm:$0xff] }
 0x540   :  { %v9957_v59 = vpack.c.bf16 %v6664_v57, %v6663_v12  ;;  %v6665_v57 = vld [vmem:[#allocation7 + $0x150] sm:$0xff] }
 0x541   :  { %v4336_v62 = vrot.slane %v4335_v16, 2  ;;  %v4468_v55 = vadd.f32 %v4467_v58, %v4466_v28  ;;  %v4484_v58 = vlaneseq }
 0x542   :  { %9958 = vmatpush1.bf16.msra.mxu1 %v9957_v59 }
 0x543   :  { %v4337_v49 = vadd.f32 %v4336_v62, %v4335_v16  ;;  %v4469_v20 = vrot.slane %v4468_v55, 2  ;;  %9959 = vmatprep.subr.bf16.mxu1 %v17937_v48  ;;  %v4485_v28 = vshrl.u32 %v4484_v58, 7 }
 0x545   :  { %v4338_v7 = vrot.slane %v4337_v49, 1  ;;  %v4470_v9 = vadd.f32 %v4469_v20, %v4468_v55  ;;  %v4269_v20 = vld [vmem:[%s16996_s2] sm:$0x1]  ;;  %v13605_v16 = vsub.s32 0, %v4485_v28  ;;  %v6666_v55 = vld [vmem:[#allocation7 + $0x158] sm:$0xff] }
 0x547   :  { %v4339_v17 = vadd.f32 %v4338_v7, %v4337_v49  ;;  %v4471_v32 = vrot.slane %v4470_v9, 1  ;;  %17998 = vst [vmem:[#allocation142_spill] sm:$0xff] %v13605_v16 }
 0x549   :  { %v4472_v2 = vadd.f32 %v4471_v32, %v4470_v9  ;;  %v4473_v39 = vmul.f32 0.001953125, %v4339_v17  ;;  %v9960_v9 = vpack.c.bf16 %v6666_v55, %v6665_v57  ;;  %v18004_v57 = vld [vmem:[#allocation107_spill] sm:$0xff]  ;;  %v18005_v55 = vld [vmem:[#allocation169_spill] sm:$0xff] }
 0x54b   :  { %v4474_v4 = vmul.f32 0.001953125, %v4472_v2  ;;  %v4475_v27 = vmul.f32 %v4473_v39, %v4473_v39  ;;  %9961 = vmatpush1.bf16.msra.mxu1 %v9960_v9  ;;  %v18006_v9 = vld [vmem:[#allocation170_spill] sm:$0xff] }
 0x54c   :  { %9962 = vmatprep.subr.bf16.mxu1 %v17937_v48  ;;  %v18020_v48 = vld [vmem:[#allocation132_spill] sm:$0xff] }
 0x54d   :  { %v4476_v42 = vsub.f32 %v4474_v4, %v4475_v27  ;;  %v4270_v4 = vld [vmem:[%s16997_s3] sm:$0x1]  ;;  %v17999_v27 = vld [vmem:[#allocation136_spill] sm:$0xff] }
 0x54f   :  { %v4477_v51 = vmax.f32 %v4476_v42, 0.0 }
 0x551   :  { %v4478_v15 = vadd.f32 1e-05, %v4477_v51  ;;  %v18000_v51 = vld [vmem:[#allocation140_spill] sm:$0xff] }
 0x553   :  { %10911 = vrsqrt.f32 %v4478_v15 }
 0x55d   :  { %v10912_v34 = vpop.eup %10911 }
 0x55e   :  { %v4480_v62 = vmul.f32 %v10912_v34, %v4269_v20  ;;  %v18001_v34 = vld [vmem:[#allocation45_spill] sm:$0xff] }
 0x560   :  { %v4481_v49 = vmul.f32 %v4480_v62, %v4473_v39  ;;  %v13611_v7 = vrot.slane %v4480_v62, %v13605_v16  ;;  %v18002_v62 = vld [vmem:[#allocation168_spill] sm:$0xff] }
 0x562   :  { %v4482_v17 = vsub.f32 %v4270_v4, %v4481_v49  ;;  %v4552_v32 = vmul.f32 %v13611_v7, %v4266_v8  ;;  %v13616_v2 = vmul.f32 %v13611_v7, %v13092_v44  ;;  %v13620_v42 = vmul.f32 %v13611_v7, %v17999_v27  ;;  %v18003_v4 = vld [vmem:[#allocation48_spill] sm:$0xff]  ;;  %v18008_v27 = vld [vmem:[#allocation102_spill] sm:$0xff] }
 0x563   :  { %v13624_v12 = vmul.f32 %v13611_v7, %v18000_v51  ;;  %v13628_v39 = vmul.f32 %v13611_v7, %v13108_v0  ;;  %v13632_v8 = vmul.f32 %v13611_v7, %v13116_v46  ;;  %v13636_v44 = vmul.f32 %v13611_v7, %v13120_v19 }
 0x564   :  { %v13640_v59 = vrot.slane %v4482_v17, %v13605_v16  ;;  %v13644_v15 = vmul.f32 %v13611_v7, %v13128_v6  ;;  %v13648_v0 = vmul.f32 %v13611_v7, %v13132_v5  ;;  %v13652_v46 = vmul.f32 %v13611_v7, %v13141_v3  ;;  %v18018_v16 = vld [vmem:[#allocation129_spill] sm:$0xff] }
 0x565   :  { %v13656_v19 = vmul.f32 %v13611_v7, %v13147_v11  ;;  %v13660_v58 = vmul.f32 %v13611_v7, %v13155_v43  ;;  %v13664_v6 = vmul.f32 %v13611_v7, %v13159_v31  ;;  %v13668_v5 = vmul.f32 %v13611_v7, %v13166_v24 }
 0x566   :  { %v4622_v28 = vadd.f32 %v13640_v59, %v4552_v32  ;;  %v13673_v3 = vmul.f32 %v13611_v7, %v13169_v1  ;;  %v13677_v11 = vmul.f32 %v13611_v7, %v13176_v30  ;;  %v13681_v43 = vmul.f32 %v13611_v7, %v13180_v50  ;;  %v18007_v32 = vld [vmem:[#allocation171_spill] sm:$0xff] }
 0x567   :  { %v13685_v31 = vmul.f32 %v13611_v7, %v13187_v45  ;;  %v13689_v24 = vmul.f32 %v13611_v7, %v13191_v13  ;;  %v13693_v1 = vmul.f32 %v13611_v7, %v13198_v35  ;;  %v13697_v30 = vmul.f32 %v13611_v7, %v13202_v56 }
 0x568   :  { %v4686_v20 = vmax.f32 %v4622_v28, 0.0  ;;  %v13701_v50 = vmul.f32 %v13611_v7, %v13209_v63  ;;  %v13705_v45 = vmul.f32 %v13611_v7, %v13213_v61  ;;  %v13709_v13 = vmul.f32 %v13611_v7, %v13220_v54  ;;  %v18009_v28 = vld [vmem:[#allocation103_spill] sm:$0xff] }
 0x569   :  { %v13713_v35 = vmul.f32 %v13611_v7, %v13224_v41  ;;  %v13717_v56 = vmul.f32 %v13611_v7, %v13231_v18  ;;  %v13721_v63 = vmul.f32 %v13611_v7, %v13235_v23  ;;  %v13725_v61 = vmul.f32 %v13611_v7, %v13242_v52 }
 0x56a   :  { %4750 = vst [vmem:[#allocation2 + $0x339] sm:$0xff] %v4686_v20  ;;  %v13729_v54 = vmul.f32 %v13611_v7, %v13246_v10  ;;  %v13733_v41 = vmul.f32 %v13611_v7, %v13253_v37  ;;  %v13737_v18 = vmul.f32 %v13611_v7, %v13257_v36  ;;  %v13741_v23 = vmul.f32 %v13611_v7, %v13264_v21 }
 0x56b   :  { %v13745_v52 = vmul.f32 %v13611_v7, %v18001_v34  ;;  %v13749_v10 = vmul.f32 %v13611_v7, %v18002_v62  ;;  %v13753_v37 = vmul.f32 %v13611_v7, %v13289_v47  ;;  %v13757_v36 = vmul.f32 %v13611_v7, %v18003_v4  ;;  %v18010_v34 = vld [vmem:[#allocation104_spill] sm:$0xff]  ;;  %v18011_v4 = vld [vmem:[#allocation105_spill] sm:$0xff] }
 0x56c   :  { %v13761_v21 = vmul.f32 %v13611_v7, %v18004_v57  ;;  %v13765_v49 = vmul.f32 %v13611_v7, %v18005_v55  ;;  %v13769_v17 = vmul.f32 %v13611_v7, %v18006_v9  ;;  %v13773_v47 = vmul.f32 %v13611_v7, %v18007_v32  ;;  %v18012_v55 = vld [vmem:[#allocation106_spill] sm:$0xff]  ;;  %v18013_v32 = vld [vmem:[#allocation108_spill] sm:$0xff] }
 0x56d   :  { %v13777_v51 = vmul.f32 %v13611_v7, %v18008_v27  ;;  %v13781_v20 = vmul.f32 %v13611_v7, %v18009_v28  ;;  %v13785_v62 = vmul.f32 %v13611_v7, %v18010_v34  ;;  %v13789_v57 = vmul.f32 %v13611_v7, %v18011_v4 }
 0x56e   :  { %v13793_v9 = vmul.f32 %v13611_v7, %v18012_v55  ;;  %v13797_v27 = vmul.f32 %v13611_v7, %v18013_v32  ;;  %v13801_v28 = vmul.f32 %v13611_v7, %v13397_v26  ;;  %v13805_v34 = vmul.f32 %v13611_v7, %v13406_v38 }
 0x56f   :  { %v13809_v4 = vmul.f32 %v13611_v7, %v13415_v33  ;;  %v13813_v55 = vmul.f32 %v13611_v7, %v13424_v40  ;;  %v13817_v32 = vmul.f32 %v13611_v7, %v13436_v60  ;;  %v13821_v26 = vmul.f32 %v13611_v7, %v13450_v53 }
 0x570   :  { %v13825_v38 = vmul.f32 %v13611_v7, %v13464_v14  ;;  %v13829_v33 = vmul.f32 %v13611_v7, %v13478_v25  ;;  %v13833_v40 = vmul.f32 %v13611_v7, %v13492_v29  ;;  %v13837_v60 = vmul.f32 %v13611_v7, %v13508_v22 }
 0x571   :  { %v13841_v53 = vmul.f32 %v13611_v7, %v18018_v16  ;;  %v13845_v14 = vmul.f32 %v13611_v7, %v18020_v48 }
 0x572   :  { %18014 = vst [vmem:[#allocation116_spill] sm:$0xff] %v13825_v38  ;;  %18015 = vst [vmem:[#allocation120_spill] sm:$0xff] %v13829_v33  ;;  %v18022_v38 = vld [vmem:[#allocation134_spill] sm:$0xff]  ;;  %v18023_v33 = vld [vmem:[#allocation111_spill] sm:$0xff] }
 0x573   :  { %18016 = vst [vmem:[#allocation118_spill] sm:$0xff] %v13833_v40  ;;  %18017 = vst [vmem:[#allocation121_spill] sm:$0xff] %v13837_v60  ;;  %v13849_v25 = vmul.f32 %v13611_v7, %v18022_v38  ;;  %v13853_v29 = vmul.f32 %v13611_v7, %v18023_v33  ;;  %v18024_v40 = vld [vmem:[#allocation137_spill] sm:$0xff]  ;;  %v18025_v60 = vld [vmem:[#allocation115_spill] sm:$0xff]  ;;  %v13873_v33 = vadd.f32 %v13640_v59, %v13616_v2 }
 0x574   :  { %18019 = vst [vmem:[#allocation125_spill] sm:$0xff] %v13841_v53  ;;  %18021 = vst [vmem:[#allocation123_spill] sm:$0xff] %v13845_v14  ;;  %v13857_v22 = vmul.f32 %v13611_v7, %v18024_v40  ;;  %v13861_v16 = vmul.f32 %v13611_v7, %v18025_v60  ;;  %v18026_v53 = vld [vmem:[#allocation139_spill] sm:$0xff]  ;;  %v18027_v14 = vld [vmem:[#allocation113_spill] sm:$0xff]  ;;  %v13877_v40 = vadd.f32 %v13640_v59, %v13620_v42 }
 0x575   :  { %v13865_v48 = vmul.f32 %v13611_v7, %v18026_v53  ;;  %v13869_v38 = vmul.f32 %v13611_v7, %v18027_v14  ;;  %v13881_v60 = vadd.f32 %v13640_v59, %v13624_v12  ;;  %v13885_v53 = vadd.f32 %v13640_v59, %v13628_v39 }
 0x576   :  { %v13889_v7 = vadd.f32 %v13640_v59, %v13632_v8  ;;  %v13893_v2 = vadd.f32 %v13640_v59, %v13636_v44  ;;  %v13897_v42 = vadd.f32 %v13640_v59, %v13644_v15  ;;  %v13901_v12 = vadd.f32 %v13640_v59, %v13648_v0 }
 0x577   :  { %v13905_v39 = vadd.f32 %v13640_v59, %v13652_v46  ;;  %v13909_v8 = vadd.f32 %v13640_v59, %v13656_v19  ;;  %v13913_v44 = vadd.f32 %v13640_v59, %v13660_v58  ;;  %v13917_v15 = vadd.f32 %v13640_v59, %v13664_v6 }
 0x578   :  { %v13921_v0 = vadd.f32 %v13640_v59, %v13668_v5  ;;  %v13925_v46 = vadd.f32 %v13640_v59, %v13673_v3  ;;  %v13929_v19 = vadd.f32 %v13640_v59, %v13677_v11  ;;  %v13933_v58 = vadd.f32 %v13640_v59, %v13681_v43 }
 0x579   :  { %v13937_v6 = vadd.f32 %v13640_v59, %v13685_v31  ;;  %v13941_v5 = vadd.f32 %v13640_v59, %v13689_v24  ;;  %v13945_v3 = vadd.f32 %v13640_v59, %v13693_v1  ;;  %v13949_v11 = vadd.f32 %v13640_v59, %v13697_v30  ;;  %v18033_v14 = vld [vmem:[#allocation116_spill] sm:$0xff] }
 0x57a   :  { %v13953_v43 = vadd.f32 %v13640_v59, %v13701_v50  ;;  %v13957_v31 = vadd.f32 %v13640_v59, %v13705_v45  ;;  %v13961_v24 = vadd.f32 %v13640_v59, %v13709_v13  ;;  %v13965_v1 = vadd.f32 %v13640_v59, %v13713_v35 }
 0x57b   :  { %v13969_v30 = vadd.f32 %v13640_v59, %v13717_v56  ;;  %v13973_v50 = vadd.f32 %v13640_v59, %v13721_v63  ;;  %v13977_v45 = vadd.f32 %v13640_v59, %v13725_v61  ;;  %v13981_v13 = vadd.f32 %v13640_v59, %v13729_v54 }
 0x57c   :  { %v13985_v35 = vadd.f32 %v13640_v59, %v13733_v41  ;;  %v13989_v56 = vadd.f32 %v13640_v59, %v13737_v18  ;;  %v13993_v63 = vadd.f32 %v13640_v59, %v13741_v23  ;;  %v13997_v61 = vadd.f32 %v13640_v59, %v13745_v52 }
 0x57d   :  { %v14001_v54 = vadd.f32 %v13640_v59, %v13749_v10  ;;  %v14005_v41 = vadd.f32 %v13640_v59, %v13753_v37  ;;  %v14009_v18 = vadd.f32 %v13640_v59, %v13757_v36  ;;  %v14013_v23 = vadd.f32 %v13640_v59, %v13761_v21 }
 0x57e   :  { %v14017_v52 = vadd.f32 %v13640_v59, %v13765_v49  ;;  %v14021_v10 = vadd.f32 %v13640_v59, %v13769_v17  ;;  %v14025_v37 = vadd.f32 %v13640_v59, %v13773_v47  ;;  %v14029_v36 = vadd.f32 %v13640_v59, %v13777_v51 }
 0x57f   :  { %v14033_v21 = vadd.f32 %v13640_v59, %v13781_v20  ;;  %v14037_v49 = vadd.f32 %v13640_v59, %v13785_v62  ;;  %v14041_v17 = vadd.f32 %v13640_v59, %v13789_v57  ;;  %v14045_v47 = vadd.f32 %v13640_v59, %v13793_v9 }
 0x580   :  { %v14049_v51 = vadd.f32 %v13640_v59, %v13797_v27  ;;  %v14053_v20 = vadd.f32 %v13640_v59, %v13801_v28  ;;  %v14057_v62 = vadd.f32 %v13640_v59, %v13805_v34  ;;  %v14061_v57 = vadd.f32 %v13640_v59, %v13809_v4 }
 0x581   :  { %v14065_v9 = vadd.f32 %v13640_v59, %v13813_v55  ;;  %v14069_v27 = vadd.f32 %v13640_v59, %v13817_v32  ;;  %v14073_v28 = vadd.f32 %v13640_v59, %v13821_v26  ;;  %v14077_v34 = vadd.f32 %v13640_v59, %v18033_v14 }
 0x582   :  { %18028 = vst [vmem:[#allocation126_spill] sm:$0xff] %v14057_v62  ;;  %18029 = vst [vmem:[#allocation130_spill] sm:$0xff] %v14061_v57  ;;  %v18034_v62 = vld [vmem:[#allocation120_spill] sm:$0xff]  ;;  %v18035_v57 = vld [vmem:[#allocation118_spill] sm:$0xff] }
 0x583   :  { %18030 = vst [vmem:[#allocation131_spill] sm:$0xff] %v14065_v9  ;;  %18031 = vst [vmem:[#allocation128_spill] sm:$0xff] %v14069_v27  ;;  %v14081_v4 = vadd.f32 %v13640_v59, %v18034_v62  ;;  %v14085_v55 = vadd.f32 %v13640_v59, %v18035_v57  ;;  %v18036_v9 = vld [vmem:[#allocation121_spill] sm:$0xff]  ;;  %v14101_v62 = vadd.f32 %v13640_v59, %v13849_v25 }
 0x584   :  { %18032 = vst [vmem:[#allocation135_spill] sm:$0xff] %v14073_v28  ;;  %v14089_v32 = vadd.f32 %v13640_v59, %v18036_v9  ;;  %v18037_v27 = vld [vmem:[#allocation125_spill] sm:$0xff]  ;;  %v18038_v28 = vld [vmem:[#allocation123_spill] sm:$0xff]  ;;  %v14105_v57 = vadd.f32 %v13640_v59, %v13853_v29  ;;  %v14109_v9 = vadd.f32 %v13640_v59, %v13857_v22  ;;  %v14121_v25 = vadd.f32 %v13640_v59, %v13869_v38 }
 0x585   :  { %v14093_v26 = vadd.f32 %v13640_v59, %v18037_v27  ;;  %v14097_v14 = vadd.f32 %v13640_v59, %v18038_v28  ;;  %18039 = vst [vmem:[#allocation133_spill] sm:$0xff] %v14101_v62  ;;  %v14113_v27 = vadd.f32 %v13640_v59, %v13861_v16  ;;  %v14117_v28 = vadd.f32 %v13640_v59, %v13865_v48 }
 0x586   :  { %18040 = vst [vmem:[#allocation49_spill] sm:$0xff] %v14105_v57  ;;  %18041 = vst [vmem:[#allocation52_spill] sm:$0xff] %v14109_v9  ;;  %v4623_v62 = vmax.f32 %v13873_v33, 0.0  ;;  %v4624_v29 = vmax.f32 %v13877_v40, 0.0  ;;  %v4625_v57 = vmax.f32 %v13881_v60, 0.0  ;;  %v4626_v22 = vmax.f32 %v13885_v53, 0.0 }
 0x587   :  { %18042 = vst [vmem:[#allocation53_spill] sm:$0xff] %v14113_v27  ;;  %18043 = vst [vmem:[#allocation56_spill] sm:$0xff] %v14117_v28  ;;  %v4627_v9 = vmax.f32 %v13889_v7, 0.0  ;;  %v4628_v16 = vmax.f32 %v13893_v2, 0.0  ;;  %v4629_v27 = vmax.f32 %v13897_v42, 0.0  ;;  %v4630_v48 = vmax.f32 %v13901_v12, 0.0 }
 0x588   :  { %v4631_v28 = vmax.f32 %v13905_v39, 0.0  ;;  %4687 = vst [vmem:[#allocation2 + $0x19] sm:$0xff] %v4623_v62  ;;  %v4632_v59 = vmax.f32 %v13909_v8, 0.0  ;;  %v4633_v38 = vmax.f32 %v13913_v44, 0.0  ;;  %v4634_v33 = vmax.f32 %v13917_v15, 0.0  ;;  %4688 = vst [vmem:[#allocation2 + $0x21] sm:$0xff] %v4624_v29 }
 0x589   :  { %v4635_v40 = vmax.f32 %v13921_v0, 0.0  ;;  %4689 = vst [vmem:[#allocation2 + $0x31] sm:$0xff] %v4625_v57  ;;  %4690 = vst [vmem:[#allocation2 + $0x39] sm:$0xff] %v4626_v22  ;;  %v4636_v60 = vmax.f32 %v13925_v46, 0.0  ;;  %v4637_v53 = vmax.f32 %v13929_v19, 0.0  ;;  %v4638_v7 = vmax.f32 %v13933_v58, 0.0 }
 0x58a   :  { %4691 = vst [vmem:[#allocation2 + $0x49] sm:$0xff] %v4627_v9  ;;  %v4639_v2 = vmax.f32 %v13937_v6, 0.0  ;;  %4692 = vst [vmem:[#allocation2 + $0x51] sm:$0xff] %v4628_v16  ;;  %v4640_v42 = vmax.f32 %v13941_v5, 0.0  ;;  %v4641_v12 = vmax.f32 %v13945_v3, 0.0  ;;  %v4642_v39 = vmax.f32 %v13949_v11, 0.0 }
 0x58b   :  { %4693 = vst [vmem:[#allocation2 + $0x61] sm:$0xff] %v4629_v27  ;;  %4694 = vst [vmem:[#allocation2 + $0x69] sm:$0xff] %v4630_v48  ;;  %v4643_v8 = vmax.f32 %v13953_v43, 0.0  ;;  %v4644_v44 = vmax.f32 %v13957_v31, 0.0  ;;  %v4645_v15 = vmax.f32 %v13961_v24, 0.0  ;;  %v4646_v0 = vmax.f32 %v13965_v1, 0.0 }
 0x58c   :  { %4695 = vst [vmem:[#allocation2 + $0x79] sm:$0xff] %v4631_v28  ;;  %4696 = vst [vmem:[#allocation2 + $0x81] sm:$0xff] %v4632_v59  ;;  %v4647_v46 = vmax.f32 %v13969_v30, 0.0  ;;  %v4648_v19 = vmax.f32 %v13973_v50, 0.0  ;;  %v4649_v58 = vmax.f32 %v13977_v45, 0.0  ;;  %v4650_v6 = vmax.f32 %v13981_v13, 0.0 }
 0x58d   :  { %4697 = vst [vmem:[#allocation2 + $0x91] sm:$0xff] %v4633_v38  ;;  %4698 = vst [vmem:[#allocation2 + $0x99] sm:$0xff] %v4634_v33  ;;  %v4651_v5 = vmax.f32 %v13985_v35, 0.0  ;;  %v4652_v3 = vmax.f32 %v13989_v56, 0.0  ;;  %v4653_v11 = vmax.f32 %v13993_v63, 0.0  ;;  %v4654_v43 = vmax.f32 %v13997_v61, 0.0 }
 0x58e   :  { %4699 = vst [vmem:[#allocation2 + $0xa9] sm:$0xff] %v4635_v40  ;;  %4700 = vst [vmem:[#allocation2 + $0xb1] sm:$0xff] %v4636_v60  ;;  %v4655_v31 = vmax.f32 %v14001_v54, 0.0  ;;  %v4656_v24 = vmax.f32 %v14005_v41, 0.0  ;;  %v4657_v1 = vmax.f32 %v14009_v18, 0.0  ;;  %v4658_v30 = vmax.f32 %v14013_v23, 0.0 }
 0x58f   :  { %4701 = vst [vmem:[#allocation2 + $0xc1] sm:$0xff] %v4637_v53  ;;  %4702 = vst [vmem:[#allocation2 + $0xc9] sm:$0xff] %v4638_v7  ;;  %v4659_v50 = vmax.f32 %v14017_v52, 0.0  ;;  %v4660_v45 = vmax.f32 %v14021_v10, 0.0  ;;  %v4661_v13 = vmax.f32 %v14025_v37, 0.0  ;;  %v4662_v35 = vmax.f32 %v14029_v36, 0.0 }
 0x590   :  { %4703 = vst [vmem:[#allocation2 + $0xd9] sm:$0xff] %v4639_v2  ;;  %4704 = vst [vmem:[#allocation2 + $0xe1] sm:$0xff] %v4640_v42  ;;  %v4663_v56 = vmax.f32 %v14033_v21, 0.0  ;;  %v4664_v63 = vmax.f32 %v14037_v49, 0.0  ;;  %v4665_v61 = vmax.f32 %v14041_v17, 0.0  ;;  %v4666_v54 = vmax.f32 %v14045_v47, 0.0 }
 0x591   :  { %4705 = vst [vmem:[#allocation2 + $0xf1] sm:$0xff] %v4641_v12  ;;  %4706 = vst [vmem:[#allocation2 + $0xf9] sm:$0xff] %v4642_v39  ;;  %v4667_v41 = vmax.f32 %v14049_v51, 0.0  ;;  %v14168_v18 = vld [vmem:[#allocation2 + $0x18] sm:$0xff]  ;;  %v14170_v23 = vld [vmem:[#allocation2 + $0x20] sm:$0xff]  ;;  %v4668_v52 = vmax.f32 %v14053_v20, 0.0 }
 0x592   :  { %4707 = vst [vmem:[#allocation2 + $0x109] sm:$0xff] %v4643_v8  ;;  %4708 = vst [vmem:[#allocation2 + $0x111] sm:$0xff] %v4644_v44  ;;  %v18044_v10 = vld [vmem:[#allocation126_spill] sm:$0xff]  ;;  %v18046_v49 = vld [vmem:[#allocation131_spill] sm:$0xff]  ;;  %v4674_v20 = vmax.f32 %v14077_v34, 0.0  ;;  %v4675_v28 = vmax.f32 %v14081_v4, 0.0 }
 0x593   :  { %4709 = vst [vmem:[#allocation2 + $0x121] sm:$0xff] %v4645_v15  ;;  %4710 = vst [vmem:[#allocation2 + $0x129] sm:$0xff] %v4646_v0  ;;  %v4669_v37 = vmax.f32 %v18044_v10, 0.0  ;;  %v18045_v36 = vld [vmem:[#allocation130_spill] sm:$0xff]  ;;  %v4671_v17 = vmax.f32 %v18046_v49, 0.0  ;;  %v14176_v47 = vld [vmem:[#allocation2 + $0x30] sm:$0xff] }
 0x594   :  { %4711 = vst [vmem:[#allocation2 + $0x139] sm:$0xff] %v4647_v46  ;;  %4712 = vst [vmem:[#allocation2 + $0x141] sm:$0xff] %v4648_v19  ;;  %v4670_v21 = vmax.f32 %v18045_v36, 0.0  ;;  %v14178_v51 = vld [vmem:[#allocation2 + $0x38] sm:$0xff]  ;;  %v18048_v9 = vld [vmem:[#allocation135_spill] sm:$0xff]  ;;  %v4676_v22 = vmax.f32 %v14085_v55, 0.0 }
 0x595   :  { %4713 = vst [vmem:[#allocation2 + $0x151] sm:$0xff] %v4649_v58  ;;  %4714 = vst [vmem:[#allocation2 + $0x159] sm:$0xff] %v4650_v6  ;;  %v18047_v62 = vld [vmem:[#allocation128_spill] sm:$0xff]  ;;  %v4673_v27 = vmax.f32 %v18048_v9, 0.0  ;;  %v14184_v29 = vld [vmem:[#allocation2 + $0x40] sm:$0x3] }
 0x596   :  { %4715 = vst [vmem:[#allocation2 + $0x169] sm:$0xff] %v4651_v5  ;;  %4716 = vst [vmem:[#allocation2 + $0x171] sm:$0xff] %v4652_v3  ;;  %v4672_v57 = vmax.f32 %v18047_v62, 0.0  ;;  %v4677_v16 = vmax.f32 %v14089_v32, 0.0  ;;  %v4678_v48 = vmax.f32 %v14093_v26, 0.0  ;;  %v4679_v59 = vmax.f32 %v14097_v14, 0.0 }
 0x597   :  { %4717 = vst [vmem:[#allocation2 + $0x181] sm:$0xff] %v4653_v11  ;;  %4718 = vst [vmem:[#allocation2 + $0x189] sm:$0xff] %v4654_v43  ;;  %v4756_v34 = vld [vmem:[#allocation2 + $0x28] sm:$0x3]  ;;  %v18049_v4 = vld [vmem:[#allocation133_spill] sm:$0xff]  ;;  %v4685_v42 = vmax.f32 %v14121_v25, 0.0 }
 0x598   :  { %4719 = vst [vmem:[#allocation2 + $0x1c9] sm:$0xff] %v4655_v31  ;;  %4720 = vst [vmem:[#allocation2 + $0x1d1] sm:$0xff] %v4656_v24  ;;  %v4680_v38 = vmax.f32 %v18049_v4, 0.0  ;;  %v18050_v33 = vld [vmem:[#allocation49_spill] sm:$0xff]  ;;  %v18051_v60 = vld [vmem:[#allocation52_spill] sm:$0xff]  ;;  %v5024_v12 = vrot.slane %v14168_v18, 1 }
 0x599   :  { %4721 = vst [vmem:[#allocation2 + $0x1e1] sm:$0xff] %v4657_v1  ;;  %4722 = vst [vmem:[#allocation2 + $0x1e9] sm:$0xff] %v4658_v30  ;;  %v4681_v40 = vmax.f32 %v18050_v33, 0.0  ;;  %v4682_v53 = vmax.f32 %v18051_v60, 0.0  ;;  %v18052_v7 = vld [vmem:[#allocation53_spill] sm:$0xff]  ;;  %v14194_v55 = vld [vmem:[#allocation2 + $0x48] sm:$0xff] }
 0x59a   :  { %4723 = vst [vmem:[#allocation2 + $0x1f9] sm:$0xff] %v4659_v50  ;;  %4724 = vst [vmem:[#allocation2 + $0x201] sm:$0xff] %v4660_v45  ;;  %v4683_v2 = vmax.f32 %v18052_v7, 0.0  ;;  %v14196_v32 = vld [vmem:[#allocation2 + $0x50] sm:$0xff]  ;;  %v18053_v26 = vld [vmem:[#allocation56_spill] sm:$0xff]  ;;  %v5025_v39 = vrot.slane %v14170_v23, 1 }
 0x59b   :  { %4725 = vst [vmem:[#allocation2 + $0x211] sm:$0xff] %v4661_v13  ;;  %4726 = vst [vmem:[#allocation2 + $0x219] sm:$0xff] %v4662_v35  ;;  %v4684_v14 = vmax.f32 %v18053_v26, 0.0  ;;  %v5317_v8 = vrot.slane %v14176_v47, 2  ;;  %v5318_v44 = vrot.slane %v14178_v51, 2  ;;  %v5320_v15 = vrot.slane %v14184_v29, 2 }
 0x59c   :  { %4727 = vst [vmem:[#allocation2 + $0x229] sm:$0xff] %v4663_v56  ;;  %4728 = vst [vmem:[#allocation2 + $0x231] sm:$0xff] %v4664_v63  ;;  %v5027_v0 = vrot.slane %v4756_v34, 1  ;;  %v14205_v25 = vld [vmem:[#allocation2 + $0x58] sm:$0x3]  ;;  %v14208_v46 = vsel %vm594_vm0, %v5024_v12, %v5025_v39  ;;  %v5322_v19 = vrot.slane %v14194_v55, 2 }
 0x59d   :  { %4729 = vst [vmem:[#allocation2 + $0x241] sm:$0xff] %v4665_v61  ;;  %4730 = vst [vmem:[#allocation2 + $0x249] sm:$0xff] %v4666_v54  ;;  %v5323_v58 = vrot.slane %v14196_v32, 2  ;;  %v14212_v6 = vld [vmem:[#allocation2 + $0x60] sm:$0xff]  ;;  %v14214_v5 = vld [vmem:[#allocation2 + $0x68] sm:$0xff]  ;;  %6841 = vmatprep.mubr.f32.mxu1 %v14208_v46  ;;  %v14218_v3 = vsel %vm883_vm2, %v5317_v8, %v5318_v44  ;;  %v14221_v11 = vsel %vm883_vm2, %v5318_v44, %v5320_v15  ;;  %v5325_v31 = vrot.slane %v14205_v25, 2 }
 0x59e   :  { %4731 = vst [vmem:[#allocation2 + $0x259] sm:$0xff] %v4667_v41  ;;  %4732 = vst [vmem:[#allocation2 + $0x261] sm:$0xff] %v4668_v52  ;;  %9576 = vmatprep.mubr.f32.mxu0 %v14218_v3  ;;  %6842 = vmatmul.mubr.f32.gmra.mrb[68].mxu1 %v14168_v18  ;;  %v14226_v43 = vsel %vm594_vm0, %v5025_v39, %v5027_v0  ;;  %v5029_v24 = vrot.slane %v14176_v47, 1  ;;  %v5030_v1 = vrot.slane %v14178_v51, 1  ;;  %v5327_v50 = vrot.slane %v14212_v6, 2  ;;  %v14241_v35 = vld [vmem:[#allocation2 + $0x78] sm:$0xff] }
 0x59f   :  { %4733 = vst [vmem:[#allocation2 + $0x271] sm:$0xff] %v4669_v37  ;;  %4734 = vst [vmem:[#allocation2 + $0x279] sm:$0xff] %v4670_v21  ;;  %9577 = vmatmul.mubr.f32.vlgmr.msra.gmra.mrb[128].mxu0 %v14221_v11  ;;  %6846 = vmatprep.mubr.f32.mxu1 %v14226_v43  ;;  %v14234_v30 = vsel %vm883_vm2, %v5322_v19, %v5323_v58  ;;  %v5328_v45 = vrot.slane %v14214_v5, 2  ;;  %v14238_v13 = vld [vmem:[#allocation2 + $0x70] sm:$0x3]  ;;  %v14243_v56 = vld [vmem:[#allocation2 + $0x80] sm:$0xff]  ;;  %v14247_v63 = vsel %vm883_vm2, %v5323_v58, %v5325_v31 }
 0x5a0   :  { %4735 = vst [vmem:[#allocation2 + $0x289] sm:$0xff] %v4671_v17  ;;  %4736 = vst [vmem:[#allocation2 + $0x291] sm:$0xff] %v4672_v57  ;;  %9579 = vmatprep.mubr.f32.mxu0 %v14234_v30  ;;  %v14250_v61 = vsel %vm594_vm0, %v5029_v24, %v5030_v1  ;;  %v5330_v54 = vrot.slane %v14238_v13, 2  ;;  %v5032_v41 = vrot.slane %v14184_v29, 1  ;;  %v14254_v18 = vld [vmem:[#allocation2 + $0x88] sm:$0x3] }
 0x5a1   :  { %4737 = vst [vmem:[#allocation2 + $0x2a1] sm:$0xff] %v4673_v27  ;;  %4738 = vst [vmem:[#allocation2 + $0x2a9] sm:$0xff] %v4674_v20  ;;  %v14259_v52 = vsel %vm883_vm2, %v5327_v50, %v5328_v45  ;;  %v5333_v10 = vrot.slane %v14243_v56, 2  ;;  %v14264_v37 = vld [vmem:[#allocation2 + $0x90] sm:$0xff]  ;;  %v14266_v36 = vld [vmem:[#allocation2 + $0x98] sm:$0xff]  ;;  %v5335_v21 = vrot.slane %v14254_v18, 2 }
 0x5a2   :  { %4739 = vst [vmem:[#allocation2 + $0x2b9] sm:$0xff] %v4675_v28  ;;  %4740 = vst [vmem:[#allocation2 + $0x2c1] sm:$0xff] %v4676_v22  ;;  %6847 = vmatmul.mubr.f32.gmra.mrb[70].mxu1 %v14170_v23  ;;  %v5332_v23 = vrot.slane %v14241_v35, 2  ;;  %v14271_v49 = vsel %vm883_vm2, %v5328_v45, %v5330_v54  ;;  %v14274_v17 = vsel %vm594_vm0, %v5030_v1, %v5032_v41  ;;  %v5034_v62 = vrot.slane %v14194_v55, 1  ;;  %v14285_v20 = vld [vmem:[#allocation2 + $0xa0] sm:$0x3] }
 0x5a3   :  { %4741 = vst [vmem:[#allocation2 + $0x2d1] sm:$0xff] %v4677_v16  ;;  %4742 = vst [vmem:[#allocation2 + $0x2d9] sm:$0xff] %v4678_v48  ;;  %9580 = vmatmul.mubr.f32.gmra.mrb[130].mxu0 %v14247_v63  ;;  %6851 = vmatprep.mubr.f32.mxu1 %v14250_v61  ;;  %v5035_v57 = vrot.slane %v14196_v32, 1  ;;  %v5337_v27 = vrot.slane %v14264_v37, 2  ;;  %v14288_v28 = vld [vmem:[#allocation2 + $0xa8] sm:$0xff]  ;;  %v14290_v29 = vld [vmem:[#allocation2 + $0xb0] sm:$0xff]  ;;  %v14294_v22 = vsel %vm883_vm2, %v5333_v10, %v5335_v21 }
 0x5a4   :  { %4743 = vst [vmem:[#allocation2 + $0x2e9] sm:$0xff] %v4679_v59  ;;  %4744 = vst [vmem:[#allocation2 + $0x2f1] sm:$0xff] %v4680_v38  ;;  %9582 = vmatprep.mubr.f32.mxu0 %v14259_v52  ;;  %v14281_v9 = vsel %vm883_vm2, %v5332_v23, %v5333_v10  ;;  %v5340_v48 = vrot.slane %v14285_v20, 2  ;;  %v5037_v59 = vrot.slane %v14205_v25, 1  ;;  %v14301_v34 = vld [vmem:[#allocation2 + $0xb8] sm:$0x3] }
 0x5a5   :  { %4745 = vst [vmem:[#allocation2 + $0x301] sm:$0xff] %v4681_v40  ;;  %4746 = vst [vmem:[#allocation2 + $0x309] sm:$0xff] %v4682_v53  ;;  %v14297_v16 = vsel %vm594_vm0, %v5034_v62, %v5035_v57  ;;  %v5343_v38 = vrot.slane %v14290_v29, 2  ;;  %v14311_v33 = vld [vmem:[#allocation2 + $0xc0] sm:$0xff]  ;;  %v14313_v40 = vld [vmem:[#allocation2 + $0xc8] sm:$0xff]  ;;  %v5345_v60 = vrot.slane %v14301_v34, 2 }
 0x5a6   :  { %4747 = vst [vmem:[#allocation2 + $0x319] sm:$0xff] %v4683_v2  ;;  %4748 = vst [vmem:[#allocation2 + $0x321] sm:$0xff] %v4684_v14  ;;  %6852 = vmatmul.mubr.f32.gmra.mrb[72].mxu1 %v14176_v47  ;;  %v5338_v47 = vrot.slane %v14266_v36, 2  ;;  %v14321_v7 = vsel %vm594_vm0, %v5035_v57, %v5037_v59  ;;  %v5039_v2 = vrot.slane %v14212_v6, 1  ;;  %v5040_v26 = vrot.slane %v14214_v5, 1  ;;  %v14335_v39 = vld [vmem:[#allocation2 + $0xd8] sm:$0xff] }
 0x5a7   :  { %4749 = vst [vmem:[#allocation2 + $0x331] sm:$0xff] %v4685_v42  ;;  %18054 = vst [vmem:[#allocation57_spill] sm:$0xff] %v14208_v46  ;;  %9583 = vmatmul.mubr.f32.gmra.mrb[132].mxu0 %v14271_v49  ;;  %6856 = vmatprep.mubr.f32.mxu1 %v14274_v17  ;;  %v14325_v14 = vld [vmem:[#allocation2 + $0xd0] sm:$0x3]  ;;  %v5348_v12 = vrot.slane %v14313_v40, 2  ;;  %v14337_v8 = vld [vmem:[#allocation2 + $0xe0] sm:$0xff]  ;;  %v14342_v15 = vsel %vm883_vm2, %v5343_v38, %v5345_v60 }
 0x5a8   :  { %18055 = vst [vmem:[#allocation60_spill] sm:$0xff] %v14226_v43  ;;  %18056 = vst [vmem:[#allocation61_spill] sm:$0xff] %v14250_v61  ;;  %9585 = vmatprep.mubr.f32.mxu0 %v14281_v9  ;;  %v14306_v4 = vsel %vm883_vm2, %v5337_v27, %v5338_v47  ;;  %v14318_v53 = vsel %vm883_vm2, %v5338_v47, %v5340_v48  ;;  %v5350_v44 = vrot.slane %v14325_v14, 2  ;;  %v5042_v25 = vrot.slane %v14238_v13, 1  ;;  %v14358_v24 = vld [vmem:[#allocation2 + $0xf0] sm:$0xff]  ;;  %v14360_v1 = vld [vmem:[#allocation2 + $0xf8] sm:$0xff] }
 0x5a9   :  { %18057 = vst [vmem:[#allocation64_spill] sm:$0xff] %v14274_v17  ;;  %18058 = vst [vmem:[#allocation65_spill] sm:$0xff] %v14281_v9  ;;  %v14345_v0 = vsel %vm594_vm0, %v5039_v2, %v5040_v26  ;;  %v5352_v58 = vrot.slane %v14335_v39, 2  ;;  %v5353_v31 = vrot.slane %v14337_v8, 2  ;;  %v5044_v54 = vrot.slane %v14241_v35, 1  ;;  %v14382_v62 = vld [vmem:[#allocation2 + $0x108] sm:$0xff] }
 0x5aa   :  { %6857 = vmatmul.mubr.f32.gmra.mrb[74].mxu1 %v14178_v51  ;;  %18059 = vst [vmem:[#allocation68_spill] sm:$0xff] %v14294_v22  ;;  %18060 = vst [vmem:[#allocation69_spill] sm:$0xff] %v14297_v16  ;;  %v5342_v51 = vrot.slane %v14288_v28, 2  ;;  %v14363_v50 = vsel %vm883_vm2, %v5348_v12, %v5350_v44  ;;  %v14367_v45 = vsel %vm594_vm0, %v5040_v26, %v5042_v25  ;;  %v5045_v41 = vrot.slane %v14243_v56, 1  ;;  %v14379_v21 = vld [vmem:[#allocation2 + $0x100] sm:$0x3] }
 0x5ab   :  { %9586 = vmatmul.mubr.f32.gmra.mrb[134].mxu0 %v14294_v22  ;;  %6861 = vmatprep.mubr.f32.mxu1 %v14297_v16  ;;  %18061 = vst [vmem:[#allocation72_spill] sm:$0xff] %v14306_v4  ;;  %18062 = vst [vmem:[#allocation73_spill] sm:$0xff] %v14318_v53  ;;  %v14375_v23 = vsel %vm883_vm2, %v5352_v58, %v5353_v31  ;;  %v5357_v10 = vrot.slane %v14358_v24, 2  ;;  %v14384_v57 = vld [vmem:[#allocation2 + $0x110] sm:$0xff]  ;;  %v5360_v48 = vrot.slane %v14379_v21, 2  ;;  %v5047_v59 = vrot.slane %v14254_v18, 1 }
 0x5ac   :  { %9588 = vmatprep.mubr.f32.mxu0 %v14306_v4  ;;  %18063 = vst [vmem:[#allocation76_spill] sm:$0xff] %v14321_v7  ;;  %v14330_v42 = vsel %vm883_vm2, %v5342_v51, %v5343_v38  ;;  %18065 = vst [vmem:[#allocation80_spill] sm:$0xff] %v14342_v15  ;;  %v14391_v47 = vsel %vm594_vm0, %v5044_v54, %v5045_v41  ;;  %v14395_v51 = vld [vmem:[#allocation2 + $0x118] sm:$0x3]  ;;  %v5363_v60 = vrot.slane %v14384_v57, 2  ;;  %v14405_v2 = vld [vmem:[#allocation2 + $0x120] sm:$0xff] }
 0x5ad   :  { %18064 = vst [vmem:[#allocation77_spill] sm:$0xff] %v14330_v42  ;;  %18066 = vst [vmem:[#allocation81_spill] sm:$0xff] %v14345_v0  ;;  %v14407_v26 = vld [vmem:[#allocation2 + $0x128] sm:$0xff]  ;;  %v5365_v18 = vrot.slane %v14395_v51, 2  ;;  %v5049_v44 = vrot.slane %v14264_v37, 1  ;;  %v5050_v25 = vrot.slane %v14266_v36, 1 }
 0x5ae   :  { %6862 = vmatmul.mubr.f32.gmra.mrb[76].mxu1 %v14194_v55  ;;  %v5347_v55 = vrot.slane %v14311_v33, 2  ;;  %18068 = vst [vmem:[#allocation85_spill] sm:$0xff] %v14363_v50  ;;  %18069 = vst [vmem:[#allocation88_spill] sm:$0xff] %v14367_v45  ;;  %v14429_v54 = vld [vmem:[#allocation2 + $0x138] sm:$0xff]  ;;  %v5055_v16 = vrot.slane %v14290_v29, 1  ;;  %v18083_v61 = vmov 0.0|0.0  }
 0x5af   :  { %9589 = vmatmul.mubr.f32.gmra.mrb[136].mxu0 %v14318_v53  ;;  %6866 = vmatprep.mubr.f32.mxu1 %v14321_v7  ;;  %18070 = vst [vmem:[#allocation89_spill] sm:$0xff] %v14375_v23  ;;  %18072 = vst [vmem:[#allocation93_spill] sm:$0xff] %v14391_v47  ;;  %v5054_v7 = vrot.slane %v14288_v28, 1  ;;  %v6670_v17 = vld [vmem:[#allocation7 + $0x178] sm:$0xff]  ;;  %v5057_v46 = vrot.slane %v14301_v34, 1  ;;  %v6672_v34 = vld [vmem:[#allocation7 + $0x188] sm:$0xff] }
 0x5b0   :  { %9591 = vmatprep.mubr.f32.mxu0 %v14330_v42  ;;  %v14351_v19 = vsel %vm883_vm2, %v5347_v55, %v5348_v12  ;;  %v14415_v12 = vsel %vm594_vm0, %v5045_v41, %v5047_v59  ;;  %v14431_v41 = vld [vmem:[#allocation2 + $0x140] sm:$0xff]  ;;  %v14438_v59 = vsel %vm594_vm0, %v5049_v44, %v5050_v25  ;;  %v14454_v44 = vld [vmem:[#allocation2 + $0x158] sm:$0xff]  ;;  %v14761_v22 = vld [vmem:[#allocation2 + $0x2c8] sm:$0x3] }
 0x5b1   :  { %18067 = vst [vmem:[#allocation84_spill] sm:$0xff] %v14351_v19  ;;  %18075 = vst [vmem:[#allocation100_spill] sm:$0xff] %v14415_v12  ;;  %v14750_v42 = vld [vmem:[#allocation2 + $0x2c0] sm:$0xff]  ;;  %v6686_v9 = vld [vmem:[#allocation7 + $0x1f8] sm:$0xff] }
 0x5b2   :  { %6867 = vmatmul.mubr.f32.gmra.mrb[78].mxu1 %v14196_v32  ;;  %v14355_v32 = vld [vmem:[#allocation2 + $0xe8] sm:$0x3]  ;;  %18078 = vst [vmem:[#allocation147_spill] sm:$0xff] %v14438_v59 }
 0x5b3   :  { %9592 = vmatmul.mubr.f32.gmra.mrb[138].mxu0 %v14342_v15  ;;  %6871 = vmatprep.mubr.f32.mxu1 %v14345_v0  ;;  %v5355_v13 = vrot.slane %v14355_v32, 2  ;;  %v14748_v15 = vld [vmem:[#allocation2 + $0x2b8] sm:$0xff] }
 0x5b4   :  { %9594 = vmatprep.mubr.f32.mxu0 %v14351_v19 }
 0x5b5   :  { %v14388_v27 = vsel %vm883_vm2, %v5353_v31, %v5355_v13  ;;  %v5367_v31 = vrot.slane %v14405_v2, 2  ;;  %v14426_v13 = vld [vmem:[#allocation2 + $0x130] sm:$0x3] }
 0x5b6   :  { %6872 = vmatmul.mubr.f32.gmra.mrb[80].mxu1 %v14212_v6  ;;  %v5358_v6 = vrot.slane %v14360_v1, 2  ;;  %18071 = vst [vmem:[#allocation92_spill] sm:$0xff] %v14388_v27 }
 0x5b7   :  { %9595 = vmatmul.mubr.f32.gmra.mrb[140].mxu0 %v14363_v50  ;;  %6876 = vmatprep.mubr.f32.mxu1 %v14367_v45 }
 0x5b8   :  { %9597 = vmatprep.mubr.f32.mxu0 %v14375_v23  ;;  %v14400_v38 = vsel %vm883_vm2, %v5357_v10, %v5358_v6  ;;  %v14412_v55 = vsel %vm883_vm2, %v5358_v6, %v5360_v48  ;;  %v6667_v10 = vld [vmem:[#allocation7 + $0x160] sm:$0xff]  ;;  %v6668_v6 = vld [vmem:[#allocation7 + $0x168] sm:$0xff]  ;;  %v14435_v48 = vsel %vm883_vm2, %v5363_v60, %v5365_v18  ;;  %v14452_v18 = vld [vmem:[#allocation2 + $0x150] sm:$0xff]  ;;  %v5077_v23 = vrot.slane %v14395_v51, 1 }
 0x5b9   :  { %18073 = vst [vmem:[#allocation96_spill] sm:$0xff] %v14400_v38  ;;  %18074 = vst [vmem:[#allocation97_spill] sm:$0xff] %v14412_v55 }
 0x5ba   :  { %6877 = vmatmul.mubr.f32.gmra.mrb[82].mxu1 %v14214_v5  ;;  %v5362_v5 = vrot.slane %v14382_v62, 2  ;;  %18077 = vst [vmem:[#allocation144_spill] sm:$0xff] %v14435_v48 }
 0x5bb   :  { %9598 = vmatmul.mubr.f32.gmra.mrb[142].mxu0 %v14388_v27  ;;  %6881 = vmatprep.mubr.f32.mxu1 %v14391_v47  ;;  %v14442_v47 = vld [vmem:[#allocation2 + $0x148] sm:$0x3] }
 0x5bc   :  { %9600 = vmatprep.mubr.f32.mxu0 %v14400_v38  ;;  %v14422_v58 = vsel %vm883_vm2, %v5362_v5, %v5363_v60  ;;  %v5370_v5 = vrot.slane %v14426_v13, 2  ;;  %v5373_v60 = vrot.slane %v14431_v41, 2  ;;  %v5375_v0 = vrot.slane %v14442_v47, 2  ;;  %v14655_v38 = vld [vmem:[#allocation2 + $0x260] sm:$0xff] }
 0x5bd   :  { %18076 = vst [vmem:[#allocation101_spill] sm:$0xff] %v14422_v58  ;;  %v5087_v4 = vrot.slane %v14442_v47, 1  ;;  %v5445_v47 = vrot.slane %v14761_v22, 2 }
 0x5be   :  { %6882 = vmatmul.mubr.f32.gmra.mrb[84].mxu1 %v14241_v35  ;;  %v5368_v35 = vrot.slane %v14407_v26, 2 }
 0x5bf   :  { %9601 = vmatmul.mubr.f32.gmra.mrb[144].mxu0 %v14412_v55  ;;  %6886 = vmatprep.mubr.f32.mxu1 %v14415_v12  ;;  %v5052_v12 = vrot.slane %v14285_v20, 1  ;;  %v9963_v20 = vpack.c.bf16 %v6668_v6, %v6667_v10  ;;  %v5377_v6 = vrot.slane %v14452_v18, 2  ;;  %v14643_v55 = vld [vmem:[#allocation2 + $0x250] sm:$0x3] }
 0x5c0   :  { %9603 = vmatprep.mubr.f32.mxu0 %v14422_v58  ;;  %v14447_v45 = vsel %vm883_vm2, %v5367_v31, %v5368_v35  ;;  %v14520_v58 = vld [vmem:[#allocation2] sm:$0xff] }
 0x5c1   :  { %18079 = vst [vmem:[#allocation149_spill] sm:$0xff] %v14447_v45  ;;  %v14462_v31 = vsel %vm594_vm0, %v5050_v25, %v5052_v12  ;;  %v14476_v12 = vld [vmem:[#allocation2 + $0x168] sm:$0xff]  ;;  %v14478_v25 = vld [vmem:[#allocation2 + $0x170] sm:$0xff]  ;;  %9964 = vmatpush1.bf16.msra.mxu1 %v9963_v20 }
 0x5c2   :  { %6887 = vmatmul.mubr.f32.gmra.mrb[86].mxu1 %v14243_v56  ;;  %v5372_v56 = vrot.slane %v14429_v54, 2  ;;  %18081 = vst [vmem:[#allocation154_spill] sm:$0xff] %v14462_v31  ;;  %9965 = vmatprep.subr.bf16.mxu1 %v18083_v61 }
 0x5c3   :  { %9604 = vmatmul.mubr.f32.gmra.mrb[146].mxu0 %v14435_v48  ;;  %6891 = vmatprep.mubr.f32.mxu1 %v14438_v59  ;;  %v14459_v59 = vsel %vm883_vm2, %v5368_v35, %v5370_v5  ;;  %v14473_v35 = vld [vmem:[#allocation2 + $0x160] sm:$0x3]  ;;  %v6669_v5 = vld [vmem:[#allocation7 + $0x170] sm:$0xff] }
 0x5c4   :  { %9606 = vmatprep.mubr.f32.mxu0 %v14447_v45  ;;  %18080 = vst [vmem:[#allocation152_spill] sm:$0xff] %v14459_v59  ;;  %v14469_v10 = vsel %vm883_vm2, %v5372_v56, %v5373_v60  ;;  %v14483_v56 = vsel %vm883_vm2, %v5373_v60, %v5375_v0  ;;  %v5380_v43 = vrot.slane %v14473_v35, 2  ;;  %v5383_v0 = vrot.slane %v14478_v25, 2  ;;  %v4799_v60 = vld [vmem:[#allocation2 + $0x180] sm:$0xff] }
 0x5c5   :  { %18082 = vst [vmem:[#allocation157_spill] sm:$0xff] %v14469_v10  ;;  %18084 = vst [vmem:[#allocation159_spill] sm:$0xff] %v14483_v56  ;;  %v6671_v45 = vld [vmem:[#allocation7 + $0x180] sm:$0xff] }
 0x5c6   :  { %6892 = vmatmul.mubr.f32.gmra.mrb[88].mxu1 %v14264_v37  ;;  %v5378_v37 = vrot.slane %v14454_v44, 2 }
 0x5c7   :  { %9607 = vmatmul.mubr.f32.gmra.mrb[148].mxu0 %v14459_v59  ;;  %6896 = vmatprep.mubr.f32.mxu1 %v14462_v31  ;;  %v14486_v31 = vsel %vm594_vm0, %v5054_v7, %v5055_v16  ;;  %v9966_v7 = vpack.c.bf16 %v6670_v17, %v6669_v5  ;;  %v4800_v59 = vld [vmem:[#allocation2 + $0x188] sm:$0xff]  ;;  %v5060_v17 = vrot.slane %v14313_v40, 1 }
 0x5c8   :  { %9609 = vmatprep.mubr.f32.mxu0 %v14469_v10  ;;  %18085 = vst [vmem:[#allocation162_spill] sm:$0xff] %v14486_v31  ;;  %v14490_v10 = vld [vmem:[#allocation2 + $0x178] sm:$0x3]  ;;  %v14495_v20 = vsel %vm883_vm2, %v5377_v6, %v5378_v37  ;;  %v14506_v6 = vsel %vm594_vm0, %v5055_v16, %v5057_v46 }
 0x5c9   :  { %18086 = vst [vmem:[#allocation165_spill] sm:$0xff] %v14495_v20  ;;  %v5385_v48 = vrot.slane %v14490_v10, 2  ;;  %9967 = vmatpush1.bf16.msra.mxu1 %v9966_v7  ;;  %18088 = vst [vmem:[#allocation138_spill] sm:$0xff] %v14506_v6  ;;  %v5744_v7 = vrot.slane %v4800_v59, 2  ;;  %v6674_v46 = vld [vmem:[#allocation7 + $0x198] sm:$0xff] }
 0x5ca   :  { %6897 = vmatmul.mubr.f32.gmra.mrb[90].mxu1 %v14266_v36  ;;  %v5382_v36 = vrot.slane %v14476_v12, 2  ;;  %9968 = vmatprep.subr.bf16.mxu1 %v18083_v61 }
 0x5cb   :  { %9610 = vmatmul.mubr.f32.gmra.mrb[150].mxu0 %v14483_v56  ;;  %6901 = vmatprep.mubr.f32.mxu1 %v14486_v31  ;;  %v14503_v31 = vsel %vm883_vm2, %v5378_v37, %v5380_v43  ;;  %v5059_v56 = vrot.slane %v14311_v33, 1  ;;  %v4801_v43 = vld [vmem:[#allocation2 + $0x190] sm:$0x3]  ;;  %v9969_v37 = vpack.c.bf16 %v6672_v34, %v6671_v45  ;;  %v14518_v16 = vsel %vm883_vm2, %v5383_v0, %v5385_v48  ;;  %v6675_v48 = vld [vmem:[#allocation7 + $0x1a0] sm:$0xff] }
 0x5cc   :  { %9612 = vmatprep.mubr.f32.mxu0 %v14495_v20  ;;  %18087 = vst [vmem:[#allocation167_spill] sm:$0xff] %v14503_v31  ;;  %v14514_v5 = vsel %vm883_vm2, %v5382_v36, %v5383_v0  ;;  %v6673_v20 = vld [vmem:[#allocation7 + $0x190] sm:$0xff]  ;;  %18090 = vst [vmem:[#allocation141_spill] sm:$0xff] %v14518_v16  ;;  %v5746_v45 = vrot.slane %v4801_v43, 2  ;;  %v5062_v36 = vrot.slane %v14325_v14, 1  ;;  %v6676_v0 = vld [vmem:[#allocation7 + $0x1a8] sm:$0xff] }
 0x5cd   :  { %18089 = vst [vmem:[#allocation145_spill] sm:$0xff] %v14514_v5  ;;  %9970 = vmatpush1.bf16.msra.mxu1 %v9969_v37  ;;  %v14527_v59 = vsel %vm594_vm0, %v5059_v56, %v5060_v17  ;;  %v14537_v56 = vld [vmem:[#allocation2 + $0x1e0] sm:$0xff]  ;;  %v14539_v43 = vld [vmem:[#allocation2 + $0x1e8] sm:$0xff]  ;;  %v9975_v14 = vpack.c.bf16 %v6676_v0, %v6675_v48 }
 0x5ce   :  { %6902 = vmatmul.mubr.f32.gmra.mrb[92].mxu1 %v14288_v28  ;;  %v5743_v28 = vrot.slane %v4799_v60, 2  ;;  %18091 = vst [vmem:[#allocation146_spill] sm:$0xff] %v14527_v59  ;;  %9971 = vmatprep.subr.bf16.mxu1 %v18083_v61  ;;  %v9972_v60 = vpack.c.bf16 %v6674_v46, %v6673_v20  ;;  %v14543_v20 = vsel %vm883_vm2, %v5744_v7, %v5746_v45  ;;  %v5065_v46 = vrot.slane %v14337_v8, 1  ;;  %v14555_v45 = vld [vmem:[#allocation2 + $0x1f0] sm:$0x3] }
 0x5cf   :  { %9613 = vmatmul.mubr.f32.gmra.mrb[152].mxu0 %v14503_v31  ;;  %6906 = vmatprep.mubr.f32.mxu1 %v14506_v6  ;;  %v14523_v31 = vrot.slane %v14520_v58, 2  ;;  %v4804_v6 = vld [vmem:[#allocation2 + $0x1a8] sm:$0x3]  ;;  %18093 = vst [vmem:[#allocation148_spill] sm:$0xff] %v14543_v20  ;;  %v14546_v37 = vsel %vm594_vm0, %v5060_v17, %v5062_v36  ;;  %v14560_v36 = vld [vmem:[#allocation2 + $0x1f8] sm:$0xff] }
 0x5d0   :  { %9615 = vmatprep.mubr.f32.mxu0 %v14514_v5  ;;  %v14534_v34 = vsel %vm883_vm2, %v5743_v28, %v5744_v7  ;;  %18094 = vst [vmem:[#allocation150_spill] sm:$0xff] %v14546_v37  ;;  %v5064_v28 = vrot.slane %v14335_v39, 1  ;;  %v5398_v7 = vrot.slane %v14539_v43, 2 }
 0x5d1   :  { %18092 = vst [vmem:[#allocation143_spill] sm:$0xff] %v14534_v34  ;;  %9973 = vmatpush1.bf16.msra.mxu1 %v9972_v60  ;;  %v14562_v60 = vld [vmem:[#allocation2 + $0x200] sm:$0xff] }
 0x5d2   :  { %6907 = vmatmul.mubr.f32.gmra.mrb[94].mxu1 %v14290_v29  ;;  %v5972_v29 = vrot.slane %v4804_v6, 2  ;;  %9974 = vmatprep.subr.bf16.mxu1 %v18083_v61  ;;  %v6677_v6 = vld [vmem:[#allocation7 + $0x1b0] sm:$0xff]  ;;  %v14566_v0 = vsel %vm594_vm0, %v5064_v28, %v5065_v46 }
 0x5d3   :  { %9616 = vmatmul.mubr.f32.gmra.mrb[154].mxu0 %v14518_v16  ;;  %6911 = vmatprep.mubr.f32.mxu1 %v14527_v59  ;;  %18095 = vst [vmem:[#allocation155_spill] sm:$0xff] %v14566_v0  ;;  %v14570_v59 = vld [vmem:[#allocation2 + $0x208] sm:$0x3]  ;;  %v14580_v28 = vld [vmem:[#allocation2 + $0x210] sm:$0xff] }
 0x5d4   :  { %9618 = vmatprep.mubr.f32.mxu0 %v14534_v34  ;;  %v6678_v34 = vld [vmem:[#allocation7 + $0x1b8] sm:$0xff]  ;;  %v5973_v17 = vsel %vm883_vm2, %v14523_v31, %v5972_v29  ;;  %v6679_v29 = vld [vmem:[#allocation7 + $0x1c0] sm:$0xff]  ;;  %v6680_v16 = vld [vmem:[#allocation7 + $0x1c8] sm:$0xff] }
 0x5d5   :  { %9976 = vmatpush1.bf16.msra.mxu1 %v9975_v14  ;;  %v9978_v48 = vpack.c.bf16 %v6678_v34, %v6677_v6  ;;  %v5403_v14 = vrot.slane %v14562_v60, 2  ;;  %v5405_v6 = vrot.slane %v14570_v59, 2  ;;  %v9981_v5 = vpack.c.bf16 %v6680_v16, %v6679_v29 }
 0x5d6   :  { %6912 = vmatmul.mubr.f32.gmra.mrb[96].mxu1 %v14311_v33  ;;  %v5397_v33 = vrot.slane %v14537_v56, 2  ;;  %9977 = vmatprep.subr.bf16.mxu1 %v18083_v61 }
 0x5d7   :  { %9619 = vmatmul.mubr.f32.gmra.mrb[156].mxu0 %v14543_v20  ;;  %6916 = vmatprep.mubr.f32.mxu1 %v14546_v37  ;;  %v5400_v20 = vrot.slane %v14555_v45, 2  ;;  %v5067_v37 = vrot.slane %v14355_v32, 1  ;;  %v14582_v32 = vld [vmem:[#allocation2 + $0x218] sm:$0xff] }
 0x5d8   :  { %9621 = vmatprep.mubr.f32.mxu0 %v14523_v31  ;;  %v14575_v34 = vsel %vm883_vm2, %v5397_v33, %v5398_v7 }
 0x5d9   :  { %18096 = vst [vmem:[#allocation151_spill] sm:$0xff] %v14575_v34  ;;  %9979 = vmatpush1.bf16.msra.mxu1 %v9978_v48  ;;  %v14590_v33 = vsel %vm594_vm0, %v5065_v46, %v5067_v37  ;;  %v14605_v37 = vld [vmem:[#allocation2 + $0x228] sm:$0xff]  ;;  %v14607_v46 = vld [vmem:[#allocation2 + $0x230] sm:$0xff]  ;;  %v14611_v48 = vsel %vm883_vm2, %v5403_v14, %v5405_v6 }
 0x5da   :  { %6917 = vmatmul.mubr.f32.gmra.mrb[98].mxu1 %v14313_v40  ;;  %v5402_v40 = vrot.slane %v14560_v36, 2  ;;  %18098 = vst [vmem:[#allocation153_spill] sm:$0xff] %v14590_v33  ;;  %9980 = vmatprep.subr.bf16.mxu1 %v18083_v61  ;;  %18100 = vst [vmem:[#allocation160_spill] sm:$0xff] %v14611_v48 }
 0x5db   :  { %9622 = vmatmul.mubr.f32.gmra.mrb[158].mxu0 %v5973_v17  ;;  %6921 = vmatprep.mubr.f32.mxu1 %v14566_v0  ;;  %v14587_v17 = vsel %vm883_vm2, %v5398_v7, %v5400_v20  ;;  %v5069_v0 = vrot.slane %v14358_v24, 1  ;;  %v5408_v20 = vrot.slane %v14582_v32, 2  ;;  %v14602_v7 = vld [vmem:[#allocation2 + $0x220] sm:$0x3] }
 0x5dc   :  { %9624 = vmatprep.mubr.f32.mxu0 %v14575_v34  ;;  %18097 = vst [vmem:[#allocation156_spill] sm:$0xff] %v14587_v17  ;;  %v5070_v34 = vrot.slane %v14360_v1, 1  ;;  %v14598_v16 = vsel %vm883_vm2, %v5402_v40, %v5403_v14  ;;  %v5410_v40 = vrot.slane %v14602_v7, 2  ;;  %v14629_v14 = vld [vmem:[#allocation2 + $0x240] sm:$0xff] }
 0x5dd   :  { %18099 = vst [vmem:[#allocation158_spill] sm:$0xff] %v14598_v16  ;;  %9982 = vmatpush1.bf16.msra.mxu1 %v9981_v5  ;;  %v5412_v5 = vrot.slane %v14605_v37, 2 }
 0x5de   :  { %6922 = vmatmul.mubr.f32.gmra.mrb[100].mxu1 %v14335_v39  ;;  %v5407_v39 = vrot.slane %v14580_v28, 2  ;;  %v14614_v29 = vsel %vm594_vm0, %v5069_v0, %v5070_v34  ;;  %9983 = vmatprep.subr.bf16.mxu1 %v18083_v61  ;;  %v5413_v0 = vrot.slane %v14607_v46, 2 }
 0x5df   :  { %9625 = vmatmul.mubr.f32.gmra.mrb[160].mxu0 %v14587_v17  ;;  %6926 = vmatprep.mubr.f32.mxu1 %v14590_v33  ;;  %18101 = vst [vmem:[#allocation164_spill] sm:$0xff] %v14614_v29  ;;  %v5072_v33 = vrot.slane %v14379_v21, 1  ;;  %v14618_v17 = vld [vmem:[#allocation2 + $0x238] sm:$0x3]  ;;  %v14631_v21 = vld [vmem:[#allocation2 + $0x248] sm:$0xff] }
 0x5e0   :  { %9627 = vmatprep.mubr.f32.mxu0 %v14598_v16  ;;  %v5415_v6 = vrot.slane %v14618_v17, 2  ;;  %v5075_v16 = vrot.slane %v14384_v57, 1 }
 0x5e2   :  { %6927 = vmatmul.mubr.f32.gmra.mrb[102].mxu1 %v14337_v8  ;;  %v14624_v8 = vsel %vm883_vm2, %v5407_v39, %v5408_v20  ;;  %v14639_v39 = vsel %vm594_vm0, %v5070_v34, %v5072_v33  ;;  %v6682_v34 = vld [vmem:[#allocation7 + $0x1d8] sm:$0xff] }
 0x5e3   :  { %9628 = vmatmul.mubr.f32.gmra.mrb[162].mxu0 %v14611_v48  ;;  %6931 = vmatprep.mubr.f32.mxu1 %v14614_v29  ;;  %18102 = vst [vmem:[#allocation161_spill] sm:$0xff] %v14624_v8  ;;  %v14636_v48 = vsel %vm883_vm2, %v5408_v20, %v5410_v40  ;;  %18104 = vst [vmem:[#allocation140_spill] sm:$0xff] %v14639_v39  ;;  %v5074_v29 = vrot.slane %v14382_v62, 1  ;;  %v5418_v20 = vrot.slane %v14631_v21, 2  ;;  %v6681_v40 = vld [vmem:[#allocation7 + $0x1d0] sm:$0xff]  ;;  %v14653_v33 = vld [vmem:[#allocation2 + $0x258] sm:$0xff] }
 0x5e4   :  { %9630 = vmatprep.mubr.f32.mxu0 %v14624_v8  ;;  %18103 = vst [vmem:[#allocation136_spill] sm:$0xff] %v14636_v48  ;;  %v14648_v8 = vsel %vm883_vm2, %v5412_v5, %v5413_v0  ;;  %v9984_v27 = vpack.c.bf16 %v6682_v34, %v6681_v40  ;;  %v14660_v5 = vsel %vm883_vm2, %v5413_v0, %v5415_v6  ;;  %v5422_v40 = vrot.slane %v14653_v33, 2  ;;  %v14676_v0 = vld [vmem:[#allocation2 + $0x270] sm:$0xff] }
 0x5e5   :  { %18105 = vst [vmem:[#allocation45_spill] sm:$0xff] %v14648_v8  ;;  %18106 = vst [vmem:[#allocation168_spill] sm:$0xff] %v14660_v5  ;;  %v5423_v34 = vrot.slane %v14655_v38, 2  ;;  %v14686_v6 = vsel %vm594_vm0, %v5075_v16, %v5077_v23 }
 0x5e6   :  { %6932 = vmatmul.mubr.f32.gmra.mrb[104].mxu1 %v14358_v24  ;;  %v5417_v24 = vrot.slane %v14629_v14, 2  ;;  %18110 = vst [vmem:[#allocation170_spill] sm:$0xff] %v14686_v6 }
 0x5e7   :  { %9631 = vmatmul.mubr.f32.gmra.mrb[164].mxu0 %v14636_v48  ;;  %6936 = vmatprep.mubr.f32.mxu1 %v14639_v39  ;;  %v5420_v48 = vrot.slane %v14643_v55, 2  ;;  %v14663_v39 = vsel %vm594_vm0, %v5074_v29, %v5075_v16  ;;  %v14678_v29 = vld [vmem:[#allocation2 + $0x278] sm:$0xff]  ;;  %v14701_v16 = vld [vmem:[#allocation2 + $0x288] sm:$0xff] }
 0x5e8   :  { %9633 = vmatprep.mubr.f32.mxu0 %v14648_v8  ;;  %18107 = vst [vmem:[#allocation48_spill] sm:$0xff] %v14663_v39  ;;  %v14669_v8 = vsel %vm883_vm2, %v5417_v24, %v5418_v20  ;;  %9985 = vmatpush1.bf16.msra.mxu1 %v9984_v27  ;;  %v14696_v27 = vsel %vm883_vm2, %v5422_v40, %v5423_v34  ;;  %v5428_v23 = vrot.slane %v14678_v29, 2  ;;  %v5432_v50 = vrot.slane %v14701_v16, 2 }
 0x5e9   :  { %18108 = vst [vmem:[#allocation107_spill] sm:$0xff] %v14669_v8  ;;  %v14681_v51 = vsel %vm883_vm2, %v5418_v20, %v5420_v48  ;;  %9986 = vmatprep.subr.bf16.mxu1 %v18083_v61  ;;  %18111 = vst [vmem:[#allocation171_spill] sm:$0xff] %v14696_v27  ;;  %v14703_v48 = vld [vmem:[#allocation2 + $0x290] sm:$0xff] }
 0x5ea   :  { %6937 = vmatmul.mubr.f32.gmra.mrb[106].mxu1 %v14360_v1  ;;  %v14673_v1 = vld [vmem:[#allocation2 + $0x268] sm:$0x3]  ;;  %18109 = vst [vmem:[#allocation169_spill] sm:$0xff] %v14681_v51  ;;  %v5433_v19 = vrot.slane %v14703_v48, 2 }
 0x5eb   :  { %9634 = vmatmul.mubr.f32.gmra.mrb[166].mxu0 %v14660_v5  ;;  %6941 = vmatprep.mubr.f32.mxu1 %v14663_v39  ;;  %v5425_v24 = vrot.slane %v14673_v1, 2  ;;  %v5079_v39 = vrot.slane %v14405_v2, 1  ;;  %v14691_v5 = vld [vmem:[#allocation2 + $0x280] sm:$0x3] }
 0x5ec   :  { %9636 = vmatprep.mubr.f32.mxu0 %v14669_v8  ;;  %v5080_v8 = vrot.slane %v14407_v26, 1  ;;  %v5430_v20 = vrot.slane %v14691_v5, 2 }
 0x5ee   :  { %6942 = vmatmul.mubr.f32.gmra.mrb[108].mxu1 %v14382_v62  ;;  %v5427_v62 = vrot.slane %v14676_v0, 2  ;;  %v14711_v40 = vsel %vm594_vm0, %v5079_v39, %v5080_v8  ;;  %v14726_v39 = vld [vmem:[#allocation2 + $0x2a8] sm:$0xff] }
 0x5ef   :  { %9637 = vmatmul.mubr.f32.gmra.mrb[168].mxu0 %v14681_v51  ;;  %6946 = vmatprep.mubr.f32.mxu1 %v14686_v6  ;;  %v14708_v51 = vsel %vm883_vm2, %v5423_v34, %v5425_v24  ;;  %18113 = vst [vmem:[#allocation103_spill] sm:$0xff] %v14711_v40  ;;  %v5082_v6 = vrot.slane %v14426_v13, 1  ;;  %v14724_v34 = vld [vmem:[#allocation2 + $0x2a0] sm:$0xff]  ;;  %v14729_v13 = vsel %vm883_vm2, %v5428_v23, %v5430_v20  ;;  %v14745_v20 = vld [vmem:[#allocation2 + $0x2b0] sm:$0x3] }
 0x5f0   :  { %9639 = vmatprep.mubr.f32.mxu0 %v14696_v27  ;;  %18112 = vst [vmem:[#allocation102_spill] sm:$0xff] %v14708_v51  ;;  %v14717_v27 = vsel %vm883_vm2, %v5427_v62, %v5428_v23  ;;  %18115 = vst [vmem:[#allocation105_spill] sm:$0xff] %v14729_v13  ;;  %v5437_v23 = vrot.slane %v14724_v34, 2  ;;  %v5440_v53 = vrot.slane %v14745_v20, 2 }
 0x5f1   :  { %18114 = vst [vmem:[#allocation104_spill] sm:$0xff] %v14717_v27  ;;  %v14733_v24 = vsel %vm594_vm0, %v5080_v8, %v5082_v6  ;;  %v6683_v8 = vld [vmem:[#allocation7 + $0x1e0] sm:$0xff]  ;;  %v6684_v6 = vld [vmem:[#allocation7 + $0x1e8] sm:$0xff] }
 0x5f2   :  { %6947 = vmatmul.mubr.f32.gmra.mrb[110].mxu1 %v14384_v57  ;;  %v14721_v57 = vld [vmem:[#allocation2 + $0x298] sm:$0x3]  ;;  %18116 = vst [vmem:[#allocation106_spill] sm:$0xff] %v14733_v24 }
 0x5f3   :  { %9640 = vmatmul.mubr.f32.gmra.mrb[170].mxu0 %v14708_v51  ;;  %6951 = vmatprep.mubr.f32.mxu1 %v14711_v40  ;;  %v5435_v62 = vrot.slane %v14721_v57, 2  ;;  %v5084_v40 = vrot.slane %v14429_v54, 1  ;;  %v5085_v51 = vrot.slane %v14431_v41, 1 }
 0x5f4   :  { %9642 = vmatprep.mubr.f32.mxu0 %v14717_v27  ;;  %v14741_v27 = vsel %vm883_vm2, %v5432_v50, %v5433_v19 }
 0x5f5   :  { %18117 = vst [vmem:[#allocation108_spill] sm:$0xff] %v14741_v27  ;;  %v14754_v50 = vsel %vm883_vm2, %v5433_v19, %v5435_v62  ;;  %v5443_v19 = vrot.slane %v14750_v42, 2  ;;  %v14773_v62 = vld [vmem:[#allocation2 + $0x2d8] sm:$0xff] }
 0x5f6   :  { %6952 = vmatmul.mubr.f32.gmra.mrb[112].mxu1 %v14405_v2  ;;  %v5438_v2 = vrot.slane %v14726_v39, 2  ;;  %18118 = vst [vmem:[#allocation129_spill] sm:$0xff] %v14754_v50 }
 0x5f7   :  { %9643 = vmatmul.mubr.f32.gmra.mrb[172].mxu0 %v14729_v13  ;;  %6956 = vmatprep.mubr.f32.mxu1 %v14733_v24  ;;  %v9987_v13 = vpack.c.bf16 %v6684_v6, %v6683_v8  ;;  %v14757_v24 = vsel %vm594_vm0, %v5084_v40, %v5085_v51  ;;  %v14771_v40 = vld [vmem:[#allocation2 + $0x2d0] sm:$0xff]  ;;  %v14782_v6 = vsel %vm594_vm0, %v5085_v51, %v5087_v4  ;;  %v14796_v4 = vld [vmem:[#allocation2 + $0x2e8] sm:$0xff] }
 0x5f8   :  { %9645 = vmatprep.mubr.f32.mxu0 %v14741_v27  ;;  %18119 = vst [vmem:[#allocation132_spill] sm:$0xff] %v14757_v24  ;;  %v14766_v8 = vsel %vm883_vm2, %v5437_v23, %v5438_v2  ;;  %v14779_v23 = vsel %vm883_vm2, %v5438_v2, %v5440_v53  ;;  %18122 = vst [vmem:[#allocation137_spill] sm:$0xff] %v14782_v6  ;;  %v14793_v53 = vld [vmem:[#allocation2 + $0x2e0] sm:$0x3]  ;;  %v14798_v51 = vld [vmem:[#allocation2 + $0x2f0] sm:$0xff]  ;;  %v14802_v2 = vsel %vm883_vm2, %v5443_v19, %v5445_v47 }
 0x5f9   :  { %18120 = vst [vmem:[#allocation134_spill] sm:$0xff] %v14766_v8  ;;  %9988 = vmatpush1.bf16.msra.mxu1 %v9987_v13  ;;  %18121 = vst [vmem:[#allocation111_spill] sm:$0xff] %v14779_v23  ;;  %v14809_v27 = vld [vmem:[#allocation2 + $0x2f8] sm:$0x3] }
 0x5fa   :  { %6957 = vmatmul.mubr.f32.gmra.mrb[114].mxu1 %v14407_v26  ;;  %v5442_v26 = vrot.slane %v14748_v15, 2  ;;  %9989 = vmatprep.subr.bf16.mxu1 %v18083_v61  ;;  %18124 = vst [vmem:[#allocation139_spill] sm:$0xff] %v14802_v2 }
 0x5fb   :  { %9646 = vmatmul.mubr.f32.gmra.mrb[174].mxu0 %v14754_v50  ;;  %6961 = vmatprep.mubr.f32.mxu1 %v14757_v24  ;;  %v5089_v24 = vrot.slane %v14452_v18, 1  ;;  %v5447_v50 = vrot.slane %v14771_v40, 2 }
 0x5fc   :  { %9648 = vmatprep.mubr.f32.mxu0 %v14766_v8  ;;  %v5090_v8 = vrot.slane %v14454_v44, 1  ;;  %v14789_v13 = vsel %vm883_vm2, %v5442_v26, %v5443_v19  ;;  %v5453_v19 = vrot.slane %v14798_v51, 2 }
 0x5fd   :  { %18123 = vst [vmem:[#allocation115_spill] sm:$0xff] %v14789_v13 }
 0x5fe   :  { %6962 = vmatmul.mubr.f32.gmra.mrb[116].mxu1 %v14429_v54  ;;  %v5448_v54 = vrot.slane %v14773_v62, 2  ;;  %v14805_v26 = vsel %vm594_vm0, %v5089_v24, %v5090_v8  ;;  %v5455_v24 = vrot.slane %v14809_v27, 2 }
 0x5ff   :  { %9649 = vmatmul.mubr.f32.gmra.mrb[176].mxu0 %v14779_v23  ;;  %6966 = vmatprep.mubr.f32.mxu1 %v14782_v6  ;;  %18125 = vst [vmem:[#allocation113_spill] sm:$0xff] %v14805_v26  ;;  %v5450_v6 = vrot.slane %v14793_v53, 2  ;;  %v5092_v23 = vrot.slane %v14473_v35, 1 }
 0x600   :  { %9651 = vmatprep.mubr.f32.mxu0 %v14789_v13  ;;  %v14814_v13 = vsel %vm883_vm2, %v5447_v50, %v5448_v54  ;;  %v5095_v50 = vrot.slane %v14478_v25, 1 }
 0x601   :  { %18126 = vst [vmem:[#allocation116_spill] sm:$0xff] %v14814_v13  ;;  %v14822_v35 = vsel %vm883_vm2, %v5448_v54, %v5450_v6  ;;  %v14825_v47 = vsel %vm594_vm0, %v5090_v8, %v5092_v23  ;;  %v14837_v8 = vsel %vm883_vm2, %v5453_v19, %v5455_v24  ;;  %v5097_v6 = vrot.slane %v14490_v10, 1  ;;  %v14845_v54 = vld [vmem:[#allocation2 + $0x1c0] sm:$0x3]  ;;  %v18129_v10 = vld [vmem:[#allocation122_spill] sm:$0xff] }
 0x602   :  { %6967 = vmatmul.mubr.f32.gmra.mrb[118].mxu1 %v14431_v41  ;;  %v5452_v41 = vrot.slane %v14796_v4, 2  ;;  %18127 = vst [vmem:[#allocation120_spill] sm:$0xff] %v14837_v8  ;;  %v14865_v24 = vld [vmem:[#allocation2 + $0x1d8] sm:$0x3] }
 0x603   :  { %9652 = vmatmul.mubr.f32.gmra.mrb[178].mxu0 %v14802_v2  ;;  %6971 = vmatprep.mubr.f32.mxu1 %v14805_v26  ;;  %v5094_v26 = vrot.slane %v14476_v12, 1  ;;  %v6685_v2 = vld [vmem:[#allocation7 + $0x1f0] sm:$0xff] }
 0x604   :  { %9654 = vmatprep.mubr.f32.mxu0 %v14814_v13  ;;  %v14832_v13 = vsel %vm883_vm2, %v5452_v41, %v5453_v19 }
 0x605   :  { %v14840_v23 = vsel %vm594_vm0, %v5094_v26, %v5095_v50  ;;  %v14858_v26 = vld [vmem:[#allocation2 + $0x1d0] sm:$0xff] }
 0x606   :  { %6972 = vmatmul.mubr.f32.gmra.mrb[120].mxu1 %v14452_v18  ;;  %v9990_v18 = vpack.c.bf16 %v6686_v9, %v6685_v2  ;;  %v14850_v9 = vsel %vm594_vm0, %v5095_v50, %v5097_v6  ;;  %v14856_v2 = vld [vmem:[#allocation2 + $0x1c8] sm:$0xff]  ;;  %v5105_v19 = vrot.slane %v14858_v26, 1  ;;  %v5107_v50 = vrot.slane %v14865_v24, 1 }
 0x607   :  { %9655 = vmatmul.mubr.f32.gmra.mrb[180].mxu0 %v14822_v35  ;;  %6976 = vmatprep.mubr.f32.mxu1 %v14825_v47  ;;  %18128 = vst [vmem:[#allocation118_spill] sm:$0xff] %v14850_v9  ;;  %v5109_v6 = vrot.slane %v14537_v56, 1 }
 0x608   :  { %9657 = vmatprep.mubr.f32.mxu0 %v14832_v13  ;;  %9991 = vmatpush1.bf16.msra.mxu1 %v9990_v18  ;;  %v14875_v18 = vsel %vm594_vm0, %v5105_v19, %v5107_v50 }
 0x609   :  { %9992 = vmatprep.subr.bf16.mxu1 %v18083_v61  ;;  %18131 = vst [vmem:[#allocation125_spill] sm:$0xff] %v14875_v18 }
 0x60a   :  { %6977 = vmatmul.mubr.f32.gmra.mrb[122].mxu1 %v14454_v44  ;;  %v5102_v44 = vrot.slane %v14845_v54, 1 }
 0x60b   :  { %9658 = vmatmul.mubr.f32.gmra.mrb[182].mxu0 %v14837_v8  ;;  %6981 = vmatprep.mubr.f32.mxu1 %v14840_v23 }
 0x60c   :  { %v5103_v41 = vsel %vm594_vm0, %v18129_v10, %v5102_v44  ;;  %v5110_v44 = vrot.slane %v14539_v43, 1 }
 0x60e   :  { %6982 = vmatmul.mubr.f32.gmra.mrb[124].mxu1 %v14476_v12  ;;  %v5104_v12 = vrot.slane %v14856_v2, 1 }
 0x60f   :  { %6986 = vmatprep.mubr.f32.mxu1 %v14850_v9  ;;  %v5393_v9 = vrot.slane %v14858_v26, 2 }
 0x612   :  { %6987 = vmatmul.mubr.f32.gmra.mrb[126].mxu1 %v14478_v25  ;;  %v14869_v25 = vsel %vm594_vm0, %v5104_v12, %v5105_v19  ;;  %v5114_v12 = vrot.slane %v14560_v36, 1  ;;  %v5115_v19 = vrot.slane %v14562_v60, 1 }
 0x613   :  { %6991 = vmatprep.mubr.f32.mxu1 %v18129_v10  ;;  %18130 = vst [vmem:[#allocation121_spill] sm:$0xff] %v14869_v25  ;;  %v5112_v10 = vrot.slane %v14555_v45, 1  ;;  %v5117_v45 = vrot.slane %v14570_v59, 1  ;;  %v5122_v59 = vrot.slane %v14602_v7, 1  ;;  %v5127_v7 = vrot.slane %v14618_v17, 1 }
 0x614   :  { %v14895_v50 = vsel %vm594_vm0, %v5114_v12, %v5115_v19  ;;  %v5125_v12 = vrot.slane %v14607_v46, 1  ;;  %v5132_v17 = vrot.slane %v14643_v55, 1  ;;  %v5137_v55 = vrot.slane %v14673_v1, 1 }
 0x615   :  { %18134 = vst [vmem:[#allocation130_spill] sm:$0xff] %v14895_v50  ;;  %v5142_v1 = vrot.slane %v14691_v5, 1  ;;  %v5147_v5 = vrot.slane %v14721_v57, 1  ;;  %v5152_v57 = vrot.slane %v14745_v20, 1  ;;  %v5157_v20 = vrot.slane %v14761_v22, 1 }
 0x616   :  { %6992 = vmatmul.mubr.f32.gmra.mrb[128].mxu1 %v14520_v58  ;;  %v5162_v22 = vrot.slane %v14793_v53, 1 }
 0x617   :  { %6996 = vmatprep.mubr.f32.mxu1 %v5103_v41  ;;  %v14888_v41 = vsel %vm594_vm0, %v5110_v44, %v5112_v10  ;;  %v5124_v10 = vrot.slane %v14605_v37, 1 }
 0x618   :  { %18133 = vst [vmem:[#allocation126_spill] sm:$0xff] %v14888_v41 }
 0x61a   :  { %6997 = vmatmul.mubr.f32.gmra.mrb[130].mxu1 %v14520_v58  ;;  %v14882_v58 = vsel %vm594_vm0, %v5109_v6, %v5110_v44  ;;  %v5119_v6 = vrot.slane %v14580_v28, 1  ;;  %v5120_v44 = vrot.slane %v14582_v32, 1 }
 0x61b   :  { %7001 = vmatprep.mubr.f32.mxu1 %v14869_v25  ;;  %18132 = vst [vmem:[#allocation123_spill] sm:$0xff] %v14882_v58  ;;  %v5392_v25 = vrot.slane %v14856_v2, 2 }
 0x61e   :  { %7002 = vmatmul.mubr.f32.gmra.mrb[132].mxu1 %v14856_v2 }
 0x61f   :  { %7006 = vmatprep.mubr.f32.mxu1 %v14875_v18  ;;  %v15329_v18 = vld [vmem:[#allocation2] sm:$0xff] }
 0x620   :  { %18267 = vst [vmem:[#allocation255_spill] sm:$0xff] %v15329_v18 }
 0x622   :  { %7007 = vmatmul.mubr.f32.gmra.mrb[134].mxu1 %v14858_v26 }
 0x623   :  { %7011 = vmatprep.mubr.f32.mxu1 %v14882_v58  ;;  %v15321_v58 = vld [vmem:[#allocation2 + $0x180] sm:$0xff] }
 0x626   :  { %7012 = vmatmul.mubr.f32.gmra.mrb[136].mxu1 %v14537_v56  ;;  %v14901_v56 = vsel %vm594_vm0, %v5115_v19, %v5117_v45  ;;  %v5129_v19 = vrot.slane %v14629_v14, 1  ;;  %v5130_v45 = vrot.slane %v14631_v21, 1 }
 0x627   :  { %7016 = vmatprep.mubr.f32.mxu1 %v14888_v41  ;;  %18135 = vst [vmem:[#allocation131_spill] sm:$0xff] %v14901_v56  ;;  %v18263_v41 = vld [vmem:[#allocation167_spill] sm:$0xff] }
 0x628   :  { %18264 = vst [vmem:[#allocation167_spill] sm:$0xff] %v15321_v58 }
 0x62a   :  { %7017 = vmatmul.mubr.f32.gmra.mrb[138].mxu1 %v14539_v43  ;;  %v14908_v43 = vsel %vm594_vm0, %v5119_v6, %v5120_v44  ;;  %v5134_v6 = vrot.slane %v14653_v33, 1 }
 0x62b   :  { %7021 = vmatprep.mubr.f32.mxu1 %v14895_v50  ;;  %18136 = vst [vmem:[#allocation128_spill] sm:$0xff] %v14908_v43 }
 0x62e   :  { %7022 = vmatmul.mubr.f32.gmra.mrb[140].mxu1 %v14560_v36  ;;  %v14914_v36 = vsel %vm594_vm0, %v5120_v44, %v5122_v59  ;;  %v5135_v44 = vrot.slane %v14655_v38, 1  ;;  %v5139_v59 = vrot.slane %v14676_v0, 1 }
 0x62f   :  { %7026 = vmatprep.mubr.f32.mxu1 %v14901_v56  ;;  %18137 = vst [vmem:[#allocation135_spill] sm:$0xff] %v14914_v36  ;;  %v18259_v56 = vld [vmem:[#allocation159_spill] sm:$0xff] }
 0x632   :  { %7027 = vmatmul.mubr.f32.gmra.mrb[142].mxu1 %v14562_v60  ;;  %v14921_v60 = vsel %vm594_vm0, %v5124_v10, %v5125_v12  ;;  %v5140_v10 = vrot.slane %v14678_v29, 1 }
 0x633   :  { %7031 = vmatprep.mubr.f32.mxu1 %v14908_v43  ;;  %18138 = vst [vmem:[#allocation133_spill] sm:$0xff] %v14921_v60  ;;  %v15304_v43 = vld [vmem:[#allocation2 + $0x150] sm:$0xff] }
 0x636   :  { %7032 = vmatmul.mubr.f32.gmra.mrb[144].mxu1 %v14580_v28  ;;  %v14927_v28 = vsel %vm594_vm0, %v5125_v12, %v5127_v7  ;;  %v5144_v12 = vrot.slane %v14701_v16, 1  ;;  %v5145_v7 = vrot.slane %v14703_v48, 1 }
 0x637   :  { %7036 = vmatprep.mubr.f32.mxu1 %v14914_v36  ;;  %18139 = vst [vmem:[#allocation49_spill] sm:$0xff] %v14927_v28  ;;  %v18255_v36 = vld [vmem:[#allocation152_spill] sm:$0xff] }
 0x638   :  { %18256 = vst [vmem:[#allocation152_spill] sm:$0xff] %v15304_v43 }
 0x63a   :  { %7037 = vmatmul.mubr.f32.gmra.mrb[146].mxu1 %v14582_v32  ;;  %v14934_v32 = vsel %vm594_vm0, %v5129_v19, %v5130_v45  ;;  %v5149_v19 = vrot.slane %v14724_v34, 1 }
 0x63b   :  { %7041 = vmatprep.mubr.f32.mxu1 %v14921_v60  ;;  %18140 = vst [vmem:[#allocation52_spill] sm:$0xff] %v14934_v32 }
 0x63e   :  { %7042 = vmatmul.mubr.f32.gmra.mrb[148].mxu1 %v14605_v37  ;;  %v14940_v37 = vsel %vm594_vm0, %v5130_v45, %v5132_v17  ;;  %v5150_v45 = vrot.slane %v14726_v39, 1 }
 0x63f   :  { %7046 = vmatprep.mubr.f32.mxu1 %v14927_v28  ;;  %18141 = vst [vmem:[#allocation53_spill] sm:$0xff] %v14940_v37  ;;  %v18251_v28 = vld [vmem:[#allocation144_spill] sm:$0xff] }
 0x640   :  { %v14992_v17 = vsel %vm594_vm0, %v5150_v45, %v5152_v57  ;;  %v5164_v57 = vrot.slane %v14796_v4, 1 }
 0x641   :  { %18149 = vst [vmem:[#allocation179_spill] sm:$0xff] %v14992_v17 }
 0x642   :  { %7047 = vmatmul.mubr.f32.gmra.mrb[150].mxu1 %v14607_v46  ;;  %v14947_v46 = vsel %vm594_vm0, %v5134_v6, %v5135_v44  ;;  %v5154_v6 = vrot.slane %v14748_v15, 1 }
 0x643   :  { %7051 = vmatprep.mubr.f32.mxu1 %v14934_v32  ;;  %18142 = vst [vmem:[#allocation56_spill] sm:$0xff] %v14947_v46  ;;  %v15287_v32 = vld [vmem:[#allocation2 + $0x120] sm:$0xff] }
 0x646   :  { %7052 = vmatmul.mubr.f32.gmra.mrb[152].mxu1 %v14629_v14  ;;  %v14953_v14 = vsel %vm594_vm0, %v5135_v44, %v5137_v55  ;;  %v5155_v44 = vrot.slane %v14750_v42, 1 }
 0x647   :  { %7056 = vmatprep.mubr.f32.mxu1 %v14940_v37  ;;  %18143 = vst [vmem:[#allocation122_spill] sm:$0xff] %v14953_v14 }
 0x648   :  { %v14999_v55 = vsel %vm594_vm0, %v5154_v6, %v5155_v44  ;;  %v5165_v6 = vrot.slane %v14798_v51, 1 }
 0x649   :  { %18150 = vst [vmem:[#allocation180_spill] sm:$0xff] %v14999_v55 }
 0x64a   :  { %7057 = vmatmul.mubr.f32.gmra.mrb[154].mxu1 %v14631_v21  ;;  %v14960_v21 = vsel %vm594_vm0, %v5139_v59, %v5140_v10  ;;  %v15005_v59 = vsel %vm594_vm0, %v5155_v44, %v5157_v20  ;;  %v15035_v20 = vsel %vm594_vm0, %v5164_v57, %v5165_v6 }
 0x64b   :  { %7061 = vmatprep.mubr.f32.mxu1 %v14947_v46  ;;  %18144 = vst [vmem:[#allocation174_spill] sm:$0xff] %v14960_v21  ;;  %18151 = vst [vmem:[#allocation181_spill] sm:$0xff] %v15005_v59 }
 0x64c   :  { %18159 = vst [vmem:[#allocation189_spill] sm:$0xff] %v15035_v20 }
 0x64e   :  { %7062 = vmatmul.mubr.f32.gmra.mrb[156].mxu1 %v14653_v33  ;;  %v14966_v33 = vsel %vm594_vm0, %v5140_v10, %v5142_v1  ;;  %v5159_v10 = vrot.slane %v14771_v40, 1  ;;  %v5160_v1 = vrot.slane %v14773_v62, 1 }
 0x64f   :  { %7066 = vmatprep.mubr.f32.mxu1 %v14953_v14  ;;  %18145 = vst [vmem:[#allocation175_spill] sm:$0xff] %v14966_v33 }
 0x652   :  { %7067 = vmatmul.mubr.f32.gmra.mrb[158].mxu1 %v14655_v38  ;;  %v14973_v38 = vsel %vm594_vm0, %v5144_v12, %v5145_v7 }
 0x653   :  { %7071 = vmatprep.mubr.f32.mxu1 %v14960_v21  ;;  %18146 = vst [vmem:[#allocation176_spill] sm:$0xff] %v14973_v38  ;;  %v15121_v21 = vld [vmem:[#allocation2 + $0x30] sm:$0xff] }
 0x654   :  { %18182 = vst [vmem:[#allocation212_spill] sm:$0xff] %v15121_v21 }
 0x656   :  { %7072 = vmatmul.mubr.f32.gmra.mrb[160].mxu1 %v14676_v0  ;;  %v14979_v0 = vsel %vm594_vm0, %v5145_v7, %v5147_v5  ;;  %v15014_v7 = vsel %vm594_vm0, %v5159_v10, %v5160_v1  ;;  %v5167_v10 = vrot.slane %v14809_v27, 1 }
 0x657   :  { %7076 = vmatprep.mubr.f32.mxu1 %v14966_v33  ;;  %18147 = vst [vmem:[#allocation177_spill] sm:$0xff] %v14979_v0  ;;  %18153 = vst [vmem:[#allocation183_spill] sm:$0xff] %v15014_v7 }
 0x65a   :  { %7077 = vmatmul.mubr.f32.gmra.mrb[162].mxu1 %v14678_v29  ;;  %v14986_v29 = vsel %vm594_vm0, %v5149_v19, %v5150_v45  ;;  %v15024_v45 = vsel %vm594_vm0, %v5160_v1, %v5162_v22  ;;  %v15041_v1 = vld [vmem:[#allocation2 + $0x300] sm:$0xff]  ;;  %v15043_v22 = vld [vmem:[#allocation2 + $0x308] sm:$0xff] }
 0x65b   :  { %7081 = vmatprep.mubr.f32.mxu1 %v14973_v38  ;;  %18148 = vst [vmem:[#allocation178_spill] sm:$0xff] %v14986_v29  ;;  %18156 = vst [vmem:[#allocation186_spill] sm:$0xff] %v15024_v45  ;;  %v5169_v57 = vrot.slane %v15041_v1, 1 }
 0x65e   :  { %7082 = vmatmul.mubr.f32.gmra.mrb[164].mxu1 %v14701_v16 }
 0x65f   :  { %7086 = vmatprep.mubr.f32.mxu1 %v14979_v0  ;;  %v6689_v0 = vld [vmem:[#allocation7 + $0x210] sm:$0xff] }
 0x662   :  { %7087 = vmatmul.mubr.f32.gmra.mrb[166].mxu1 %v14703_v48 }
 0x663   :  { %7091 = vmatprep.mubr.f32.mxu1 %v14986_v29 }
 0x666   :  { %7092 = vmatmul.mubr.f32.gmra.mrb[168].mxu1 %v14724_v34 }
 0x667   :  { %7096 = vmatprep.mubr.f32.mxu1 %v14992_v17  ;;  %v10998_v17 = vld [vmem:[#allocation2 + $0x10] sm:$0x3] }
 0x668   :  { %v5310_v29 = vrot.slane %v10998_v17, 2 }
 0x66a   :  { %7097 = vmatmul.mubr.f32.gmra.mrb[170].mxu1 %v14726_v39 }
 0x66b   :  { %7101 = vmatprep.mubr.f32.mxu1 %v14999_v55 }
 0x66e   :  { %7102 = vmatmul.mubr.f32.gmra.mrb[172].mxu1 %v14748_v15 }
 0x66f   :  { %7106 = vmatprep.mubr.f32.mxu1 %v15005_v59 }
 0x672   :  { %v15010_v12 = vpop.f32.mrb[128].mxu0  ;;  %7107 = vmatmul.mubr.f32.gmra.mrb[174].mxu1 %v14750_v42 }
 0x673   :  { %18152 = vst [vmem:[#allocation182_spill] sm:$0xff] %v15010_v12  ;;  %v15017_v5 = vpop.f32.mrb[129].mxu0  ;;  %7111 = vmatprep.mubr.f32.mxu1 %v15014_v7  ;;  %v5170_v12 = vrot.slane %v15043_v22, 1 }
 0x674   :  { %18154 = vst [vmem:[#allocation184_spill] sm:$0xff] %v15017_v5 }
 0x676   :  { %v15020_v19 = vpop.f32.mrb[130].mxu0  ;;  %7112 = vmatmul.mubr.f32.gmra.mrb[176].mxu1 %v14771_v40 }
 0x677   :  { %18155 = vst [vmem:[#allocation185_spill] sm:$0xff] %v15020_v19  ;;  %v15028_v44 = vpop.f32.mrb[131].mxu0  ;;  %7116 = vmatprep.mubr.f32.mxu1 %v15024_v45 }
 0x678   :  { %18157 = vst [vmem:[#allocation187_spill] sm:$0xff] %v15028_v44 }
 0x67a   :  { %v15031_v53 = vpop.f32.mrb[132].mxu0  ;;  %7117 = vmatmul.mubr.f32.gmra.mrb[178].mxu1 %v14773_v62 }
 0x67b   :  { %18158 = vst [vmem:[#allocation188_spill] sm:$0xff] %v15031_v53  ;;  %v15038_v19 = vpop.f32.mrb[133].mxu0  ;;  %7121 = vmatprep.mubr.f32.mxu1 %v15035_v20  ;;  %v15049_v53 = vsel %vm594_vm0, %v5165_v6, %v5167_v10  ;;  %v15068_v20 = vld [vmem:[#allocation2 + $0x318] sm:$0xff] }
 0x67c   :  { %18160 = vst [vmem:[#allocation190_spill] sm:$0xff] %v15038_v19  ;;  %18162 = vst [vmem:[#allocation192_spill] sm:$0xff] %v15049_v53  ;;  %v15056_v19 = vld [vmem:[#allocation2 + $0x310] sm:$0x3] }
 0x67d   :  { %v5172_v6 = vrot.slane %v15056_v19, 1 }
 0x67e   :  { %v15045_v44 = vpop.f32.mrb[134].mxu0  ;;  %7122 = vmatmul.mubr.f32.gmra.mrb[180].mxu1 %v14796_v4 }
 0x67f   :  { %18161 = vst [vmem:[#allocation191_spill] sm:$0xff] %v15045_v44  ;;  %v15053_v27 = vpop.f32.mrb[135].mxu0  ;;  %7126 = vmatprep.mubr.f32.mxu1 %v15049_v53  ;;  %v15062_v44 = vsel %vm594_vm0, %v5169_v57, %v5170_v12  ;;  %v5174_v57 = vrot.slane %v15068_v20, 1 }
 0x680   :  { %18163 = vst [vmem:[#allocation193_spill] sm:$0xff] %v15053_v27  ;;  %18165 = vst [vmem:[#allocation195_spill] sm:$0xff] %v15062_v44  ;;  %v15070_v27 = vld [vmem:[#allocation2 + $0x320] sm:$0xff] }
 0x681   :  { %v5175_v45 = vrot.slane %v15070_v27, 1 }
 0x682   :  { %v15058_v5 = vpop.f32.mrb[136].mxu0  ;;  %7127 = vmatmul.mubr.f32.gmra.mrb[182].mxu1 %v14798_v51 }
 0x683   :  { %18164 = vst [vmem:[#allocation194_spill] sm:$0xff] %v15058_v5  ;;  %v15065_v10 = vpop.f32.mrb[137].mxu0  ;;  %7131 = vmatprep.mubr.f32.mxu1 %v15062_v44  ;;  %v15076_v5 = vsel %vm594_vm0, %v5170_v12, %v5172_v6 }
 0x684   :  { %18166 = vst [vmem:[#allocation196_spill] sm:$0xff] %v15065_v10  ;;  %18168 = vst [vmem:[#allocation198_spill] sm:$0xff] %v15076_v5  ;;  %v15083_v10 = vld [vmem:[#allocation2 + $0x328] sm:$0x3] }
 0x685   :  { %v5177_v12 = vrot.slane %v15083_v10, 1 }
 0x686   :  { %v15072_v53 = vpop.f32.mrb[138].mxu0  ;;  %7132 = vmatmul.mubr.f32.gmra.mrb[184].mxu1 %v15041_v1 }
 0x687   :  { %18167 = vst [vmem:[#allocation197_spill] sm:$0xff] %v15072_v53  ;;  %v15080_v7 = vpop.f32.mrb[139].mxu0  ;;  %7136 = vmatprep.mubr.f32.mxu1 %v15076_v5  ;;  %v15089_v53 = vsel %vm594_vm0, %v5174_v57, %v5175_v45  ;;  %v6688_v57 = vld [vmem:[#allocation7 + $0x208] sm:$0xff] }
 0x688   :  { %18169 = vst [vmem:[#allocation199_spill] sm:$0xff] %v15080_v7  ;;  %18171 = vst [vmem:[#allocation201_spill] sm:$0xff] %v15089_v53  ;;  %v15099_v7 = vsel %vm594_vm0, %v5175_v45, %v5177_v12  ;;  %v6690_v45 = vld [vmem:[#allocation7 + $0x218] sm:$0xff] }
 0x689   :  { %18174 = vst [vmem:[#allocation204_spill] sm:$0xff] %v15099_v7 }
 0x68a   :  { %v15085_v44 = vpop.f32.mrb[140].mxu0  ;;  %7137 = vmatmul.mubr.f32.gmra.mrb[186].mxu1 %v15043_v22 }
 0x68b   :  { %18170 = vst [vmem:[#allocation200_spill] sm:$0xff] %v15085_v44  ;;  %v15092_v6 = vpop.f32.mrb[141].mxu0  ;;  %7141 = vmatprep.mubr.f32.mxu1 %v15089_v53  ;;  %v6687_v44 = vld [vmem:[#allocation7 + $0x200] sm:$0xff]  ;;  %v10997_v53 = vld [vmem:[#allocation2 + $0x18] sm:$0xff] }
 0x68c   :  { %18172 = vst [vmem:[#allocation202_spill] sm:$0xff] %v15092_v6  ;;  %v5312_v17 = vrot.slane %v10997_v53, 2 }
 0x68e   :  { %v15095_v59 = vpop.f32.mrb[142].mxu0  ;;  %7142 = vmatmul.mubr.f32.gmra.mrb[188].mxu1 %v15068_v20 }
 0x68f   :  { %18173 = vst [vmem:[#allocation203_spill] sm:$0xff] %v15095_v59  ;;  %v15101_v5 = vpop.f32.mrb[143].mxu0  ;;  %7146 = vmatprep.mubr.f32.mxu1 %v15099_v7  ;;  %v9993_v59 = vpack.c.bf16 %v6688_v57, %v6687_v44  ;;  %v10999_v7 = vld [vmem:[#allocation2 + $0x20] sm:$0xff]  ;;  %v6692_v57 = vld [vmem:[#allocation7 + $0x228] sm:$0xff] }
 0x690   :  { %18175 = vst [vmem:[#allocation205_spill] sm:$0xff] %v15101_v5  ;;  %v6691_v44 = vld [vmem:[#allocation7 + $0x220] sm:$0xff]  ;;  %v5313_v38 = vrot.slane %v10999_v7, 2 }
 0x692   :  { %v15104_v55 = vpop.f32.mrb[144].mxu0  ;;  %7147 = vmatmul.mubr.f32.gmra.mrb[190].mxu1 %v15070_v27 }
 0x693   :  { %18176 = vst [vmem:[#allocation206_spill] sm:$0xff] %v15104_v55  ;;  %v15107_v6 = vpop.f32.mrb[145].mxu0  ;;  %7216 = vmatprep.mubr.f32.mxu1 %v10997_v53  ;;  %v5311_v55 = vsel %vm883_vm2, %v14523_v31, %v5310_v29  ;;  %v15126_v29 = vsel %vm883_vm2, %v5312_v17, %v5313_v38  ;;  %v11001_v53 = vld [vmem:[#allocation2 + $0x28] sm:$0x3] }
 0x694   :  { %18177 = vst [vmem:[#allocation207_spill] sm:$0xff] %v15107_v6  ;;  %v9996_v6 = vpack.c.bf16 %v6690_v45, %v6689_v0  ;;  %v6694_v0 = vld [vmem:[#allocation7 + $0x238] sm:$0xff] }
 0x696   :  { %v15109_v12 = vpop.f32.mrb[146].mxu0  ;;  %7217 = vmatmul.mubr.f32.vlgmr.msra.gmra.mrb[64].mxu1 %v14523_v31  ;;  %v6693_v31 = vld [vmem:[#allocation7 + $0x230] sm:$0xff] }
 0x697   :  { %18178 = vst [vmem:[#allocation208_spill] sm:$0xff] %v15109_v12  ;;  %v15112_v5 = vpop.f32.mrb[147].mxu0  ;;  %7221 = vmatprep.mubr.f32.mxu1 %v10999_v7  ;;  %9994 = vmatpush1.bf16.msra.mxu1 %v9993_v59  ;;  %v9999_v59 = vpack.c.bf16 %v6692_v57, %v6691_v44  ;;  %v5315_v7 = vrot.slane %v11001_v53, 2  ;;  %v6695_v44 = vld [vmem:[#allocation7 + $0x240] sm:$0xff]  ;;  %v6696_v57 = vld [vmem:[#allocation7 + $0x248] sm:$0xff] }
 0x698   :  { %18179 = vst [vmem:[#allocation209_spill] sm:$0xff] %v15112_v5  ;;  %9995 = vmatprep.subr.bf16.mxu1 %v18083_v61  ;;  %v15170_v5 = vld [vmem:[#allocation2 + $0x68] sm:$0xff] }
 0x699   :  { %v15138_v17 = vsel %vm883_vm2, %v5313_v38, %v5315_v7  ;;  %v15154_v7 = vld [vmem:[#allocation2 + $0x50] sm:$0xff]  ;;  %18196 = vst [vmem:[#allocation226_spill] sm:$0xff] %v15170_v5 }
 0x69a   :  { %v15117_v33 = vpop.f32.mrb[148].mxu0  ;;  %7222 = vmatmul.mubr.f32.gmra.mrb[66].mxu1 %v5311_v55  ;;  %18191 = vst [vmem:[#allocation221_spill] sm:$0xff] %v15154_v7 }
 0x69b   :  { %18180 = vst [vmem:[#allocation210_spill] sm:$0xff] %v15117_v33  ;;  %v15119_v12 = vpop.f32.mrb[149].mxu0  ;;  %7226 = vmatprep.mubr.f32.mxu1 %v15121_v21  ;;  %9997 = vmatpush1.bf16.msra.mxu1 %v9996_v6  ;;  %v15133_v33 = vld [vmem:[#allocation2 + $0x38] sm:$0xff]  ;;  %v10002_v6 = vpack.c.bf16 %v6694_v0, %v6693_v31  ;;  %v6697_v31 = vld [vmem:[#allocation7 + $0x250] sm:$0xff] }
 0x69c   :  { %18181 = vst [vmem:[#allocation211_spill] sm:$0xff] %v15119_v12  ;;  %9998 = vmatprep.subr.bf16.mxu1 %v18083_v61  ;;  %18185 = vst [vmem:[#allocation215_spill] sm:$0xff] %v15133_v33  ;;  %v6698_v0 = vld [vmem:[#allocation7 + $0x258] sm:$0xff] }
 0x69e   :  { %v15128_v45 = vpop.f32.mrb[150].mxu0  ;;  %7227 = vmatmul.mubr.f32.gmra.mrb[68].mxu1 %v15126_v29 }
 0x69f   :  { %18183 = vst [vmem:[#allocation213_spill] sm:$0xff] %v15128_v45  ;;  %v15131_v55 = vpop.f32.mrb[151].mxu0  ;;  %7231 = vmatprep.mubr.f32.mxu1 %v15133_v33  ;;  %10000 = vmatpush1.bf16.msra.mxu1 %v9999_v59  ;;  %v10005_v59 = vpack.c.bf16 %v6696_v57, %v6695_v44  ;;  %v6700_v44 = vld [vmem:[#allocation7 + $0x268] sm:$0xff] }
 0x6a0   :  { %18184 = vst [vmem:[#allocation214_spill] sm:$0xff] %v15131_v55  ;;  %10001 = vmatprep.subr.bf16.mxu1 %v18083_v61  ;;  %v15145_v55 = vld [vmem:[#allocation2 + $0x48] sm:$0xff] }
 0x6a1   :  { %18188 = vst [vmem:[#allocation218_spill] sm:$0xff] %v15145_v55 }
 0x6a2   :  { %v15140_v53 = vpop.f32.mrb[152].mxu0  ;;  %7232 = vmatmul.mubr.f32.gmra.mrb[70].mxu1 %v15138_v17 }
 0x6a3   :  { %18186 = vst [vmem:[#allocation216_spill] sm:$0xff] %v15140_v53  ;;  %v15143_v45 = vpop.f32.mrb[153].mxu0  ;;  %7236 = vmatprep.mubr.f32.mxu1 %v15145_v55  ;;  %10003 = vmatpush1.bf16.msra.mxu1 %v10002_v6  ;;  %v10008_v53 = vpack.c.bf16 %v6698_v0, %v6697_v31  ;;  %v6699_v6 = vld [vmem:[#allocation7 + $0x260] sm:$0xff]  ;;  %v6702_v31 = vld [vmem:[#allocation7 + $0x278] sm:$0xff] }
 0x6a4   :  { %18187 = vst [vmem:[#allocation217_spill] sm:$0xff] %v15143_v45  ;;  %10004 = vmatprep.subr.bf16.mxu1 %v18083_v61 }
 0x6a6   :  { %v15149_v12 = vpop.f32.mrb[154].mxu0  ;;  %7237 = vmatmul.mubr.f32.gmra.mrb[72].mxu1 %v14218_v3 }
 0x6a7   :  { %18189 = vst [vmem:[#allocation219_spill] sm:$0xff] %v15149_v12  ;;  %v15152_v38 = vpop.f32.mrb[155].mxu0  ;;  %7241 = vmatprep.mubr.f32.mxu1 %v15154_v7  ;;  %10006 = vmatpush1.bf16.msra.mxu1 %v10005_v59  ;;  %v15163_v12 = vld [vmem:[#allocation2 + $0x60] sm:$0xff]  ;;  %v6701_v59 = vld [vmem:[#allocation7 + $0x270] sm:$0xff]  ;;  %v15181_v7 = vld [vmem:[#allocation2 + $0x78] sm:$0xff] }
 0x6a8   :  { %18190 = vst [vmem:[#allocation220_spill] sm:$0xff] %v15152_v38  ;;  %10007 = vmatprep.subr.bf16.mxu1 %v18083_v61  ;;  %18194 = vst [vmem:[#allocation224_spill] sm:$0xff] %v15163_v12  ;;  %v10011_v38 = vpack.c.bf16 %v6700_v44, %v6699_v6  ;;  %v6704_v6 = vld [vmem:[#allocation7 + $0x288] sm:$0xff] }
 0x6a9   :  { %18200 = vst [vmem:[#allocation230_spill] sm:$0xff] %v15181_v7 }
 0x6aa   :  { %v15158_v57 = vpop.f32.mrb[156].mxu0  ;;  %7242 = vmatmul.mubr.f32.gmra.mrb[74].mxu1 %v14221_v11 }
 0x6ab   :  { %18192 = vst [vmem:[#allocation222_spill] sm:$0xff] %v15158_v57  ;;  %v15161_v45 = vpop.f32.mrb[157].mxu0  ;;  %7246 = vmatprep.mubr.f32.mxu1 %v15163_v12  ;;  %10009 = vmatpush1.bf16.msra.mxu1 %v10008_v53  ;;  %v6703_v53 = vld [vmem:[#allocation7 + $0x280] sm:$0xff] }
 0x6ac   :  { %18193 = vst [vmem:[#allocation223_spill] sm:$0xff] %v15161_v45  ;;  %10010 = vmatprep.subr.bf16.mxu1 %v18083_v61  ;;  %v10014_v45 = vpack.c.bf16 %v6702_v31, %v6701_v59  ;;  %v6706_v59 = vld [vmem:[#allocation7 + $0x298] sm:$0xff] }
 0x6ae   :  { %7247 = vmatmul.mubr.f32.gmra.mrb[76].mxu1 %v14234_v30  ;;  %v15168_v0 = vpop.f32.mrb[158].mxu0 }
 0x6af   :  { %18195 = vst [vmem:[#allocation225_spill] sm:$0xff] %v15168_v0  ;;  %7251 = vmatprep.mubr.f32.mxu1 %v15170_v5  ;;  %v15173_v57 = vpop.f32.mrb[159].mxu0  ;;  %10012 = vmatpush1.bf16.msra.mxu1 %v10011_v38  ;;  %v10017_v0 = vpack.c.bf16 %v6704_v6, %v6703_v53  ;;  %v6705_v38 = vld [vmem:[#allocation7 + $0x290] sm:$0xff]  ;;  %v6708_v53 = vld [vmem:[#allocation7 + $0x2a8] sm:$0xff] }
 0x6b0   :  { %18197 = vst [vmem:[#allocation227_spill] sm:$0xff] %v15173_v57  ;;  %10013 = vmatprep.subr.bf16.mxu1 %v18083_v61 }
 0x6b2   :  { %v15176_v44 = vpop.f32.mrb[160].mxu0  ;;  %7252 = vmatmul.mubr.f32.gmra.mrb[78].mxu1 %v14247_v63 }
 0x6b3   :  { %18198 = vst [vmem:[#allocation228_spill] sm:$0xff] %v15176_v44  ;;  %v15179_v12 = vpop.f32.mrb[161].mxu0  ;;  %7256 = vmatprep.mubr.f32.mxu1 %v15181_v7  ;;  %10015 = vmatpush1.bf16.msra.mxu1 %v10014_v45  ;;  %v15190_v44 = vld [vmem:[#allocation2 + $0x80] sm:$0xff] }
 0x6b4   :  { %18199 = vst [vmem:[#allocation229_spill] sm:$0xff] %v15179_v12  ;;  %10016 = vmatprep.subr.bf16.mxu1 %v18083_v61  ;;  %18203 = vst [vmem:[#allocation233_spill] sm:$0xff] %v15190_v44  ;;  %v10020_v12 = vpack.c.bf16 %v6706_v59, %v6705_v38  ;;  %v6707_v45 = vld [vmem:[#allocation7 + $0x2a0] sm:$0xff] }
 0x6b5   :  { %v18208_v38 = vld [vmem:[#allocation65_spill] sm:$0xff] }
 0x6b6   :  { %v15185_v31 = vpop.f32.mrb[162].mxu0  ;;  %7257 = vmatmul.mubr.f32.gmra.mrb[80].mxu1 %v14259_v52 }
 0x6b7   :  { %18201 = vst [vmem:[#allocation231_spill] sm:$0xff] %v15185_v31  ;;  %v15188_v57 = vpop.f32.mrb[163].mxu0  ;;  %7261 = vmatprep.mubr.f32.mxu1 %v15190_v44  ;;  %10018 = vmatpush1.bf16.msra.mxu1 %v10017_v0  ;;  %v15199_v31 = vld [vmem:[#allocation2 + $0x90] sm:$0xff]  ;;  %v15208_v44 = vld [vmem:[#allocation2 + $0x98] sm:$0xff] }
 0x6b8   :  { %18202 = vst [vmem:[#allocation232_spill] sm:$0xff] %v15188_v57  ;;  %10019 = vmatprep.subr.bf16.mxu1 %v18083_v61  ;;  %18206 = vst [vmem:[#allocation236_spill] sm:$0xff] %v15199_v31  ;;  %v10023_v57 = vpack.c.bf16 %v6708_v53, %v6707_v45  ;;  %v15217_v45 = vld [vmem:[#allocation2 + $0xa8] sm:$0xff] }
 0x6b9   :  { %18210 = vst [vmem:[#allocation238_spill] sm:$0xff] %v15208_v44  ;;  %18214 = vst [vmem:[#allocation240_spill] sm:$0xff] %v15217_v45 }
 0x6ba   :  { %v15194_v6 = vpop.f32.mrb[164].mxu0  ;;  %7262 = vmatmul.mubr.f32.gmra.mrb[82].mxu1 %v14271_v49 }
 0x6bb   :  { %18204 = vst [vmem:[#allocation234_spill] sm:$0xff] %v15194_v6  ;;  %v15197_v7 = vpop.f32.mrb[165].mxu0  ;;  %7266 = vmatprep.mubr.f32.mxu1 %v15199_v31  ;;  %10021 = vmatpush1.bf16.msra.mxu1 %v10020_v12 }
 0x6bc   :  { %18205 = vst [vmem:[#allocation235_spill] sm:$0xff] %v15197_v7  ;;  %10022 = vmatprep.subr.bf16.mxu1 %v18083_v61  ;;  %v18212_v7 = vld [vmem:[#allocation68_spill] sm:$0xff] }
 0x6be   :  { %v15203_v0 = vpop.f32.mrb[166].mxu0  ;;  %7267 = vmatmul.mubr.f32.gmra.mrb[84].mxu1 %v18208_v38 }
 0x6bf   :  { %18207 = vst [vmem:[#allocation237_spill] sm:$0xff] %v15203_v0  ;;  %v15206_v59 = vpop.f32.mrb[167].mxu0  ;;  %7271 = vmatprep.mubr.f32.mxu1 %v15208_v44  ;;  %10024 = vmatpush1.bf16.msra.mxu1 %v10023_v57  ;;  %v18216_v0 = vld [vmem:[#allocation72_spill] sm:$0xff]  ;;  %v15225_v44 = vld [vmem:[#allocation2 + $0xb0] sm:$0xff] }
 0x6c0   :  { %18209 = vst [vmem:[#allocation65_spill] sm:$0xff] %v15206_v59  ;;  %10025 = vmatprep.subr.bf16.mxu1 %v18083_v61  ;;  %18218 = vst [vmem:[#allocation242_spill] sm:$0xff] %v15225_v44  ;;  %v6709_v57 = vld [vmem:[#allocation7 + $0x2b0] sm:$0xff] }
 0x6c2   :  { %v15212_v6 = vpop.f32.mrb[168].mxu0  ;;  %7272 = vmatmul.mubr.f32.gmra.mrb[86].mxu1 %v18212_v7 }
 0x6c3   :  { %18211 = vst [vmem:[#allocation239_spill] sm:$0xff] %v15212_v6  ;;  %v15215_v12 = vpop.f32.mrb[169].mxu0  ;;  %7276 = vmatprep.mubr.f32.mxu1 %v15217_v45  ;;  %v6710_v6 = vld [vmem:[#allocation7 + $0x2b8] sm:$0xff]  ;;  %v15233_v45 = vld [vmem:[#allocation2 + $0xc0] sm:$0xff] }
 0x6c4   :  { %18213 = vst [vmem:[#allocation68_spill] sm:$0xff] %v15215_v12  ;;  %v10026_v31 = vpack.c.bf16 %v6710_v6, %v6709_v57  ;;  %v18220_v12 = vld [vmem:[#allocation73_spill] sm:$0xff]  ;;  %18222 = vst [vmem:[#allocation244_spill] sm:$0xff] %v15233_v45  ;;  %v15242_v6 = vld [vmem:[#allocation2 + $0xc8] sm:$0xff] }
 0x6c5   :  { %18226 = vst [vmem:[#allocation246_spill] sm:$0xff] %v15242_v6 }
 0x6c6   :  { %v15220_v53 = vpop.f32.mrb[170].mxu0  ;;  %7277 = vmatmul.mubr.f32.gmra.mrb[88].mxu1 %v18216_v0 }
 0x6c7   :  { %18215 = vst [vmem:[#allocation241_spill] sm:$0xff] %v15220_v53  ;;  %v15223_v59 = vpop.f32.mrb[171].mxu0  ;;  %7281 = vmatprep.mubr.f32.mxu1 %v15225_v44  ;;  %10027 = vmatpush1.bf16.msra.mxu1 %v10026_v31 }
 0x6c8   :  { %18217 = vst [vmem:[#allocation72_spill] sm:$0xff] %v15223_v59  ;;  %10028 = vmatprep.subr.bf16.mxu1 %v18083_v61  ;;  %v18224_v59 = vld [vmem:[#allocation77_spill] sm:$0xff] }
 0x6ca   :  { %v15228_v5 = vpop.f32.mrb[172].mxu0  ;;  %7282 = vmatmul.mubr.f32.gmra.mrb[90].mxu1 %v18220_v12 }
 0x6cb   :  { %18219 = vst [vmem:[#allocation243_spill] sm:$0xff] %v15228_v5  ;;  %v15231_v55 = vpop.f32.mrb[173].mxu0  ;;  %7286 = vmatprep.mubr.f32.mxu1 %v15233_v45  ;;  %v18228_v5 = vld [vmem:[#allocation80_spill] sm:$0xff] }
 0x6cc   :  { %18221 = vst [vmem:[#allocation73_spill] sm:$0xff] %v15231_v55  ;;  %v15250_v45 = vld [vmem:[#allocation2 + $0xd8] sm:$0xff] }
 0x6cd   :  { %18230 = vst [vmem:[#allocation248_spill] sm:$0xff] %v15250_v45 }
 0x6ce   :  { %v15237_v53 = vpop.f32.mrb[174].mxu0  ;;  %7287 = vmatmul.mubr.f32.gmra.mrb[92].mxu1 %v18224_v59 }
 0x6cf   :  { %18223 = vst [vmem:[#allocation245_spill] sm:$0xff] %v15237_v53  ;;  %v15240_v44 = vpop.f32.mrb[175].mxu0  ;;  %7291 = vmatprep.mubr.f32.mxu1 %v15242_v6  ;;  %v18232_v53 = vld [vmem:[#allocation84_spill] sm:$0xff]  ;;  %v6711_v6 = vld [vmem:[#allocation7 + $0x2c0] sm:$0xff] }
 0x6d0   :  { %18225 = vst [vmem:[#allocation77_spill] sm:$0xff] %v15240_v44  ;;  %v15258_v44 = vld [vmem:[#allocation2 + $0xe0] sm:$0xff] }
 0x6d1   :  { %18234 = vst [vmem:[#allocation250_spill] sm:$0xff] %v15258_v44 }
 0x6d2   :  { %v15245_v57 = vpop.f32.mrb[176].mxu0  ;;  %7292 = vmatmul.mubr.f32.gmra.mrb[94].mxu1 %v18228_v5 }
 0x6d3   :  { %18227 = vst [vmem:[#allocation247_spill] sm:$0xff] %v15245_v57  ;;  %v15248_v55 = vpop.f32.mrb[177].mxu0  ;;  %7296 = vmatprep.mubr.f32.mxu1 %v15250_v45  ;;  %v6712_v57 = vld [vmem:[#allocation7 + $0x2c8] sm:$0xff]  ;;  %v15266_v45 = vld [vmem:[#allocation2 + $0xf0] sm:$0xff] }
 0x6d4   :  { %18229 = vst [vmem:[#allocation80_spill] sm:$0xff] %v15248_v55  ;;  %v10029_v21 = vpack.c.bf16 %v6712_v57, %v6711_v6  ;;  %v18236_v55 = vld [vmem:[#allocation85_spill] sm:$0xff]  ;;  %18238 = vst [vmem:[#allocation252_spill] sm:$0xff] %v15266_v45  ;;  %v15275_v6 = vld [vmem:[#allocation2 + $0xf8] sm:$0xff] }
 0x6d5   :  { %18242 = vst [vmem:[#allocation254_spill] sm:$0xff] %v15275_v6  ;;  %v18243_v57 = vld [vmem:[#allocation92_spill] sm:$0xff] }
 0x6d6   :  { %v15253_v31 = vpop.f32.mrb[178].mxu0  ;;  %7297 = vmatmul.mubr.f32.gmra.mrb[96].mxu1 %v18232_v53 }
 0x6d7   :  { %18231 = vst [vmem:[#allocation249_spill] sm:$0xff] %v15253_v31  ;;  %v15256_v33 = vpop.f32.mrb[179].mxu0  ;;  %7301 = vmatprep.mubr.f32.mxu1 %v15258_v44  ;;  %10030 = vmatpush1.bf16.msra.mxu1 %v10029_v21  ;;  %v15283_v21 = vld [vmem:[#allocation2 + $0x110] sm:$0xff] }
 0x6d8   :  { %18233 = vst [vmem:[#allocation84_spill] sm:$0xff] %v15256_v33  ;;  %10031 = vmatprep.subr.bf16.mxu1 %v18083_v61  ;;  %v18240_v33 = vld [vmem:[#allocation89_spill] sm:$0xff] }
 0x6da   :  { %v15261_v14 = vpop.f32.mrb[180].mxu0  ;;  %7302 = vmatmul.mubr.f32.gmra.mrb[98].mxu1 %v18236_v55 }
 0x6db   :  { %18235 = vst [vmem:[#allocation251_spill] sm:$0xff] %v15261_v14  ;;  %v15264_v46 = vpop.f32.mrb[181].mxu0  ;;  %7306 = vmatprep.mubr.f32.mxu1 %v15266_v45  ;;  %v15279_v14 = vld [vmem:[#allocation2 + $0x108] sm:$0xff]  ;;  %v6714_v45 = vld [vmem:[#allocation7 + $0x2d8] sm:$0xff] }
 0x6dc   :  { %18237 = vst [vmem:[#allocation85_spill] sm:$0xff] %v15264_v46  ;;  %18244 = vst [vmem:[#allocation92_spill] sm:$0xff] %v15279_v14  ;;  %v18245_v46 = vld [vmem:[#allocation96_spill] sm:$0xff] }
 0x6dd   :  { %18246 = vst [vmem:[#allocation96_spill] sm:$0xff] %v15283_v21 }
 0x6de   :  { %v15270_v31 = vpop.f32.mrb[182].mxu0  ;;  %7307 = vmatmul.mubr.f32.gmra.mrb[100].mxu1 %v18240_v33 }
 0x6df   :  { %18239 = vst [vmem:[#allocation253_spill] sm:$0xff] %v15270_v31  ;;  %v15273_v44 = vpop.f32.mrb[183].mxu0  ;;  %7311 = vmatprep.mubr.f32.mxu1 %v15275_v6  ;;  %v6713_v31 = vld [vmem:[#allocation7 + $0x2d0] sm:$0xff]  ;;  %v18249_v6 = vld [vmem:[#allocation101_spill] sm:$0xff] }
 0x6e0   :  { %18241 = vst [vmem:[#allocation89_spill] sm:$0xff] %v15273_v44  ;;  %v10032_v37 = vpack.c.bf16 %v6714_v45, %v6713_v31  ;;  %v18247_v44 = vld [vmem:[#allocation97_spill] sm:$0xff] }
 0x6e1   :  { %18248 = vst [vmem:[#allocation97_spill] sm:$0xff] %v15287_v32  ;;  %v18253_v45 = vld [vmem:[#allocation149_spill] sm:$0xff] }
 0x6e2   :  { %7312 = vmatmul.mubr.f32.gmra.mrb[102].mxu1 %v18243_v57  ;;  %v15300_v31 = vld [vmem:[#allocation2 + $0x140] sm:$0xff] }
 0x6e3   :  { %7316 = vmatprep.mubr.f32.mxu1 %v15279_v14  ;;  %10033 = vmatpush1.bf16.msra.mxu1 %v10032_v37  ;;  %v15292_v14 = vld [vmem:[#allocation2 + $0x128] sm:$0xff]  ;;  %18254 = vst [vmem:[#allocation149_spill] sm:$0xff] %v15300_v31  ;;  %v6715_v37 = vld [vmem:[#allocation7 + $0x2e0] sm:$0xff] }
 0x6e4   :  { %10034 = vmatprep.subr.bf16.mxu1 %v18083_v61  ;;  %18250 = vst [vmem:[#allocation101_spill] sm:$0xff] %v15292_v14 }
 0x6e6   :  { %7317 = vmatmul.mubr.f32.gmra.mrb[104].mxu1 %v18245_v46 }
 0x6e7   :  { %7321 = vmatprep.mubr.f32.mxu1 %v15283_v21  ;;  %v15296_v21 = vld [vmem:[#allocation2 + $0x138] sm:$0xff] }
 0x6e8   :  { %18252 = vst [vmem:[#allocation144_spill] sm:$0xff] %v15296_v21 }
 0x6ea   :  { %7322 = vmatmul.mubr.f32.gmra.mrb[106].mxu1 %v18247_v44 }
 0x6eb   :  { %7326 = vmatprep.mubr.f32.mxu1 %v15287_v32  ;;  %v6716_v32 = vld [vmem:[#allocation7 + $0x2e8] sm:$0xff] }
 0x6ec   :  { %v10035_v60 = vpack.c.bf16 %v6716_v32, %v6715_v37  ;;  %v18261_v32 = vld [vmem:[#allocation165_spill] sm:$0xff]  ;;  %v15317_v37 = vld [vmem:[#allocation2 + $0x170] sm:$0xff] }
 0x6ed   :  { %18262 = vst [vmem:[#allocation165_spill] sm:$0xff] %v15317_v37 }
 0x6ee   :  { %7327 = vmatmul.mubr.f32.gmra.mrb[108].mxu1 %v18249_v6 }
 0x6ef   :  { %7331 = vmatprep.mubr.f32.mxu1 %v15292_v14  ;;  %10036 = vmatpush1.bf16.msra.mxu1 %v10035_v60  ;;  %v18257_v14 = vld [vmem:[#allocation157_spill] sm:$0xff]  ;;  %v6717_v60 = vld [vmem:[#allocation7 + $0x2f0] sm:$0xff] }
 0x6f0   :  { %10037 = vmatprep.subr.bf16.mxu1 %v18083_v61 }
 0x6f2   :  { %7332 = vmatmul.mubr.f32.gmra.mrb[110].mxu1 %v18251_v28 }
 0x6f3   :  { %7336 = vmatprep.mubr.f32.mxu1 %v15296_v21  ;;  %v15309_v21 = vld [vmem:[#allocation2 + $0x158] sm:$0xff] }
 0x6f4   :  { %18258 = vst [vmem:[#allocation157_spill] sm:$0xff] %v15309_v21 }
 0x6f6   :  { %7337 = vmatmul.mubr.f32.gmra.mrb[112].mxu1 %v18253_v45 }
 0x6f7   :  { %7341 = vmatprep.mubr.f32.mxu1 %v15300_v31  ;;  %v15313_v31 = vld [vmem:[#allocation2 + $0x168] sm:$0xff] }
 0x6f8   :  { %18260 = vst [vmem:[#allocation159_spill] sm:$0xff] %v15313_v31 }
 0x6fa   :  { %7342 = vmatmul.mubr.f32.gmra.mrb[114].mxu1 %v18255_v36 }
 0x6fb   :  { %7346 = vmatprep.mubr.f32.mxu1 %v15304_v43  ;;  %v6718_v43 = vld [vmem:[#allocation7 + $0x2f8] sm:$0xff] }
 0x6fc   :  { %v10038_v50 = vpack.c.bf16 %v6718_v43, %v6717_v60  ;;  %v18269_v43 = vld [vmem:[#allocation141_spill] sm:$0xff]  ;;  %v5390_v60 = vrot.slane %v14845_v54, 2  ;;  %v5395_v54 = vrot.slane %v14865_v24, 2  ;;  %v18275_v24 = vld [vmem:[#allocation156_spill] sm:$0xff] }
 0x6fe   :  { %7347 = vmatmul.mubr.f32.gmra.mrb[116].mxu1 %v18257_v14 }
 0x6ff   :  { %7351 = vmatprep.mubr.f32.mxu1 %v15309_v21  ;;  %10039 = vmatpush1.bf16.msra.mxu1 %v10038_v50  ;;  %v18265_v21 = vld [vmem:[#allocation145_spill] sm:$0xff] }
 0x700   :  { %10040 = vmatprep.subr.bf16.mxu1 %v18083_v61 }
 0x702   :  { %7352 = vmatmul.mubr.f32.gmra.mrb[118].mxu1 %v18259_v56 }
 0x703   :  { %7356 = vmatprep.mubr.f32.mxu1 %v15313_v31  ;;  %v15326_v31 = vld [vmem:[#allocation2 + $0x188] sm:$0xff] }
 0x704   :  { %18266 = vst [vmem:[#allocation145_spill] sm:$0xff] %v15326_v31 }
 0x706   :  { %7357 = vmatmul.mubr.f32.gmra.mrb[120].mxu1 %v18261_v32 }
 0x707   :  { %7361 = vmatprep.mubr.f32.mxu1 %v15317_v37  ;;  %v15332_v37 = vrot.slane %v15329_v18, 2  ;;  %v15343_v18 = vld [vmem:[#allocation2 + $0x1e0] sm:$0xff] }
 0x708   :  { %18270 = vst [vmem:[#allocation141_spill] sm:$0xff] %v15343_v18 }
 0x709   :  { %18268 = vst [vmem:[#allocation256_spill] sm:$0xff] %v15332_v37  ;;  %v5391_v50 = vsel %vm883_vm2, %v15332_v37, %v5390_v60  ;;  %v18273_v60 = vld [vmem:[#allocation151_spill] sm:$0xff] }
 0x70a   :  { %7362 = vmatmul.mubr.f32.gmra.mrb[122].mxu1 %v18263_v41 }
 0x70b   :  { %7366 = vmatprep.mubr.f32.mxu1 %v15321_v58  ;;  %v15351_v58 = vld [vmem:[#allocation2 + $0x1e8] sm:$0xff] }
 0x70c   :  { %18271 = vst [vmem:[#allocation257_spill] sm:$0xff] %v15351_v58 }
 0x70e   :  { %7367 = vmatmul.mubr.f32.gmra.mrb[124].mxu1 %v18265_v21 }
 0x70f   :  { %7371 = vmatprep.mubr.f32.mxu1 %v15326_v31  ;;  %v15347_v31 = vsel %vm883_vm2, %v5392_v25, %v5393_v9  ;;  %v15362_v25 = vld [vmem:[#allocation2 + $0x200] sm:$0xff] }
 0x710   :  { %18274 = vst [vmem:[#allocation151_spill] sm:$0xff] %v15362_v25 }
 0x712   :  { %7372 = vmatmul.mubr.f32.gmra.mrb[126].mxu1 %v18269_v43 }
 0x713   :  { %7376 = vmatprep.mubr.f32.mxu1 %v14856_v2  ;;  %v15355_v2 = vsel %vm883_vm2, %v5393_v9, %v5395_v54  ;;  %v18277_v9 = vld [vmem:[#allocation158_spill] sm:$0xff]  ;;  %v15370_v54 = vld [vmem:[#allocation2 + $0x218] sm:$0xff] }
 0x714   :  { %18278 = vst [vmem:[#allocation259_spill] sm:$0xff] %v15370_v54 }
 0x716   :  { %7377 = vmatmul.mubr.f32.gmra.mrb[128].mxu1 %v15332_v37  ;;  %v18279_v37 = vld [vmem:[#allocation160_spill] sm:$0xff] }
 0x717   :  { %7381 = vmatprep.mubr.f32.mxu1 %v14858_v26  ;;  %v15358_v26 = vld [vmem:[#allocation2 + $0x1f8] sm:$0xff] }
 0x718   :  { %18272 = vst [vmem:[#allocation258_spill] sm:$0xff] %v15358_v26 }
 0x71a   :  { %7382 = vmatmul.mubr.f32.gmra.mrb[130].mxu1 %v5391_v50  ;;  %v15366_v50 = vld [vmem:[#allocation2 + $0x210] sm:$0xff] }
 0x71b   :  { %7386 = vmatprep.mubr.f32.mxu1 %v15343_v18  ;;  %18276 = vst [vmem:[#allocation156_spill] sm:$0xff] %v15366_v50  ;;  %v18283_v18 = vld [vmem:[#allocation136_spill] sm:$0xff] }
 0x71e   :  { %7387 = vmatmul.mubr.f32.gmra.mrb[132].mxu1 %v15347_v31 }
 0x71f   :  { %7391 = vmatprep.mubr.f32.mxu1 %v15351_v58  ;;  %v18281_v58 = vld [vmem:[#allocation161_spill] sm:$0xff] }
 0x722   :  { %7392 = vmatmul.mubr.f32.gmra.mrb[134].mxu1 %v15355_v2 }
 0x723   :  { %7396 = vmatprep.mubr.f32.mxu1 %v15358_v26  ;;  %v15374_v26 = vld [vmem:[#allocation2 + $0x228] sm:$0xff] }
 0x724   :  { %18280 = vst [vmem:[#allocation260_spill] sm:$0xff] %v15374_v26 }
 0x726   :  { %7397 = vmatmul.mubr.f32.gmra.mrb[136].mxu1 %v18273_v60 }
 0x727   :  { %7401 = vmatprep.mubr.f32.mxu1 %v15362_v25  ;;  %v15378_v25 = vld [vmem:[#allocation2 + $0x230] sm:$0xff] }
 0x728   :  { %18282 = vst [vmem:[#allocation261_spill] sm:$0xff] %v15378_v25 }
 0x72a   :  { %7402 = vmatmul.mubr.f32.gmra.mrb[138].mxu1 %v18275_v24 }
 0x72b   :  { %7406 = vmatprep.mubr.f32.mxu1 %v15366_v50  ;;  %v15382_v50 = vld [vmem:[#allocation2 + $0x240] sm:$0xff] }
 0x72c   :  { %18284 = vst [vmem:[#allocation262_spill] sm:$0xff] %v15382_v50 }
 0x72e   :  { %7407 = vmatmul.mubr.f32.gmra.mrb[140].mxu1 %v18277_v9  ;;  %v18285_v9 = vld [vmem:[#allocation45_spill] sm:$0xff] }
 0x72f   :  { %7411 = vmatprep.mubr.f32.mxu1 %v15370_v54  ;;  %v15386_v54 = vld [vmem:[#allocation2 + $0x248] sm:$0xff] }
 0x730   :  { %18286 = vst [vmem:[#allocation263_spill] sm:$0xff] %v15386_v54 }
 0x732   :  { %7412 = vmatmul.mubr.f32.gmra.mrb[142].mxu1 %v18279_v37  ;;  %v18287_v37 = vld [vmem:[#allocation168_spill] sm:$0xff] }
 0x733   :  { %7416 = vmatprep.mubr.f32.mxu1 %v15374_v26  ;;  %v15390_v26 = vld [vmem:[#allocation2 + $0x258] sm:$0xff] }
 0x734   :  { %18288 = vst [vmem:[#allocation264_spill] sm:$0xff] %v15390_v26 }
 0x736   :  { %7417 = vmatmul.mubr.f32.gmra.mrb[144].mxu1 %v18281_v58  ;;  %v18289_v58 = vld [vmem:[#allocation107_spill] sm:$0xff] }
 0x737   :  { %7421 = vmatprep.mubr.f32.mxu1 %v15378_v25  ;;  %v15394_v25 = vld [vmem:[#allocation2 + $0x260] sm:$0xff] }
 0x738   :  { %18290 = vst [vmem:[#allocation107_spill] sm:$0xff] %v15394_v25 }
 0x73a   :  { %7422 = vmatmul.mubr.f32.gmra.mrb[146].mxu1 %v18283_v18  ;;  %v18291_v18 = vld [vmem:[#allocation169_spill] sm:$0xff] }
 0x73b   :  { %7426 = vmatprep.mubr.f32.mxu1 %v15382_v50  ;;  %v15398_v50 = vld [vmem:[#allocation2 + $0x270] sm:$0xff] }
 0x73c   :  { %18292 = vst [vmem:[#allocation265_spill] sm:$0xff] %v15398_v50 }
 0x73e   :  { %7427 = vmatmul.mubr.f32.gmra.mrb[148].mxu1 %v18285_v9  ;;  %v18293_v9 = vld [vmem:[#allocation171_spill] sm:$0xff] }
 0x73f   :  { %7431 = vmatprep.mubr.f32.mxu1 %v15386_v54  ;;  %v15402_v54 = vld [vmem:[#allocation2 + $0x278] sm:$0xff] }
 0x740   :  { %18294 = vst [vmem:[#allocation171_spill] sm:$0xff] %v15402_v54 }
 0x742   :  { %7432 = vmatmul.mubr.f32.gmra.mrb[150].mxu1 %v18287_v37  ;;  %v18295_v37 = vld [vmem:[#allocation102_spill] sm:$0xff] }
 0x743   :  { %7436 = vmatprep.mubr.f32.mxu1 %v15390_v26  ;;  %v18296_v26 = vld [vmem:[#allocation104_spill] sm:$0xff] }
 0x746   :  { %7437 = vmatmul.mubr.f32.gmra.mrb[152].mxu1 %v18289_v58 }
 0x747   :  { %7441 = vmatprep.mubr.f32.mxu1 %v15394_v25  ;;  %v18297_v25 = vld [vmem:[#allocation105_spill] sm:$0xff] }
 0x74a   :  { %7442 = vmatmul.mubr.f32.gmra.mrb[154].mxu1 %v18291_v18  ;;  %v18298_v18 = vld [vmem:[#allocation108_spill] sm:$0xff] }
 0x74b   :  { %7446 = vmatprep.mubr.f32.mxu1 %v15398_v50  ;;  %v18299_v50 = vld [vmem:[#allocation129_spill] sm:$0xff] }
 0x74e   :  { %7447 = vmatmul.mubr.f32.gmra.mrb[156].mxu1 %v18293_v9 }
 0x74f   :  { %7451 = vmatprep.mubr.f32.mxu1 %v15402_v54  ;;  %v18300_v54 = vld [vmem:[#allocation134_spill] sm:$0xff] }
 0x752   :  { %7452 = vmatmul.mubr.f32.gmra.mrb[158].mxu1 %v18295_v37 }
 0x753   :  { %7456 = vmatprep.mubr.f32.mxu1 %v14701_v16  ;;  %v18301_v16 = vld [vmem:[#allocation111_spill] sm:$0xff] }
 0x756   :  { %7457 = vmatmul.mubr.f32.gmra.mrb[160].mxu1 %v18296_v26 }
 0x757   :  { %7461 = vmatprep.mubr.f32.mxu1 %v14703_v48  ;;  %v18302_v48 = vld [vmem:[#allocation115_spill] sm:$0xff] }
 0x75a   :  { %7462 = vmatmul.mubr.f32.gmra.mrb[162].mxu1 %v18297_v25 }
 0x75b   :  { %7466 = vmatprep.mubr.f32.mxu1 %v14724_v34  ;;  %v18303_v34 = vld [vmem:[#allocation139_spill] sm:$0xff] }
 0x75e   :  { %7467 = vmatmul.mubr.f32.gmra.mrb[164].mxu1 %v18298_v18 }
 0x75f   :  { %7471 = vmatprep.mubr.f32.mxu1 %v14726_v39  ;;  %v18304_v39 = vld [vmem:[#allocation116_spill] sm:$0xff] }
 0x762   :  { %7472 = vmatmul.mubr.f32.gmra.mrb[166].mxu1 %v18299_v50 }
 0x763   :  { %7476 = vmatprep.mubr.f32.mxu1 %v14748_v15  ;;  %v5458_v15 = vrot.slane %v15043_v22, 2 }
 0x766   :  { %7477 = vmatmul.mubr.f32.gmra.mrb[168].mxu1 %v18300_v54 }
 0x767   :  { %7481 = vmatprep.mubr.f32.mxu1 %v14750_v42  ;;  %v5457_v42 = vrot.slane %v15041_v1, 2 }
 0x76a   :  { %7482 = vmatmul.mubr.f32.gmra.mrb[170].mxu1 %v18301_v16 }
 0x76b   :  { %7486 = vmatprep.mubr.f32.mxu1 %v14771_v40  ;;  %v15434_v40 = vsel %vm883_vm2, %v5457_v42, %v5458_v15 }
 0x76c   :  { %18305 = vst [vmem:[#allocation102_spill] sm:$0xff] %v15434_v40 }
 0x76e   :  { %7487 = vmatmul.mubr.f32.gmra.mrb[172].mxu1 %v18302_v48 }
 0x76f   :  { %7491 = vmatprep.mubr.f32.mxu1 %v14773_v62  ;;  %v5460_v62 = vrot.slane %v15056_v19, 2  ;;  %v5465_v19 = vrot.slane %v15083_v10, 2 }
 0x772   :  { %7492 = vmatmul.mubr.f32.gmra.mrb[174].mxu1 %v18303_v34 }
 0x773   :  { %7496 = vmatprep.mubr.f32.mxu1 %v14796_v4  ;;  %v15440_v4 = vsel %vm883_vm2, %v5458_v15, %v5460_v62  ;;  %v6720_v15 = vld [vmem:[#allocation7 + $0x308] sm:$0xff] }
 0x774   :  { %18306 = vst [vmem:[#allocation104_spill] sm:$0xff] %v15440_v4 }
 0x776   :  { %7497 = vmatmul.mubr.f32.gmra.mrb[176].mxu1 %v18304_v39 }
 0x777   :  { %7501 = vmatprep.mubr.f32.mxu1 %v14798_v51  ;;  %v5462_v51 = vrot.slane %v15068_v20, 2 }
 0x77a   :  { %7502 = vmatmul.mubr.f32.gmra.mrb[178].mxu1 %v14822_v35 }
 0x77b   :  { %7506 = vmatprep.mubr.f32.mxu1 %v15041_v1  ;;  %v5463_v1 = vrot.slane %v15070_v27, 2 }
 0x77d   :  { %v15449_v42 = vsel %vm883_vm2, %v5462_v51, %v5463_v1  ;;  %v6721_v51 = vld [vmem:[#allocation7 + $0x310] sm:$0xff] }
 0x77e   :  { %7507 = vmatmul.mubr.f32.gmra.mrb[180].mxu1 %v14832_v13  ;;  %18308 = vst [vmem:[#allocation108_spill] sm:$0xff] %v15449_v42 }
 0x77f   :  { %7511 = vmatprep.mubr.f32.mxu1 %v15043_v22  ;;  %v15445_v22 = vld [vmem:[#allocation2 + $0x330] sm:$0xff] }
 0x780   :  { %18307 = vst [vmem:[#allocation105_spill] sm:$0xff] %v15445_v22 }
 0x782   :  { %7512 = vmatmul.mubr.f32.gmra.mrb[182].mxu1 %v14837_v8  ;;  %v18312_v8 = vld [vmem:[#allocation60_spill] sm:$0xff] }
 0x783   :  { %7516 = vmatprep.mubr.f32.mxu1 %v15068_v20  ;;  %v6719_v20 = vld [vmem:[#allocation7 + $0x300] sm:$0xff] }
 0x784   :  { %v10041_v62 = vpack.c.bf16 %v6720_v15, %v6719_v20  ;;  %v18313_v20 = vld [vmem:[#allocation61_spill] sm:$0xff]  ;;  %v18314_v15 = vld [vmem:[#allocation64_spill] sm:$0xff] }
 0x786   :  { %7517 = vmatmul.mubr.f32.gmra.mrb[184].mxu1 %v15434_v40  ;;  %v15453_v40 = vld [vmem:[#allocation2 + $0x338] sm:$0xff] }
 0x787   :  { %7521 = vmatprep.mubr.f32.mxu1 %v15070_v27  ;;  %18309 = vst [vmem:[#allocation129_spill] sm:$0xff] %v15453_v40  ;;  %v15457_v27 = vsel %vm883_vm2, %v5463_v1, %v5465_v19  ;;  %v6726_v19 = vld [vmem:[#allocation7 + $0x338] sm:$0xff] }
 0x788   :  { %18310 = vst [vmem:[#allocation134_spill] sm:$0xff] %v15457_v27 }
 0x78a   :  { %7522 = vmatmul.mubr.f32.gmra.mrb[186].mxu1 %v15440_v4  ;;  %v18311_v4 = vld [vmem:[#allocation57_spill] sm:$0xff] }
 0x78b   :  { %7526 = vmatprep.mubr.f32.mxu1 %v15445_v22  ;;  %v6722_v22 = vld [vmem:[#allocation7 + $0x318] sm:$0xff] }
 0x78c   :  { %v10044_v10 = vpack.c.bf16 %v6722_v22, %v6721_v51  ;;  %v6728_v22 = vld [vmem:[#allocation7 + $0x348] sm:$0xff] }
 0x78d   :  { %v6732_v51 = vld [vmem:[#allocation7 + $0x368] sm:$0xff] }
 0x78e   :  { %7527 = vmatmul.mubr.f32.gmra.mrb[188].mxu1 %v15449_v42  ;;  %v6724_v42 = vld [vmem:[#allocation7 + $0x328] sm:$0xff] }
 0x78f   :  { %7531 = vmatprep.mubr.f32.mxu1 %v15453_v40  ;;  %v6723_v40 = vld [vmem:[#allocation7 + $0x320] sm:$0xff] }
 0x790   :  { %v10047_v1 = vpack.c.bf16 %v6724_v42, %v6723_v40  ;;  %v6730_v40 = vld [vmem:[#allocation7 + $0x358] sm:$0xff]  ;;  %v18315_v42 = vld [vmem:[#allocation69_spill] sm:$0xff] }
 0x792   :  { %7532 = vmatmul.mubr.f32.gmra.mrb[190].mxu1 %v15457_v27 }
 0x793   :  { %7601 = vmatprep.mubr.f32.mxu1 %v15126_v29  ;;  %v6725_v29 = vld [vmem:[#allocation7 + $0x330] sm:$0xff] }
 0x796   :  { %7602 = vmatmul.mubr.f32.vlgmr.msra.gmra.mrb[64].mxu1 %v18311_v4  ;;  %v6727_v4 = vld [vmem:[#allocation7 + $0x340] sm:$0xff] }
 0x797   :  { %7606 = vmatprep.mubr.f32.mxu1 %v15138_v17  ;;  %10042 = vmatpush1.bf16.msra.mxu1 %v10041_v62  ;;  %v10050_v17 = vpack.c.bf16 %v6726_v19, %v6725_v29  ;;  %v6731_v62 = vld [vmem:[#allocation7 + $0x360] sm:$0xff]  ;;  %v6734_v29 = vld [vmem:[#allocation7 + $0x378] sm:$0xff] }
 0x798   :  { %10043 = vmatprep.subr.bf16.mxu1 %v18083_v61  ;;  %v18317_v19 = vld [vmem:[#allocation81_spill] sm:$0xff] }
 0x79a   :  { %7607 = vmatmul.mubr.f32.gmra.mrb[66].mxu1 %v18312_v8  ;;  %v6729_v8 = vld [vmem:[#allocation7 + $0x350] sm:$0xff] }
 0x79b   :  { %7611 = vmatprep.mubr.f32.mxu1 %v14218_v3  ;;  %10045 = vmatpush1.bf16.msra.mxu1 %v10044_v10  ;;  %v10053_v3 = vpack.c.bf16 %v6728_v22, %v6727_v4  ;;  %v18316_v10 = vld [vmem:[#allocation76_spill] sm:$0xff]  ;;  %v6736_v4 = vld [vmem:[#allocation7 + $0x388] sm:$0xff] }
 0x79c   :  { %10046 = vmatprep.subr.bf16.mxu1 %v18083_v61  ;;  %v18318_v22 = vld [vmem:[#allocation88_spill] sm:$0xff] }
 0x79e   :  { %7612 = vmatmul.mubr.f32.gmra.mrb[68].mxu1 %v18313_v20 }
 0x79f   :  { %7616 = vmatprep.mubr.f32.mxu1 %v14221_v11  ;;  %10048 = vmatpush1.bf16.msra.mxu1 %v10047_v1  ;;  %v10056_v11 = vpack.c.bf16 %v6730_v40, %v6729_v8  ;;  %v6733_v1 = vld [vmem:[#allocation7 + $0x370] sm:$0xff]  ;;  %v6738_v8 = vld [vmem:[#allocation7 + $0x398] sm:$0xff]  ;;  %v18319_v40 = vld [vmem:[#allocation93_spill] sm:$0xff] }
 0x7a0   :  { %10049 = vmatprep.subr.bf16.mxu1 %v18083_v61 }
 0x7a2   :  { %7617 = vmatmul.mubr.f32.gmra.mrb[70].mxu1 %v18314_v15 }
 0x7a3   :  { %7621 = vmatprep.mubr.f32.mxu1 %v14234_v30  ;;  %10051 = vmatpush1.bf16.msra.mxu1 %v10050_v17  ;;  %v10059_v30 = vpack.c.bf16 %v6732_v51, %v6731_v62  ;;  %v6735_v17 = vld [vmem:[#allocation7 + $0x380] sm:$0xff]  ;;  %v6740_v62 = vld [vmem:[#allocation7 + $0x3a8] sm:$0xff]  ;;  %v18320_v51 = vld [vmem:[#allocation100_spill] sm:$0xff] }
 0x7a4   :  { %10052 = vmatprep.subr.bf16.mxu1 %v18083_v61 }
 0x7a6   :  { %7622 = vmatmul.mubr.f32.gmra.mrb[72].mxu1 %v18315_v42 }
 0x7a7   :  { %7626 = vmatprep.mubr.f32.mxu1 %v14247_v63  ;;  %10054 = vmatpush1.bf16.msra.mxu1 %v10053_v3  ;;  %v10062_v63 = vpack.c.bf16 %v6734_v29, %v6733_v1  ;;  %v6737_v3 = vld [vmem:[#allocation7 + $0x390] sm:$0xff]  ;;  %v18323_v1 = vld [vmem:[#allocation162_spill] sm:$0xff]  ;;  %v6742_v29 = vld [vmem:[#allocation7 + $0x3b8] sm:$0xff] }
 0x7a8   :  { %10055 = vmatprep.subr.bf16.mxu1 %v18083_v61 }
 0x7aa   :  { %7627 = vmatmul.mubr.f32.gmra.mrb[74].mxu1 %v18316_v10 }
 0x7ab   :  { %7631 = vmatprep.mubr.f32.mxu1 %v14259_v52  ;;  %10057 = vmatpush1.bf16.msra.mxu1 %v10056_v11  ;;  %v10065_v52 = vpack.c.bf16 %v6736_v4, %v6735_v17  ;;  %v6739_v11 = vld [vmem:[#allocation7 + $0x3a0] sm:$0xff]  ;;  %v18324_v17 = vld [vmem:[#allocation138_spill] sm:$0xff] }
 0x7ac   :  { %10058 = vmatprep.subr.bf16.mxu1 %v18083_v61  ;;  %v18326_v4 = vld [vmem:[#allocation150_spill] sm:$0xff] }
 0x7ae   :  { %7632 = vmatmul.mubr.f32.gmra.mrb[76].mxu1 %v18317_v19 }
 0x7af   :  { %7636 = vmatprep.mubr.f32.mxu1 %v14271_v49  ;;  %10060 = vmatpush1.bf16.msra.mxu1 %v10059_v30  ;;  %v10068_v49 = vpack.c.bf16 %v6738_v8, %v6737_v3  ;;  %v18321_v30 = vld [vmem:[#allocation147_spill] sm:$0xff]  ;;  %v18328_v8 = vld [vmem:[#allocation153_spill] sm:$0xff] }
 0x7b0   :  { %10061 = vmatprep.subr.bf16.mxu1 %v18083_v61 }
 0x7b2   :  { %7637 = vmatmul.mubr.f32.gmra.mrb[78].mxu1 %v18318_v22 }
 0x7b3   :  { %7641 = vmatprep.mubr.f32.mxu1 %v18208_v38  ;;  %10063 = vmatpush1.bf16.msra.mxu1 %v10062_v63  ;;  %v10071_v38 = vpack.c.bf16 %v6740_v62, %v6739_v11  ;;  %v18332_v62 = vld [vmem:[#allocation170_spill] sm:$0xff] }
 0x7b4   :  { %10064 = vmatprep.subr.bf16.mxu1 %v18083_v61 }
 0x7b6   :  { %7642 = vmatmul.mubr.f32.gmra.mrb[80].mxu1 %v18319_v40 }
 0x7b7   :  { %7646 = vmatprep.mubr.f32.mxu1 %v18212_v7  ;;  %10066 = vmatpush1.bf16.msra.mxu1 %v10065_v52  ;;  %v18322_v7 = vld [vmem:[#allocation154_spill] sm:$0xff] }
 0x7b8   :  { %10067 = vmatprep.subr.bf16.mxu1 %v18083_v61  ;;  %v6744_v52 = vld [vmem:[#allocation7 + $0x3c8] sm:$0xff] }
 0x7ba   :  { %7647 = vmatmul.mubr.f32.gmra.mrb[82].mxu1 %v18320_v51 }
 0x7bb   :  { %7651 = vmatprep.mubr.f32.mxu1 %v18216_v0  ;;  %10069 = vmatpush1.bf16.msra.mxu1 %v10068_v49  ;;  %v6741_v0 = vld [vmem:[#allocation7 + $0x3b0] sm:$0xff]  ;;  %v6746_v49 = vld [vmem:[#allocation7 + $0x3d8] sm:$0xff] }
 0x7bc   :  { %10070 = vmatprep.subr.bf16.mxu1 %v18083_v61  ;;  %v10074_v63 = vpack.c.bf16 %v6742_v29, %v6741_v0  ;;  %v18336_v29 = vld [vmem:[#allocation137_spill] sm:$0xff] }
 0x7be   :  { %7652 = vmatmul.mubr.f32.gmra.mrb[84].mxu1 %v18321_v30 }
 0x7bf   :  { %7656 = vmatprep.mubr.f32.mxu1 %v18220_v12  ;;  %10072 = vmatpush1.bf16.msra.mxu1 %v10071_v38  ;;  %v18325_v12 = vld [vmem:[#allocation146_spill] sm:$0xff] }
 0x7c0   :  { %10073 = vmatprep.subr.bf16.mxu1 %v18083_v61  ;;  %v6748_v38 = vld [vmem:[#allocation7 + $0x3e8] sm:$0xff] }
 0x7c2   :  { %7657 = vmatmul.mubr.f32.gmra.mrb[86].mxu1 %v18322_v7 }
 0x7c3   :  { %7661 = vmatprep.mubr.f32.mxu1 %v18224_v59  ;;  %10075 = vmatpush1.bf16.msra.mxu1 %v10074_v63  ;;  %v18327_v59 = vld [vmem:[#allocation155_spill] sm:$0xff] }
 0x7c4   :  { %10076 = vmatprep.subr.bf16.mxu1 %v18083_v61  ;;  %v18338_v63 = vld [vmem:[#allocation167_spill] sm:$0xff] }
 0x7c6   :  { %7662 = vmatmul.mubr.f32.gmra.mrb[88].mxu1 %v18323_v1 }
 0x7c7   :  { %7666 = vmatprep.mubr.f32.mxu1 %v18228_v5  ;;  %v6743_v5 = vld [vmem:[#allocation7 + $0x3c0] sm:$0xff] }
 0x7c8   :  { %v10077_v3 = vpack.c.bf16 %v6744_v52, %v6743_v5  ;;  %v18339_v5 = vld [vmem:[#allocation145_spill] sm:$0xff] }
 0x7c9   :  { %v5666_v52 = vrot.slane %v18339_v5, 1 }
 0x7ca   :  { %7667 = vmatmul.mubr.f32.gmra.mrb[90].mxu1 %v18324_v17 }
 0x7cb   :  { %7671 = vmatprep.mubr.f32.mxu1 %v18232_v53  ;;  %10078 = vmatpush1.bf16.msra.mxu1 %v10077_v3  ;;  %v18329_v53 = vld [vmem:[#allocation164_spill] sm:$0xff]  ;;  %v18341_v3 = vld [vmem:[#allocation143_spill] sm:$0xff] }
 0x7cc   :  { %10079 = vmatprep.subr.bf16.mxu1 %v18083_v61 }
 0x7ce   :  { %7672 = vmatmul.mubr.f32.gmra.mrb[92].mxu1 %v18325_v12 }
 0x7cf   :  { %7676 = vmatprep.mubr.f32.mxu1 %v18236_v55  ;;  %v18330_v55 = vld [vmem:[#allocation140_spill] sm:$0xff] }
 0x7d2   :  { %7677 = vmatmul.mubr.f32.gmra.mrb[94].mxu1 %v18326_v4 }
 0x7d3   :  { %7681 = vmatprep.mubr.f32.mxu1 %v18240_v33  ;;  %v18331_v33 = vld [vmem:[#allocation48_spill] sm:$0xff] }
 0x7d6   :  { %7682 = vmatmul.mubr.f32.gmra.mrb[96].mxu1 %v18327_v59 }
 0x7d7   :  { %7686 = vmatprep.mubr.f32.mxu1 %v18243_v57  ;;  %v6745_v57 = vld [vmem:[#allocation7 + $0x3d0] sm:$0xff] }
 0x7d8   :  { %v10080_v11 = vpack.c.bf16 %v6746_v49, %v6745_v57  ;;  %v11046_v57 = vld [vmem:[#allocation2 + $0x190] sm:$0x3] }
 0x7d9   :  { %v5668_v49 = vrot.slane %v11046_v57, 1  ;;  %v18356_v57 = vld [vmem:[#allocation45_spill] sm:$0xff] }
 0x7da   :  { %7687 = vmatmul.mubr.f32.gmra.mrb[98].mxu1 %v18328_v8 }
 0x7db   :  { %7691 = vmatprep.mubr.f32.mxu1 %v18245_v46  ;;  %10081 = vmatpush1.bf16.msra.mxu1 %v10080_v11  ;;  %v18333_v46 = vld [vmem:[#allocation103_spill] sm:$0xff]  ;;  %v15545_v11 = vsel %vm594_vm0, %v5666_v52, %v5668_v49  ;;  %v18358_v49 = vld [vmem:[#allocation168_spill] sm:$0xff] }
 0x7dc   :  { %10082 = vmatprep.subr.bf16.mxu1 %v18083_v61 }
 0x7de   :  { %7692 = vmatmul.mubr.f32.gmra.mrb[100].mxu1 %v18329_v53 }
 0x7df   :  { %7696 = vmatprep.mubr.f32.mxu1 %v18247_v44  ;;  %v18334_v44 = vld [vmem:[#allocation106_spill] sm:$0xff] }
 0x7e2   :  { %7697 = vmatmul.mubr.f32.gmra.mrb[102].mxu1 %v18330_v55 }
 0x7e3   :  { %7701 = vmatprep.mubr.f32.mxu1 %v18249_v6  ;;  %v18335_v6 = vld [vmem:[#allocation132_spill] sm:$0xff] }
 0x7e6   :  { %7702 = vmatmul.mubr.f32.gmra.mrb[104].mxu1 %v18331_v33 }
 0x7e7   :  { %7706 = vmatprep.mubr.f32.mxu1 %v18251_v28  ;;  %v6747_v28 = vld [vmem:[#allocation7 + $0x3e0] sm:$0xff] }
 0x7e8   :  { %v10083_v0 = vpack.c.bf16 %v6748_v38, %v6747_v28  ;;  %v18344_v28 = vld [vmem:[#allocation121_spill] sm:$0xff] }
 0x7e9   :  { %v18345_v38 = vld [vmem:[#allocation125_spill] sm:$0xff] }
 0x7ea   :  { %7707 = vmatmul.mubr.f32.gmra.mrb[106].mxu1 %v18332_v62 }
 0x7eb   :  { %7711 = vmatprep.mubr.f32.mxu1 %v18253_v45  ;;  %10084 = vmatpush1.bf16.msra.mxu1 %v10083_v0  ;;  %v18337_v45 = vld [vmem:[#allocation113_spill] sm:$0xff]  ;;  %v18346_v0 = vld [vmem:[#allocation123_spill] sm:$0xff] }
 0x7ec   :  { %10085 = vmatprep.subr.bf16.mxu1 %v18083_v61  ;;  %v18340_v61 = vld [vmem:[#allocation118_spill] sm:$0xff] }
 0x7ee   :  { %7712 = vmatmul.mubr.f32.gmra.mrb[108].mxu1 %v18333_v46 }
 0x7ef   :  { %7716 = vmatprep.mubr.f32.mxu1 %v18255_v36  ;;  %v6750_v36 = vld [vmem:[#allocation7 + $0x3f8] sm:$0xff] }
 0x7f2   :  { %7717 = vmatmul.mubr.f32.gmra.mrb[110].mxu1 %v18334_v44 }
 0x7f3   :  { %7721 = vmatprep.mubr.f32.mxu1 %v18257_v14 }
 0x7f6   :  { %7722 = vmatmul.mubr.f32.gmra.mrb[112].mxu1 %v18335_v6 }
 0x7f7   :  { %7726 = vmatprep.mubr.f32.mxu1 %v18259_v56  ;;  %v6749_v56 = vld [vmem:[#allocation7 + $0x3f0] sm:$0xff] }
 0x7f8   :  { %v10086_v14 = vpack.c.bf16 %v6750_v36, %v6749_v56  ;;  %v18347_v56 = vld [vmem:[#allocation126_spill] sm:$0xff] }
 0x7f9   :  { %v18348_v36 = vld [vmem:[#allocation158_spill] sm:$0xff] }
 0x7fa   :  { %7727 = vmatmul.mubr.f32.gmra.mrb[114].mxu1 %v18336_v29 }
 0x7fb   :  { %7731 = vmatprep.mubr.f32.mxu1 %v18261_v32  ;;  %v5665_v32 = vrot.slane %v18338_v63, 1  ;;  %10087 = vmatpush1.bf16.msra.mxu1 %v10086_v14  ;;  %v18349_v14 = vld [vmem:[#allocation130_spill] sm:$0xff] }
 0x7fe   :  { %7732 = vmatmul.mubr.f32.gmra.mrb[116].mxu1 %v18337_v45 }
 0x7ff   :  { %7736 = vmatprep.mubr.f32.mxu1 %v18263_v41  ;;  %v18342_v41 = vld [vmem:[#allocation109_spill] sm:$0xff] }
 0x800   :  { %10120 = vmatprep.subr.bf16.mxu1 %v18342_v41 }
 0x802   :  { %7737 = vmatmul.mubr.f32.gmra.mrb[118].mxu1 %v14825_v47 }
 0x803   :  { %7741 = vmatprep.mubr.f32.mxu1 %v18265_v21  ;;  %v15540_v21 = vsel %vm594_vm0, %v5665_v32, %v5666_v52  ;;  %v18350_v32 = vld [vmem:[#allocation160_spill] sm:$0xff]  ;;  %v18352_v52 = vld [vmem:[#allocation161_spill] sm:$0xff] }
 0x806   :  { %7742 = vmatmul.mubr.f32.gmra.mrb[120].mxu1 %v14840_v23 }
 0x807   :  { %7746 = vmatprep.mubr.f32.mxu1 %v18269_v43  ;;  %v18343_v43 = vld [vmem:[#allocation148_spill] sm:$0xff] }
 0x80a   :  { %7747 = vmatmul.mubr.f32.gmra.mrb[122].mxu1 %v18340_v61 }
 0x80b   :  { %7751 = vmatprep.mubr.f32.mxu1 %v18341_v3  ;;  %v18354_v3 = vld [vmem:[#allocation136_spill] sm:$0xff] }
 0x80e   :  { %7752 = vmatmul.mubr.f32.gmra.mrb[124].mxu1 %v15540_v21 }
 0x80f   :  { %7756 = vmatprep.mubr.f32.mxu1 %v18343_v43  ;;  %v18359_v43 = vld [vmem:[#allocation49_spill] sm:$0xff] }
 0x812   :  { %7757 = vmatmul.mubr.f32.gmra.mrb[126].mxu1 %v15545_v11 }
 0x813   :  { %7761 = vmatprep.mubr.f32.mxu1 %v15347_v31  ;;  %v18351_v31 = vld [vmem:[#allocation131_spill] sm:$0xff] }
 0x816   :  { %7762 = vmatmul.mubr.f32.gmra.mrb[128].mxu1 %v18344_v28  ;;  %v18360_v28 = vld [vmem:[#allocation52_spill] sm:$0xff] }
 0x817   :  { %7766 = vmatprep.mubr.f32.mxu1 %v15355_v2  ;;  %v18353_v2 = vld [vmem:[#allocation128_spill] sm:$0xff] }
 0x81a   :  { %7767 = vmatmul.mubr.f32.gmra.mrb[130].mxu1 %v18345_v38  ;;  %v18361_v38 = vld [vmem:[#allocation169_spill] sm:$0xff] }
 0x81b   :  { %7771 = vmatprep.mubr.f32.mxu1 %v18273_v60  ;;  %v18355_v60 = vld [vmem:[#allocation135_spill] sm:$0xff] }
 0x81e   :  { %7772 = vmatmul.mubr.f32.gmra.mrb[132].mxu1 %v18346_v0 }
 0x81f   :  { %7776 = vmatprep.mubr.f32.mxu1 %v18275_v24  ;;  %v18357_v24 = vld [vmem:[#allocation133_spill] sm:$0xff] }
 0x822   :  { %7777 = vmatmul.mubr.f32.gmra.mrb[134].mxu1 %v18347_v56 }
 0x823   :  { %7781 = vmatprep.mubr.f32.mxu1 %v18348_v36  ;;  %v18362_v36 = vld [vmem:[#allocation53_spill] sm:$0xff] }
 0x826   :  { %7782 = vmatmul.mubr.f32.gmra.mrb[136].mxu1 %v18349_v14 }
 0x827   :  { %7786 = vmatprep.mubr.f32.mxu1 %v18350_v32  ;;  %v18363_v32 = vld [vmem:[#allocation56_spill] sm:$0xff] }
 0x82a   :  { %7787 = vmatmul.mubr.f32.gmra.mrb[138].mxu1 %v18351_v31 }
 0x82b   :  { %7791 = vmatprep.mubr.f32.mxu1 %v18352_v52  ;;  %v18364_v52 = vld [vmem:[#allocation122_spill] sm:$0xff] }
 0x82e   :  { %7792 = vmatmul.mubr.f32.gmra.mrb[140].mxu1 %v18353_v2 }
 0x82f   :  { %7796 = vmatprep.mubr.f32.mxu1 %v18354_v3  ;;  %v18365_v3 = vld [vmem:[#allocation174_spill] sm:$0xff] }
 0x832   :  { %7797 = vmatmul.mubr.f32.gmra.mrb[142].mxu1 %v18355_v60 }
 0x833   :  { %7801 = vmatprep.mubr.f32.mxu1 %v18356_v57  ;;  %v18367_v57 = vld [vmem:[#allocation176_spill] sm:$0xff] }
 0x836   :  { %7802 = vmatmul.mubr.f32.gmra.mrb[144].mxu1 %v18357_v24 }
 0x837   :  { %7806 = vmatprep.mubr.f32.mxu1 %v18358_v49  ;;  %v18376_v49 = vld [vmem:[#allocation120_spill] sm:$0xff] }
 0x83a   :  { %7807 = vmatmul.mubr.f32.gmra.mrb[146].mxu1 %v18359_v43 }
 0x83b   :  { %7811 = vmatprep.mubr.f32.mxu1 %v18289_v58  ;;  %v18366_v58 = vld [vmem:[#allocation175_spill] sm:$0xff] }
 0x83e   :  { %7812 = vmatmul.mubr.f32.gmra.mrb[148].mxu1 %v18360_v28 }
 0x83f   :  { %7816 = vmatprep.mubr.f32.mxu1 %v18361_v38  ;;  %v18378_v38 = vld [vmem:[#allocation102_spill] sm:$0xff] }
 0x842   :  { %7817 = vmatmul.mubr.f32.gmra.mrb[150].mxu1 %v18362_v36 }
 0x843   :  { %7821 = vmatprep.mubr.f32.mxu1 %v18293_v9  ;;  %v18368_v9 = vld [vmem:[#allocation177_spill] sm:$0xff] }
 0x846   :  { %7822 = vmatmul.mubr.f32.gmra.mrb[152].mxu1 %v18363_v32 }
 0x847   :  { %7826 = vmatprep.mubr.f32.mxu1 %v18295_v37  ;;  %v18369_v37 = vld [vmem:[#allocation178_spill] sm:$0xff] }
 0x84a   :  { %7827 = vmatmul.mubr.f32.gmra.mrb[154].mxu1 %v18364_v52 }
 0x84b   :  { %7831 = vmatprep.mubr.f32.mxu1 %v18296_v26  ;;  %v18370_v26 = vld [vmem:[#allocation179_spill] sm:$0xff] }
 0x84e   :  { %7832 = vmatmul.mubr.f32.gmra.mrb[156].mxu1 %v18365_v3 }
 0x84f   :  { %7836 = vmatprep.mubr.f32.mxu1 %v18297_v25  ;;  %v18371_v25 = vld [vmem:[#allocation180_spill] sm:$0xff] }
 0x852   :  { %7837 = vmatmul.mubr.f32.gmra.mrb[158].mxu1 %v18366_v58 }
 0x853   :  { %7841 = vmatprep.mubr.f32.mxu1 %v18298_v18  ;;  %v18372_v18 = vld [vmem:[#allocation181_spill] sm:$0xff] }
 0x856   :  { %7842 = vmatmul.mubr.f32.gmra.mrb[160].mxu1 %v18367_v57 }
 0x857   :  { %7846 = vmatprep.mubr.f32.mxu1 %v18299_v50  ;;  %v18373_v50 = vld [vmem:[#allocation183_spill] sm:$0xff] }
 0x85a   :  { %7847 = vmatmul.mubr.f32.gmra.mrb[162].mxu1 %v18368_v9 }
 0x85b   :  { %7851 = vmatprep.mubr.f32.mxu1 %v18300_v54  ;;  %v18374_v54 = vld [vmem:[#allocation186_spill] sm:$0xff] }
 0x85e   :  { %7852 = vmatmul.mubr.f32.gmra.mrb[164].mxu1 %v18369_v37 }
 0x85f   :  { %7856 = vmatprep.mubr.f32.mxu1 %v18301_v16  ;;  %v18375_v16 = vld [vmem:[#allocation189_spill] sm:$0xff] }
 0x862   :  { %7857 = vmatmul.mubr.f32.gmra.mrb[166].mxu1 %v18370_v26 }
 0x863   :  { %7861 = vmatprep.mubr.f32.mxu1 %v18302_v48  ;;  %v18377_v48 = vld [vmem:[#allocation192_spill] sm:$0xff] }
 0x866   :  { %7862 = vmatmul.mubr.f32.gmra.mrb[168].mxu1 %v18371_v25  ;;  %v18385_v25 = vld [vmem:[#allocation129_spill] sm:$0xff] }
 0x867   :  { %7866 = vmatprep.mubr.f32.mxu1 %v18303_v34  ;;  %v18379_v34 = vld [vmem:[#allocation195_spill] sm:$0xff] }
 0x86a   :  { %7867 = vmatmul.mubr.f32.gmra.mrb[170].mxu1 %v18372_v18  ;;  %v18380_v18 = vld [vmem:[#allocation104_spill] sm:$0xff] }
 0x86b   :  { %7871 = vmatprep.mubr.f32.mxu1 %v18304_v39  ;;  %v18381_v39 = vld [vmem:[#allocation198_spill] sm:$0xff] }
 0x86e   :  { %7872 = vmatmul.mubr.f32.gmra.mrb[172].mxu1 %v18373_v50  ;;  %v18382_v50 = vld [vmem:[#allocation108_spill] sm:$0xff] }
 0x86f   :  { %7876 = vmatprep.mubr.f32.mxu1 %v14822_v35  ;;  %v18383_v35 = vld [vmem:[#allocation201_spill] sm:$0xff] }
 0x872   :  { %7877 = vmatmul.mubr.f32.gmra.mrb[174].mxu1 %v18374_v54  ;;  %v18384_v54 = vld [vmem:[#allocation105_spill] sm:$0xff] }
 0x873   :  { %7881 = vmatprep.mubr.f32.mxu1 %v14832_v13  ;;  %v5748_v13 = vrot.slane %v18384_v54, 2 }
 0x876   :  { %7882 = vmatmul.mubr.f32.gmra.mrb[176].mxu1 %v18375_v16  ;;  %v5749_v16 = vrot.slane %v18385_v25, 2 }
 0x877   :  { %7886 = vmatprep.mubr.f32.mxu1 %v18376_v49  ;;  %v4855_v49 = vld [vmem:[#allocation2 + $0x340] sm:$0x3] }
 0x87a   :  { %7887 = vmatmul.mubr.f32.gmra.mrb[178].mxu1 %v18377_v48  ;;  %v5670_v48 = vrot.slane %v18384_v54, 1 }
 0x87b   :  { %7891 = vmatprep.mubr.f32.mxu1 %v18378_v38  ;;  %v5671_v38 = vrot.slane %v18385_v25, 1 }
 0x87e   :  { %7892 = vmatmul.mubr.f32.gmra.mrb[180].mxu1 %v18379_v34  ;;  %v18386_v34 = vld [vmem:[#allocation204_spill] sm:$0xff] }
 0x87f   :  { %7896 = vmatprep.mubr.f32.mxu1 %v18380_v18  ;;  %v15613_v18 = vsel %vm883_vm2, %v5748_v13, %v5749_v16  ;;  %v18387_v13 = vld [vmem:[#allocation212_spill] sm:$0xff] }
 0x882   :  { %7897 = vmatmul.mubr.f32.gmra.mrb[182].mxu1 %v18381_v39  ;;  %v5751_v39 = vrot.slane %v4855_v49, 2 }
 0x883   :  { %7901 = vmatprep.mubr.f32.mxu1 %v18382_v50  ;;  %v15617_v50 = vsel %vm594_vm0, %v5670_v48, %v5671_v38  ;;  %v18388_v48 = vld [vmem:[#allocation110_spill] sm:$0xff] }
 0x886   :  { %7902 = vmatmul.mubr.f32.gmra.mrb[184].mxu1 %v18383_v35  ;;  %v5673_v35 = vrot.slane %v4855_v49, 1  ;;  %v18389_v49 = vld [vmem:[#allocation215_spill] sm:$0xff] }
 0x887   :  { %7906 = vmatprep.mubr.f32.mxu1 %v15457_v27  ;;  %v15621_v27 = vsel %vm883_vm2, %v5749_v16, %v5751_v39  ;;  %v18390_v16 = vld [vmem:[#allocation112_spill] sm:$0xff]  ;;  %v18396_v39 = vld [vmem:[#allocation119_spill] sm:$0xff] }
 0x888   :  { %v15625_v25 = vsel %vm594_vm0, %v5671_v38, %v5673_v35  ;;  %v18391_v38 = vld [vmem:[#allocation218_spill] sm:$0xff]  ;;  %v18398_v35 = vld [vmem:[#allocation124_spill] sm:$0xff] }
 0x88a   :  { %7907 = vmatmul.mubr.f32.gmra.mrb[186].mxu1 %v18386_v34 }
 0x88b   :  { %7911 = vmatprep.mubr.f32.mxu1 %v15613_v18 }
 0x88e   :  { %7912 = vmatmul.mubr.f32.gmra.mrb[188].mxu1 %v15617_v50 }
 0x88f   :  { %7916 = vmatprep.mubr.f32.mxu1 %v15621_v27 }
 0x892   :  { %7917 = vmatmul.mubr.f32.gmra.mrb[190].mxu1 %v15625_v25 }
 0x893   :  { %7986 = vmatprep.mubr.f32.mxu1 %v18313_v20  ;;  %v18392_v20 = vld [vmem:[#allocation114_spill] sm:$0xff] }
 0x896   :  { %7987 = vmatmul.mubr.f32.vlgmr.msra.gmra.mrb[64].mxu1 %v18387_v13  ;;  %v18400_v13 = vld [vmem:[#allocation127_spill] sm:$0xff] }
 0x897   :  { %7991 = vmatprep.mubr.f32.mxu1 %v18314_v15  ;;  %10128 = vmatpush3.bf16.msra.mxu1 %v18342_v41  ;;  %v18393_v15 = vld [vmem:[#allocation221_spill] sm:$0xff] }
 0x898   :  { %10121 = vmatprep.subr.bf16.mxu1 %v18388_v48  ;;  %v18394_v41 = vld [vmem:[#allocation117_spill] sm:$0xff] }
 0x89a   :  { %7992 = vmatmul.mubr.f32.gmra.mrb[66].mxu1 %v18389_v49  ;;  %v18404_v49 = vld [vmem:[#allocation240_spill] sm:$0xff] }
 0x89b   :  { %7996 = vmatprep.mubr.f32.mxu1 %v18315_v42  ;;  %10129 = vmatpush3.bf16.msra.mxu1 %v18388_v48  ;;  %v18395_v42 = vld [vmem:[#allocation224_spill] sm:$0xff] }
 0x89c   :  { %10122 = vmatprep.subr.bf16.mxu1 %v18390_v16  ;;  %v18402_v48 = vld [vmem:[#allocation236_spill] sm:$0xff] }
 0x89e   :  { %7997 = vmatmul.mubr.f32.gmra.mrb[68].mxu1 %v18391_v38 }
 0x89f   :  { %8001 = vmatprep.mubr.f32.mxu1 %v18316_v10  ;;  %10130 = vmatpush3.bf16.msra.mxu1 %v18390_v16  ;;  %v18397_v10 = vld [vmem:[#allocation226_spill] sm:$0xff]  ;;  %v18406_v16 = vld [vmem:[#allocation244_spill] sm:$0xff] }
 0x8a0   :  { %10123 = vmatprep.subr.bf16.mxu1 %v18392_v20 }
 0x8a2   :  { %8002 = vmatmul.mubr.f32.gmra.mrb[70].mxu1 %v18393_v15  ;;  %v18438_v15 = vld [vmem:[#allocation181_spill] sm:$0xff] }
 0x8a3   :  { %8006 = vmatprep.mubr.f32.mxu1 %v18317_v19  ;;  %10131 = vmatpush3.bf16.msra.mxu1 %v18392_v20  ;;  %v18399_v19 = vld [vmem:[#allocation230_spill] sm:$0xff]  ;;  %v18437_v20 = vld [vmem:[#allocation180_spill] sm:$0xff] }
 0x8a4   :  { %10124 = vmatprep.subr.bf16.mxu1 %v18394_v41 }
 0x8a6   :  { %8007 = vmatmul.mubr.f32.gmra.mrb[72].mxu1 %v18395_v42  ;;  %v18440_v42 = vld [vmem:[#allocation186_spill] sm:$0xff] }
 0x8a7   :  { %8011 = vmatprep.mubr.f32.mxu1 %v18318_v22  ;;  %10132 = vmatpush3.bf16.msra.mxu1 %v18394_v41  ;;  %v18401_v22 = vld [vmem:[#allocation233_spill] sm:$0xff]  ;;  %v18439_v41 = vld [vmem:[#allocation183_spill] sm:$0xff] }
 0x8a8   :  { %10125 = vmatprep.subr.bf16.mxu1 %v18396_v39 }
 0x8aa   :  { %8012 = vmatmul.mubr.f32.gmra.mrb[74].mxu1 %v18397_v10 }
 0x8ab   :  { %8016 = vmatprep.mubr.f32.mxu1 %v18319_v40  ;;  %10133 = vmatpush3.bf16.msra.mxu1 %v18396_v39  ;;  %v18403_v40 = vld [vmem:[#allocation238_spill] sm:$0xff]  ;;  %v18441_v39 = vld [vmem:[#allocation184_spill] sm:$0xff] }
 0x8ac   :  { %10126 = vmatprep.subr.bf16.mxu1 %v18398_v35 }
 0x8ae   :  { %8017 = vmatmul.mubr.f32.gmra.mrb[76].mxu1 %v18399_v19  ;;  %v18442_v19 = vld [vmem:[#allocation189_spill] sm:$0xff] }
 0x8af   :  { %8021 = vmatprep.mubr.f32.mxu1 %v18320_v51  ;;  %10134 = vmatpush3.bf16.msra.mxu1 %v18398_v35  ;;  %v18405_v51 = vld [vmem:[#allocation242_spill] sm:$0xff]  ;;  %v11055_v35 = vld [vmem:[#allocation2 + $0x2d8] sm:$0xff] }
 0x8b0   :  { %10127 = vmatprep.subr.bf16.mxu1 %v18400_v13 }
 0x8b2   :  { %8022 = vmatmul.mubr.f32.gmra.mrb[78].mxu1 %v18401_v22  ;;  %v18443_v22 = vld [vmem:[#allocation182_spill] sm:$0xff] }
 0x8b3   :  { %8026 = vmatprep.mubr.f32.mxu1 %v18321_v30  ;;  %10135 = vmatpush3.bf16.msra.mxu1 %v18400_v13  ;;  %v18407_v30 = vld [vmem:[#allocation246_spill] sm:$0xff] }
 0x8b6   :  { %8027 = vmatmul.mubr.f32.gmra.mrb[80].mxu1 %v18402_v48 }
 0x8b7   :  { %8031 = vmatprep.mubr.f32.mxu1 %v18322_v7  ;;  %v18408_v7 = vld [vmem:[#allocation248_spill] sm:$0xff] }
 0x8ba   :  { %8032 = vmatmul.mubr.f32.gmra.mrb[82].mxu1 %v18403_v40 }
 0x8bb   :  { %8036 = vmatprep.mubr.f32.mxu1 %v18323_v1  ;;  %v18409_v1 = vld [vmem:[#allocation250_spill] sm:$0xff] }
 0x8be   :  { %8037 = vmatmul.mubr.f32.gmra.mrb[84].mxu1 %v18404_v49  ;;  %v11056_v49 = vld [vmem:[#allocation2 + $0x2e8] sm:$0xff] }
 0x8bf   :  { %8041 = vmatprep.mubr.f32.mxu1 %v18324_v17  ;;  %v18410_v17 = vld [vmem:[#allocation252_spill] sm:$0xff] }
 0x8c2   :  { %8042 = vmatmul.mubr.f32.gmra.mrb[86].mxu1 %v18405_v51  ;;  %v18444_v51 = vld [vmem:[#allocation192_spill] sm:$0xff] }
 0x8c3   :  { %8046 = vmatprep.mubr.f32.mxu1 %v18325_v12  ;;  %v18411_v12 = vld [vmem:[#allocation254_spill] sm:$0xff] }
 0x8c6   :  { %8047 = vmatmul.mubr.f32.gmra.mrb[88].mxu1 %v18406_v16 }
 0x8c7   :  { %8051 = vmatprep.mubr.f32.mxu1 %v18326_v4  ;;  %v18412_v4 = vld [vmem:[#allocation92_spill] sm:$0xff] }
 0x8ca   :  { %8052 = vmatmul.mubr.f32.gmra.mrb[90].mxu1 %v18407_v30  ;;  %v18445_v30 = vld [vmem:[#allocation187_spill] sm:$0xff] }
 0x8cb   :  { %8056 = vmatprep.mubr.f32.mxu1 %v18327_v59  ;;  %v18413_v59 = vld [vmem:[#allocation96_spill] sm:$0xff] }
 0x8ce   :  { %8057 = vmatmul.mubr.f32.gmra.mrb[92].mxu1 %v18408_v7 }
 0x8cf   :  { %8061 = vmatprep.mubr.f32.mxu1 %v18328_v8  ;;  %v18414_v8 = vld [vmem:[#allocation97_spill] sm:$0xff] }
 0x8d2   :  { %8062 = vmatmul.mubr.f32.gmra.mrb[94].mxu1 %v18409_v1 }
 0x8d3   :  { %8066 = vmatprep.mubr.f32.mxu1 %v18329_v53  ;;  %v18415_v53 = vld [vmem:[#allocation101_spill] sm:$0xff] }
 0x8d6   :  { %8067 = vmatmul.mubr.f32.gmra.mrb[96].mxu1 %v18410_v17  ;;  %v11057_v17 = vld [vmem:[#allocation2 + $0x2f0] sm:$0xff] }
 0x8d7   :  { %8071 = vmatprep.mubr.f32.mxu1 %v18330_v55  ;;  %v18416_v55 = vld [vmem:[#allocation144_spill] sm:$0xff] }
 0x8da   :  { %8072 = vmatmul.mubr.f32.gmra.mrb[98].mxu1 %v18411_v12  ;;  %v18446_v12 = vld [vmem:[#allocation195_spill] sm:$0xff] }
 0x8db   :  { %8076 = vmatprep.mubr.f32.mxu1 %v18331_v33  ;;  %v18417_v33 = vld [vmem:[#allocation149_spill] sm:$0xff] }
 0x8de   :  { %8077 = vmatmul.mubr.f32.gmra.mrb[100].mxu1 %v18412_v4 }
 0x8df   :  { %8081 = vmatprep.mubr.f32.mxu1 %v18332_v62  ;;  %v18418_v62 = vld [vmem:[#allocation152_spill] sm:$0xff] }
 0x8e2   :  { %8082 = vmatmul.mubr.f32.gmra.mrb[102].mxu1 %v18413_v59  ;;  %v18447_v59 = vld [vmem:[#allocation185_spill] sm:$0xff] }
 0x8e3   :  { %8086 = vmatprep.mubr.f32.mxu1 %v18333_v46  ;;  %v18419_v46 = vld [vmem:[#allocation157_spill] sm:$0xff] }
 0x8e6   :  { %8087 = vmatmul.mubr.f32.gmra.mrb[104].mxu1 %v18414_v8 }
 0x8e7   :  { %8091 = vmatprep.mubr.f32.mxu1 %v18334_v44  ;;  %v18420_v44 = vld [vmem:[#allocation159_spill] sm:$0xff] }
 0x8ea   :  { %8092 = vmatmul.mubr.f32.gmra.mrb[106].mxu1 %v18415_v53 }
 0x8eb   :  { %8096 = vmatprep.mubr.f32.mxu1 %v18335_v6  ;;  %v18421_v6 = vld [vmem:[#allocation165_spill] sm:$0xff] }
 0x8ee   :  { %8097 = vmatmul.mubr.f32.gmra.mrb[108].mxu1 %v18416_v55  ;;  %v11058_v55 = vld [vmem:[#allocation2 + $0x300] sm:$0xff] }
 0x8ef   :  { %8101 = vmatprep.mubr.f32.mxu1 %v18336_v29  ;;  %v18422_v29 = vld [vmem:[#allocation255_spill] sm:$0xff] }
 0x8f0   :  { %v15701_v38 = vrot.slane %v18422_v29, 1 }
 0x8f2   :  { %8102 = vmatmul.mubr.f32.gmra.mrb[110].mxu1 %v18417_v33  ;;  %v18448_v33 = vld [vmem:[#allocation198_spill] sm:$0xff] }
 0x8f3   :  { %8106 = vmatprep.mubr.f32.mxu1 %v18337_v45 }
 0x8f6   :  { %8107 = vmatmul.mubr.f32.gmra.mrb[112].mxu1 %v18418_v62 }
 0x8f7   :  { %8111 = vmatprep.mubr.f32.mxu1 %v14825_v47  ;;  %v11047_v47 = vld [vmem:[#allocation2 + $0x1a8] sm:$0x3] }
 0x8f8   :  { %v5894_v45 = vrot.slane %v11047_v47, 1  ;;  %v11059_v47 = vld [vmem:[#allocation2 + $0x308] sm:$0xff] }
 0x8fa   :  { %8112 = vmatmul.mubr.f32.gmra.mrb[114].mxu1 %v18419_v46  ;;  %v18449_v46 = vld [vmem:[#allocation190_spill] sm:$0xff] }
 0x8fb   :  { %8116 = vmatprep.mubr.f32.mxu1 %v14840_v23  ;;  %v5895_v23 = vsel %vm594_vm0, %v15701_v38, %v5894_v45  ;;  %v18450_v45 = vld [vmem:[#allocation201_spill] sm:$0xff] }
 0x8fe   :  { %8117 = vmatmul.mubr.f32.gmra.mrb[116].mxu1 %v18420_v44 }
 0x8ff   :  { %8121 = vmatprep.mubr.f32.mxu1 %v18340_v61  ;;  %v18423_v61 = vld [vmem:[#allocation141_spill] sm:$0xff] }
 0x902   :  { %8122 = vmatmul.mubr.f32.gmra.mrb[118].mxu1 %v18421_v6 }
 0x903   :  { %8126 = vmatprep.mubr.f32.mxu1 %v15540_v21  ;;  %v18426_v21 = vld [vmem:[#allocation151_spill] sm:$0xff] }
 0x906   :  { %8127 = vmatmul.mubr.f32.gmra.mrb[120].mxu1 %v18338_v63  ;;  %v18424_v63 = vld [vmem:[#allocation257_spill] sm:$0xff] }
 0x907   :  { %8131 = vmatprep.mubr.f32.mxu1 %v15545_v11  ;;  %v18427_v11 = vld [vmem:[#allocation156_spill] sm:$0xff] }
 0x90a   :  { %8132 = vmatmul.mubr.f32.gmra.mrb[122].mxu1 %v18339_v5  ;;  %v18425_v5 = vld [vmem:[#allocation258_spill] sm:$0xff] }
 0x90b   :  { %8136 = vmatprep.mubr.f32.mxu1 %v15701_v38 }
 0x90e   :  { %8137 = vmatmul.mubr.f32.gmra.mrb[124].mxu1 %v18422_v29 }
 0x90f   :  { %8141 = vmatprep.mubr.f32.mxu1 %v5895_v23 }
 0x912   :  { %8142 = vmatmul.mubr.f32.gmra.mrb[126].mxu1 %v18422_v29 }
 0x913   :  { %8146 = vmatprep.mubr.f32.mxu1 %v18346_v0  ;;  %v18428_v0 = vld [vmem:[#allocation259_spill] sm:$0xff] }
 0x916   :  { %8147 = vmatmul.mubr.f32.gmra.mrb[128].mxu1 %v18423_v61  ;;  %v18451_v61 = vld [vmem:[#allocation188_spill] sm:$0xff] }
 0x917   :  { %8151 = vmatprep.mubr.f32.mxu1 %v18347_v56  ;;  %v18429_v56 = vld [vmem:[#allocation260_spill] sm:$0xff] }
 0x91a   :  { %8152 = vmatmul.mubr.f32.gmra.mrb[130].mxu1 %v18424_v63 }
 0x91b   :  { %8156 = vmatprep.mubr.f32.mxu1 %v18349_v14  ;;  %v18430_v14 = vld [vmem:[#allocation261_spill] sm:$0xff] }
 0x91e   :  { %8157 = vmatmul.mubr.f32.gmra.mrb[132].mxu1 %v18425_v5 }
 0x91f   :  { %8161 = vmatprep.mubr.f32.mxu1 %v18351_v31  ;;  %v18431_v31 = vld [vmem:[#allocation262_spill] sm:$0xff] }
 0x922   :  { %8162 = vmatmul.mubr.f32.gmra.mrb[134].mxu1 %v18426_v21  ;;  %v11060_v21 = vld [vmem:[#allocation2 + $0x318] sm:$0xff] }
 0x923   :  { %8166 = vmatprep.mubr.f32.mxu1 %v18353_v2  ;;  %v18432_v2 = vld [vmem:[#allocation263_spill] sm:$0xff] }
 0x926   :  { %8167 = vmatmul.mubr.f32.gmra.mrb[136].mxu1 %v18427_v11 }
 0x927   :  { %8171 = vmatprep.mubr.f32.mxu1 %v18355_v60  ;;  %v18433_v60 = vld [vmem:[#allocation264_spill] sm:$0xff] }
 0x92a   :  { %8172 = vmatmul.mubr.f32.gmra.mrb[138].mxu1 %v18428_v0  ;;  %v18452_v0 = vld [vmem:[#allocation193_spill] sm:$0xff] }
 0x92b   :  { %8176 = vmatprep.mubr.f32.mxu1 %v18357_v24  ;;  %v18434_v24 = vld [vmem:[#allocation107_spill] sm:$0xff] }
 0x92e   :  { %8177 = vmatmul.mubr.f32.gmra.mrb[140].mxu1 %v18429_v56 }
 0x92f   :  { %8181 = vmatprep.mubr.f32.mxu1 %v18359_v43  ;;  %v18435_v43 = vld [vmem:[#allocation265_spill] sm:$0xff] }
 0x932   :  { %8182 = vmatmul.mubr.f32.gmra.mrb[142].mxu1 %v18430_v14 }
 0x933   :  { %8186 = vmatprep.mubr.f32.mxu1 %v18360_v28  ;;  %v18436_v28 = vld [vmem:[#allocation171_spill] sm:$0xff] }
 0x936   :  { %8187 = vmatmul.mubr.f32.gmra.mrb[144].mxu1 %v18431_v31  ;;  %v11061_v31 = vld [vmem:[#allocation2 + $0x320] sm:$0xff] }
 0x937   :  { %8191 = vmatprep.mubr.f32.mxu1 %v18362_v36  ;;  %v11048_v36 = vld [vmem:[#allocation2 + $0x288] sm:$0xff] }
 0x93a   :  { %8192 = vmatmul.mubr.f32.gmra.mrb[146].mxu1 %v18432_v2 }
 0x93b   :  { %8196 = vmatprep.mubr.f32.mxu1 %v18363_v32  ;;  %v11049_v32 = vld [vmem:[#allocation2 + $0x290] sm:$0xff] }
 0x93e   :  { %8197 = vmatmul.mubr.f32.gmra.mrb[148].mxu1 %v18433_v60  ;;  %v4858_v60 = vld [vmem:[#allocation2 + $0x358] sm:$0x3] }
 0x93f   :  { %8201 = vmatprep.mubr.f32.mxu1 %v18364_v52  ;;  %v11050_v52 = vld [vmem:[#allocation2 + $0x2a0] sm:$0xff] }
 0x942   :  { %8202 = vmatmul.mubr.f32.gmra.mrb[150].mxu1 %v18434_v24  ;;  %v18453_v24 = vld [vmem:[#allocation191_spill] sm:$0xff] }
 0x943   :  { %8206 = vmatprep.mubr.f32.mxu1 %v18365_v3  ;;  %v11051_v3 = vld [vmem:[#allocation2 + $0x2a8] sm:$0xff] }
 0x946   :  { %8207 = vmatmul.mubr.f32.gmra.mrb[152].mxu1 %v18435_v43 }
 0x947   :  { %8211 = vmatprep.mubr.f32.mxu1 %v18366_v58  ;;  %v11052_v58 = vld [vmem:[#allocation2 + $0x2b8] sm:$0xff] }
 0x94a   :  { %8212 = vmatmul.mubr.f32.gmra.mrb[154].mxu1 %v18436_v28 }
 0x94b   :  { %8216 = vmatprep.mubr.f32.mxu1 %v18367_v57  ;;  %v11053_v57 = vld [vmem:[#allocation2 + $0x2c0] sm:$0xff] }
 0x94e   :  { %8217 = vmatmul.mubr.f32.gmra.mrb[156].mxu1 %v11048_v36 }
 0x94f   :  { %8221 = vmatprep.mubr.f32.mxu1 %v18368_v9  ;;  %v11054_v9 = vld [vmem:[#allocation2 + $0x2d0] sm:$0xff] }
 0x952   :  { %8222 = vmatmul.mubr.f32.gmra.mrb[158].mxu1 %v11049_v32  ;;  %v18454_v32 = vld [vmem:[#allocation196_spill] sm:$0xff] }
 0x953   :  { %8226 = vmatprep.mubr.f32.mxu1 %v18369_v37 }
 0x956   :  { %8227 = vmatmul.mubr.f32.gmra.mrb[160].mxu1 %v11050_v52 }
 0x957   :  { %8231 = vmatprep.mubr.f32.mxu1 %v18370_v26 }
 0x95a   :  { %8232 = vmatmul.mubr.f32.gmra.mrb[162].mxu1 %v11051_v3 }
 0x95b   :  { %8236 = vmatprep.mubr.f32.mxu1 %v18437_v20  ;;  %v18455_v20 = vld [vmem:[#allocation129_spill] sm:$0xff] }
 0x95e   :  { %8237 = vmatmul.mubr.f32.gmra.mrb[164].mxu1 %v11052_v58 }
 0x95f   :  { %8241 = vmatprep.mubr.f32.mxu1 %v18438_v15  ;;  %v18456_v15 = vld [vmem:[#allocation194_spill] sm:$0xff] }
 0x962   :  { %8242 = vmatmul.mubr.f32.gmra.mrb[166].mxu1 %v11053_v57 }
 0x963   :  { %8246 = vmatprep.mubr.f32.mxu1 %v18439_v41  ;;  %v18457_v41 = vld [vmem:[#allocation199_spill] sm:$0xff] }
 0x966   :  { %8247 = vmatmul.mubr.f32.gmra.mrb[168].mxu1 %v11054_v9 }
 0x967   :  { %8251 = vmatprep.mubr.f32.mxu1 %v18440_v42 }
 0x969   :  { %v7988_v37 = vpop.f32.mrb[64].mxu1 }
 0x96a   :  { %v15748_v10 = vadd.f32 %v18441_v39, %v7988_v37  ;;  %v7990_v26 = vpop.f32.mrb[65].mxu1  ;;  %8252 = vmatmul.mubr.f32.gmra.mrb[170].mxu1 %v11055_v35  ;;  %v18458_v37 = vld [vmem:[#allocation102_spill] sm:$0xff] }
 0x96b   :  { %8256 = vmatprep.mubr.f32.mxu1 %v18442_v19  ;;  %v18459_v26 = vld [vmem:[#allocation197_spill] sm:$0xff]  ;;  %v18460_v19 = vld [vmem:[#allocation104_spill] sm:$0xff] }
 0x96d   :  { %v7993_v13 = vpop.f32.mrb[66].mxu1 }
 0x96e   :  { %v15752_v48 = vadd.f32 %v18443_v22, %v7993_v13  ;;  %v7995_v40 = vpop.f32.mrb[67].mxu1  ;;  %8257 = vmatmul.mubr.f32.gmra.mrb[172].mxu1 %v11056_v49  ;;  %v18461_v13 = vld [vmem:[#allocation108_spill] sm:$0xff] }
 0x96f   :  { %8261 = vmatprep.mubr.f32.mxu1 %v18444_v51  ;;  %v18462_v40 = vld [vmem:[#allocation202_spill] sm:$0xff] }
 0x971   :  { %v7998_v16 = vpop.f32.mrb[68].mxu1 }
 0x972   :  { %v15756_v7 = vadd.f32 %v18445_v30, %v7998_v16  ;;  %v8000_v1 = vpop.f32.mrb[69].mxu1  ;;  %8262 = vmatmul.mubr.f32.gmra.mrb[174].mxu1 %v11057_v17  ;;  %v18463_v16 = vld [vmem:[#allocation134_spill] sm:$0xff] }
 0x973   :  { %8266 = vmatprep.mubr.f32.mxu1 %v18446_v12  ;;  %v18464_v1 = vld [vmem:[#allocation200_spill] sm:$0xff] }
 0x975   :  { %v8003_v4 = vpop.f32.mrb[70].mxu1 }
 0x976   :  { %v15760_v8 = vadd.f32 %v18447_v59, %v8003_v4  ;;  %v8005_v53 = vpop.f32.mrb[71].mxu1  ;;  %8267 = vmatmul.mubr.f32.gmra.mrb[176].mxu1 %v11058_v55  ;;  %v18465_v4 = vld [vmem:[#allocation256_spill] sm:$0xff]  ;;  %v18466_v55 = vld [vmem:[#allocation205_spill] sm:$0xff] }
 0x977   :  { %8271 = vmatprep.mubr.f32.mxu1 %v18448_v33 }
 0x979   :  { %v8008_v62 = vpop.f32.mrb[72].mxu1 }
 0x97a   :  { %v15764_v44 = vadd.f32 %v18449_v46, %v8008_v62  ;;  %v8010_v6 = vpop.f32.mrb[73].mxu1  ;;  %8272 = vmatmul.mubr.f32.gmra.mrb[178].mxu1 %v11059_v47  ;;  %v18467_v46 = vld [vmem:[#allocation203_spill] sm:$0xff] }
 0x97b   :  { %8276 = vmatprep.mubr.f32.mxu1 %v18450_v45 }
 0x97d   :  { %v8013_v23 = vpop.f32.mrb[74].mxu1 }
 0x97e   :  { %v15768_v63 = vadd.f32 %v18451_v61, %v8013_v23  ;;  %v8015_v5 = vpop.f32.mrb[75].mxu1  ;;  %8277 = vmatmul.mubr.f32.gmra.mrb[180].mxu1 %v11060_v21  ;;  %v18468_v23 = vld [vmem:[#allocation207_spill] sm:$0xff]  ;;  %v18469_v21 = vld [vmem:[#allocation206_spill] sm:$0xff] }
 0x97f   :  { %8281 = vmatprep.mubr.f32.mxu1 %v18386_v34  ;;  %v5899_v34 = vrot.slane %v4858_v60, 1 }
 0x981   :  { %v8018_v11 = vpop.f32.mrb[76].mxu1 }
 0x982   :  { %v15772_v56 = vadd.f32 %v18452_v0, %v8018_v11  ;;  %v8020_v14 = vpop.f32.mrb[77].mxu1  ;;  %8282 = vmatmul.mubr.f32.gmra.mrb[182].mxu1 %v11061_v31  ;;  %v18470_v31 = vld [vmem:[#allocation209_spill] sm:$0xff] }
 0x983   :  { %8286 = vmatprep.mubr.f32.mxu1 %v15617_v50  ;;  %v5900_v50 = vsel %vm594_vm0, %v15701_v38, %v5899_v34 }
 0x985   :  { %v8023_v2 = vpop.f32.mrb[78].mxu1 }
 0x986   :  { %v15776_v43 = vadd.f32 %v18453_v24, %v8023_v2  ;;  %v8025_v28 = vpop.f32.mrb[79].mxu1  ;;  %8287 = vmatmul.mubr.f32.gmra.mrb[184].mxu1 %v18384_v54 }
 0x987   :  { %8291 = vmatprep.mubr.f32.mxu1 %v15625_v25  ;;  %v18471_v28 = vld [vmem:[#allocation208_spill] sm:$0xff] }
 0x989   :  { %v8028_v36 = vpop.f32.mrb[80].mxu1 }
 0x98a   :  { %v15781_v52 = vadd.f32 %v18454_v32, %v8028_v36  ;;  %v8030_v3 = vpop.f32.mrb[81].mxu1  ;;  %8292 = vmatmul.mubr.f32.gmra.mrb[186].mxu1 %v18455_v20 }
 0x98b   :  { %8296 = vmatprep.mubr.f32.mxu1 %v15701_v38  ;;  %v18472_v3 = vld [vmem:[#allocation211_spill] sm:$0xff] }
 0x98d   :  { %v8033_v58 = vpop.f32.mrb[82].mxu1 }
 0x98e   :  { %v15788_v57 = vadd.f32 %v18456_v15, %v8033_v58  ;;  %v8035_v54 = vpop.f32.mrb[83].mxu1  ;;  %8297 = vmatmul.mubr.f32.gmra.mrb[188].mxu1 %v18422_v29  ;;  %v18474_v15 = vld [vmem:[#allocation210_spill] sm:$0xff] }
 0x98f   :  { %8301 = vmatprep.mubr.f32.mxu1 %v5900_v50 }
 0x991   :  { %v8038_v25 = vpop.f32.mrb[84].mxu1 }
 0x992   :  { %v15792_v9 = vadd.f32 %v18457_v41, %v8038_v25  ;;  %v8040_v42 = vpop.f32.mrb[85].mxu1  ;;  %8302 = vmatmul.mubr.f32.gmra.mrb[190].mxu1 %v18422_v29  ;;  %v5977_v29 = vrot.slane %v4858_v60, 2 }
 0x993   :  { %9660 = vmatprep.mubr.f32.mxu1 %v18458_v37  ;;  %v18475_v42 = vld [vmem:[#allocation214_spill] sm:$0xff] }
 0x994   :  { %v5978_v59 = vsel %vm883_vm2, %v18465_v4, %v5977_v29 }
 0x995   :  { %v8043_v39 = vpop.f32.mrb[86].mxu1 }
 0x996   :  { %v15797_v38 = vadd.f32 %v18459_v26, %v8043_v39  ;;  %v8045_v35 = vpop.f32.mrb[87].mxu1  ;;  %9661 = vmatmul.mubr.f32.vlgmr.msra.gmra.mrb[192].mxu1 %v18460_v19 }
 0x997   :  { %9663 = vmatprep.mubr.f32.mxu1 %v18461_v13  ;;  %v18477_v35 = vld [vmem:[#allocation213_spill] sm:$0xff] }
 0x999   :  { %v8048_v22 = vpop.f32.mrb[88].mxu1 }
 0x99a   :  { %v15802_v49 = vadd.f32 %v18462_v40, %v8048_v22  ;;  %v8050_v51 = vpop.f32.mrb[89].mxu1  ;;  %9664 = vmatmul.mubr.f32.gmra.mrb[194].mxu1 %v18463_v16  ;;  %v18478_v40 = vld [vmem:[#allocation217_spill] sm:$0xff] }
 0x99b   :  { %9666 = vmatprep.mubr.f32.mxu1 %v15613_v18 }
 0x99d   :  { %v8053_v30 = vpop.f32.mrb[90].mxu1 }
 0x99e   :  { %v15807_v17 = vadd.f32 %v18464_v1, %v8053_v30  ;;  %v8055_v12 = vpop.f32.mrb[91].mxu1  ;;  %9667 = vmatmul.mubr.f32.gmra.mrb[196].mxu1 %v15621_v27  ;;  %v18480_v30 = vld [vmem:[#allocation216_spill] sm:$0xff] }
 0x99f   :  { %9669 = vmatprep.mubr.f32.mxu1 %v18465_v4 }
 0x9a1   :  { %v8058_v53 = vpop.f32.mrb[92].mxu1 }
 0x9a2   :  { %v15814_v33 = vadd.f32 %v18466_v55, %v8058_v53  ;;  %v8060_v62 = vpop.f32.mrb[93].mxu1  ;;  %9670 = vmatmul.mubr.f32.gmra.mrb[198].mxu1 %v5978_v59  ;;  %v18481_v59 = vld [vmem:[#allocation220_spill] sm:$0xff] }
 0x9a5   :  { %v8063_v18 = vpop.f32.mrb[94].mxu1 }
 0x9a6   :  { %v15817_v6 = vadd.f32 %v18467_v46, %v8063_v18  ;;  %v8065_v47 = vpop.f32.mrb[95].mxu1  ;;  %v18483_v18 = vld [vmem:[#allocation219_spill] sm:$0xff] }
 0x9a9   :  { %v8068_v45 = vpop.f32.mrb[96].mxu1 }
 0x9aa   :  { %v15820_v61 = vadd.f32 %v18468_v23, %v8068_v45  ;;  %v8070_v27 = vpop.f32.mrb[97].mxu1  ;;  %v18484_v23 = vld [vmem:[#allocation223_spill] sm:$0xff] }
 0x9ad   :  { %v8073_v5 = vpop.f32.mrb[98].mxu1 }
 0x9ae   :  { %v15823_v11 = vadd.f32 %v18469_v21, %v8073_v5  ;;  %v8075_v0 = vpop.f32.mrb[99].mxu1 }
 0x9af   :  { %v18486_v0 = vld [vmem:[#allocation222_spill] sm:$0xff] }
 0x9b1   :  { %v8078_v14 = vpop.f32.mrb[100].mxu1 }
 0x9b2   :  { %v15826_v2 = vadd.f32 %v18470_v31, %v8078_v14  ;;  %v8080_v60 = vpop.f32.mrb[101].mxu1 }
 0x9b5   :  { %v8083_v24 = vpop.f32.mrb[102].mxu1 }
 0x9b6   :  { %v15829_v34 = vadd.f32 %v18471_v28, %v8083_v24  ;;  %v8085_v36 = vpop.f32.mrb[103].mxu1  ;;  %v18487_v24 = vld [vmem:[#allocation227_spill] sm:$0xff] }
 0x9b9   :  { %v8088_v32 = vpop.f32.mrb[104].mxu1 }
 0x9ba   :  { %v15832_v20 = vadd.f32 %v18472_v3, %v8088_v32  ;;  %v8090_v50 = vpop.f32.mrb[105].mxu1  ;;  %v18489_v3 = vld [vmem:[#allocation225_spill] sm:$0xff] }
 0x9bc   :  { %18473 = vst [vmem:[#allocation111_spill] sm:$0xff] %v15832_v20 }
 0x9bd   :  { %v8093_v58 = vpop.f32.mrb[106].mxu1 }
 0x9be   :  { %v15835_v54 = vadd.f32 %v18474_v15, %v8093_v58  ;;  %v8095_v25 = vpop.f32.mrb[107].mxu1 }
 0x9bf   :  { %v18490_v25 = vld [vmem:[#allocation229_spill] sm:$0xff] }
 0x9c1   :  { %v8098_v41 = vpop.f32.mrb[108].mxu1 }
 0x9c2   :  { %v15838_v37 = vadd.f32 %v18475_v42, %v8098_v41  ;;  %v8100_v39 = vpop.f32.mrb[109].mxu1 }
 0x9c4   :  { %18476 = vst [vmem:[#allocation115_spill] sm:$0xff] %v15838_v37 }
 0x9c5   :  { %v8103_v26 = vpop.f32.mrb[110].mxu1 }
 0x9c6   :  { %v15841_v19 = vadd.f32 %v18477_v35, %v8103_v26  ;;  %v8105_v13 = vpop.f32.mrb[111].mxu1  ;;  %v18492_v26 = vld [vmem:[#allocation228_spill] sm:$0xff] }
 0x9c9   :  { %v8108_v22 = vpop.f32.mrb[112].mxu1 }
 0x9ca   :  { %v15844_v51 = vadd.f32 %v18478_v40, %v8108_v22  ;;  %v8110_v16 = vpop.f32.mrb[113].mxu1  ;;  %v18493_v40 = vld [vmem:[#allocation232_spill] sm:$0xff] }
 0x9cc   :  { %18479 = vst [vmem:[#allocation139_spill] sm:$0xff] %v15844_v51 }
 0x9cd   :  { %v8113_v29 = vpop.f32.mrb[114].mxu1 }
 0x9ce   :  { %v15847_v1 = vadd.f32 %v18480_v30, %v8113_v29  ;;  %v8115_v12 = vpop.f32.mrb[115].mxu1 }
 0x9cf   :  { %v18495_v12 = vld [vmem:[#allocation231_spill] sm:$0xff] }
 0x9d1   :  { %v8118_v4 = vpop.f32.mrb[116].mxu1 }
 0x9d2   :  { %v15850_v53 = vadd.f32 %v18481_v59, %v8118_v4  ;;  %v8120_v55 = vpop.f32.mrb[117].mxu1 }
 0x9d4   :  { %18482 = vst [vmem:[#allocation116_spill] sm:$0xff] %v15850_v53 }
 0x9d5   :  { %v8123_v62 = vpop.f32.mrb[118].mxu1 }
 0x9d6   :  { %v15853_v46 = vadd.f32 %v18483_v18, %v8123_v62  ;;  %v8125_v47 = vpop.f32.mrb[119].mxu1  ;;  %v18496_v62 = vld [vmem:[#allocation235_spill] sm:$0xff] }
 0x9d9   :  { %v8128_v45 = vpop.f32.mrb[120].mxu1 }
 0x9da   :  { %v15856_v27 = vadd.f32 %v18484_v23, %v8128_v45  ;;  %v8130_v5 = vpop.f32.mrb[121].mxu1  ;;  %v8764_v45 = vmul.f32 %v15752_v48, %v15752_v48 }
 0x9db   :  { %v18497_v5 = vld [vmem:[#allocation234_spill] sm:$0xff] }
 0x9dc   :  { %18485 = vst [vmem:[#allocation57_spill] sm:$0xff] %v15856_v27 }
 0x9dd   :  { %v8133_v21 = vpop.f32.mrb[122].mxu1 }
 0x9de   :  { %v15859_v14 = vadd.f32 %v18486_v0, %v8133_v21  ;;  %v8135_v31 = vpop.f32.mrb[123].mxu1 }
 0x9df   :  { %v8763_v31 = vmul.f32 %v15748_v10, %v15748_v10 }
 0x9e1   :  { %v8138_v60 = vpop.f32.mrb[124].mxu1 }
 0x9e2   :  { %v15862_v28 = vadd.f32 %v18487_v24, %v8138_v60  ;;  %v8140_v36 = vpop.f32.mrb[125].mxu1  ;;  %v8694_v60 = vadd.f32 %v15752_v48, %v15748_v10  ;;  %v8765_v24 = vmul.f32 %v15756_v7, %v15756_v7 }
 0x9e3   :  { %v8827_v36 = vadd.f32 %v8764_v45, %v8763_v31  ;;  %v8769_v45 = vmul.f32 %v15772_v56, %v15772_v56 }
 0x9e4   :  { %18488 = vst [vmem:[#allocation60_spill] sm:$0xff] %v15862_v28 }
 0x9e5   :  { %v8143_v32 = vpop.f32.mrb[126].mxu1 }
 0x9e6   :  { %v15865_v50 = vadd.f32 %v18489_v3, %v8143_v32  ;;  %v8145_v58 = vpop.f32.mrb[127].mxu1  ;;  %v8695_v32 = vadd.f32 %v8694_v60, %v15756_v7  ;;  %v8766_v3 = vmul.f32 %v15760_v8, %v15760_v8  ;;  %v18500_v60 = vld [vmem:[#allocation68_spill] sm:$0xff] }
 0x9e9   :  { %v8148_v15 = vpop.f32.mrb[128].mxu1 }
 0x9ea   :  { %v15868_v41 = vadd.f32 %v18490_v25, %v8148_v15  ;;  %v8150_v42 = vpop.f32.mrb[129].mxu1  ;;  %v18498_v15 = vld [vmem:[#allocation65_spill] sm:$0xff] }
 0x9ec   :  { %18491 = vst [vmem:[#allocation61_spill] sm:$0xff] %v15868_v41 }
 0x9ed   :  { %v8153_v39 = vpop.f32.mrb[130].mxu1 }
 0x9ee   :  { %v15871_v35 = vadd.f32 %v18492_v26, %v8153_v39  ;;  %v8155_v13 = vpop.f32.mrb[131].mxu1  ;;  %v8828_v39 = vadd.f32 %v8827_v36, %v8765_v24  ;;  %v8696_v26 = vadd.f32 %v8695_v32, %v15760_v8 }
 0x9ef   :  { %v8767_v13 = vmul.f32 %v15764_v44, %v15764_v44 }
 0x9f1   :  { %v8158_v22 = vpop.f32.mrb[132].mxu1 }
 0x9f2   :  { %v15874_v16 = vadd.f32 %v18493_v40, %v8158_v22  ;;  %v8160_v29 = vpop.f32.mrb[133].mxu1  ;;  %v8829_v22 = vadd.f32 %v8828_v39, %v8766_v3  ;;  %v8697_v40 = vadd.f32 %v8696_v26, %v15764_v44  ;;  %v8772_v39 = vmul.f32 %v15788_v57, %v15788_v57 }
 0x9f3   :  { %v8768_v29 = vmul.f32 %v15768_v63, %v15768_v63 }
 0x9f4   :  { %18494 = vst [vmem:[#allocation64_spill] sm:$0xff] %v15874_v16 }
 0x9f5   :  { %v8163_v30 = vpop.f32.mrb[134].mxu1 }
 0x9f6   :  { %v15877_v4 = vadd.f32 %v18495_v12, %v8163_v30  ;;  %v8165_v59 = vpop.f32.mrb[135].mxu1  ;;  %v18499_v12 = vld [vmem:[#allocation237_spill] sm:$0xff] }
 0x9f9   :  { %v8168_v55 = vpop.f32.mrb[136].mxu1 }
 0x9fa   :  { %v15880_v18 = vadd.f32 %v18496_v62, %v8168_v55  ;;  %v8170_v47 = vpop.f32.mrb[137].mxu1  ;;  %v8830_v62 = vadd.f32 %v8829_v22, %v8767_v13  ;;  %v18502_v13 = vld [vmem:[#allocation239_spill] sm:$0xff] }
 0x9fb   :  { %v8698_v47 = vadd.f32 %v8697_v40, %v15768_v63 }
 0x9fd   :  { %v8173_v23 = vpop.f32.mrb[138].mxu1 }
 0x9fe   :  { %v15885_v21 = vadd.f32 %v18497_v5, %v8173_v23  ;;  %v8175_v0 = vpop.f32.mrb[139].mxu1  ;;  %v8831_v23 = vadd.f32 %v8830_v62, %v8768_v29  ;;  %v8699_v5 = vadd.f32 %v8698_v47, %v15772_v56  ;;  %v8774_v47 = vmul.f32 %v15797_v38, %v15797_v38 }
 0x9ff   :  { %v8770_v0 = vmul.f32 %v15776_v43, %v15776_v43 }
 0xa00   :  { %v8832_v32 = vadd.f32 %v8831_v23, %v8769_v45  ;;  %v8700_v3 = vadd.f32 %v8699_v5, %v15776_v43  ;;  %v18503_v23 = vld [vmem:[#allocation72_spill] sm:$0xff] }
 0xa01   :  { %v8178_v58 = vpop.f32.mrb[140].mxu1 }
 0xa02   :  { %v15897_v25 = vadd.f32 %v18498_v15, %v8178_v58  ;;  %v8180_v42 = vpop.f32.mrb[141].mxu1  ;;  %v8771_v58 = vmul.f32 %v15781_v52, %v15781_v52  ;;  %v8833_v15 = vadd.f32 %v8832_v32, %v8770_v0 }
 0xa03   :  { %v8701_v42 = vadd.f32 %v8700_v3, %v15781_v52 }
 0xa04   :  { %v8834_v29 = vadd.f32 %v8833_v15, %v8771_v58  ;;  %v8776_v58 = vmul.f32 %v15807_v17, %v15807_v17 }
 0xa05   :  { %v8183_v30 = vpop.f32.mrb[142].mxu1 }
 0xa06   :  { %v15906_v59 = vadd.f32 %v18499_v12, %v8183_v30  ;;  %v8185_v55 = vpop.f32.mrb[143].mxu1  ;;  %v8702_v30 = vadd.f32 %v8701_v42, %v15788_v57  ;;  %v8773_v12 = vmul.f32 %v15792_v9, %v15792_v9  ;;  %v18505_v42 = vld [vmem:[#allocation241_spill] sm:$0xff] }
 0xa07   :  { %v8835_v55 = vadd.f32 %v8834_v29, %v8772_v39  ;;  %v8777_v29 = vmul.f32 %v15814_v33, %v15814_v33 }
 0xa08   :  { %v8703_v62 = vadd.f32 %v8702_v30, %v15792_v9 }
 0xa09   :  { %v8188_v31 = vpop.f32.mrb[144].mxu1 }
 0xa0a   :  { %v15915_v24 = vadd.f32 %v18500_v60, %v8188_v31  ;;  %v8190_v36 = vpop.f32.mrb[145].mxu1  ;;  %v8836_v31 = vadd.f32 %v8835_v55, %v8773_v12  ;;  %v8704_v60 = vadd.f32 %v8703_v62, %v15797_v38  ;;  %v8778_v55 = vmul.f32 %v15817_v6, %v15817_v6 }
 0xa0b   :  { %v8775_v36 = vmul.f32 %v15802_v49, %v15802_v49 }
 0xa0c   :  { %18501 = vst [vmem:[#allocation69_spill] sm:$0xff] %v15915_v24  ;;  %v8837_v32 = vadd.f32 %v8836_v31, %v8774_v47  ;;  %v8705_v3 = vadd.f32 %v8704_v60, %v15802_v49  ;;  %v18506_v47 = vld [vmem:[#allocation73_spill] sm:$0xff]  ;;  %v8779_v60 = vmul.f32 %v15820_v61, %v15820_v61 }
 0xa0d   :  { %v8193_v26 = vpop.f32.mrb[146].mxu1 }
 0xa0e   :  { %v15924_v22 = vadd.f32 %v18502_v13, %v8193_v26  ;;  %v8195_v40 = vpop.f32.mrb[147].mxu1  ;;  %v8838_v13 = vadd.f32 %v8837_v32, %v8775_v36 }
 0xa0f   :  { %v8706_v40 = vadd.f32 %v8705_v3, %v15807_v17  ;;  %v8780_v3 = vmul.f32 %v15823_v11, %v15823_v11 }
 0xa10   :  { %v8839_v30 = vadd.f32 %v8838_v13, %v8776_v58 }
 0xa11   :  { %v8198_v45 = vpop.f32.mrb[148].mxu1  ;;  %v8707_v12 = vadd.f32 %v8706_v40, %v15814_v33 }
 0xa12   :  { %v15933_v5 = vadd.f32 %v18503_v23, %v8198_v45  ;;  %v8200_v0 = vpop.f32.mrb[149].mxu1 }
 0xa13   :  { %v8840_v0 = vadd.f32 %v8839_v30, %v8777_v29  ;;  %v8708_v31 = vadd.f32 %v8707_v12, %v15817_v6  ;;  %v8781_v29 = vmul.f32 %v15826_v2, %v15826_v2 }
 0xa14   :  { %18504 = vst [vmem:[#allocation76_spill] sm:$0xff] %v15933_v5 }
 0xa15   :  { %v8203_v15 = vpop.f32.mrb[150].mxu1  ;;  %v8841_v36 = vadd.f32 %v8840_v0, %v8778_v55  ;;  %v8709_v32 = vadd.f32 %v8708_v31, %v15820_v61  ;;  %v8782_v55 = vmul.f32 %v15829_v34, %v15829_v34 }
 0xa16   :  { %v15942_v39 = vadd.f32 %v18505_v42, %v8203_v15  ;;  %v8205_v26 = vpop.f32.mrb[151].mxu1  ;;  %v18508_v15 = vld [vmem:[#allocation243_spill] sm:$0xff] }
 0xa17   :  { %v8842_v13 = vadd.f32 %v8841_v36, %v8779_v60  ;;  %v8710_v40 = vadd.f32 %v8709_v32, %v15823_v11  ;;  %v8783_v60 = vmul.f32 %v15832_v20, %v15832_v20 }
 0xa19   :  { %v8208_v62 = vpop.f32.mrb[152].mxu1  ;;  %v8843_v30 = vadd.f32 %v8842_v13, %v8780_v3  ;;  %v8711_v12 = vadd.f32 %v8710_v40, %v15826_v2  ;;  %v8784_v3 = vmul.f32 %v15835_v54, %v15835_v54 }
 0xa1a   :  { %v15951_v45 = vadd.f32 %v18506_v47, %v8208_v62  ;;  %v8210_v23 = vpop.f32.mrb[153].mxu1  ;;  %v18509_v47 = vld [vmem:[#allocation77_spill] sm:$0xff] }
 0xa1b   :  { %v8844_v31 = vadd.f32 %v8843_v30, %v8781_v29  ;;  %v8785_v29 = vmul.f32 %v15838_v37, %v15838_v37 }
 0xa1c   :  { %18507 = vst [vmem:[#allocation81_spill] sm:$0xff] %v15951_v45 }
 0xa1d   :  { %v8213_v58 = vpop.f32.mrb[154].mxu1  ;;  %v8845_v36 = vadd.f32 %v8844_v31, %v8782_v55  ;;  %v8786_v55 = vmul.f32 %v15841_v19, %v15841_v19  ;;  %v18512_v31 = vld [vmem:[#allocation80_spill] sm:$0xff] }
 0xa1e   :  { %v15960_v42 = vadd.f32 %v18508_v15, %v8213_v58  ;;  %v8215_v26 = vpop.f32.mrb[155].mxu1  ;;  %v8712_v58 = vadd.f32 %v8711_v12, %v15829_v34 }
 0xa1f   :  { %v18511_v26 = vld [vmem:[#allocation245_spill] sm:$0xff] }
 0xa20   :  { %v8713_v32 = vadd.f32 %v8712_v58, %v15832_v20 }
 0xa21   :  { %v8218_v62 = vpop.f32.mrb[156].mxu1 }
 0xa22   :  { %v15969_v23 = vadd.f32 %v18509_v47, %v8218_v62  ;;  %v8220_v0 = vpop.f32.mrb[157].mxu1  ;;  %v8846_v62 = vadd.f32 %v8845_v36, %v8783_v60  ;;  %v8714_v47 = vadd.f32 %v8713_v32, %v15835_v54  ;;  %v8787_v60 = vmul.f32 %v15844_v51, %v15844_v51 }
 0xa24   :  { %18510 = vst [vmem:[#allocation88_spill] sm:$0xff] %v15969_v23  ;;  %v8847_v30 = vadd.f32 %v8846_v62, %v8784_v3  ;;  %v8715_v12 = vadd.f32 %v8714_v47, %v15838_v37  ;;  %v8788_v3 = vmul.f32 %v15847_v1, %v15847_v1  ;;  %v18514_v62 = vld [vmem:[#allocation247_spill] sm:$0xff] }
 0xa25   :  { %v8223_v15 = vpop.f32.mrb[158].mxu1 }
 0xa26   :  { %v15978_v13 = vadd.f32 %v18511_v26, %v8223_v15  ;;  %v8225_v40 = vpop.f32.mrb[159].mxu1  ;;  %v8848_v15 = vadd.f32 %v8847_v30, %v8785_v29  ;;  %v8716_v26 = vadd.f32 %v8715_v12, %v15841_v19  ;;  %v8789_v29 = vmul.f32 %v15850_v53, %v15850_v53 }
 0xa28   :  { %v8849_v36 = vadd.f32 %v8848_v15, %v8786_v55  ;;  %v8717_v32 = vadd.f32 %v8716_v26, %v15844_v51  ;;  %v8790_v55 = vmul.f32 %v15853_v46, %v15853_v46  ;;  %v18515_v15 = vld [vmem:[#allocation84_spill] sm:$0xff] }
 0xa29   :  { %v8228_v0 = vpop.f32.mrb[160].mxu1 }
 0xa2a   :  { %v15987_v58 = vadd.f32 %v18512_v31, %v8228_v0  ;;  %v8230_v20 = vpop.f32.mrb[161].mxu1  ;;  %v8850_v0 = vadd.f32 %v8849_v36, %v8787_v60  ;;  %v8791_v60 = vmul.f32 %v15856_v27, %v15856_v27 }
 0xa2b   :  { %v8718_v20 = vadd.f32 %v8717_v32, %v15847_v1 }
 0xa2c   :  { %18513 = vst [vmem:[#allocation93_spill] sm:$0xff] %v15987_v58  ;;  %v8851_v30 = vadd.f32 %v8850_v0, %v8788_v3  ;;  %v8792_v3 = vmul.f32 %v15859_v14, %v15859_v14  ;;  %v18517_v0 = vld [vmem:[#allocation249_spill] sm:$0xff] }
 0xa2d   :  { %v8233_v40 = vpop.f32.mrb[162].mxu1  ;;  %v8719_v12 = vadd.f32 %v8718_v20, %v15850_v53 }
 0xa2e   :  { %v15996_v47 = vadd.f32 %v18514_v62, %v8233_v40  ;;  %v8235_v37 = vpop.f32.mrb[163].mxu1  ;;  %v8852_v40 = vadd.f32 %v8851_v30, %v8789_v29  ;;  %v8793_v29 = vmul.f32 %v15862_v28, %v15862_v28 }
 0xa2f   :  { %v8720_v37 = vadd.f32 %v8719_v12, %v15853_v46 }
 0xa30   :  { %v8853_v36 = vadd.f32 %v8852_v40, %v8790_v55  ;;  %v8794_v55 = vmul.f32 %v15865_v50, %v15865_v50  ;;  %v18519_v40 = vld [vmem:[#allocation85_spill] sm:$0xff] }
 0xa31   :  { %v8238_v31 = vpop.f32.mrb[164].mxu1  ;;  %v8721_v32 = vadd.f32 %v8720_v37, %v15856_v27 }
 0xa32   :  { %v16005_v26 = vadd.f32 %v18515_v15, %v8238_v31  ;;  %v8240_v51 = vpop.f32.mrb[165].mxu1  ;;  %v8854_v31 = vadd.f32 %v8853_v36, %v8791_v60  ;;  %v8795_v60 = vmul.f32 %v15868_v41, %v15868_v41 }
 0xa33   :  { %v8722_v51 = vadd.f32 %v8721_v32, %v15859_v14 }
 0xa34   :  { %18516 = vst [vmem:[#allocation100_spill] sm:$0xff] %v16005_v26  ;;  %v8855_v30 = vadd.f32 %v8854_v31, %v8792_v3  ;;  %v8796_v3 = vmul.f32 %v15871_v35, %v15871_v35  ;;  %v18521_v31 = vld [vmem:[#allocation251_spill] sm:$0xff] }
 0xa35   :  { %v8243_v62 = vpop.f32.mrb[166].mxu1  ;;  %v8723_v12 = vadd.f32 %v8722_v51, %v15862_v28 }
 0xa36   :  { %v16014_v20 = vadd.f32 %v18517_v0, %v8243_v62  ;;  %v8245_v53 = vpop.f32.mrb[167].mxu1  ;;  %v8856_v62 = vadd.f32 %v8855_v30, %v8793_v29  ;;  %v8797_v29 = vmul.f32 %v15874_v16, %v15874_v16 }
 0xa37   :  { %v8724_v53 = vadd.f32 %v8723_v12, %v15865_v50 }
 0xa38   :  { %18518 = vst [vmem:[#allocation147_spill] sm:$0xff] %v16014_v20  ;;  %v8857_v36 = vadd.f32 %v8856_v62, %v8794_v55  ;;  %v8798_v55 = vmul.f32 %v15877_v4, %v15877_v4  ;;  %v18522_v62 = vld [vmem:[#allocation89_spill] sm:$0xff] }
 0xa39   :  { %v8248_v15 = vpop.f32.mrb[168].mxu1  ;;  %v8725_v32 = vadd.f32 %v8724_v53, %v15868_v41 }
 0xa3a   :  { %v16023_v37 = vadd.f32 %v18519_v40, %v8248_v15  ;;  %v8250_v27 = vpop.f32.mrb[169].mxu1  ;;  %v8858_v15 = vadd.f32 %v8857_v36, %v8795_v60  ;;  %v8799_v60 = vmul.f32 %v15880_v18, %v15880_v18 }
 0xa3b   :  { %v8726_v27 = vadd.f32 %v8725_v32, %v15871_v35 }
 0xa3c   :  { %18520 = vst [vmem:[#allocation154_spill] sm:$0xff] %v16023_v37  ;;  %v8859_v30 = vadd.f32 %v8858_v15, %v8796_v3  ;;  %v8800_v3 = vmul.f32 %v15885_v21, %v15885_v21  ;;  %v18524_v15 = vld [vmem:[#allocation253_spill] sm:$0xff] }
 0xa3d   :  { %v8253_v0 = vpop.f32.mrb[170].mxu1  ;;  %v8727_v12 = vadd.f32 %v8726_v27, %v15874_v16 }
 0xa3e   :  { %v16032_v51 = vadd.f32 %v18521_v31, %v8253_v0  ;;  %v8255_v28 = vpop.f32.mrb[171].mxu1  ;;  %v8860_v0 = vadd.f32 %v8859_v30, %v8797_v29  ;;  %v8801_v29 = vmul.f32 %v15897_v25, %v15897_v25 }
 0xa3f   :  { %v8728_v28 = vadd.f32 %v8727_v12, %v15877_v4 }
 0xa40   :  { %v8861_v36 = vadd.f32 %v8860_v0, %v8798_v55  ;;  %v8802_v55 = vmul.f32 %v15906_v59, %v15906_v59 }
 0xa41   :  { %v8258_v40 = vpop.f32.mrb[172].mxu1  ;;  %v8729_v32 = vadd.f32 %v8728_v28, %v15880_v18 }
 0xa42   :  { %v16041_v53 = vadd.f32 %v18522_v62, %v8258_v40  ;;  %v8260_v41 = vpop.f32.mrb[173].mxu1  ;;  %v8862_v40 = vadd.f32 %v8861_v36, %v8799_v60 }
 0xa43   :  { %v8730_v41 = vadd.f32 %v8729_v32, %v15885_v21  ;;  %v8804_v32 = vmul.f32 %v15924_v22, %v15924_v22 }
 0xa44   :  { %18523 = vst [vmem:[#allocation162_spill] sm:$0xff] %v16041_v53  ;;  %v8863_v30 = vadd.f32 %v8862_v40, %v8800_v3 }
 0xa45   :  { %v8263_v31 = vpop.f32.mrb[174].mxu1  ;;  %v8731_v12 = vadd.f32 %v8730_v41, %v15897_v25 }
 0xa46   :  { %v16050_v27 = vadd.f32 %v18524_v15, %v8263_v31  ;;  %v8265_v16 = vpop.f32.mrb[175].mxu1  ;;  %v8864_v28 = vadd.f32 %v8863_v30, %v8801_v29 }
 0xa47   :  { %v8732_v31 = vadd.f32 %v8731_v12, %v15906_v59  ;;  %v8803_v16 = vmul.f32 %v15915_v24, %v15915_v24  ;;  %v8806_v12 = vmul.f32 %v15942_v39, %v15942_v39 }
 0xa48   :  { %18525 = vst [vmem:[#allocation138_spill] sm:$0xff] %v16050_v27  ;;  %v8865_v60 = vadd.f32 %v8864_v28, %v8802_v55 }
 0xa49   :  { %v16058_v62 = vpop.f32.mrb[176].mxu1  ;;  %v8733_v36 = vadd.f32 %v8732_v31, %v15915_v24 }
 0xa4a   :  { %v8270_v0 = vpop.f32.mrb[177].mxu1  ;;  %v8866_v40 = vadd.f32 %v8865_v60, %v8803_v16 }
 0xa4b   :  { %v8734_v41 = vadd.f32 %v8733_v36, %v15924_v22  ;;  %v8805_v0 = vmul.f32 %v15933_v5, %v15933_v5  ;;  %v8808_v36 = vmul.f32 %v15960_v42, %v15960_v42 }
 0xa4c   :  { %v8867_v29 = vadd.f32 %v8866_v40, %v8804_v32 }
 0xa4d   :  { %v8273_v3 = vpop.f32.mrb[178].mxu1  ;;  %v8735_v30 = vadd.f32 %v8734_v41, %v15933_v5 }
 0xa4e   :  { %v8275_v15 = vpop.f32.mrb[179].mxu1  ;;  %v8868_v31 = vadd.f32 %v8867_v29, %v8805_v0 }
 0xa4f   :  { %v8736_v24 = vadd.f32 %v8735_v30, %v15942_v39  ;;  %v8807_v15 = vmul.f32 %v15951_v45, %v15951_v45  ;;  %v8810_v30 = vmul.f32 %v15978_v13, %v15978_v13 }
 0xa50   :  { %v8869_v16 = vadd.f32 %v8868_v31, %v8806_v12 }
 0xa51   :  { %v8278_v55 = vpop.f32.mrb[180].mxu1  ;;  %v8737_v60 = vadd.f32 %v8736_v24, %v15951_v45 }
 0xa52   :  { %v8280_v28 = vpop.f32.mrb[181].mxu1  ;;  %v8870_v41 = vadd.f32 %v8869_v16, %v8807_v15 }
 0xa53   :  { %v8738_v5 = vadd.f32 %v8737_v60, %v15960_v42  ;;  %v8809_v28 = vmul.f32 %v15969_v23, %v15969_v23  ;;  %v8812_v60 = vmul.f32 %v15996_v47, %v15996_v47 }
 0xa54   :  { %v8871_v0 = vadd.f32 %v8870_v41, %v8808_v36 }
 0xa55   :  { %v8283_v32 = vpop.f32.mrb[182].mxu1  ;;  %v8739_v29 = vadd.f32 %v8738_v5, %v15969_v23 }
 0xa56   :  { %v8285_v40 = vpop.f32.mrb[183].mxu1  ;;  %v8872_v24 = vadd.f32 %v8871_v0, %v8809_v28 }
 0xa57   :  { %v8740_v45 = vadd.f32 %v8739_v29, %v15978_v13  ;;  %v8811_v40 = vmul.f32 %v15987_v58, %v15987_v58  ;;  %v8814_v29 = vmul.f32 %v16014_v20, %v16014_v20 }
 0xa58   :  { %v8873_v15 = vadd.f32 %v8872_v24, %v8810_v30 }
 0xa59   :  { %v8288_v12 = vpop.f32.mrb[184].mxu1  ;;  %v8741_v16 = vadd.f32 %v8740_v45, %v15987_v58 }
 0xa5a   :  { %v8290_v31 = vpop.f32.mrb[185].mxu1  ;;  %v8874_v5 = vadd.f32 %v8873_v15, %v8811_v40 }
 0xa5b   :  { %v8742_v23 = vadd.f32 %v8741_v16, %v15996_v47  ;;  %v8813_v31 = vmul.f32 %v16005_v26, %v16005_v26  ;;  %v8816_v16 = vmul.f32 %v16032_v51, %v16032_v51 }
 0xa5c   :  { %v8875_v28 = vadd.f32 %v8874_v5, %v8812_v60 }
 0xa5d   :  { %v8293_v36 = vpop.f32.mrb[186].mxu1  ;;  %v8743_v0 = vadd.f32 %v8742_v23, %v16005_v26 }
 0xa5e   :  { %v8295_v41 = vpop.f32.mrb[187].mxu1  ;;  %v8876_v45 = vadd.f32 %v8875_v28, %v8813_v31 }
 0xa5f   :  { %v8744_v58 = vadd.f32 %v8743_v0, %v16014_v20  ;;  %v8815_v41 = vmul.f32 %v16023_v37, %v16023_v37  ;;  %v8818_v0 = vmul.f32 %v16050_v27, %v16050_v27 }
 0xa60   :  { %v8877_v40 = vadd.f32 %v8876_v45, %v8814_v29 }
 0xa61   :  { %v8298_v30 = vpop.f32.mrb[188].mxu1  ;;  %v8745_v15 = vadd.f32 %v8744_v58, %v16023_v37 }
 0xa62   :  { %v8300_v24 = vpop.f32.mrb[189].mxu1  ;;  %v8878_v23 = vadd.f32 %v8877_v40, %v8815_v41 }
 0xa63   :  { %v8746_v26 = vadd.f32 %v8745_v15, %v16032_v51  ;;  %v8817_v24 = vmul.f32 %v16041_v53, %v16041_v53 }
 0xa64   :  { %v8879_v31 = vadd.f32 %v8878_v23, %v8816_v16 }
 0xa65   :  { %v8303_v60 = vpop.f32.mrb[190].mxu1  ;;  %v8747_v28 = vadd.f32 %v8746_v26, %v16041_v53 }
 0xa66   :  { %v8305_v5 = vpop.f32.mrb[191].mxu1  ;;  %v8880_v37 = vadd.f32 %v8879_v31, %v8817_v24 }
 0xa67   :  { %v8748_v20 = vadd.f32 %v8747_v28, %v16050_v27 }
 0xa68   :  { %v8881_v40 = vadd.f32 %v8880_v37, %v8818_v0 }
 0xa69   :  { %v9662_v29 = vpop.f32.mrb[192].mxu1 }
 0xa6a   :  { %v16108_v45 = vadd.f32 %v9662_v29, %v8273_v3  ;;  %v8653_v58 = vpop.f32.mrb[193].mxu1 }
 0xa6b   :  { %v16112_v41 = vadd.f32 %v8653_v58, %v16058_v62 }
 0xa6c   :  { %18526 = vst [vmem:[#allocation146_spill] sm:$0xff] %v16108_v45  ;;  %v8820_v3 = vmul.f32 %v16108_v45, %v16108_v45 }
 0xa6d   :  { %18527 = vst [vmem:[#allocation150_spill] sm:$0xff] %v16112_v41  ;;  %v8749_v15 = vadd.f32 %v8748_v20, %v16112_v41  ;;  %v8819_v16 = vmul.f32 %v16112_v41, %v16112_v41  ;;  %v9665_v26 = vpop.f32.mrb[194].mxu1 }
 0xa6e   :  { %v16117_v5 = vadd.f32 %v9665_v26, %v8283_v32  ;;  %v8663_v23 = vpop.f32.mrb[195].mxu1 }
 0xa6f   :  { %v8882_v29 = vadd.f32 %v8881_v40, %v8819_v16  ;;  %v16121_v24 = vadd.f32 %v8663_v23, %v8278_v55  ;;  %v8750_v31 = vadd.f32 %v8749_v15, %v16108_v45 }
 0xa70   :  { %18528 = vst [vmem:[#allocation155_spill] sm:$0xff] %v16117_v5  ;;  %v8822_v58 = vmul.f32 %v16117_v5, %v16117_v5 }
 0xa71   :  { %18529 = vst [vmem:[#allocation153_spill] sm:$0xff] %v16121_v24  ;;  %v8751_v62 = vadd.f32 %v8750_v31, %v16121_v24  ;;  %v8821_v20 = vmul.f32 %v16121_v24, %v16121_v24  ;;  %v8883_v37 = vadd.f32 %v8882_v29, %v8820_v3  ;;  %v9668_v28 = vpop.f32.mrb[196].mxu1 }
 0xa72   :  { %v16127_v0 = vadd.f32 %v9668_v28, %v8293_v36  ;;  %v8673_v32 = vpop.f32.mrb[197].mxu1 }
 0xa73   :  { %v8884_v26 = vadd.f32 %v8883_v37, %v8821_v20  ;;  %v16131_v41 = vadd.f32 %v8673_v32, %v8288_v12  ;;  %v8752_v55 = vadd.f32 %v8751_v62, %v16117_v5 }
 0xa74   :  { %18530 = vst [vmem:[#allocation164_spill] sm:$0xff] %v16127_v0  ;;  %v8824_v29 = vmul.f32 %v16127_v0, %v16127_v0 }
 0xa75   :  { %18531 = vst [vmem:[#allocation140_spill] sm:$0xff] %v16131_v41  ;;  %v8753_v40 = vadd.f32 %v8752_v55, %v16131_v41  ;;  %v8823_v15 = vmul.f32 %v16131_v41, %v16131_v41  ;;  %v8885_v16 = vadd.f32 %v8884_v26, %v8822_v58  ;;  %v9671_v23 = vpop.f32.mrb[198].mxu1 }
 0xa76   :  { %v16137_v3 = vadd.f32 %v9671_v23, %v8303_v60  ;;  %v8683_v36 = vpop.f32.mrb[199].mxu1 }
 0xa77   :  { %v8886_v31 = vadd.f32 %v8885_v16, %v8823_v15  ;;  %v8684_v28 = vadd.f32 %v8683_v36, %v8298_v30  ;;  %v8754_v12 = vadd.f32 %v8753_v40, %v16127_v0 }
 0xa78   :  { %v8826_v32 = vmul.f32 %v16137_v3, %v16137_v3 }
 0xa79   :  { %v8755_v20 = vadd.f32 %v8754_v12, %v8684_v28  ;;  %v8825_v37 = vmul.f32 %v8684_v28, %v8684_v28  ;;  %v8887_v62 = vadd.f32 %v8886_v31, %v8824_v29 }
 0xa7b   :  { %v8756_v55 = vadd.f32 %v8755_v20, %v16137_v3  ;;  %v8888_v58 = vadd.f32 %v8887_v62, %v8825_v37  ;;  %v8692_v37 = vld [vmem:[%s16999_s5] sm:$0x1]  ;;  %s11140_s5 = smov [#allocation9]  }
 0xa7d   :  { %v8757_v26 = vrot.slane %v8756_v55, 4  ;;  %v8889_v60 = vadd.f32 %v8888_v58, %v8826_v32 }
 0xa7f   :  { %v8758_v23 = vadd.f32 %v8757_v26, %v8756_v55  ;;  %v8890_v41 = vrot.slane %v8889_v60, 4 }
 0xa81   :  { %v8759_v5 = vrot.slane %v8758_v23, 2  ;;  %v8891_v24 = vadd.f32 %v8890_v41, %v8889_v60 }
 0xa83   :  { %v8760_v45 = vadd.f32 %v8759_v5, %v8758_v23  ;;  %v8892_v15 = vrot.slane %v8891_v24, 2  ;;  %v8693_v5 = vld [vmem:[%s17000_s6] sm:$0x1]  ;;  %s9243_s6 = sshll.u32 %s11140_s5, 4  ;;  %s9244_s6 = int_to_ptr.vmem [resolvable:$true] %s9243_s6 }
 0xa84   :  { %s11106_s22 = scalar_lea.vmem %s9244_s6, 8192  ;;  %p11111_p3 = scmp.lt.s32.totalorder %s9244_s6, %s9244_s6 }
 0xa85   :  { %v8761_v30 = vrot.slane %v8760_v45, 1  ;;  %v8893_v16 = vadd.f32 %v8892_v15, %v8891_v24  ;;  %v18532_v24 = vld [vmem:[#allocation142_spill] sm:$0xff]  ;;  %v18533_v15 = vld [vmem:[#allocation172_spill] sm:$0xff]  ;;  %p11107_p2 = scmp.ne.s32.totalorder %s9244_s6, %s11106_s22  ;;  %p11112_p4 = scmp.lt.s32.totalorder %s11106_s22, %s11106_s22 }
 0xa87   :  { %v8762_v40 = vadd.f32 %v8761_v30, %v8760_v45  ;;  %v8894_v36 = vrot.slane %v8893_v16, 1  ;;  %p11113_p5 = por %p11112_p4, %p11111_p3 }
 0xa89   :  { %v8895_v12 = vadd.f32 %v8894_v36, %v8893_v16  ;;  %v8896_v29 = vmul.f32 0.001953125, %v8762_v40  ;;  %p11114_p6 = pnand %p11113_p5, %p11107_p2 }
 0xa8b   :  { %v8897_v31 = vmul.f32 0.001953125, %v8895_v12  ;;  %v8898_v0 = vmul.f32 %v8896_v29, %v8896_v29 }
 0xa8d   :  { %v8899_v27 = vsub.f32 %v8897_v31, %v8898_v0 }
 0xa8f   :  { %v8900_v53 = vmax.f32 %v8899_v27, 0.0 }
 0xa91   :  { %v8901_v20 = vadd.f32 1e-05, %v8900_v53 }
 0xa93   :  { %10913 = vrsqrt.f32 %v8901_v20 }
 0xa9d   :  { %v10914_v62 = vpop.eup %10913 }
 0xa9e   :  { %v8903_v41 = vmul.f32 %v10914_v62, %v8692_v37  ;;  %v18538_v37 = vld [vmem:[#allocation57_spill] sm:$0xff] }
 0xaa0   :  { %v8904_v45 = vmul.f32 %v8903_v41, %v8896_v29  ;;  %v16152_v32 = vrot.slane %v8903_v41, %v18532_v24  ;;  %v18537_v29 = vld [vmem:[#allocation116_spill] sm:$0xff] }
 0xaa1   :  { %v18539_v41 = vld [vmem:[#allocation60_spill] sm:$0xff] }
 0xaa2   :  { %v8905_v55 = vsub.f32 %v8693_v5, %v8904_v45  ;;  %v8974_v0 = vmul.f32 %v16152_v32, %v8684_v28  ;;  %v16157_v53 = vmul.f32 %v16152_v32, %v15748_v10  ;;  %v16161_v27 = vmul.f32 %v16152_v32, %v15752_v48  ;;  %v18540_v45 = vld [vmem:[#allocation61_spill] sm:$0xff] }
 0xaa3   :  { %v16165_v58 = vmul.f32 %v16152_v32, %v15756_v7  ;;  %v16169_v26 = vmul.f32 %v16152_v32, %v15760_v8  ;;  %v16173_v60 = vmul.f32 %v16152_v32, %v15764_v44  ;;  %v16177_v10 = vmul.f32 %v16152_v32, %v15768_v63 }
 0xaa4   :  { %v16180_v28 = vrot.slane %v8905_v55, %v18532_v24  ;;  %v16184_v48 = vmul.f32 %v16152_v32, %v15772_v56  ;;  %v16188_v7 = vmul.f32 %v16152_v32, %v15776_v43  ;;  %v16192_v8 = vmul.f32 %v16152_v32, %v15781_v52  ;;  %v18541_v55 = vld [vmem:[#allocation64_spill] sm:$0xff] }
 0xaa5   :  { %v16196_v44 = vmul.f32 %v16152_v32, %v15788_v57  ;;  %v16200_v63 = vmul.f32 %v16152_v32, %v15792_v9  ;;  %v16204_v56 = vmul.f32 %v16152_v32, %v15797_v38  ;;  %v16208_v43 = vmul.f32 %v16152_v32, %v15802_v49 }
 0xaa6   :  { %v9044_v23 = vadd.f32 %v16180_v28, %v8974_v0  ;;  %v16213_v52 = vmul.f32 %v16152_v32, %v15807_v17  ;;  %v16217_v57 = vmul.f32 %v16152_v32, %v15814_v33  ;;  %v16221_v9 = vmul.f32 %v16152_v32, %v15817_v6  ;;  %v18534_v6 = vld [vmem:[#allocation111_spill] sm:$0xff] }
 0xaa7   :  { %v16225_v38 = vmul.f32 %v16152_v32, %v15820_v61  ;;  %v16229_v49 = vmul.f32 %v16152_v32, %v15823_v11  ;;  %v16233_v17 = vmul.f32 %v16152_v32, %v15826_v2  ;;  %v16237_v33 = vmul.f32 %v16152_v32, %v15829_v34  ;;  %v18535_v11 = vld [vmem:[#allocation115_spill] sm:$0xff] }
 0xaa8   :  { %v9108_v30 = vadd.f32 %v9044_v23, %v18533_v15  ;;  %v16242_v16 = vmul.f32 %v16152_v32, %v18534_v6  ;;  %v16246_v61 = vmul.f32 %v16152_v32, %v15835_v54  ;;  %v16250_v40 = vmul.f32 %v16152_v32, %v18535_v11  ;;  %v18536_v34 = vld [vmem:[#allocation139_spill] sm:$0xff]  ;;  %v18543_v6 = vld [vmem:[#allocation76_spill] sm:$0xff]  ;;  %v18544_v11 = vld [vmem:[#allocation81_spill] sm:$0xff] }
 0xaa9   :  { %v16254_v2 = vmul.f32 %v16152_v32, %v15841_v19  ;;  %v16258_v36 = vmul.f32 %v16152_v32, %v18536_v34  ;;  %v16262_v12 = vmul.f32 %v16152_v32, %v15847_v1  ;;  %v16266_v54 = vmul.f32 %v16152_v32, %v18537_v29  ;;  %v18545_v29 = vld [vmem:[#allocation88_spill] sm:$0xff] }
 0xaaa   :  { %v9172_v31 = vmax.f32 %v9108_v30, 0.0  ;;  %v16270_v20 = vmul.f32 %v16152_v32, %v15853_v46  ;;  %v16274_v19 = vmul.f32 %v16152_v32, %v18538_v37  ;;  %v16278_v62 = vmul.f32 %v16152_v32, %v15859_v14  ;;  %v18542_v30 = vld [vmem:[#allocation69_spill] sm:$0xff] }
 0xaab   :  { %v16282_v1 = vmul.f32 %v16152_v32, %v18539_v41  ;;  %v16286_v5 = vmul.f32 %v16152_v32, %v15865_v50  ;;  %v16290_v46 = vmul.f32 %v16152_v32, %v18540_v45  ;;  %v16294_v24 = vmul.f32 %v16152_v32, %v15871_v35  ;;  %v18546_v37 = vld [vmem:[#allocation93_spill] sm:$0xff]  ;;  %v18547_v45 = vld [vmem:[#allocation100_spill] sm:$0xff] }
 0xaac   :  { %9236 = vst [vmem:[#allocation9 + $0x1f0] sm:$0xff] %v9172_v31  ;;  %v16298_v14 = vmul.f32 %v16152_v32, %v18541_v55  ;;  %v16302_v0 = vmul.f32 %v16152_v32, %v15877_v4  ;;  %v16306_v50 = vmul.f32 %v16152_v32, %v15880_v18  ;;  %v16310_v23 = vmul.f32 %v16152_v32, %v15885_v21  ;;  %v18549_v55 = vld [vmem:[#allocation147_spill] sm:$0xff] }
 0xaad   :  { %v16314_v35 = vmul.f32 %v16152_v32, %v15897_v25  ;;  %v16318_v15 = vmul.f32 %v16152_v32, %v15906_v59  ;;  %v16322_v4 = vmul.f32 %v16152_v32, %v18542_v30  ;;  %v16326_v18 = vmul.f32 %v16152_v32, %v15924_v22 }
 0xaae   :  { %v16330_v21 = vmul.f32 %v16152_v32, %v18543_v6  ;;  %v16334_v25 = vmul.f32 %v16152_v32, %v15942_v39  ;;  %v16338_v59 = vmul.f32 %v16152_v32, %v18544_v11  ;;  %v16342_v34 = vmul.f32 %v16152_v32, %v15960_v42  ;;  %v18551_v6 = vld [vmem:[#allocation154_spill] sm:$0xff] }
 0xaaf   :  { %v16346_v22 = vmul.f32 %v16152_v32, %v18545_v29  ;;  %v16350_v31 = vmul.f32 %v16152_v32, %v15978_v13  ;;  %v16354_v39 = vmul.f32 %v16152_v32, %v18546_v37  ;;  %v16358_v41 = vmul.f32 %v16152_v32, %v15996_v47  ;;  %v18554_v29 = vld [vmem:[#allocation162_spill] sm:$0xff] }
 0xab0   :  { %v16362_v42 = vmul.f32 %v16152_v32, %v18547_v45  ;;  %v16366_v30 = vmul.f32 %v16152_v32, %v18549_v55  ;;  %v16370_v13 = vmul.f32 %v16152_v32, %v18551_v6  ;;  %v16374_v11 = vmul.f32 %v16152_v32, %v16032_v51  ;;  %v18556_v37 = vld [vmem:[#allocation138_spill] sm:$0xff] }
 0xab1   :  { %v16378_v47 = vmul.f32 %v16152_v32, %v18554_v29  ;;  %v16382_v45 = vmul.f32 %v16152_v32, %v18556_v37 }
 0xab2   :  { %18548 = vst [vmem:[#allocation48_spill] sm:$0xff] %v16362_v42  ;;  %18550 = vst [vmem:[#allocation170_spill] sm:$0xff] %v16366_v30  ;;  %v18558_v42 = vld [vmem:[#allocation150_spill] sm:$0xff] }
 0xab3   :  { %18552 = vst [vmem:[#allocation103_spill] sm:$0xff] %v16370_v13  ;;  %18553 = vst [vmem:[#allocation106_spill] sm:$0xff] %v16374_v11  ;;  %v16386_v55 = vmul.f32 %v16152_v32, %v18558_v42  ;;  %v18559_v30 = vld [vmem:[#allocation146_spill] sm:$0xff]  ;;  %v18560_v13 = vld [vmem:[#allocation153_spill] sm:$0xff] }
 0xab4   :  { %18555 = vst [vmem:[#allocation132_spill] sm:$0xff] %v16378_v47  ;;  %18557 = vst [vmem:[#allocation137_spill] sm:$0xff] %v16382_v45  ;;  %v16390_v6 = vmul.f32 %v16152_v32, %v18559_v30  ;;  %v16394_v51 = vmul.f32 %v16152_v32, %v18560_v13  ;;  %v18561_v11 = vld [vmem:[#allocation155_spill] sm:$0xff]  ;;  %v18562_v47 = vld [vmem:[#allocation140_spill] sm:$0xff]  ;;  %v16410_v30 = vmul.f32 %v16152_v32, %v16137_v3 }
 0xab5   :  { %v16398_v29 = vmul.f32 %v16152_v32, %v18561_v11  ;;  %v16402_v37 = vmul.f32 %v16152_v32, %v18562_v47  ;;  %v18563_v45 = vld [vmem:[#allocation164_spill] sm:$0xff]  ;;  %v16414_v13 = vadd.f32 %v16180_v28, %v16157_v53  ;;  %v16418_v11 = vadd.f32 %v16180_v28, %v16161_v27 }
 0xab6   :  { %v16406_v42 = vmul.f32 %v16152_v32, %v18563_v45  ;;  %v16422_v47 = vadd.f32 %v16180_v28, %v16165_v58  ;;  %v16426_v45 = vadd.f32 %v16180_v28, %v16169_v26  ;;  %v16430_v3 = vadd.f32 %v16180_v28, %v16173_v60 }
 0xab7   :  { %v16434_v32 = vadd.f32 %v16180_v28, %v16177_v10  ;;  %v16438_v53 = vadd.f32 %v16180_v28, %v16184_v48  ;;  %v16442_v27 = vadd.f32 %v16180_v28, %v16188_v7  ;;  %v16446_v58 = vadd.f32 %v16180_v28, %v16192_v8 }
 0xab8   :  { %v16450_v26 = vadd.f32 %v16180_v28, %v16196_v44  ;;  %v16454_v60 = vadd.f32 %v16180_v28, %v16200_v63  ;;  %v16458_v10 = vadd.f32 %v16180_v28, %v16204_v56  ;;  %v16462_v48 = vadd.f32 %v16180_v28, %v16208_v43 }
 0xab9   :  { %v16466_v7 = vadd.f32 %v16180_v28, %v16213_v52  ;;  %v16470_v8 = vadd.f32 %v16180_v28, %v16217_v57  ;;  %v16474_v44 = vadd.f32 %v16180_v28, %v16221_v9  ;;  %v16478_v63 = vadd.f32 %v16180_v28, %v16225_v38 }
 0xaba   :  { %v16482_v56 = vadd.f32 %v16180_v28, %v16229_v49  ;;  %v16486_v43 = vadd.f32 %v16180_v28, %v16233_v17  ;;  %v16490_v52 = vadd.f32 %v16180_v28, %v16237_v33  ;;  %v16494_v57 = vadd.f32 %v16180_v28, %v16242_v16 }
 0xabb   :  { %v16498_v9 = vadd.f32 %v16180_v28, %v16246_v61  ;;  %v16502_v38 = vadd.f32 %v16180_v28, %v16250_v40  ;;  %v16506_v49 = vadd.f32 %v16180_v28, %v16254_v2  ;;  %v16510_v17 = vadd.f32 %v16180_v28, %v16258_v36 }
 0xabc   :  { %v16514_v33 = vadd.f32 %v16180_v28, %v16262_v12  ;;  %v16518_v16 = vadd.f32 %v16180_v28, %v16266_v54  ;;  %v16522_v61 = vadd.f32 %v16180_v28, %v16270_v20  ;;  %v16526_v40 = vadd.f32 %v16180_v28, %v16274_v19 }
 0xabd   :  { %v16530_v2 = vadd.f32 %v16180_v28, %v16278_v62  ;;  %v16534_v36 = vadd.f32 %v16180_v28, %v16282_v1  ;;  %v16538_v12 = vadd.f32 %v16180_v28, %v16286_v5  ;;  %v16542_v54 = vadd.f32 %v16180_v28, %v16290_v46 }
 0xabe   :  { %v16546_v20 = vadd.f32 %v16180_v28, %v16294_v24  ;;  %v16550_v19 = vadd.f32 %v16180_v28, %v16298_v14  ;;  %v16554_v62 = vadd.f32 %v16180_v28, %v16302_v0  ;;  %v16558_v1 = vadd.f32 %v16180_v28, %v16306_v50 }
 0xabf   :  { %v16562_v5 = vadd.f32 %v16180_v28, %v16310_v23  ;;  %v16566_v46 = vadd.f32 %v16180_v28, %v16314_v35  ;;  %v16570_v24 = vadd.f32 %v16180_v28, %v16318_v15  ;;  %v16574_v14 = vadd.f32 %v16180_v28, %v16322_v4 }
 0xac0   :  { %v16578_v0 = vadd.f32 %v16180_v28, %v16326_v18  ;;  %v16582_v50 = vadd.f32 %v16180_v28, %v16330_v21  ;;  %v16586_v23 = vadd.f32 %v16180_v28, %v16334_v25  ;;  %v16590_v35 = vadd.f32 %v16180_v28, %v16338_v59  ;;  %v18569_v59 = vld [vmem:[#allocation48_spill] sm:$0xff] }
 0xac1   :  { %v16594_v15 = vadd.f32 %v16180_v28, %v16342_v34  ;;  %v16598_v4 = vadd.f32 %v16180_v28, %v16346_v22  ;;  %v16602_v18 = vadd.f32 %v16180_v28, %v16350_v31  ;;  %v16606_v21 = vadd.f32 %v16180_v28, %v16354_v39 }
 0xac2   :  { %v16610_v25 = vadd.f32 %v16180_v28, %v16358_v41  ;;  %v16614_v34 = vadd.f32 %v16180_v28, %v18569_v59 }
 0xac3   :  { %18564 = vst [vmem:[#allocation113_spill] sm:$0xff] %v16594_v15  ;;  %18565 = vst [vmem:[#allocation167_spill] sm:$0xff] %v16598_v4  ;;  %v18570_v15 = vld [vmem:[#allocation170_spill] sm:$0xff]  ;;  %v18571_v4 = vld [vmem:[#allocation103_spill] sm:$0xff] }
 0xac4   :  { %18566 = vst [vmem:[#allocation145_spill] sm:$0xff] %v16602_v18  ;;  %18567 = vst [vmem:[#allocation118_spill] sm:$0xff] %v16606_v21  ;;  %v16618_v22 = vadd.f32 %v16180_v28, %v18570_v15  ;;  %v16622_v31 = vadd.f32 %v16180_v28, %v18571_v4  ;;  %v18572_v18 = vld [vmem:[#allocation106_spill] sm:$0xff]  ;;  %v18573_v21 = vld [vmem:[#allocation132_spill] sm:$0xff]  ;;  %v16638_v15 = vadd.f32 %v16180_v28, %v16386_v55 }
 0xac5   :  { %18568 = vst [vmem:[#allocation143_spill] sm:$0xff] %v16610_v25  ;;  %v16626_v39 = vadd.f32 %v16180_v28, %v18572_v18  ;;  %v16630_v41 = vadd.f32 %v16180_v28, %v18573_v21  ;;  %v18574_v25 = vld [vmem:[#allocation137_spill] sm:$0xff]  ;;  %v16642_v4 = vadd.f32 %v16180_v28, %v16390_v6  ;;  %v16646_v18 = vadd.f32 %v16180_v28, %v16394_v51 }
 0xac6   :  { %v16634_v59 = vadd.f32 %v16180_v28, %v18574_v25  ;;  %v16650_v21 = vadd.f32 %v16180_v28, %v16398_v29  ;;  %v16654_v25 = vadd.f32 %v16180_v28, %v16402_v37  ;;  %v16658_v55 = vadd.f32 %v16180_v28, %v16406_v42 }
 0xac7   :  { %18575 = vst [vmem:[#allocation109_spill] sm:$0xff] %v16642_v4  ;;  %18576 = vst [vmem:[#allocation148_spill] sm:$0xff] %v16646_v18  ;;  %v16662_v6 = vadd.f32 %v16180_v28, %v16410_v30  ;;  %v18580_v4 = vld [vmem:[#allocation13_spill] sm:$0xff]  ;;  %v18581_v18 = vld [vmem:[#allocation14_spill] sm:$0xff] }
 0xac8   :  { %18577 = vst [vmem:[#allocation121_spill] sm:$0xff] %v16650_v21  ;;  %18578 = vst [vmem:[#allocation125_spill] sm:$0xff] %v16654_v25  ;;  %v16666_v51 = vadd.f32 %v16414_v13, %v18580_v4  ;;  %v16670_v29 = vadd.f32 %v16418_v11, %v18581_v18  ;;  %v18582_v21 = vld [vmem:[#allocation15_spill] sm:$0xff]  ;;  %v18583_v25 = vld [vmem:[#allocation16_spill] sm:$0xff] }
 0xac9   :  { %18579 = vst [vmem:[#allocation123_spill] sm:$0xff] %v16658_v55  ;;  %v16674_v37 = vadd.f32 %v16422_v47, %v18582_v21  ;;  %v16678_v42 = vadd.f32 %v16426_v45, %v18583_v25  ;;  %v18584_v55 = vld [vmem:[#allocation17_spill] sm:$0xff]  ;;  %v18585_v30 = vld [vmem:[#allocation18_spill] sm:$0xff]  ;;  %v18586_v4 = vld [vmem:[#allocation19_spill] sm:$0xff] }
 0xaca   :  { %v16682_v28 = vadd.f32 %v16430_v3, %v18584_v55  ;;  %v16686_v13 = vadd.f32 %v16434_v32, %v18585_v30  ;;  %v16690_v11 = vadd.f32 %v16438_v53, %v18586_v4  ;;  %v18587_v18 = vld [vmem:[#allocation20_spill] sm:$0xff]  ;;  %v18588_v21 = vld [vmem:[#allocation21_spill] sm:$0xff]  ;;  %v18589_v25 = vld [vmem:[#allocation22_spill] sm:$0xff] }
 0xacb   :  { %v16694_v47 = vadd.f32 %v16442_v27, %v18587_v18  ;;  %v16698_v45 = vadd.f32 %v16446_v58, %v18588_v21  ;;  %v16702_v3 = vadd.f32 %v16450_v26, %v18589_v25  ;;  %v18590_v55 = vld [vmem:[#allocation23_spill] sm:$0xff]  ;;  %v18591_v30 = vld [vmem:[#allocation24_spill] sm:$0xff]  ;;  %v18592_v4 = vld [vmem:[#allocation25_spill] sm:$0xff] }
 0xacc   :  { %v16706_v32 = vadd.f32 %v16454_v60, %v18590_v55  ;;  %v16710_v53 = vadd.f32 %v16458_v10, %v18591_v30  ;;  %v16714_v27 = vadd.f32 %v16462_v48, %v18592_v4  ;;  %v18593_v18 = vld [vmem:[#allocation26_spill] sm:$0xff]  ;;  %v18594_v21 = vld [vmem:[#allocation27_spill] sm:$0xff]  ;;  %v18595_v25 = vld [vmem:[#allocation28_spill] sm:$0xff] }
 0xacd   :  { %v16718_v58 = vadd.f32 %v16466_v7, %v18593_v18  ;;  %v16722_v26 = vadd.f32 %v16470_v8, %v18594_v21  ;;  %v16726_v60 = vadd.f32 %v16474_v44, %v18595_v25  ;;  %v18596_v55 = vld [vmem:[#allocation29_spill] sm:$0xff]  ;;  %v18597_v30 = vld [vmem:[#allocation30_spill] sm:$0xff]  ;;  %v18598_v4 = vld [vmem:[#allocation31_spill] sm:$0xff] }
 0xace   :  { %v16730_v10 = vadd.f32 %v16478_v63, %v18596_v55  ;;  %v16734_v48 = vadd.f32 %v16482_v56, %v18597_v30  ;;  %v16738_v7 = vadd.f32 %v16486_v43, %v18598_v4  ;;  %v18599_v18 = vld [vmem:[#allocation32_spill] sm:$0xff]  ;;  %v18600_v21 = vld [vmem:[#allocation33_spill] sm:$0xff]  ;;  %v18601_v25 = vld [vmem:[#allocation34_spill] sm:$0xff] }
 0xacf   :  { %v16742_v8 = vadd.f32 %v16490_v52, %v18599_v18  ;;  %v16746_v44 = vadd.f32 %v16494_v57, %v18600_v21  ;;  %v16750_v63 = vadd.f32 %v16498_v9, %v18601_v25  ;;  %v18602_v55 = vld [vmem:[#allocation35_spill] sm:$0xff]  ;;  %v18603_v30 = vld [vmem:[#allocation36_spill] sm:$0xff]  ;;  %v18604_v4 = vld [vmem:[#allocation37_spill] sm:$0xff] }
 0xad0   :  { %v16754_v56 = vadd.f32 %v16502_v38, %v18602_v55  ;;  %v16758_v43 = vadd.f32 %v16506_v49, %v18603_v30  ;;  %v16762_v52 = vadd.f32 %v16510_v17, %v18604_v4  ;;  %v18605_v18 = vld [vmem:[#allocation38_spill] sm:$0xff]  ;;  %v18606_v21 = vld [vmem:[#allocation39_spill] sm:$0xff]  ;;  %v18607_v25 = vld [vmem:[#allocation40_spill] sm:$0xff] }
 0xad1   :  { %v16766_v57 = vadd.f32 %v16514_v33, %v18605_v18  ;;  %v16770_v9 = vadd.f32 %v16518_v16, %v18606_v21  ;;  %v16774_v38 = vadd.f32 %v16522_v61, %v18607_v25  ;;  %v18608_v55 = vld [vmem:[#allocation41_spill] sm:$0xff]  ;;  %v18609_v30 = vld [vmem:[#allocation42_spill] sm:$0xff]  ;;  %v18610_v4 = vld [vmem:[#allocation163_spill] sm:$0xff] }
 0xad2   :  { %v16778_v49 = vadd.f32 %v16526_v40, %v18608_v55  ;;  %v16782_v17 = vadd.f32 %v16530_v2, %v18609_v30  ;;  %v16786_v33 = vadd.f32 %v16534_v36, %v18610_v4  ;;  %v18611_v18 = vld [vmem:[#allocation166_spill] sm:$0xff]  ;;  %v18612_v21 = vld [vmem:[#allocation43_spill] sm:$0xff]  ;;  %v18613_v25 = vld [vmem:[#allocation44_spill] sm:$0xff] }
 0xad3   :  { %v16790_v16 = vadd.f32 %v16538_v12, %v18611_v18  ;;  %v16794_v61 = vadd.f32 %v16542_v54, %v18612_v21  ;;  %v16798_v40 = vadd.f32 %v16546_v20, %v18613_v25  ;;  %v18614_v55 = vld [vmem:[#allocation46_spill] sm:$0xff]  ;;  %v18615_v30 = vld [vmem:[#allocation47_spill] sm:$0xff] }
 0xad4   :  { %v16802_v2 = vadd.f32 %v16550_v19, %v18614_v55  ;;  %v16806_v36 = vadd.f32 %v16554_v62, %v18615_v30  ;;  %v18616_v4 = vld [vmem:[#allocation50_spill] sm:$0xff]  ;;  %v18617_v18 = vld [vmem:[#allocation51_spill] sm:$0xff] }
 0xad5   :  { %v16810_v12 = vadd.f32 %v16558_v1, %v18616_v4  ;;  %v16814_v54 = vadd.f32 %v16562_v5, %v18617_v18  ;;  %v18618_v21 = vld [vmem:[#allocation54_spill] sm:$0xff]  ;;  %v18619_v25 = vld [vmem:[#allocation55_spill] sm:$0xff] }
 0xad6   :  { %v16818_v20 = vadd.f32 %v16566_v46, %v18618_v21  ;;  %v16822_v19 = vadd.f32 %v16570_v24, %v18619_v25  ;;  %v18621_v55 = vld [vmem:[#allocation58_spill] sm:$0xff]  ;;  %v18623_v30 = vld [vmem:[#allocation59_spill] sm:$0xff] }
 0xad7   :  { %v16826_v62 = vadd.f32 %v16574_v14, %v18621_v55  ;;  %v16830_v1 = vadd.f32 %v16578_v0, %v18623_v30  ;;  %v18625_v4 = vld [vmem:[#allocation62_spill] sm:$0xff]  ;;  %v18627_v18 = vld [vmem:[#allocation63_spill] sm:$0xff] }
 0xad8   :  { %18620 = vst [vmem:[#allocation126_spill] sm:$0xff] %v16822_v19  ;;  %v16834_v5 = vadd.f32 %v16582_v50, %v18625_v4  ;;  %v16838_v46 = vadd.f32 %v16586_v23, %v18627_v18  ;;  %v18629_v21 = vld [vmem:[#allocation66_spill] sm:$0xff]  ;;  %v18630_v25 = vld [vmem:[#allocation67_spill] sm:$0xff]  ;;  %v18631_v19 = vld [vmem:[#allocation113_spill] sm:$0xff] }
 0xad9   :  { %18622 = vst [vmem:[#allocation158_spill] sm:$0xff] %v16826_v62  ;;  %18624 = vst [vmem:[#allocation130_spill] sm:$0xff] %v16830_v1  ;;  %v16842_v24 = vadd.f32 %v16590_v35, %v18629_v21  ;;  %v16846_v14 = vadd.f32 %v18631_v19, %v18630_v25  ;;  %v18632_v55 = vld [vmem:[#allocation70_spill] sm:$0xff]  ;;  %v18633_v62 = vld [vmem:[#allocation167_spill] sm:$0xff] }
 0xada   :  { %18626 = vst [vmem:[#allocation160_spill] sm:$0xff] %v16834_v5  ;;  %18628 = vst [vmem:[#allocation131_spill] sm:$0xff] %v16838_v46  ;;  %v16850_v0 = vadd.f32 %v18633_v62, %v18632_v55  ;;  %v18634_v30 = vld [vmem:[#allocation71_spill] sm:$0xff]  ;;  %v18635_v1 = vld [vmem:[#allocation145_spill] sm:$0xff] }
 0xadb   :  { %v16854_v50 = vadd.f32 %v18635_v1, %v18634_v30  ;;  %v18636_v4 = vld [vmem:[#allocation74_spill] sm:$0xff]  ;;  %v18638_v18 = vld [vmem:[#allocation75_spill] sm:$0xff] }
 0xadc   :  { %v18637_v5 = vld [vmem:[#allocation118_spill] sm:$0xff]  ;;  %v18639_v46 = vld [vmem:[#allocation143_spill] sm:$0xff] }
 0xadd   :  { %v16858_v23 = vadd.f32 %v18637_v5, %v18636_v4  ;;  %v16862_v35 = vadd.f32 %v18639_v46, %v18638_v18  ;;  %v18640_v21 = vld [vmem:[#allocation78_spill] sm:$0xff]  ;;  %v18641_v25 = vld [vmem:[#allocation79_spill] sm:$0xff] }
 0xade   :  { %v16866_v19 = vadd.f32 %v16614_v34, %v18640_v21  ;;  %v16870_v62 = vadd.f32 %v16618_v22, %v18641_v25  ;;  %v18643_v55 = vld [vmem:[#allocation82_spill] sm:$0xff]  ;;  %v18645_v30 = vld [vmem:[#allocation83_spill] sm:$0xff] }
 0xadf   :  { %v16874_v1 = vadd.f32 %v16622_v31, %v18643_v55  ;;  %v16878_v5 = vadd.f32 %v16626_v39, %v18645_v30  ;;  %v18647_v4 = vld [vmem:[#allocation86_spill] sm:$0xff]  ;;  %v18649_v18 = vld [vmem:[#allocation87_spill] sm:$0xff] }
 0xae0   :  { %18642 = vst [vmem:[#allocation161_spill] sm:$0xff] %v16870_v62  ;;  %v16882_v46 = vadd.f32 %v16630_v41, %v18647_v4  ;;  %v16886_v34 = vadd.f32 %v16634_v59, %v18649_v18  ;;  %v18651_v21 = vld [vmem:[#allocation90_spill] sm:$0xff]  ;;  %v18652_v25 = vld [vmem:[#allocation91_spill] sm:$0xff]  ;;  %v18653_v62 = vld [vmem:[#allocation109_spill] sm:$0xff] }
 0xae1   :  { %18644 = vst [vmem:[#allocation128_spill] sm:$0xff] %v16874_v1  ;;  %18646 = vst [vmem:[#allocation136_spill] sm:$0xff] %v16878_v5  ;;  %v16890_v22 = vadd.f32 %v16638_v15, %v18651_v21  ;;  %v16894_v31 = vadd.f32 %v18653_v62, %v18652_v25  ;;  %v18654_v55 = vld [vmem:[#allocation94_spill] sm:$0xff]  ;;  %v18655_v1 = vld [vmem:[#allocation148_spill] sm:$0xff]  ;;  %v9110_v25 = vmax.f32 %v16666_v51, 0.0  ;;  %v9120_v51 = vmax.f32 %v16706_v32, 0.0 }
 0xae2   :  { %18648 = vst [vmem:[#allocation135_spill] sm:$0xff] %v16882_v46  ;;  %18650 = vst [vmem:[#allocation45_spill] sm:$0xff] %v16886_v34  ;;  %v16898_v39 = vadd.f32 %v18655_v1, %v18654_v55  ;;  %v18656_v30 = vld [vmem:[#allocation95_spill] sm:$0xff]  ;;  %v18657_v5 = vld [vmem:[#allocation121_spill] sm:$0xff]  ;;  %v9111_v1 = vmax.f32 %v16670_v29, 0.0  ;;  %v9112_v55 = vmax.f32 %v16674_v37, 0.0 }
 0xae3   :  { %v16902_v41 = vadd.f32 %v18657_v5, %v18656_v30  ;;  %v18658_v4 = vld [vmem:[#allocation98_spill] sm:$0xff]  ;;  %v18659_v46 = vld [vmem:[#allocation125_spill] sm:$0xff]  ;;  %v18660_v18 = vld [vmem:[#allocation99_spill] sm:$0xff]  ;;  %v9113_v5 = vmax.f32 %v16678_v42, 0.0  ;;  %v9114_v30 = vmax.f32 %v16682_v28, 0.0  ;;  %9174 = vst [vmem:[#allocation9] sm:$0xff] %v9110_v25 }
 0xae4   :  { %v16906_v59 = vadd.f32 %v18659_v46, %v18658_v4  ;;  %v18661_v34 = vld [vmem:[#allocation123_spill] sm:$0xff]  ;;  %v18662_v21 = vld [vmem:[#allocation173_spill] sm:$0xff]  ;;  %v9115_v46 = vmax.f32 %v16686_v13, 0.0  ;;  %v9116_v4 = vmax.f32 %v16690_v11, 0.0  ;;  %v9121_v29 = vmax.f32 %v16710_v53, 0.0  ;;  %9175 = vst [vmem:[#allocation9 + $0x8] sm:$0xff] %v9111_v1 }
 0xae5   :  { %v16910_v15 = vadd.f32 %v18661_v34, %v18660_v18  ;;  %v16914_v62 = vadd.f32 %v16662_v6, %v18662_v21  ;;  %v9117_v34 = vmax.f32 %v16694_v47, 0.0  ;;  %v9118_v18 = vmax.f32 %v16698_v45, 0.0  ;;  %9176 = vst [vmem:[#allocation9 + $0x10] sm:$0xff] %v9112_v55  ;;  %9177 = vst [vmem:[#allocation9 + $0x18] sm:$0xff] %v9113_v5  ;;  %v18667_v21 = vld [vmem:[#allocation131_spill] sm:$0xff] }
 0xae6   :  { %v9119_v6 = vmax.f32 %v16702_v3, 0.0  ;;  %v9122_v37 = vmax.f32 %v16714_v27, 0.0  ;;  %9178 = vst [vmem:[#allocation9 + $0x20] sm:$0xff] %v9114_v30  ;;  %v9123_v42 = vmax.f32 %v16718_v58, 0.0  ;;  %v9124_v28 = vmax.f32 %v16722_v26, 0.0  ;;  %9179 = vst [vmem:[#allocation9 + $0x28] sm:$0xff] %v9115_v46 }
 0xae7   :  { %v9125_v13 = vmax.f32 %v16726_v60, 0.0  ;;  %v9126_v11 = vmax.f32 %v16730_v10, 0.0  ;;  %9180 = vst [vmem:[#allocation9 + $0x30] sm:$0xff] %v9116_v4  ;;  %9181 = vst [vmem:[#allocation9 + $0x38] sm:$0xff] %v9117_v34  ;;  %v9127_v47 = vmax.f32 %v16734_v48, 0.0  ;;  %v9128_v45 = vmax.f32 %v16738_v7, 0.0 }
 0xae8   :  { %9182 = vst [vmem:[#allocation9 + $0x40] sm:$0xff] %v9118_v18  ;;  %v9129_v3 = vmax.f32 %v16742_v8, 0.0  ;;  %v9130_v32 = vmax.f32 %v16746_v44, 0.0  ;;  %9183 = vst [vmem:[#allocation9 + $0x48] sm:$0xff] %v9119_v6  ;;  %v9131_v53 = vmax.f32 %v16750_v63, 0.0  ;;  %v9132_v27 = vmax.f32 %v16754_v56, 0.0 }
 0xae9   :  { %9184 = vst [vmem:[#allocation9 + $0x50] sm:$0xff] %v9120_v51  ;;  %9185 = vst [vmem:[#allocation9 + $0x58] sm:$0xff] %v9121_v29  ;;  %v9133_v58 = vmax.f32 %v16758_v43, 0.0  ;;  %v9134_v26 = vmax.f32 %v16762_v52, 0.0  ;;  %v9135_v60 = vmax.f32 %v16766_v57, 0.0  ;;  %v9136_v10 = vmax.f32 %v16770_v9, 0.0 }
 0xaea   :  { %9186 = vst [vmem:[#allocation9 + $0x60] sm:$0xff] %v9122_v37  ;;  %9187 = vst [vmem:[#allocation9 + $0x68] sm:$0xff] %v9123_v42  ;;  %v9137_v48 = vmax.f32 %v16774_v38, 0.0  ;;  %v9138_v7 = vmax.f32 %v16778_v49, 0.0  ;;  %v9139_v8 = vmax.f32 %v16782_v17, 0.0  ;;  %v9140_v44 = vmax.f32 %v16786_v33, 0.0 }
 0xaeb   :  { %9188 = vst [vmem:[#allocation9 + $0x70] sm:$0xff] %v9124_v28  ;;  %9189 = vst [vmem:[#allocation9 + $0x78] sm:$0xff] %v9125_v13  ;;  %v9141_v63 = vmax.f32 %v16790_v16, 0.0  ;;  %v9142_v56 = vmax.f32 %v16794_v61, 0.0  ;;  %v9143_v43 = vmax.f32 %v16798_v40, 0.0  ;;  %v9144_v52 = vmax.f32 %v16802_v2, 0.0 }
 0xaec   :  { %9190 = vst [vmem:[#allocation9 + $0x80] sm:$0xff] %v9126_v11  ;;  %9191 = vst [vmem:[#allocation9 + $0x88] sm:$0xff] %v9127_v47  ;;  %v9145_v57 = vmax.f32 %v16806_v36, 0.0  ;;  %v9146_v9 = vmax.f32 %v16810_v12, 0.0  ;;  %v9147_v38 = vmax.f32 %v16814_v54, 0.0  ;;  %v9148_v49 = vmax.f32 %v16818_v20, 0.0 }
 0xaed   :  { %9192 = vst [vmem:[#allocation9 + $0x90] sm:$0xff] %v9128_v45  ;;  %9193 = vst [vmem:[#allocation9 + $0x98] sm:$0xff] %v9129_v3  ;;  %v18663_v17 = vld [vmem:[#allocation126_spill] sm:$0xff]  ;;  %v18666_v36 = vld [vmem:[#allocation160_spill] sm:$0xff]  ;;  %v9153_v25 = vmax.f32 %v18667_v21, 0.0  ;;  %v9154_v1 = vmax.f32 %v16842_v24, 0.0 }
 0xaee   :  { %9194 = vst [vmem:[#allocation9 + $0xa0] sm:$0xff] %v9130_v32  ;;  %9195 = vst [vmem:[#allocation9 + $0xa8] sm:$0xff] %v9131_v53  ;;  %v9149_v33 = vmax.f32 %v18663_v17, 0.0  ;;  %v18664_v16 = vld [vmem:[#allocation158_spill] sm:$0xff]  ;;  %v9152_v12 = vmax.f32 %v18666_v36, 0.0  ;;  %v9155_v54 = vmax.f32 %v16846_v14, 0.0 }
 0xaef   :  { %9196 = vst [vmem:[#allocation9 + $0xb0] sm:$0xff] %v9132_v27  ;;  %9197 = vst [vmem:[#allocation9 + $0xb8] sm:$0xff] %v9133_v58  ;;  %v9150_v61 = vmax.f32 %v18664_v16, 0.0  ;;  %v18665_v40 = vld [vmem:[#allocation130_spill] sm:$0xff]  ;;  %v9156_v20 = vmax.f32 %v16850_v0, 0.0  ;;  %v9157_v55 = vmax.f32 %v16854_v50, 0.0 }
 0xaf0   :  { %9198 = vst [vmem:[#allocation9 + $0xc0] sm:$0xff] %v9134_v26  ;;  %9199 = vst [vmem:[#allocation9 + $0xc8] sm:$0xff] %v9135_v60  ;;  %v9151_v2 = vmax.f32 %v18665_v40, 0.0  ;;  %v9158_v5 = vmax.f32 %v16858_v23, 0.0  ;;  %v9159_v30 = vmax.f32 %v16862_v35, 0.0  ;;  %v9160_v24 = vmax.f32 %v16866_v19, 0.0 }
 0xaf1   :  { %9200 = vst [vmem:[#allocation9 + $0xd0] sm:$0xff] %v9136_v10  ;;  %9201 = vst [vmem:[#allocation9 + $0xd8] sm:$0xff] %v9137_v48  ;;  %v18668_v46 = vld [vmem:[#allocation161_spill] sm:$0xff]  ;;  %v18669_v34 = vld [vmem:[#allocation128_spill] sm:$0xff]  ;;  %v9166_v35 = vmax.f32 %v16890_v22, 0.0  ;;  %v9167_v19 = vmax.f32 %v16894_v31, 0.0 }
 0xaf2   :  { %9202 = vst [vmem:[#allocation9 + $0xe0] sm:$0xff] %v9138_v7  ;;  %9203 = vst [vmem:[#allocation9 + $0xe8] sm:$0xff] %v9139_v8  ;;  %v9161_v4 = vmax.f32 %v18668_v46, 0.0  ;;  %v9162_v18 = vmax.f32 %v18669_v34, 0.0  ;;  %v18670_v14 = vld [vmem:[#allocation136_spill] sm:$0xff]  ;;  %v18671_v50 = vld [vmem:[#allocation135_spill] sm:$0xff] }
 0xaf3   :  { %9204 = vst [vmem:[#allocation9 + $0xf0] sm:$0xff] %v9140_v44  ;;  %9205 = vst [vmem:[#allocation9 + $0xf8] sm:$0xff] %v9141_v63  ;;  %v9163_v0 = vmax.f32 %v18670_v14, 0.0  ;;  %v9164_v23 = vmax.f32 %v18671_v50, 0.0  ;;  %v18672_v6 = vld [vmem:[#allocation45_spill] sm:$0xff]  ;;  %v9168_v29 = vmax.f32 %v16898_v39, 0.0 }
 0xaf4   :  { %9206 = vst [vmem:[#allocation9 + $0x100] sm:$0xff] %v9142_v56  ;;  %9207 = vst [vmem:[#allocation9 + $0x108] sm:$0xff] %v9143_v43  ;;  %v9165_v51 = vmax.f32 %v18672_v6, 0.0  ;;  %v9169_v37 = vmax.f32 %v16902_v41, 0.0  ;;  %v9170_v42 = vmax.f32 %v16906_v59, 0.0  ;;  %v9171_v28 = vmax.f32 %v16910_v15, 0.0 }
 0xaf5   :  { %9208 = vst [vmem:[#allocation9 + $0x110] sm:$0xff] %v9144_v52  ;;  %9209 = vst [vmem:[#allocation9 + $0x118] sm:$0xff] %v9145_v57  ;;  %v9173_v22 = vmax.f32 %v16914_v62, 0.0 }
 0xaf6   :  { %9210 = vst [vmem:[#allocation9 + $0x120] sm:$0xff] %v9146_v9  ;;  %9211 = vst [vmem:[#allocation9 + $0x128] sm:$0xff] %v9147_v38 }
 0xaf7   :  { %9212 = vst [vmem:[#allocation9 + $0x130] sm:$0xff] %v9148_v49  ;;  %9213 = vst [vmem:[#allocation9 + $0x138] sm:$0xff] %v9149_v33 }
 0xaf8   :  { %9214 = vst [vmem:[#allocation9 + $0x140] sm:$0xff] %v9150_v61  ;;  %9215 = vst [vmem:[#allocation9 + $0x148] sm:$0xff] %v9151_v2 }
 0xaf9   :  { %9216 = vst [vmem:[#allocation9 + $0x150] sm:$0xff] %v9152_v12  ;;  %9217 = vst [vmem:[#allocation9 + $0x158] sm:$0xff] %v9153_v25 }
 0xafa   :  { %9218 = vst [vmem:[#allocation9 + $0x160] sm:$0xff] %v9154_v1  ;;  %9219 = vst [vmem:[#allocation9 + $0x168] sm:$0xff] %v9155_v54 }
 0xafb   :  { %9220 = vst [vmem:[#allocation9 + $0x170] sm:$0xff] %v9156_v20  ;;  %9221 = vst [vmem:[#allocation9 + $0x178] sm:$0xff] %v9157_v55 }
 0xafc   :  { %9222 = vst [vmem:[#allocation9 + $0x180] sm:$0xff] %v9158_v5  ;;  %9223 = vst [vmem:[#allocation9 + $0x188] sm:$0xff] %v9159_v30 }
 0xafd   :  { %9224 = vst [vmem:[#allocation9 + $0x190] sm:$0xff] %v9160_v24  ;;  %9225 = vst [vmem:[#allocation9 + $0x198] sm:$0xff] %v9161_v4 }
 0xafe   :  { %9226 = vst [vmem:[#allocation9 + $0x1a0] sm:$0xff] %v9162_v18  ;;  %9227 = vst [vmem:[#allocation9 + $0x1a8] sm:$0xff] %v9163_v0 }
 0xaff   :  { %9228 = vst [vmem:[#allocation9 + $0x1b0] sm:$0xff] %v9164_v23  ;;  %9229 = vst [vmem:[#allocation9 + $0x1b8] sm:$0xff] %v9165_v51 }
 0xb00   :  { %9230 = vst [vmem:[#allocation9 + $0x1c0] sm:$0xff] %v9166_v35  ;;  %9231 = vst [vmem:[#allocation9 + $0x1c8] sm:$0xff] %v9167_v19 }
 0xb01   :  { %9232 = vst [vmem:[#allocation9 + $0x1d0] sm:$0xff] %v9168_v29  ;;  %9233 = vst [vmem:[#allocation9 + $0x1d8] sm:$0xff] %v9169_v37 }
 0xb02   :  { %9234 = vst [vmem:[#allocation9 + $0x1e0] sm:$0xff] %v9170_v42  ;;  %9235 = vst [vmem:[#allocation9 + $0x1e8] sm:$0xff] %v9171_v28 }
 0xb03   :  { %9237 = vst [vmem:[#allocation9 + $0x1f8] sm:$0xff] %v9173_v22 }
 0xb04   :  { %11117 = shalt.err (!%p11114_p6)
}
 0xb05   :  { %s11118_s1 = scalar_lea.hbm %s17001_s7, 8192 }
 0xb06   :  { %p11119_p7 = scmp.ne.s32.totalorder %s17001_s7, %s11118_s1  ;;  %p11122_p8 = scmp.lt.u32.totalorder %s11118_s1, %s17001_s7 }
 0xb08   :  { %p11124_p9 = pnand %p11122_p8, %p11119_p7 }
 0xb0a   :  { %11127 = shalt.err (!%p11124_p9)
}
 0xb0b   :  { %9249 = dma.vmem_to_hbm [thread:$0]  %s9244_s6, 8192, %s17001_s7, [#allocation6], %s11135_s11, %s11135_s11, %s11136_s12  }
 0xb0c   :  { %11132 = dma.done.wait [#allocation6], 8192  }
 0xb0d   :  { %11133 = vsyncadd [#allocation6], 4294959104 }
 0xb0e   :  { %9253 = vsyncpa [#allocation5], 1 }
 0xb0f   :  { %9254 = vsyncpa [#allocation8], 1 }
 0xb10   :  { %9255 = vsyncpa [#allocation6], 1 }

</bundles_post_ra>
